<compile_context>
chip_gen: v5e
topology: v5e:2x2
jax: 0.10.0
libtpu: 0.0.40
codegen_flags: <defaults>
</compile_context>

<pallas_src>
import functools

import jax
import jax.numpy as jnp
from jax import lax
from jax.experimental import pallas as pl
from jax.experimental.pallas import tpu as pltpu


# ----------------------------------------------------------------------------
# Fused kernel: conv_s + BN_s + ReLU + conv_t + BN_t + ReLU for one clip.
# ----------------------------------------------------------------------------
def _sepconv3d_kernel(x_ref, ws_ref, ss_ref, bs_ref, wt_ref, st_ref, bt_ref,
                      o_ref, *, k, stride, pad, ho, wo):
    # x_ref block: (1, D, Hp, Wp, Cin)  -- channels-last, spatially padded.
    d = x_ref.shape[1]
    cin = x_ref.shape[4]
    cout = o_ref.shape[1]
    hw = ho * wo

    # ---- spatial (1,k,k) conv: lane-dense accumulator (Cout, D*Ho*Wo) ----
    acc = jnp.zeros((cout, d * hw), jnp.float32)
    for kh in range(k):
        for kw in range(k):
            if stride == 1:
                hsl, wsl = pl.ds(kh, ho), pl.ds(kw, wo)
            else:
                hsl, wsl = pl.ds(kh, ho, stride), pl.ds(kw, wo, stride)
            patch = x_ref[0, :, hsl, wsl, :]          # (D, Ho, Wo, Cin)
            patch = patch.reshape(d * hw, cin)        # channels stay minor
            # (Cout, Cin) . (D*HW, Cin)^T -> (Cout, D*HW): spatial on lanes.
            acc = acc + lax.dot_general(
                ws_ref[kh * k + kw], patch,
                dimension_numbers=(((1,), (1,)), ((), ())),
                preferred_element_type=jnp.float32)
    y = jnp.maximum(acc * ss_ref[...] + bs_ref[...], 0.0)    # BN_s + ReLU

    # ---- temporal (k,1,1) conv (stride 1 internally) as ONE K=k*Cout matmul ----
    if pad > 0:
        # zero-pad in time: frames are contiguous 128-aligned lane blocks.
        zpad = jnp.zeros((cout, pad * hw), jnp.float32)
        y = jnp.concatenate([zpad, y, zpad], axis=1)          # (Cout, Dp*HW)
    dfull = d + 2 * pad - k + 1                               # stride-1 output frames
    patch_t = jnp.concatenate(
        [y[:, kt * hw:(kt + dfull) * hw] for kt in range(k)], axis=0)
    z = jnp.dot(wt_ref[...], patch_t, preferred_element_type=jnp.float32)
    z = jnp.maximum(z * st_ref[...] + bt_ref[...], 0.0)       # BN_t + ReLU
    o_ref[0] = z.astype(o_ref.dtype)                          # (Cout, Dfull*HW), lane dense


# ----------------------------------------------------------------------------
# Wrapper: layout prep (XLA) + one fused pallas_call over the batch.
# ----------------------------------------------------------------------------
def _fold_bn(gamma, beta, mean, var, eps=1e-3):
    scale = gamma / jnp.sqrt(var + eps)
    bias = beta - mean * scale
    return scale.reshape(-1, 1), bias.reshape(-1, 1)


def sep_conv3d(x_ncdhw, params, k, stride, padding):
    w_s, bn_s, w_t, bn_t = params
    n, cin, d, h, w = x_ncdhw.shape
    cout = w_s.shape[0]
    hp, wp = h + 2 * padding, w + 2 * padding
    ho = (hp - k) // stride + 1
    wo = (wp - k) // stride + 1
    hw = ho * wo
    dfull = d + 2 * padding - k + 1                    # stride-1 temporal extent
    do = (d + 2 * padding - k) // stride + 1           # actual temporal extent

    # ---- layout prep (cheap, XLA) ----
    xs = jnp.transpose(x_ncdhw, (0, 2, 3, 4, 1))                       # (N,D,H,W,Cin)
    xs = jnp.pad(xs, ((0, 0), (0, 0),
                      (padding, padding), (padding, padding), (0, 0)))
    # spatial weight (Cout,Cin,1,k,k) -> (k*k, Cout, Cin)
    ws = jnp.transpose(w_s[:, :, 0], (2, 3, 0, 1)).reshape(k * k, cout, cin)
    # temporal weight (Cout,Cout,k,1,1) -> (Cout, k*Cout), column = kt*Cout + ci
    wt = jnp.transpose(w_t[:, :, :, 0, 0], (0, 2, 1)).reshape(cout, k * cout)
    ss, bs = _fold_bn(*bn_s)
    st, bt = _fold_bn(*bn_t)

    kernel = functools.partial(_sepconv3d_kernel, k=k, stride=stride,
                               pad=padding, ho=ho, wo=wo)
    out = pl.pallas_call(
        kernel,
        out_shape=jax.ShapeDtypeStruct((n, cout, dfull * hw), x_ncdhw.dtype),
        grid_spec=pltpu.PrefetchScalarGridSpec(
            num_scalar_prefetch=0,
            grid=(n,),                              # one clip per step; "parallel"
            in_specs=[                              #   -> both v7x TensorCores
                pl.BlockSpec((1, d, hp, wp, cin), lambda i: (i, 0, 0, 0, 0)),
                pl.BlockSpec((k * k, cout, cin), lambda i: (0, 0, 0)),
                pl.BlockSpec((cout, 1), lambda i: (0, 0)),
                pl.BlockSpec((cout, 1), lambda i: (0, 0)),
                pl.BlockSpec((cout, k * cout), lambda i: (0, 0)),
                pl.BlockSpec((cout, 1), lambda i: (0, 0)),
                pl.BlockSpec((cout, 1), lambda i: (0, 0)),
            ],
            out_specs=pl.BlockSpec((1, cout, dfull * hw), lambda i: (i, 0, 0)),
        ),
        compiler_params=pltpu.CompilerParams(
            dimension_semantics=("parallel",)),
    )(xs, ws, ss, bs, wt, st, bt)
    # TODO(synk): for very large D*Ho*Wo (real S3D sizes on v7x's 64 MiB VMEM)
    # add an Ho*Wo grid axis and raise vmem_limit_bytes accordingly.

    out = out.reshape(n, cout, dfull, ho, wo)
    if stride > 1:
        out = out[:, :, ::stride]          # temporal stride = subsample of stride-1 conv
    return out                              # NCDHW


# ----------------------------------------------------------------------------
# Pure-JAX reference (mirrors the PyTorch module, eval-mode BN)
# ----------------------------------------------------------------------------
def sep_conv3d_reference(x, params, k, stride, padding, eps=1e-3):
    w_s, bn_s, w_t, bn_t = params

    def bn_relu(y, bn):
        gamma, beta, mean, var = bn
        s = gamma / jnp.sqrt(var + eps)
        b = beta - mean * s
        y = y * s[None, :, None, None, None] + b[None, :, None, None, None]
        return jnp.maximum(y, 0.0)

    dn = lax.conv_dimension_numbers(x.shape, w_s.shape, ('NCDHW', 'OIDHW', 'NCDHW'))
    y = lax.conv_general_dilated(
        x, w_s, (1, stride, stride),
        [(0, 0), (padding, padding), (padding, padding)], dimension_numbers=dn)
    y = bn_relu(y, bn_s)
    dn2 = lax.conv_dimension_numbers(y.shape, w_t.shape, ('NCDHW', 'OIDHW', 'NCDHW'))
    y = lax.conv_general_dilated(
        y, w_t, (stride, 1, 1),
        [(padding, padding), (0, 0), (0, 0)], dimension_numbers=dn2)
    return bn_relu(y, bn_t)


# ----------------------------------------------------------------------------
if __name__ == "__main__":
    # SepConv3d(4, 8, kernel_size=3, stride=1, padding=1) on x (N=2,C=4,D=8,H=16,W=16).
    N, Cin, Cout, D, H, W = 2, 4, 8, 8, 16, 16
    k, stride, padding = 3, 1, 1

    key = jax.random.PRNGKey(0)
    ks = jax.random.split(key, 10)

    x = jax.random.normal(ks[0], (N, Cin, D, H, W), jnp.float32)

    # Deterministic synthetic parameters (shapes from the module __init__).
    w_s = 0.1 * jax.random.normal(ks[1], (Cout, Cin, 1, k, k), jnp.float32)
    w_t = 0.1 * jax.random.normal(ks[2], (Cout, Cout, k, 1, 1), jnp.float32)
    bn_s = (0.5 + jax.random.uniform(ks[3], (Cout,)),          # gamma
            0.1 * jax.random.normal(ks[4], (Cout,)),           # beta
            0.1 * jax.random.normal(ks[5], (Cout,)),           # running_mean
            0.5 + jax.random.uniform(ks[6], (Cout,)))          # running_var
    bn_t = (0.5 + jax.random.uniform(ks[7], (Cout,)),
            0.1 * jax.random.normal(ks[8], (Cout,)),
            0.1 * jax.random.normal(ks[9], (Cout,)),
            0.5 + jax.random.uniform(ks[0], (Cout,)))
    params = (w_s, bn_s, w_t, bn_t)

    fwd = jax.jit(sep_conv3d, static_argnums=(2, 3, 4))
    out = fwd(x, params, k, stride, padding)
    out = jax.block_until_ready(out)

    ref = sep_conv3d_reference(x, params, k, stride, padding)
    assert out.shape == ref.shape, (out.shape, ref.shape)
    assert jnp.allclose(out, ref, atol=2e-3, rtol=2e-3), "mismatch vs reference"

    print("KERNEL_OK")
</pallas_src>

<mosaic_0001>
module attributes {stable_mosaic.version = 11 : i64} {
  func.func @_sepconv3d_kernel(%arg0: i32, %arg1: memref<1x8x18x18x4xf32, #tpu.memory_space<vmem>>, %arg2: memref<9x8x4xf32, #tpu.memory_space<vmem>>, %arg3: memref<8x1xf32, #tpu.memory_space<vmem>>, %arg4: memref<8x1xf32, #tpu.memory_space<vmem>>, %arg5: memref<8x24xf32, #tpu.memory_space<vmem>>, %arg6: memref<8x1xf32, #tpu.memory_space<vmem>>, %arg7: memref<8x1xf32, #tpu.memory_space<vmem>>, %arg8: memref<1x8x2048xf32, #tpu.memory_space<vmem>>) attributes {dimension_semantics = [#tpu.dimension_semantics<parallel>], iteration_bounds = array<i64: 2>, scalar_prefetch = 0 : i64, scratch_operands = 0 : i64, tpu.core_type = #tpu.core_type<tc>, window_params = [{transform_indices = @transform_0, window_bounds = array<i64: 1, 8, 18, 18, 4>}, {pipeline_mode = #tpu.pipeline_mode<synchronous>, transform_indices = @transform_1, window_bounds = array<i64: 9, 8, 4>}, {pipeline_mode = #tpu.pipeline_mode<synchronous>, transform_indices = @transform_2, window_bounds = array<i64: 8, 1>}, {pipeline_mode = #tpu.pipeline_mode<synchronous>, transform_indices = @transform_3, window_bounds = array<i64: 8, 1>}, {pipeline_mode = #tpu.pipeline_mode<synchronous>, transform_indices = @transform_4, window_bounds = array<i64: 8, 24>}, {pipeline_mode = #tpu.pipeline_mode<synchronous>, transform_indices = @transform_5, window_bounds = array<i64: 8, 1>}, {pipeline_mode = #tpu.pipeline_mode<synchronous>, transform_indices = @transform_6, window_bounds = array<i64: 8, 1>}, {transform_indices = @transform_7, window_bounds = array<i64: 1, 8, 2048>}]} {
    %cst = arith.constant 0.000000e+00 : f32
    %0 = vector.broadcast %cst : f32 to vector<8x2048xf32>
    %c0 = arith.constant 0 : index
    %c0_0 = arith.constant 0 : index
    %c0_1 = arith.constant 0 : index
    %c0_2 = arith.constant 0 : index
    %c0_3 = arith.constant 0 : index
    %1 = vector.load %arg1[%c0, %c0_0, %c0_1, %c0_2, %c0_3] : memref<1x8x18x18x4xf32, #tpu.memory_space<vmem>>, vector<1x8x16x16x4xf32>
    %2 = vector.shape_cast %1 : vector<1x8x16x16x4xf32> to vector<8x16x16x4xf32>
    %3 = vector.shape_cast %2 : vector<8x16x16x4xf32> to vector<2048x4xf32>
    %c0_4 = arith.constant 0 : index
    %c0_5 = arith.constant 0 : index
    %c0_6 = arith.constant 0 : index
    %4 = vector.load %arg2[%c0_4, %c0_5, %c0_6] : memref<9x8x4xf32, #tpu.memory_space<vmem>>, vector<1x8x4xf32>
    %5 = vector.shape_cast %4 : vector<1x8x4xf32> to vector<8x4xf32>
    %cst_7 = arith.constant dense<0.000000e+00> : vector<8x2048xf32>
    %6 = tpu.matmul %5, %3, %cst_7 {dimension_numbers = #tpu.dot_dimension_numbers<[1], [1], [0], [0], [0, 0, 1, 0], [], []>} : vector<8x4xf32>, vector<2048x4xf32>, vector<8x2048xf32> -> vector<8x2048xf32>
    %7 = arith.addf %0, %6 : vector<8x2048xf32>
    %c0_8 = arith.constant 0 : index
    %c0_9 = arith.constant 0 : index
    %c0_10 = arith.constant 0 : index
    %c1 = arith.constant 1 : index
    %c0_11 = arith.constant 0 : index
    %8 = vector.load %arg1[%c0_8, %c0_9, %c0_10, %c1, %c0_11] : memref<1x8x18x18x4xf32, #tpu.memory_space<vmem>>, vector<1x8x16x16x4xf32>
    %9 = vector.shape_cast %8 : vector<1x8x16x16x4xf32> to vector<8x16x16x4xf32>
    %10 = vector.shape_cast %9 : vector<8x16x16x4xf32> to vector<2048x4xf32>
    %c1_12 = arith.constant 1 : index
    %c0_13 = arith.constant 0 : index
    %c0_14 = arith.constant 0 : index
    %11 = vector.load %arg2[%c1_12, %c0_13, %c0_14] : memref<9x8x4xf32, #tpu.memory_space<vmem>>, vector<1x8x4xf32>
    %12 = vector.shape_cast %11 : vector<1x8x4xf32> to vector<8x4xf32>
    %cst_15 = arith.constant dense<0.000000e+00> : vector<8x2048xf32>
    %13 = tpu.matmul %12, %10, %cst_15 {dimension_numbers = #tpu.dot_dimension_numbers<[1], [1], [0], [0], [0, 0, 1, 0], [], []>} : vector<8x4xf32>, vector<2048x4xf32>, vector<8x2048xf32> -> vector<8x2048xf32>
    %14 = arith.addf %7, %13 : vector<8x2048xf32>
    %c0_16 = arith.constant 0 : index
    %c0_17 = arith.constant 0 : index
    %c0_18 = arith.constant 0 : index
    %c2 = arith.constant 2 : index
    %c0_19 = arith.constant 0 : index
    %15 = vector.load %arg1[%c0_16, %c0_17, %c0_18, %c2, %c0_19] : memref<1x8x18x18x4xf32, #tpu.memory_space<vmem>>, vector<1x8x16x16x4xf32>
    %16 = vector.shape_cast %15 : vector<1x8x16x16x4xf32> to vector<8x16x16x4xf32>
    %17 = vector.shape_cast %16 : vector<8x16x16x4xf32> to vector<2048x4xf32>
    %c2_20 = arith.constant 2 : index
    %c0_21 = arith.constant 0 : index
    %c0_22 = arith.constant 0 : index
    %18 = vector.load %arg2[%c2_20, %c0_21, %c0_22] : memref<9x8x4xf32, #tpu.memory_space<vmem>>, vector<1x8x4xf32>
    %19 = vector.shape_cast %18 : vector<1x8x4xf32> to vector<8x4xf32>
    %cst_23 = arith.constant dense<0.000000e+00> : vector<8x2048xf32>
    %20 = tpu.matmul %19, %17, %cst_23 {dimension_numbers = #tpu.dot_dimension_numbers<[1], [1], [0], [0], [0, 0, 1, 0], [], []>} : vector<8x4xf32>, vector<2048x4xf32>, vector<8x2048xf32> -> vector<8x2048xf32>
    %21 = arith.addf %14, %20 : vector<8x2048xf32>
    %c0_24 = arith.constant 0 : index
    %c0_25 = arith.constant 0 : index
    %c1_26 = arith.constant 1 : index
    %c0_27 = arith.constant 0 : index
    %c0_28 = arith.constant 0 : index
    %22 = vector.load %arg1[%c0_24, %c0_25, %c1_26, %c0_27, %c0_28] : memref<1x8x18x18x4xf32, #tpu.memory_space<vmem>>, vector<1x8x16x16x4xf32>
    %23 = vector.shape_cast %22 : vector<1x8x16x16x4xf32> to vector<8x16x16x4xf32>
    %24 = vector.shape_cast %23 : vector<8x16x16x4xf32> to vector<2048x4xf32>
    %c3 = arith.constant 3 : index
    %c0_29 = arith.constant 0 : index
    %c0_30 = arith.constant 0 : index
    %25 = vector.load %arg2[%c3, %c0_29, %c0_30] : memref<9x8x4xf32, #tpu.memory_space<vmem>>, vector<1x8x4xf32>
    %26 = vector.shape_cast %25 : vector<1x8x4xf32> to vector<8x4xf32>
    %cst_31 = arith.constant dense<0.000000e+00> : vector<8x2048xf32>
    %27 = tpu.matmul %26, %24, %cst_31 {dimension_numbers = #tpu.dot_dimension_numbers<[1], [1], [0], [0], [0, 0, 1, 0], [], []>} : vector<8x4xf32>, vector<2048x4xf32>, vector<8x2048xf32> -> vector<8x2048xf32>
    %28 = arith.addf %21, %27 : vector<8x2048xf32>
    %c0_32 = arith.constant 0 : index
    %c0_33 = arith.constant 0 : index
    %c1_34 = arith.constant 1 : index
    %c1_35 = arith.constant 1 : index
    %c0_36 = arith.constant 0 : index
    %29 = vector.load %arg1[%c0_32, %c0_33, %c1_34, %c1_35, %c0_36] : memref<1x8x18x18x4xf32, #tpu.memory_space<vmem>>, vector<1x8x16x16x4xf32>
    %30 = vector.shape_cast %29 : vector<1x8x16x16x4xf32> to vector<8x16x16x4xf32>
    %31 = vector.shape_cast %30 : vector<8x16x16x4xf32> to vector<2048x4xf32>
    %c4 = arith.constant 4 : index
    %c0_37 = arith.constant 0 : index
    %c0_38 = arith.constant 0 : index
    %32 = vector.load %arg2[%c4, %c0_37, %c0_38] : memref<9x8x4xf32, #tpu.memory_space<vmem>>, vector<1x8x4xf32>
    %33 = vector.shape_cast %32 : vector<1x8x4xf32> to vector<8x4xf32>
    %cst_39 = arith.constant dense<0.000000e+00> : vector<8x2048xf32>
    %34 = tpu.matmul %33, %31, %cst_39 {dimension_numbers = #tpu.dot_dimension_numbers<[1], [1], [0], [0], [0, 0, 1, 0], [], []>} : vector<8x4xf32>, vector<2048x4xf32>, vector<8x2048xf32> -> vector<8x2048xf32>
    %35 = arith.addf %28, %34 : vector<8x2048xf32>
    %c0_40 = arith.constant 0 : index
    %c0_41 = arith.constant 0 : index
    %c1_42 = arith.constant 1 : index
    %c2_43 = arith.constant 2 : index
    %c0_44 = arith.constant 0 : index
    %36 = vector.load %arg1[%c0_40, %c0_41, %c1_42, %c2_43, %c0_44] : memref<1x8x18x18x4xf32, #tpu.memory_space<vmem>>, vector<1x8x16x16x4xf32>
    %37 = vector.shape_cast %36 : vector<1x8x16x16x4xf32> to vector<8x16x16x4xf32>
    %38 = vector.shape_cast %37 : vector<8x16x16x4xf32> to vector<2048x4xf32>
    %c5 = arith.constant 5 : index
    %c0_45 = arith.constant 0 : index
    %c0_46 = arith.constant 0 : index
    %39 = vector.load %arg2[%c5, %c0_45, %c0_46] : memref<9x8x4xf32, #tpu.memory_space<vmem>>, vector<1x8x4xf32>
    %40 = vector.shape_cast %39 : vector<1x8x4xf32> to vector<8x4xf32>
    %cst_47 = arith.constant dense<0.000000e+00> : vector<8x2048xf32>
    %41 = tpu.matmul %40, %38, %cst_47 {dimension_numbers = #tpu.dot_dimension_numbers<[1], [1], [0], [0], [0, 0, 1, 0], [], []>} : vector<8x4xf32>, vector<2048x4xf32>, vector<8x2048xf32> -> vector<8x2048xf32>
    %42 = arith.addf %35, %41 : vector<8x2048xf32>
    %c0_48 = arith.constant 0 : index
    %c0_49 = arith.constant 0 : index
    %c2_50 = arith.constant 2 : index
    %c0_51 = arith.constant 0 : index
    %c0_52 = arith.constant 0 : index
    %43 = vector.load %arg1[%c0_48, %c0_49, %c2_50, %c0_51, %c0_52] : memref<1x8x18x18x4xf32, #tpu.memory_space<vmem>>, vector<1x8x16x16x4xf32>
    %44 = vector.shape_cast %43 : vector<1x8x16x16x4xf32> to vector<8x16x16x4xf32>
    %45 = vector.shape_cast %44 : vector<8x16x16x4xf32> to vector<2048x4xf32>
    %c6 = arith.constant 6 : index
    %c0_53 = arith.constant 0 : index
    %c0_54 = arith.constant 0 : index
    %46 = vector.load %arg2[%c6, %c0_53, %c0_54] : memref<9x8x4xf32, #tpu.memory_space<vmem>>, vector<1x8x4xf32>
    %47 = vector.shape_cast %46 : vector<1x8x4xf32> to vector<8x4xf32>
    %cst_55 = arith.constant dense<0.000000e+00> : vector<8x2048xf32>
    %48 = tpu.matmul %47, %45, %cst_55 {dimension_numbers = #tpu.dot_dimension_numbers<[1], [1], [0], [0], [0, 0, 1, 0], [], []>} : vector<8x4xf32>, vector<2048x4xf32>, vector<8x2048xf32> -> vector<8x2048xf32>
    %49 = arith.addf %42, %48 : vector<8x2048xf32>
    %c0_56 = arith.constant 0 : index
    %c0_57 = arith.constant 0 : index
    %c2_58 = arith.constant 2 : index
    %c1_59 = arith.constant 1 : index
    %c0_60 = arith.constant 0 : index
    %50 = vector.load %arg1[%c0_56, %c0_57, %c2_58, %c1_59, %c0_60] : memref<1x8x18x18x4xf32, #tpu.memory_space<vmem>>, vector<1x8x16x16x4xf32>
    %51 = vector.shape_cast %50 : vector<1x8x16x16x4xf32> to vector<8x16x16x4xf32>
    %52 = vector.shape_cast %51 : vector<8x16x16x4xf32> to vector<2048x4xf32>
    %c7 = arith.constant 7 : index
    %c0_61 = arith.constant 0 : index
    %c0_62 = arith.constant 0 : index
    %53 = vector.load %arg2[%c7, %c0_61, %c0_62] : memref<9x8x4xf32, #tpu.memory_space<vmem>>, vector<1x8x4xf32>
    %54 = vector.shape_cast %53 : vector<1x8x4xf32> to vector<8x4xf32>
    %cst_63 = arith.constant dense<0.000000e+00> : vector<8x2048xf32>
    %55 = tpu.matmul %54, %52, %cst_63 {dimension_numbers = #tpu.dot_dimension_numbers<[1], [1], [0], [0], [0, 0, 1, 0], [], []>} : vector<8x4xf32>, vector<2048x4xf32>, vector<8x2048xf32> -> vector<8x2048xf32>
    %56 = arith.addf %49, %55 : vector<8x2048xf32>
    %c0_64 = arith.constant 0 : index
    %c0_65 = arith.constant 0 : index
    %c2_66 = arith.constant 2 : index
    %c2_67 = arith.constant 2 : index
    %c0_68 = arith.constant 0 : index
    %57 = vector.load %arg1[%c0_64, %c0_65, %c2_66, %c2_67, %c0_68] : memref<1x8x18x18x4xf32, #tpu.memory_space<vmem>>, vector<1x8x16x16x4xf32>
    %58 = vector.shape_cast %57 : vector<1x8x16x16x4xf32> to vector<8x16x16x4xf32>
    %59 = vector.shape_cast %58 : vector<8x16x16x4xf32> to vector<2048x4xf32>
    %c8 = arith.constant 8 : index
    %c0_69 = arith.constant 0 : index
    %c0_70 = arith.constant 0 : index
    %60 = vector.load %arg2[%c8, %c0_69, %c0_70] : memref<9x8x4xf32, #tpu.memory_space<vmem>>, vector<1x8x4xf32>
    %61 = vector.shape_cast %60 : vector<1x8x4xf32> to vector<8x4xf32>
    %cst_71 = arith.constant dense<0.000000e+00> : vector<8x2048xf32>
    %62 = tpu.matmul %61, %59, %cst_71 {dimension_numbers = #tpu.dot_dimension_numbers<[1], [1], [0], [0], [0, 0, 1, 0], [], []>} : vector<8x4xf32>, vector<2048x4xf32>, vector<8x2048xf32> -> vector<8x2048xf32>
    %63 = arith.addf %56, %62 : vector<8x2048xf32>
    %c0_72 = arith.constant 0 : index
    %c0_73 = arith.constant 0 : index
    %64 = vector.load %arg3[%c0_72, %c0_73] : memref<8x1xf32, #tpu.memory_space<vmem>>, vector<8x1xf32>
    %65 = vector.broadcast %64 : vector<8x1xf32> to vector<8x2048xf32>
    %66 = arith.mulf %63, %65 : vector<8x2048xf32>
    %c0_74 = arith.constant 0 : index
    %c0_75 = arith.constant 0 : index
    %67 = vector.load %arg4[%c0_74, %c0_75] : memref<8x1xf32, #tpu.memory_space<vmem>>, vector<8x1xf32>
    %68 = vector.broadcast %67 : vector<8x1xf32> to vector<8x2048xf32>
    %69 = arith.addf %66, %68 : vector<8x2048xf32>
    %cst_76 = arith.constant 0.000000e+00 : f32
    %70 = vector.broadcast %cst_76 : f32 to vector<8x2048xf32>
    %71 = arith.maximumf %69, %70 : vector<8x2048xf32>
    %cst_77 = arith.constant 0.000000e+00 : f32
    %72 = vector.broadcast %cst_77 : f32 to vector<8x256xf32>
    %73 = tpu.concatenate %72, %71, %72 in 1 : vector<8x256xf32>, vector<8x2048xf32>, vector<8x256xf32> -> vector<8x2560xf32>
    %74 = vector.extract_strided_slice %73 {offsets = [0, 0], sizes = [8, 2048], strides = [1, 1]} : vector<8x2560xf32> to vector<8x2048xf32>
    %75 = vector.extract_strided_slice %73 {offsets = [0, 256], sizes = [8, 2048], strides = [1, 1]} : vector<8x2560xf32> to vector<8x2048xf32>
    %76 = vector.extract_strided_slice %73 {offsets = [0, 512], sizes = [8, 2048], strides = [1, 1]} : vector<8x2560xf32> to vector<8x2048xf32>
    %77 = tpu.concatenate %74, %75, %76 in 0 : vector<8x2048xf32>, vector<8x2048xf32>, vector<8x2048xf32> -> vector<24x2048xf32>
    %c0_78 = arith.constant 0 : index
    %c0_79 = arith.constant 0 : index
    %78 = vector.load %arg5[%c0_78, %c0_79] : memref<8x24xf32, #tpu.memory_space<vmem>>, vector<8x24xf32>
    %cst_80 = arith.constant dense<0.000000e+00> : vector<8x2048xf32>
    %79 = tpu.matmul %78, %77, %cst_80 {dimension_numbers = #tpu.dot_dimension_numbers<[1], [0], [0], [1], [0, 0, 1, 1], [], []>} : vector<8x24xf32>, vector<24x2048xf32>, vector<8x2048xf32> -> vector<8x2048xf32>
    %c0_81 = arith.constant 0 : index
    %c0_82 = arith.constant 0 : index
    %80 = vector.load %arg6[%c0_81, %c0_82] : memref<8x1xf32, #tpu.memory_space<vmem>>, vector<8x1xf32>
    %81 = vector.broadcast %80 : vector<8x1xf32> to vector<8x2048xf32>
    %82 = arith.mulf %79, %81 : vector<8x2048xf32>
    %c0_83 = arith.constant 0 : index
    %c0_84 = arith.constant 0 : index
    %83 = vector.load %arg7[%c0_83, %c0_84] : memref<8x1xf32, #tpu.memory_space<vmem>>, vector<8x1xf32>
    %84 = vector.broadcast %83 : vector<8x1xf32> to vector<8x2048xf32>
    %85 = arith.addf %82, %84 : vector<8x2048xf32>
    %cst_85 = arith.constant 0.000000e+00 : f32
    %86 = vector.broadcast %cst_85 : f32 to vector<8x2048xf32>
    %87 = arith.maximumf %85, %86 : vector<8x2048xf32>
    %c0_86 = arith.constant 0 : index
    %c0_87 = arith.constant 0 : index
    %c0_88 = arith.constant 0 : index
    %88 = vector.load %arg8[%c0_86, %c0_87, %c0_88] : memref<1x8x2048xf32, #tpu.memory_space<vmem>>, vector<1x8x2048xf32>
    %89 = vector.shape_cast %88 : vector<1x8x2048xf32> to vector<8x2048xf32>
    %90 = vector.shape_cast %87 : vector<8x2048xf32> to vector<1x8x2048xf32>
    tpu.vector_store %arg8[%c0_86, %c0_87, %c0_88], %90 {strides = array<i32>} : memref<1x8x2048xf32, #tpu.memory_space<vmem>>, vector<1x8x2048xf32>,
    return
  }
  func.func @transform_0(%arg0: i32) -> (i32, i32, i32, i32, i32) {
    %c0_i32 = arith.constant 0 : i32
    %c0_i32_0 = arith.constant 0 : i32
    %c0_i32_1 = arith.constant 0 : i32
    %c0_i32_2 = arith.constant 0 : i32
    %c0_i32_3 = arith.constant 0 : i32
    return %arg0, %c0_i32, %c0_i32_0, %c0_i32_1, %c0_i32_2 : i32, i32, i32, i32, i32
  }
  func.func @transform_1(%arg0: i32) -> (i32, i32, i32) {
    %c0_i32 = arith.constant 0 : i32
    %c0_i32_0 = arith.constant 0 : i32
    %c0_i32_1 = arith.constant 0 : i32
    %c0_i32_2 = arith.constant 0 : i32
    return %c0_i32, %c0_i32_0, %c0_i32_1 : i32, i32, i32
  }
  func.func @transform_2(%arg0: i32) -> (i32, i32) {
    %c0_i32 = arith.constant 0 : i32
    %c0_i32_0 = arith.constant 0 : i32
    %c0_i32_1 = arith.constant 0 : i32
    return %c0_i32, %c0_i32_0 : i32, i32
  }
  func.func @transform_3(%arg0: i32) -> (i32, i32) {
    %c0_i32 = arith.constant 0 : i32
    %c0_i32_0 = arith.constant 0 : i32
    %c0_i32_1 = arith.constant 0 : i32
    return %c0_i32, %c0_i32_0 : i32, i32
  }
  func.func @transform_4(%arg0: i32) -> (i32, i32) {
    %c0_i32 = arith.constant 0 : i32
    %c0_i32_0 = arith.constant 0 : i32
    %c0_i32_1 = arith.constant 0 : i32
    return %c0_i32, %c0_i32_0 : i32, i32
  }
  func.func @transform_5(%arg0: i32) -> (i32, i32) {
    %c0_i32 = arith.constant 0 : i32
    %c0_i32_0 = arith.constant 0 : i32
    %c0_i32_1 = arith.constant 0 : i32
    return %c0_i32, %c0_i32_0 : i32, i32
  }
  func.func @transform_6(%arg0: i32) -> (i32, i32) {
    %c0_i32 = arith.constant 0 : i32
    %c0_i32_0 = arith.constant 0 : i32
    %c0_i32_1 = arith.constant 0 : i32
    return %c0_i32, %c0_i32_0 : i32, i32
  }
  func.func @transform_7(%arg0: i32) -> (i32, i32, i32) {
    %c0_i32 = arith.constant 0 : i32
    %c0_i32_0 = arith.constant 0 : i32
    %c0_i32_1 = arith.constant 0 : i32
    return %arg0, %c0_i32, %c0_i32_0 : i32, i32, i32
  }
}

</mosaic_0001>

<bundles_post_ra>
// kernel: sep_conv3d.1
= control target key start
LH: loop header
LB: loop body
LE: loop exit
PB: predicated region body
PF: predicated region fallthrough
CT: control target
= control target key end

     0   :  { %s17132_s24 = smov 0   ;;  %s22601_s0 = inlined_call_operand.vmem [shape: f32[2,8,18,18,4], index: 0, kind: input, shape index: {}]   ;;  %s22602_s1 = inlined_call_operand.vmem [shape: f32[9,8,4], index: 1, kind: input, shape index: {}]   ;;  %s22603_s2 = inlined_call_operand.vmem [shape: f32[8,1], index: 2, kind: input, shape index: {}]   ;;  %s22604_s3 = inlined_call_operand.vmem [shape: f32[8,1], index: 3, kind: input, shape index: {}]   ;;  %s22605_s4 = inlined_call_operand.vmem [shape: f32[8,24], index: 4, kind: input, shape index: {}]   ;;  %s22606_s5 = inlined_call_operand.vmem [shape: f32[8,1], index: 5, kind: input, shape index: {}]   ;;  %s22607_s6 = inlined_call_operand.vmem [shape: f32[8,1], index: 6, kind: input, shape index: {}]   ;;  %s22608_s7 = inlined_call_operand.vmem [shape: f32[2,8,2048], index: 7, kind: output, shape index: {}]  }
   0x1 LB: > { %s13050_s25 = sadd.s32 4294967295, %s17088_s24   ;;  %p13054_p0 = scmp.ge.s32.totalorder %s17088_s24, 1  ;;  %s17088_s24 = sphi %s17132_s24, %s17_s24  }
   0x2   : > { %p237_p1 = scmp.lt.s32.totalorder %s17088_s24, 3 }
   0x4   : > { %p238_p2 = pnand %p13054_p0, %p237_p1 }
   0x6   : > { %241 = sbr.rel (%p238_p2) target bundleno = 2608 (0xa30), region = 48 }
   0xb   : > { %p269_p3 = scmp.lt.s32.totalorder %s13050_s25, 1  ;;  %vm794_vm0 = vcmask 31744   ;;  %vm12595_vm1 = vcmask 195584  }
   0xd   : > { %s22664_s25 = smov (!%p269_p3, %s13050_s25), 1 }
   0xe   : > { %s17069_s26 = smul.u32 3456, %s22664_s25  ;;  %s17068_s14 = sshll.u32 %s22664_s25, 7 }
   0xf   : > { %s22573_s17 = scalar_lea.vmem %s22608_s7, %s17068_s14 }
  0x10   : > { %s17146_s29 = scalar_lea.vmem %s22601_s0, %s17069_s26 }
  0x11   : > { %v551_v0 = vld [vmem:[%s17146_s29 + $0xb1] sm:$0xff]  ;;  %v583_v2 = vld [vmem:[%s17146_s29 + $0x261] sm:$0xff]  ;;  %v550_v4 = vld [vmem:[%s17146_s29 + $0xa9] sm:$0xff] }
  0x12   : > { %v567_v1 = vld [vmem:[%s17146_s29 + $0x171] sm:$0xff]  ;;  %13059 = vmatpush.xpose.msk.msra.mxu0 %vm794_vm0, %v551_v0  ;;  %v599_v3 = vld [vmem:[%s17146_s29 + $0x321] sm:$0xff]  ;;  %13093 = vmatpush.xpose.msk.msra.mxu2 %vm794_vm0, %v583_v2  ;;  %v566_v5 = vld [vmem:[%s17146_s29 + $0x169] sm:$0xff] }
  0x13   : > { %13076 = vmatpush.xpose.msk.msra.mxu1 %vm794_vm0, %v567_v1  ;;  %13110 = vmatpush.xpose.msk.msra.mxu3 %vm794_vm0, %v599_v3  ;;  %v582_v6 = vld [vmem:[%s17146_s29 + $0x259] sm:$0xff]  ;;  %v581_v10 = vld [vmem:[%s17146_s29 + $0x249] sm:$0xff]  ;;  %v548_v12 = vld [vmem:[%s17146_s29 + $0x91] sm:$0xff] }
  0x14   : > { %v598_v7 = vld [vmem:[%s17146_s29 + $0x319] sm:$0xff]  ;;  %v597_v11 = vld [vmem:[%s17146_s29 + $0x309] sm:$0xff]  ;;  %v564_v13 = vld [vmem:[%s17146_s29 + $0x151] sm:$0xff] }
  0x15   : > { %v549_v8 = vld [vmem:[%s17146_s29 + $0x99] sm:$0xff]  ;;  %v580_v14 = vld [vmem:[%s17146_s29 + $0x241] sm:$0xff]  ;;  %v579_v18 = vld [vmem:[%s17146_s29 + $0x231] sm:$0xff] }
  0x16   : > { %13060 = vmatpush.xpose.msk.msra.mxu0 %vm794_vm0, %v550_v4  ;;  %13094 = vmatpush.xpose.msk.msra.mxu2 %vm794_vm0, %v582_v6  ;;  %v565_v9 = vld [vmem:[%s17146_s29 + $0x159] sm:$0xff]  ;;  %v596_v15 = vld [vmem:[%s17146_s29 + $0x301] sm:$0xff]  ;;  %v595_v19 = vld [vmem:[%s17146_s29 + $0x2f1] sm:$0xff] }
  0x17   : > { %13077 = vmatpush.xpose.msk.msra.mxu1 %vm794_vm0, %v566_v5  ;;  %13111 = vmatpush.xpose.msk.msra.mxu3 %vm794_vm0, %v598_v7  ;;  %v547_v16 = vld [vmem:[%s17146_s29 + $0x81] sm:$0xff]  ;;  %v546_v20 = vld [vmem:[%s17146_s29 + $0x79] sm:$0xff]  ;;  %v578_v22 = vld [vmem:[%s17146_s29 + $0x229] sm:$0xff] }
  0x18   : > { %v563_v17 = vld [vmem:[%s17146_s29 + $0x141] sm:$0xff]  ;;  %v562_v21 = vld [vmem:[%s17146_s29 + $0x139] sm:$0xff]  ;;  %v594_v23 = vld [vmem:[%s17146_s29 + $0x2e9] sm:$0xff] }
  0x19   : > { %v545_v24 = vld [vmem:[%s17146_s29 + $0x69] sm:$0xff]  ;;  %v577_v26 = vld [vmem:[%s17146_s29 + $0x219] sm:$0xff]  ;;  %v544_v28 = vld [vmem:[%s17146_s29 + $0x61] sm:$0xff] }
  0x1a   : > { %13061 = vmatpush.xpose.msk.msra.mxu0 %vm794_vm0, %v549_v8  ;;  %13095 = vmatpush.xpose.msk.msra.mxu2 %vm794_vm0, %v581_v10  ;;  %v561_v25 = vld [vmem:[%s17146_s29 + $0x129] sm:$0xff]  ;;  %v593_v27 = vld [vmem:[%s17146_s29 + $0x2d9] sm:$0xff]  ;;  %v560_v29 = vld [vmem:[%s17146_s29 + $0x121] sm:$0xff] }
  0x1b   : > { %13078 = vmatpush.xpose.msk.msra.mxu1 %vm794_vm0, %v565_v9  ;;  %13112 = vmatpush.xpose.msk.msra.mxu3 %vm794_vm0, %v597_v11  ;;  %v576_v30 = vld [vmem:[%s17146_s29 + $0x211] sm:$0xff]  ;;  %v575_v34 = vld [vmem:[%s17146_s29 + $0x201] sm:$0xff]  ;;  %v542_v36 = vld [vmem:[%s17146_s29 + $0x49] sm:$0xff] }
  0x1c   : > { %v592_v31 = vld [vmem:[%s17146_s29 + $0x2d1] sm:$0xff]  ;;  %v591_v35 = vld [vmem:[%s17146_s29 + $0x2c1] sm:$0xff]  ;;  %v558_v37 = vld [vmem:[%s17146_s29 + $0x109] sm:$0xff] }
  0x1d   : > { %v543_v32 = vld [vmem:[%s17146_s29 + $0x51] sm:$0xff]  ;;  %v574_v38 = vld [vmem:[%s17146_s29 + $0x1f9] sm:$0xff]  ;;  %v573_v42 = vld [vmem:[%s17146_s29 + $0x1e9] sm:$0xff] }
  0x1e   : > { %13062 = vmatpush.xpose.msk.msra.mxu0 %vm794_vm0, %v548_v12  ;;  %13096 = vmatpush.xpose.msk.msra.mxu2 %vm794_vm0, %v580_v14  ;;  %v559_v33 = vld [vmem:[%s17146_s29 + $0x111] sm:$0xff]  ;;  %v590_v39 = vld [vmem:[%s17146_s29 + $0x2b9] sm:$0xff]  ;;  %v589_v43 = vld [vmem:[%s17146_s29 + $0x2a9] sm:$0xff] }
  0x1f   : > { %13079 = vmatpush.xpose.msk.msra.mxu1 %vm794_vm0, %v564_v13  ;;  %13113 = vmatpush.xpose.msk.msra.mxu3 %vm794_vm0, %v596_v15  ;;  %v541_v40 = vld [vmem:[%s17146_s29 + $0x39] sm:$0xff]  ;;  %v540_v44 = vld [vmem:[%s17146_s29 + $0x31] sm:$0xff]  ;;  %v572_v46 = vld [vmem:[%s17146_s29 + $0x1e1] sm:$0xff] }
  0x20   : > { %v557_v41 = vld [vmem:[%s17146_s29 + $0xf9] sm:$0xff]  ;;  %v556_v45 = vld [vmem:[%s17146_s29 + $0xf1] sm:$0xff]  ;;  %v588_v47 = vld [vmem:[%s17146_s29 + $0x2a1] sm:$0xff] }
  0x21   : > { %v539_v48 = vld [vmem:[%s17146_s29 + $0x21] sm:$0xff]  ;;  %v571_v50 = vld [vmem:[%s17146_s29 + $0x1d1] sm:$0xff]  ;;  %v538_v52 = vld [vmem:[%s17146_s29 + $0x19] sm:$0xff] }
  0x22   : > { %13063 = vmatpush.xpose.msk.msra.mxu0 %vm794_vm0, %v547_v16  ;;  %13097 = vmatpush.xpose.msk.msra.mxu2 %vm794_vm0, %v579_v18  ;;  %v555_v49 = vld [vmem:[%s17146_s29 + $0xe1] sm:$0xff]  ;;  %v587_v51 = vld [vmem:[%s17146_s29 + $0x291] sm:$0xff]  ;;  %v554_v53 = vld [vmem:[%s17146_s29 + $0xd9] sm:$0xff] }
  0x23   : > { %13080 = vmatpush.xpose.msk.msra.mxu1 %vm794_vm0, %v563_v17  ;;  %13114 = vmatpush.xpose.msk.msra.mxu3 %vm794_vm0, %v595_v19  ;;  %v570_v54 = vld [vmem:[%s17146_s29 + $0x1c9] sm:$0xff]  ;;  %v569_v58 = vld [vmem:[%s17146_s29 + $0x1b9] sm:$0xff]  ;;  %v536_v60 = vld [vmem:[%s17146_s29 + $0x1] sm:$0xff] }
  0x24   : > { %v586_v55 = vld [vmem:[%s17146_s29 + $0x289] sm:$0xff]  ;;  %v585_v59 = vld [vmem:[%s17146_s29 + $0x279] sm:$0xff]  ;;  %v552_v61 = vld [vmem:[%s17146_s29 + $0xc1] sm:$0xff] }
  0x25   : > { %v537_v56 = vld [vmem:[%s17146_s29 + $0x9] sm:$0xff]  ;;  %v568_v62 = vld [vmem:[%s17146_s29 + $0x1b1] sm:$0xff]  ;;  %v647_v2 = vld [vmem:[%s17146_s29 + $0x5c1] sm:$0xff] }
  0x26   : > { %13064 = vmatpush.xpose.msk.msra.mxu0 %vm794_vm0, %v546_v20  ;;  %13098 = vmatpush.xpose.msk.msra.mxu2 %vm794_vm0, %v578_v22  ;;  %v553_v57 = vld [vmem:[%s17146_s29 + $0xc9] sm:$0xff]  ;;  %v584_v63 = vld [vmem:[%s17146_s29 + $0x271] sm:$0xff]  ;;  %v663_v3 = vld [vmem:[%s17146_s29 + $0x681] sm:$0xff] }
  0x27   : > { %13081 = vmatpush.xpose.msk.msra.mxu1 %vm794_vm0, %v562_v21  ;;  %13115 = vmatpush.xpose.msk.msra.mxu3 %vm794_vm0, %v594_v23  ;;  %v615_v0 = vld [vmem:[%s17146_s29 + $0x411] sm:$0xff]  ;;  %v614_v4 = vld [vmem:[%s17146_s29 + $0x409] sm:$0xff]  ;;  %v646_v6 = vld [vmem:[%s17146_s29 + $0x5b9] sm:$0xff] }
  0x28   : > { %v631_v1 = vld [vmem:[%s17146_s29 + $0x4d1] sm:$0xff]  ;;  %v630_v5 = vld [vmem:[%s17146_s29 + $0x4c9] sm:$0xff]  ;;  %v662_v7 = vld [vmem:[%s17146_s29 + $0x679] sm:$0xff] }
  0x29   : > { %v613_v8 = vld [vmem:[%s17146_s29 + $0x3f9] sm:$0xff]  ;;  %v645_v10 = vld [vmem:[%s17146_s29 + $0x5a9] sm:$0xff]  ;;  %v612_v12 = vld [vmem:[%s17146_s29 + $0x3f1] sm:$0xff] }
  0x2a   : > { %13065 = vmatpush.xpose.msk.msra.mxu0 %vm794_vm0, %v545_v24  ;;  %13099 = vmatpush.xpose.msk.msra.mxu2 %vm794_vm0, %v577_v26  ;;  %v629_v9 = vld [vmem:[%s17146_s29 + $0x4b9] sm:$0xff]  ;;  %v661_v11 = vld [vmem:[%s17146_s29 + $0x669] sm:$0xff]  ;;  %v628_v13 = vld [vmem:[%s17146_s29 + $0x4b1] sm:$0xff] }
  0x2b   : > { %13082 = vmatpush.xpose.msk.msra.mxu1 %vm794_vm0, %v561_v25  ;;  %13116 = vmatpush.xpose.msk.msra.mxu3 %vm794_vm0, %v593_v27  ;;  %v644_v14 = vld [vmem:[%s17146_s29 + $0x5a1] sm:$0xff]  ;;  %v643_v18 = vld [vmem:[%s17146_s29 + $0x591] sm:$0xff]  ;;  %v610_v20 = vld [vmem:[%s17146_s29 + $0x3d9] sm:$0xff] }
  0x2c   : > { %v660_v15 = vld [vmem:[%s17146_s29 + $0x661] sm:$0xff]  ;;  %v659_v19 = vld [vmem:[%s17146_s29 + $0x651] sm:$0xff]  ;;  %v626_v21 = vld [vmem:[%s17146_s29 + $0x499] sm:$0xff] }
  0x2d   : > { %v611_v16 = vld [vmem:[%s17146_s29 + $0x3e1] sm:$0xff]  ;;  %v642_v22 = vld [vmem:[%s17146_s29 + $0x589] sm:$0xff]  ;;  %v641_v26 = vld [vmem:[%s17146_s29 + $0x579] sm:$0xff] }
  0x2e   : > { %13066 = vmatpush.xpose.msk.msra.mxu0 %vm794_vm0, %v544_v28  ;;  %13100 = vmatpush.xpose.msk.msra.mxu2 %vm794_vm0, %v576_v30  ;;  %v627_v17 = vld [vmem:[%s17146_s29 + $0x4a1] sm:$0xff]  ;;  %v658_v23 = vld [vmem:[%s17146_s29 + $0x649] sm:$0xff]  ;;  %v657_v27 = vld [vmem:[%s17146_s29 + $0x639] sm:$0xff] }
  0x2f   : > { %13083 = vmatpush.xpose.msk.msra.mxu1 %vm794_vm0, %v560_v29  ;;  %13117 = vmatpush.xpose.msk.msra.mxu3 %vm794_vm0, %v592_v31  ;;  %v609_v24 = vld [vmem:[%s17146_s29 + $0x3c9] sm:$0xff]  ;;  %v608_v28 = vld [vmem:[%s17146_s29 + $0x3c1] sm:$0xff]  ;;  %v640_v30 = vld [vmem:[%s17146_s29 + $0x571] sm:$0xff] }
  0x30   : > { %v625_v25 = vld [vmem:[%s17146_s29 + $0x489] sm:$0xff]  ;;  %v624_v29 = vld [vmem:[%s17146_s29 + $0x481] sm:$0xff]  ;;  %v656_v31 = vld [vmem:[%s17146_s29 + $0x631] sm:$0xff] }
  0x32   : > { %13067 = vmatpush.xpose.msk.msra.mxu0 %vm794_vm0, %v543_v32  ;;  %13101 = vmatpush.xpose.msk.msra.mxu2 %vm794_vm0, %v575_v34  ;;  %v607_v32 = vld [vmem:[%s17146_s29 + $0x3b1] sm:$0xff]  ;;  %v17345_v34 = vld [vmem:[%s22602_s1 + $0x8] sm:$0xff] }
  0x33   : > { %13084 = vmatpush.xpose.msk.msra.mxu1 %vm794_vm0, %v559_v33  ;;  %13118 = vmatpush.xpose.msk.msra.mxu3 %vm794_vm0, %v591_v35  ;;  %v623_v33 = vld [vmem:[%s17146_s29 + $0x471] sm:$0xff]  ;;  %v639_v35 = vld [vmem:[%s17146_s29 + $0x561] sm:$0xff] }
  0x36   : > { %13068 = vmatpush.xpose.msk.msra.mxu0 %vm794_vm0, %v542_v36  ;;  %13102 = vmatpush.xpose.msk.msra.mxu2 %vm794_vm0, %v574_v38  ;;  %v655_v36 = vld [vmem:[%s17146_s29 + $0x621] sm:$0xff]  ;;  %v622_v38 = vld [vmem:[%s17146_s29 + $0x469] sm:$0xff] }
  0x37   : > { %13085 = vmatpush.xpose.msk.msra.mxu1 %vm794_vm0, %v558_v37  ;;  %13119 = vmatpush.xpose.msk.msra.mxu3 %vm794_vm0, %v590_v39  ;;  %v606_v37 = vld [vmem:[%s17146_s29 + $0x3a9] sm:$0xff]  ;;  %v638_v39 = vld [vmem:[%s17146_s29 + $0x559] sm:$0xff] }
  0x3a   : > { %13069 = vmatpush.xpose.msk.msra.mxu0 %vm794_vm0, %v541_v40  ;;  %13103 = vmatpush.xpose.msk.msra.mxu2 %vm794_vm0, %v573_v42  ;;  %v654_v40 = vld [vmem:[%s17146_s29 + $0x619] sm:$0xff] }
  0x3b   : > { %13086 = vmatpush.xpose.msk.msra.mxu1 %vm794_vm0, %v557_v41  ;;  %13120 = vmatpush.xpose.msk.msra.mxu3 %vm794_vm0, %v589_v43  ;;  %v605_v41 = vld [vmem:[%s17146_s29 + $0x399] sm:$0xff]  ;;  %v637_v43 = vld [vmem:[%s17146_s29 + $0x549] sm:$0xff] }
  0x3c   : > { %v621_v42 = vld [vmem:[%s17146_s29 + $0x459] sm:$0xff] }
  0x3e   : > { %13070 = vmatpush.xpose.msk.msra.mxu0 %vm794_vm0, %v540_v44  ;;  %13104 = vmatpush.xpose.msk.msra.mxu2 %vm794_vm0, %v572_v46  ;;  %v653_v44 = vld [vmem:[%s17146_s29 + $0x609] sm:$0xff]  ;;  %v620_v46 = vld [vmem:[%s17146_s29 + $0x451] sm:$0xff] }
  0x3f   : > { %13087 = vmatpush.xpose.msk.msra.mxu1 %vm794_vm0, %v556_v45  ;;  %13121 = vmatpush.xpose.msk.msra.mxu3 %vm794_vm0, %v588_v47  ;;  %v604_v45 = vld [vmem:[%s17146_s29 + $0x391] sm:$0xff]  ;;  %v636_v47 = vld [vmem:[%s17146_s29 + $0x541] sm:$0xff] }
  0x42   : > { %13071 = vmatpush.xpose.msk.msra.mxu0 %vm794_vm0, %v539_v48  ;;  %13105 = vmatpush.xpose.msk.msra.mxu2 %vm794_vm0, %v571_v50  ;;  %v652_v48 = vld [vmem:[%s17146_s29 + $0x601] sm:$0xff] }
  0x43   : > { %13088 = vmatpush.xpose.msk.msra.mxu1 %vm794_vm0, %v555_v49  ;;  %13122 = vmatpush.xpose.msk.msra.mxu3 %vm794_vm0, %v587_v51  ;;  %v603_v49 = vld [vmem:[%s17146_s29 + $0x381] sm:$0xff]  ;;  %v635_v51 = vld [vmem:[%s17146_s29 + $0x531] sm:$0xff] }
  0x44   : > { %v619_v50 = vld [vmem:[%s17146_s29 + $0x441] sm:$0xff] }
  0x46   : > { %13072 = vmatpush.xpose.msk.msra.mxu0 %vm794_vm0, %v538_v52  ;;  %13106 = vmatpush.xpose.msk.msra.mxu2 %vm794_vm0, %v570_v54  ;;  %v651_v52 = vld [vmem:[%s17146_s29 + $0x5f1] sm:$0xff]  ;;  %v618_v54 = vld [vmem:[%s17146_s29 + $0x439] sm:$0xff] }
  0x47   : > { %13089 = vmatpush.xpose.msk.msra.mxu1 %vm794_vm0, %v554_v53  ;;  %13123 = vmatpush.xpose.msk.msra.mxu3 %vm794_vm0, %v586_v55  ;;  %v602_v53 = vld [vmem:[%s17146_s29 + $0x379] sm:$0xff]  ;;  %v634_v55 = vld [vmem:[%s17146_s29 + $0x529] sm:$0xff] }
  0x4a   : > { %13073 = vmatpush.xpose.msk.msra.mxu0 %vm794_vm0, %v537_v56  ;;  %13107 = vmatpush.xpose.msk.msra.mxu2 %vm794_vm0, %v569_v58  ;;  %v650_v56 = vld [vmem:[%s17146_s29 + $0x5e9] sm:$0xff] }
  0x4b   : > { %13090 = vmatpush.xpose.msk.msra.mxu1 %vm794_vm0, %v553_v57  ;;  %13124 = vmatpush.xpose.msk.msra.mxu3 %vm794_vm0, %v585_v59  ;;  %v601_v57 = vld [vmem:[%s17146_s29 + $0x369] sm:$0xff]  ;;  %v633_v59 = vld [vmem:[%s17146_s29 + $0x519] sm:$0xff] }
  0x4c   : > { %v617_v58 = vld [vmem:[%s17146_s29 + $0x429] sm:$0xff] }
  0x4e   : > { %13074 = vmatpush.xpose.msk.msra.mxu0 %vm794_vm0, %v536_v60  ;;  %13108 = vmatpush.xpose.msk.msra.mxu2 %vm794_vm0, %v568_v62  ;;  %v649_v60 = vld [vmem:[%s17146_s29 + $0x5d9] sm:$0xff]  ;;  %v616_v62 = vld [vmem:[%s17146_s29 + $0x421] sm:$0xff] }
  0x4f   : > { %13091 = vmatpush.xpose.msk.msra.mxu1 %vm794_vm0, %v552_v61  ;;  %13125 = vmatpush.xpose.msk.msra.mxu3 %vm794_vm0, %v584_v63  ;;  %v600_v61 = vld [vmem:[%s17146_s29 + $0x361] sm:$0xff]  ;;  %v632_v63 = vld [vmem:[%s17146_s29 + $0x511] sm:$0xff] }
  0x51   : > { %13075 = vmatmul.msk.f32.vlgmr.msra.gmra.mxu0 %vm794_vm0, %v17345_v34  ;;  %13109 = vmatmul.msk.f32.vlgmr.msra.gmra.mxu2 %vm794_vm0, %v17345_v34 }
  0x52   : > { %13127 = vmatpush.xpose.msk.msrb.mxu0 %vm794_vm0, %v615_v0  ;;  %13161 = vmatpush.xpose.msk.msrb.mxu2 %vm794_vm0, %v647_v2  ;;  %v648_v0 = vld [vmem:[%s17146_s29 + $0x5d1] sm:$0xff] }
  0x53   : > { %13144 = vmatpush.xpose.msk.msrb.mxu1 %vm794_vm0, %v631_v1  ;;  %13178 = vmatpush.xpose.msk.msrb.mxu3 %vm794_vm0, %v663_v3  ;;  %v679_v1 = vld [vmem:[%s17146_s29 + $0x771] sm:$0xff]  ;;  %v711_v3 = vld [vmem:[%s17146_s29 + $0x921] sm:$0xff] }
  0x54   : > { %13092 = vmatmul.msk.f32.vlgmr.msra.gmra.mxu1 %vm794_vm0, %v17345_v34  ;;  %13126 = vmatmul.msk.f32.vlgmr.msra.gmra.mxu3 %vm794_vm0, %v17345_v34  ;;  %v695_v2 = vld [vmem:[%s17146_s29 + $0x831] sm:$0xff] }
  0x56   : > { %13128 = vmatpush.xpose.msk.msrb.mxu0 %vm794_vm0, %v614_v4  ;;  %13162 = vmatpush.xpose.msk.msrb.mxu2 %vm794_vm0, %v646_v6  ;;  %v727_v4 = vld [vmem:[%s17146_s29 + $0x9e1] sm:$0xff]  ;;  %v694_v6 = vld [vmem:[%s17146_s29 + $0x829] sm:$0xff] }
  0x57   : > { %13145 = vmatpush.xpose.msk.msrb.mxu1 %vm794_vm0, %v630_v5  ;;  %13179 = vmatpush.xpose.msk.msrb.mxu3 %vm794_vm0, %v662_v7  ;;  %v678_v5 = vld [vmem:[%s17146_s29 + $0x769] sm:$0xff]  ;;  %v710_v7 = vld [vmem:[%s17146_s29 + $0x919] sm:$0xff] }
  0x5a   : > { %13129 = vmatpush.xpose.msk.msrb.mxu0 %vm794_vm0, %v613_v8  ;;  %13163 = vmatpush.xpose.msk.msrb.mxu2 %vm794_vm0, %v645_v10  ;;  %v726_v8 = vld [vmem:[%s17146_s29 + $0x9d9] sm:$0xff] }
  0x5b   : > { %13146 = vmatpush.xpose.msk.msrb.mxu1 %vm794_vm0, %v629_v9  ;;  %13180 = vmatpush.xpose.msk.msrb.mxu3 %vm794_vm0, %v661_v11  ;;  %v677_v9 = vld [vmem:[%s17146_s29 + $0x759] sm:$0xff]  ;;  %v709_v11 = vld [vmem:[%s17146_s29 + $0x909] sm:$0xff] }
  0x5c   : > { %v693_v10 = vld [vmem:[%s17146_s29 + $0x819] sm:$0xff] }
  0x5e   : > { %13130 = vmatpush.xpose.msk.msrb.mxu0 %vm794_vm0, %v612_v12  ;;  %13164 = vmatpush.xpose.msk.msrb.mxu2 %vm794_vm0, %v644_v14  ;;  %v725_v12 = vld [vmem:[%s17146_s29 + $0x9c9] sm:$0xff]  ;;  %v692_v14 = vld [vmem:[%s17146_s29 + $0x811] sm:$0xff] }
  0x5f   : > { %13147 = vmatpush.xpose.msk.msrb.mxu1 %vm794_vm0, %v628_v13  ;;  %13181 = vmatpush.xpose.msk.msrb.mxu3 %vm794_vm0, %v660_v15  ;;  %v676_v13 = vld [vmem:[%s17146_s29 + $0x751] sm:$0xff]  ;;  %v708_v15 = vld [vmem:[%s17146_s29 + $0x901] sm:$0xff] }
  0x62   : > { %13131 = vmatpush.xpose.msk.msrb.mxu0 %vm794_vm0, %v611_v16  ;;  %13165 = vmatpush.xpose.msk.msrb.mxu2 %vm794_vm0, %v643_v18  ;;  %v724_v16 = vld [vmem:[%s17146_s29 + $0x9c1] sm:$0xff] }
  0x63   : > { %13148 = vmatpush.xpose.msk.msrb.mxu1 %vm794_vm0, %v627_v17  ;;  %13182 = vmatpush.xpose.msk.msrb.mxu3 %vm794_vm0, %v659_v19  ;;  %v675_v17 = vld [vmem:[%s17146_s29 + $0x741] sm:$0xff]  ;;  %v707_v19 = vld [vmem:[%s17146_s29 + $0x8f1] sm:$0xff] }
  0x64   : > { %v691_v18 = vld [vmem:[%s17146_s29 + $0x801] sm:$0xff] }
  0x66   : > { %13132 = vmatpush.xpose.msk.msrb.mxu0 %vm794_vm0, %v610_v20  ;;  %13166 = vmatpush.xpose.msk.msrb.mxu2 %vm794_vm0, %v642_v22  ;;  %v723_v20 = vld [vmem:[%s17146_s29 + $0x9b1] sm:$0xff]  ;;  %v690_v22 = vld [vmem:[%s17146_s29 + $0x7f9] sm:$0xff] }
  0x67   : > { %13149 = vmatpush.xpose.msk.msrb.mxu1 %vm794_vm0, %v626_v21  ;;  %13183 = vmatpush.xpose.msk.msrb.mxu3 %vm794_vm0, %v658_v23  ;;  %v674_v21 = vld [vmem:[%s17146_s29 + $0x739] sm:$0xff]  ;;  %v706_v23 = vld [vmem:[%s17146_s29 + $0x8e9] sm:$0xff] }
  0x6a   : > { %13133 = vmatpush.xpose.msk.msrb.mxu0 %vm794_vm0, %v609_v24  ;;  %13167 = vmatpush.xpose.msk.msrb.mxu2 %vm794_vm0, %v641_v26  ;;  %v722_v24 = vld [vmem:[%s17146_s29 + $0x9a9] sm:$0xff] }
  0x6b   : > { %13150 = vmatpush.xpose.msk.msrb.mxu1 %vm794_vm0, %v625_v25  ;;  %13184 = vmatpush.xpose.msk.msrb.mxu3 %vm794_vm0, %v657_v27  ;;  %v673_v25 = vld [vmem:[%s17146_s29 + $0x729] sm:$0xff]  ;;  %v705_v27 = vld [vmem:[%s17146_s29 + $0x8d9] sm:$0xff] }
  0x6c   : > { %v689_v26 = vld [vmem:[%s17146_s29 + $0x7e9] sm:$0xff] }
  0x6e   : > { %13134 = vmatpush.xpose.msk.msrb.mxu0 %vm794_vm0, %v608_v28  ;;  %13168 = vmatpush.xpose.msk.msrb.mxu2 %vm794_vm0, %v640_v30  ;;  %v721_v28 = vld [vmem:[%s17146_s29 + $0x999] sm:$0xff]  ;;  %v688_v30 = vld [vmem:[%s17146_s29 + $0x7e1] sm:$0xff] }
  0x6f   : > { %13151 = vmatpush.xpose.msk.msrb.mxu1 %vm794_vm0, %v624_v29  ;;  %13185 = vmatpush.xpose.msk.msrb.mxu3 %vm794_vm0, %v656_v31  ;;  %v672_v29 = vld [vmem:[%s17146_s29 + $0x721] sm:$0xff]  ;;  %v704_v31 = vld [vmem:[%s17146_s29 + $0x8d1] sm:$0xff] }
  0x72   : > { %13135 = vmatpush.xpose.msk.msrb.mxu0 %vm794_vm0, %v607_v32  ;;  %13169 = vmatpush.xpose.msk.msrb.mxu2 %vm794_vm0, %v639_v35  ;;  %v720_v32 = vld [vmem:[%s17146_s29 + $0x991] sm:$0xff] }
  0x73   : > { %13152 = vmatpush.xpose.msk.msrb.mxu1 %vm794_vm0, %v623_v33  ;;  %13186 = vmatpush.xpose.msk.msrb.mxu3 %vm794_vm0, %v655_v36  ;;  %v671_v33 = vld [vmem:[%s17146_s29 + $0x711] sm:$0xff]  ;;  %v703_v36 = vld [vmem:[%s17146_s29 + $0x8c1] sm:$0xff] }
  0x74   : > { %v687_v35 = vld [vmem:[%s17146_s29 + $0x7d1] sm:$0xff] }
  0x76   : > { %13136 = vmatpush.xpose.msk.msrb.mxu0 %vm794_vm0, %v606_v37  ;;  %13170 = vmatpush.xpose.msk.msrb.mxu2 %vm794_vm0, %v638_v39  ;;  %v719_v37 = vld [vmem:[%s17146_s29 + $0x981] sm:$0xff]  ;;  %v686_v39 = vld [vmem:[%s17146_s29 + $0x7c9] sm:$0xff] }
  0x77   : > { %13153 = vmatpush.xpose.msk.msrb.mxu1 %vm794_vm0, %v622_v38  ;;  %13187 = vmatpush.xpose.msk.msrb.mxu3 %vm794_vm0, %v654_v40  ;;  %v670_v38 = vld [vmem:[%s17146_s29 + $0x709] sm:$0xff]  ;;  %v702_v40 = vld [vmem:[%s17146_s29 + $0x8b9] sm:$0xff] }
  0x7a   : > { %13137 = vmatpush.xpose.msk.msrb.mxu0 %vm794_vm0, %v605_v41  ;;  %13171 = vmatpush.xpose.msk.msrb.mxu2 %vm794_vm0, %v637_v43  ;;  %v718_v41 = vld [vmem:[%s17146_s29 + $0x979] sm:$0xff] }
  0x7b   : > { %13154 = vmatpush.xpose.msk.msrb.mxu1 %vm794_vm0, %v621_v42  ;;  %13188 = vmatpush.xpose.msk.msrb.mxu3 %vm794_vm0, %v653_v44  ;;  %v669_v42 = vld [vmem:[%s17146_s29 + $0x6f9] sm:$0xff]  ;;  %v701_v44 = vld [vmem:[%s17146_s29 + $0x8a9] sm:$0xff] }
  0x7c   : > { %v685_v43 = vld [vmem:[%s17146_s29 + $0x7b9] sm:$0xff] }
  0x7e   : > { %13138 = vmatpush.xpose.msk.msrb.mxu0 %vm794_vm0, %v604_v45  ;;  %13172 = vmatpush.xpose.msk.msrb.mxu2 %vm794_vm0, %v636_v47  ;;  %v717_v45 = vld [vmem:[%s17146_s29 + $0x969] sm:$0xff]  ;;  %v684_v47 = vld [vmem:[%s17146_s29 + $0x7b1] sm:$0xff] }
  0x7f   : > { %13155 = vmatpush.xpose.msk.msrb.mxu1 %vm794_vm0, %v620_v46  ;;  %13189 = vmatpush.xpose.msk.msrb.mxu3 %vm794_vm0, %v652_v48  ;;  %v668_v46 = vld [vmem:[%s17146_s29 + $0x6f1] sm:$0xff]  ;;  %v700_v48 = vld [vmem:[%s17146_s29 + $0x8a1] sm:$0xff] }
  0x82   : > { %13139 = vmatpush.xpose.msk.msrb.mxu0 %vm794_vm0, %v603_v49  ;;  %13173 = vmatpush.xpose.msk.msrb.mxu2 %vm794_vm0, %v635_v51  ;;  %v716_v49 = vld [vmem:[%s17146_s29 + $0x961] sm:$0xff] }
  0x83   : > { %13156 = vmatpush.xpose.msk.msrb.mxu1 %vm794_vm0, %v619_v50  ;;  %13190 = vmatpush.xpose.msk.msrb.mxu3 %vm794_vm0, %v651_v52  ;;  %v667_v50 = vld [vmem:[%s17146_s29 + $0x6e1] sm:$0xff]  ;;  %v699_v52 = vld [vmem:[%s17146_s29 + $0x891] sm:$0xff] }
  0x84   : > { %v683_v51 = vld [vmem:[%s17146_s29 + $0x7a1] sm:$0xff] }
  0x86   : > { %13140 = vmatpush.xpose.msk.msrb.mxu0 %vm794_vm0, %v602_v53  ;;  %13174 = vmatpush.xpose.msk.msrb.mxu2 %vm794_vm0, %v634_v55  ;;  %v715_v53 = vld [vmem:[%s17146_s29 + $0x951] sm:$0xff]  ;;  %v682_v55 = vld [vmem:[%s17146_s29 + $0x799] sm:$0xff] }
  0x87   : > { %13157 = vmatpush.xpose.msk.msrb.mxu1 %vm794_vm0, %v618_v54  ;;  %13191 = vmatpush.xpose.msk.msrb.mxu3 %vm794_vm0, %v650_v56  ;;  %v666_v54 = vld [vmem:[%s17146_s29 + $0x6d9] sm:$0xff]  ;;  %v698_v56 = vld [vmem:[%s17146_s29 + $0x889] sm:$0xff] }
  0x8a   : > { %13141 = vmatpush.xpose.msk.msrb.mxu0 %vm794_vm0, %v601_v57  ;;  %13175 = vmatpush.xpose.msk.msrb.mxu2 %vm794_vm0, %v633_v59  ;;  %v714_v57 = vld [vmem:[%s17146_s29 + $0x949] sm:$0xff] }
  0x8b   : > { %13158 = vmatpush.xpose.msk.msrb.mxu1 %vm794_vm0, %v617_v58  ;;  %13192 = vmatpush.xpose.msk.msrb.mxu3 %vm794_vm0, %v649_v60  ;;  %v665_v58 = vld [vmem:[%s17146_s29 + $0x6c9] sm:$0xff]  ;;  %v697_v60 = vld [vmem:[%s17146_s29 + $0x879] sm:$0xff] }
  0x8c   : > { %v681_v59 = vld [vmem:[%s17146_s29 + $0x789] sm:$0xff] }
  0x8e   : > { %13142 = vmatpush.xpose.msk.msrb.mxu0 %vm794_vm0, %v600_v61  ;;  %13176 = vmatpush.xpose.msk.msrb.mxu2 %vm794_vm0, %v632_v63  ;;  %v713_v61 = vld [vmem:[%s17146_s29 + $0x939] sm:$0xff]  ;;  %v680_v63 = vld [vmem:[%s17146_s29 + $0x781] sm:$0xff] }
  0x8f   : > { %13159 = vmatpush.xpose.msk.msrb.mxu1 %vm794_vm0, %v616_v62  ;;  %13193 = vmatpush.xpose.msk.msrb.mxu3 %vm794_vm0, %v648_v0  ;;  %v664_v62 = vld [vmem:[%s17146_s29 + $0x6c1] sm:$0xff]  ;;  %v696_v0 = vld [vmem:[%s17146_s29 + $0x871] sm:$0xff] }
  0x91   : > { %13143 = vmatmul.msk.f32.vlgmr.msrb.gmra.mxu0 %vm794_vm0, %v17345_v34  ;;  %13177 = vmatmul.msk.f32.vlgmr.msrb.gmra.mxu2 %vm794_vm0, %v17345_v34 }
  0x92   : > { %13195 = vmatpush.xpose.msk.msra.mxu0 %vm794_vm0, %v679_v1  ;;  %13229 = vmatpush.xpose.msk.msra.mxu2 %vm794_vm0, %v711_v3  ;;  %v712_v1 = vld [vmem:[%s17146_s29 + $0x931] sm:$0xff] }
  0x93   : > { %13212 = vmatpush.xpose.msk.msra.mxu1 %vm794_vm0, %v695_v2  ;;  %13246 = vmatpush.xpose.msk.msra.mxu3 %vm794_vm0, %v727_v4  ;;  %v743_v2 = vld [vmem:[%s17146_s29 + $0xad1] sm:$0xff]  ;;  %v775_v4 = vld [vmem:[%s17146_s29 + $0xc81] sm:$0xff] }
  0x94   : > { %13160 = vmatmul.msk.f32.vlgmr.msrb.gmra.mxu1 %vm794_vm0, %v17345_v34  ;;  %13194 = vmatmul.msk.f32.vlgmr.msrb.gmra.mxu3 %vm794_vm0, %v17345_v34  ;;  %v759_v3 = vld [vmem:[%s17146_s29 + $0xb91] sm:$0xff] }
  0x96   : > { %13196 = vmatpush.xpose.msk.msra.mxu0 %vm794_vm0, %v678_v5  ;;  %13230 = vmatpush.xpose.msk.msra.mxu2 %vm794_vm0, %v710_v7  ;;  %v791_v5 = vld [vmem:[%s17146_s29 + $0xd41] sm:$0xff]  ;;  %v758_v7 = vld [vmem:[%s17146_s29 + $0xb89] sm:$0xff] }
  0x97   : > { %13213 = vmatpush.xpose.msk.msra.mxu1 %vm794_vm0, %v694_v6  ;;  %13247 = vmatpush.xpose.msk.msra.mxu3 %vm794_vm0, %v726_v8  ;;  %v742_v6 = vld [vmem:[%s17146_s29 + $0xac9] sm:$0xff]  ;;  %v774_v8 = vld [vmem:[%s17146_s29 + $0xc79] sm:$0xff] }
  0x9a   : > { %13197 = vmatpush.xpose.msk.msra.mxu0 %vm794_vm0, %v677_v9  ;;  %13231 = vmatpush.xpose.msk.msra.mxu2 %vm794_vm0, %v709_v11  ;;  %v790_v9 = vld [vmem:[%s17146_s29 + $0xd39] sm:$0xff] }
  0x9b   : > { %13214 = vmatpush.xpose.msk.msra.mxu1 %vm794_vm0, %v693_v10  ;;  %13248 = vmatpush.xpose.msk.msra.mxu3 %vm794_vm0, %v725_v12  ;;  %v741_v10 = vld [vmem:[%s17146_s29 + $0xab9] sm:$0xff]  ;;  %v773_v12 = vld [vmem:[%s17146_s29 + $0xc69] sm:$0xff] }
  0x9c   : > { %v757_v11 = vld [vmem:[%s17146_s29 + $0xb79] sm:$0xff] }
  0x9e   : > { %13198 = vmatpush.xpose.msk.msra.mxu0 %vm794_vm0, %v676_v13  ;;  %13232 = vmatpush.xpose.msk.msra.mxu2 %vm794_vm0, %v708_v15  ;;  %v789_v13 = vld [vmem:[%s17146_s29 + $0xd29] sm:$0xff]  ;;  %v756_v15 = vld [vmem:[%s17146_s29 + $0xb71] sm:$0xff] }
  0x9f   : > { %13215 = vmatpush.xpose.msk.msra.mxu1 %vm794_vm0, %v692_v14  ;;  %13249 = vmatpush.xpose.msk.msra.mxu3 %vm794_vm0, %v724_v16  ;;  %v740_v14 = vld [vmem:[%s17146_s29 + $0xab1] sm:$0xff]  ;;  %v772_v16 = vld [vmem:[%s17146_s29 + $0xc61] sm:$0xff] }
  0xa2   : > { %13199 = vmatpush.xpose.msk.msra.mxu0 %vm794_vm0, %v675_v17  ;;  %13233 = vmatpush.xpose.msk.msra.mxu2 %vm794_vm0, %v707_v19  ;;  %v788_v17 = vld [vmem:[%s17146_s29 + $0xd21] sm:$0xff] }
  0xa3   : > { %13216 = vmatpush.xpose.msk.msra.mxu1 %vm794_vm0, %v691_v18  ;;  %13250 = vmatpush.xpose.msk.msra.mxu3 %vm794_vm0, %v723_v20  ;;  %v739_v18 = vld [vmem:[%s17146_s29 + $0xaa1] sm:$0xff]  ;;  %v771_v20 = vld [vmem:[%s17146_s29 + $0xc51] sm:$0xff] }
  0xa4   : > { %v755_v19 = vld [vmem:[%s17146_s29 + $0xb61] sm:$0xff] }
  0xa6   : > { %13200 = vmatpush.xpose.msk.msra.mxu0 %vm794_vm0, %v674_v21  ;;  %13234 = vmatpush.xpose.msk.msra.mxu2 %vm794_vm0, %v706_v23  ;;  %v787_v21 = vld [vmem:[%s17146_s29 + $0xd11] sm:$0xff]  ;;  %v754_v23 = vld [vmem:[%s17146_s29 + $0xb59] sm:$0xff] }
  0xa7   : > { %13217 = vmatpush.xpose.msk.msra.mxu1 %vm794_vm0, %v690_v22  ;;  %13251 = vmatpush.xpose.msk.msra.mxu3 %vm794_vm0, %v722_v24  ;;  %v738_v22 = vld [vmem:[%s17146_s29 + $0xa99] sm:$0xff]  ;;  %v770_v24 = vld [vmem:[%s17146_s29 + $0xc49] sm:$0xff] }
  0xaa   : > { %13201 = vmatpush.xpose.msk.msra.mxu0 %vm794_vm0, %v673_v25  ;;  %13235 = vmatpush.xpose.msk.msra.mxu2 %vm794_vm0, %v705_v27  ;;  %v786_v25 = vld [vmem:[%s17146_s29 + $0xd09] sm:$0xff] }
  0xab   : > { %13218 = vmatpush.xpose.msk.msra.mxu1 %vm794_vm0, %v689_v26  ;;  %13252 = vmatpush.xpose.msk.msra.mxu3 %vm794_vm0, %v721_v28  ;;  %v737_v26 = vld [vmem:[%s17146_s29 + $0xa89] sm:$0xff]  ;;  %v769_v28 = vld [vmem:[%s17146_s29 + $0xc39] sm:$0xff] }
  0xac   : > { %v753_v27 = vld [vmem:[%s17146_s29 + $0xb49] sm:$0xff] }
  0xae   : > { %13202 = vmatpush.xpose.msk.msra.mxu0 %vm794_vm0, %v672_v29  ;;  %13236 = vmatpush.xpose.msk.msra.mxu2 %vm794_vm0, %v704_v31  ;;  %v785_v29 = vld [vmem:[%s17146_s29 + $0xcf9] sm:$0xff]  ;;  %v752_v31 = vld [vmem:[%s17146_s29 + $0xb41] sm:$0xff] }
  0xaf   : > { %13219 = vmatpush.xpose.msk.msra.mxu1 %vm794_vm0, %v688_v30  ;;  %13253 = vmatpush.xpose.msk.msra.mxu3 %vm794_vm0, %v720_v32  ;;  %v736_v30 = vld [vmem:[%s17146_s29 + $0xa81] sm:$0xff]  ;;  %v768_v32 = vld [vmem:[%s17146_s29 + $0xc31] sm:$0xff] }
  0xb2   : > { %13203 = vmatpush.xpose.msk.msra.mxu0 %vm794_vm0, %v671_v33  ;;  %13237 = vmatpush.xpose.msk.msra.mxu2 %vm794_vm0, %v703_v36  ;;  %v784_v33 = vld [vmem:[%s17146_s29 + $0xcf1] sm:$0xff] }
  0xb3   : > { %13220 = vmatpush.xpose.msk.msra.mxu1 %vm794_vm0, %v687_v35  ;;  %13254 = vmatpush.xpose.msk.msra.mxu3 %vm794_vm0, %v719_v37  ;;  %v735_v35 = vld [vmem:[%s17146_s29 + $0xa71] sm:$0xff]  ;;  %v767_v37 = vld [vmem:[%s17146_s29 + $0xc21] sm:$0xff] }
  0xb4   : > { %v751_v36 = vld [vmem:[%s17146_s29 + $0xb31] sm:$0xff] }
  0xb6   : > { %13204 = vmatpush.xpose.msk.msra.mxu0 %vm794_vm0, %v670_v38  ;;  %13238 = vmatpush.xpose.msk.msra.mxu2 %vm794_vm0, %v702_v40  ;;  %v783_v38 = vld [vmem:[%s17146_s29 + $0xce1] sm:$0xff]  ;;  %v750_v40 = vld [vmem:[%s17146_s29 + $0xb29] sm:$0xff] }
  0xb7   : > { %13221 = vmatpush.xpose.msk.msra.mxu1 %vm794_vm0, %v686_v39  ;;  %13255 = vmatpush.xpose.msk.msra.mxu3 %vm794_vm0, %v718_v41  ;;  %v734_v39 = vld [vmem:[%s17146_s29 + $0xa69] sm:$0xff]  ;;  %v766_v41 = vld [vmem:[%s17146_s29 + $0xc19] sm:$0xff] }
  0xba   : > { %13205 = vmatpush.xpose.msk.msra.mxu0 %vm794_vm0, %v669_v42  ;;  %13239 = vmatpush.xpose.msk.msra.mxu2 %vm794_vm0, %v701_v44  ;;  %v782_v42 = vld [vmem:[%s17146_s29 + $0xcd9] sm:$0xff] }
  0xbb   : > { %13222 = vmatpush.xpose.msk.msra.mxu1 %vm794_vm0, %v685_v43  ;;  %13256 = vmatpush.xpose.msk.msra.mxu3 %vm794_vm0, %v717_v45  ;;  %v733_v43 = vld [vmem:[%s17146_s29 + $0xa59] sm:$0xff]  ;;  %v765_v45 = vld [vmem:[%s17146_s29 + $0xc09] sm:$0xff] }
  0xbc   : > { %v749_v44 = vld [vmem:[%s17146_s29 + $0xb19] sm:$0xff] }
  0xbe   : > { %13206 = vmatpush.xpose.msk.msra.mxu0 %vm794_vm0, %v668_v46  ;;  %13240 = vmatpush.xpose.msk.msra.mxu2 %vm794_vm0, %v700_v48  ;;  %v781_v46 = vld [vmem:[%s17146_s29 + $0xcc9] sm:$0xff]  ;;  %v748_v48 = vld [vmem:[%s17146_s29 + $0xb11] sm:$0xff] }
  0xbf   : > { %13223 = vmatpush.xpose.msk.msra.mxu1 %vm794_vm0, %v684_v47  ;;  %13257 = vmatpush.xpose.msk.msra.mxu3 %vm794_vm0, %v716_v49  ;;  %v732_v47 = vld [vmem:[%s17146_s29 + $0xa51] sm:$0xff]  ;;  %v764_v49 = vld [vmem:[%s17146_s29 + $0xc01] sm:$0xff] }
  0xc2   : > { %13207 = vmatpush.xpose.msk.msra.mxu0 %vm794_vm0, %v667_v50  ;;  %13241 = vmatpush.xpose.msk.msra.mxu2 %vm794_vm0, %v699_v52  ;;  %v780_v50 = vld [vmem:[%s17146_s29 + $0xcc1] sm:$0xff] }
  0xc3   : > { %13224 = vmatpush.xpose.msk.msra.mxu1 %vm794_vm0, %v683_v51  ;;  %13258 = vmatpush.xpose.msk.msra.mxu3 %vm794_vm0, %v715_v53  ;;  %v731_v51 = vld [vmem:[%s17146_s29 + $0xa41] sm:$0xff]  ;;  %v763_v53 = vld [vmem:[%s17146_s29 + $0xbf1] sm:$0xff] }
  0xc4   : > { %v747_v52 = vld [vmem:[%s17146_s29 + $0xb01] sm:$0xff] }
  0xc6   : > { %13208 = vmatpush.xpose.msk.msra.mxu0 %vm794_vm0, %v666_v54  ;;  %13242 = vmatpush.xpose.msk.msra.mxu2 %vm794_vm0, %v698_v56  ;;  %v779_v54 = vld [vmem:[%s17146_s29 + $0xcb1] sm:$0xff]  ;;  %v746_v56 = vld [vmem:[%s17146_s29 + $0xaf9] sm:$0xff] }
  0xc7   : > { %13225 = vmatpush.xpose.msk.msra.mxu1 %vm794_vm0, %v682_v55  ;;  %13259 = vmatpush.xpose.msk.msra.mxu3 %vm794_vm0, %v714_v57  ;;  %v730_v55 = vld [vmem:[%s17146_s29 + $0xa39] sm:$0xff]  ;;  %v762_v57 = vld [vmem:[%s17146_s29 + $0xbe9] sm:$0xff] }
  0xca   : > { %13209 = vmatpush.xpose.msk.msra.mxu0 %vm794_vm0, %v665_v58  ;;  %13243 = vmatpush.xpose.msk.msra.mxu2 %vm794_vm0, %v697_v60  ;;  %v778_v58 = vld [vmem:[%s17146_s29 + $0xca9] sm:$0xff] }
  0xcb   : > { %13226 = vmatpush.xpose.msk.msra.mxu1 %vm794_vm0, %v681_v59  ;;  %13260 = vmatpush.xpose.msk.msra.mxu3 %vm794_vm0, %v713_v61  ;;  %v729_v59 = vld [vmem:[%s17146_s29 + $0xa29] sm:$0xff]  ;;  %v761_v61 = vld [vmem:[%s17146_s29 + $0xbd9] sm:$0xff] }
  0xcc   : > { %v745_v60 = vld [vmem:[%s17146_s29 + $0xae9] sm:$0xff] }
  0xce   : > { %13210 = vmatpush.xpose.msk.msra.mxu0 %vm794_vm0, %v664_v62  ;;  %13244 = vmatpush.xpose.msk.msra.mxu2 %vm794_vm0, %v696_v0  ;;  %v777_v62 = vld [vmem:[%s17146_s29 + $0xc99] sm:$0xff]  ;;  %v744_v0 = vld [vmem:[%s17146_s29 + $0xae1] sm:$0xff] }
  0xcf   : > { %13227 = vmatpush.xpose.msk.msra.mxu1 %vm794_vm0, %v680_v63  ;;  %13261 = vmatpush.xpose.msk.msra.mxu3 %vm794_vm0, %v712_v1  ;;  %v728_v63 = vld [vmem:[%s17146_s29 + $0xa21] sm:$0xff]  ;;  %v760_v1 = vld [vmem:[%s17146_s29 + $0xbd1] sm:$0xff] }
  0xd1   : > { %13211 = vmatmul.msk.f32.vlgmr.msra.gmra.mxu0 %vm794_vm0, %v17345_v34  ;;  %13245 = vmatmul.msk.f32.vlgmr.msra.gmra.mxu2 %vm794_vm0, %v17345_v34 }
  0xd2   : > { %13263 = vmatpush.xpose.msk.msrb.mxu0 %vm794_vm0, %v743_v2  ;;  %13297 = vmatpush.xpose.msk.msrb.mxu2 %vm794_vm0, %v775_v4  ;;  %v776_v2 = vld [vmem:[%s17146_s29 + $0xc91] sm:$0xff] }
  0xd3   : > { %13280 = vmatpush.xpose.msk.msrb.mxu1 %vm794_vm0, %v759_v3  ;;  %13314 = vmatpush.xpose.msk.msrb.mxu3 %vm794_vm0, %v791_v5  ;;  %v294_v3 = vld [vmem:[%s17146_s29 + $0xb0] sm:$0xff]  ;;  %v326_v5 = vld [vmem:[%s17146_s29 + $0x260] sm:$0xff] }
  0xd4   : > { %13228 = vmatmul.msk.f32.vlgmr.msra.gmra.mxu1 %vm794_vm0, %v17345_v34  ;;  %13262 = vmatmul.msk.f32.vlgmr.msra.gmra.mxu3 %vm794_vm0, %v17345_v34  ;;  %v310_v4 = vld [vmem:[%s17146_s29 + $0x170] sm:$0xff] }
  0xd6   : > { %13264 = vmatpush.xpose.msk.msrb.mxu0 %vm794_vm0, %v742_v6  ;;  %13298 = vmatpush.xpose.msk.msrb.mxu2 %vm794_vm0, %v774_v8  ;;  %v342_v6 = vld [vmem:[%s17146_s29 + $0x320] sm:$0xff]  ;;  %v309_v8 = vld [vmem:[%s17146_s29 + $0x168] sm:$0xff] }
  0xd7   : > { %13281 = vmatpush.xpose.msk.msrb.mxu1 %vm794_vm0, %v758_v7  ;;  %13315 = vmatpush.xpose.msk.msrb.mxu3 %vm794_vm0, %v790_v9  ;;  %v293_v7 = vld [vmem:[%s17146_s29 + $0xa8] sm:$0xff]  ;;  %v325_v9 = vld [vmem:[%s17146_s29 + $0x258] sm:$0xff] }
  0xda   : > { %13265 = vmatpush.xpose.msk.msrb.mxu0 %vm794_vm0, %v741_v10  ;;  %13299 = vmatpush.xpose.msk.msrb.mxu2 %vm794_vm0, %v773_v12  ;;  %v341_v10 = vld [vmem:[%s17146_s29 + $0x318] sm:$0xff] }
  0xdb   : > { %13282 = vmatpush.xpose.msk.msrb.mxu1 %vm794_vm0, %v757_v11  ;;  %13316 = vmatpush.xpose.msk.msrb.mxu3 %vm794_vm0, %v789_v13  ;;  %v292_v11 = vld [vmem:[%s17146_s29 + $0x98] sm:$0xff]  ;;  %v324_v13 = vld [vmem:[%s17146_s29 + $0x248] sm:$0xff] }
  0xdc   : > { %v308_v12 = vld [vmem:[%s17146_s29 + $0x158] sm:$0xff] }
  0xde   : > { %13266 = vmatpush.xpose.msk.msrb.mxu0 %vm794_vm0, %v740_v14  ;;  %13300 = vmatpush.xpose.msk.msrb.mxu2 %vm794_vm0, %v772_v16  ;;  %v340_v14 = vld [vmem:[%s17146_s29 + $0x308] sm:$0xff]  ;;  %v323_v16 = vld [vmem:[%s17146_s29 + $0x240] sm:$0xff] }
  0xdf   : > { %13283 = vmatpush.xpose.msk.msrb.mxu1 %vm794_vm0, %v756_v15  ;;  %13317 = vmatpush.xpose.msk.msrb.mxu3 %vm794_vm0, %v788_v17  ;;  %v307_v15 = vld [vmem:[%s17146_s29 + $0x150] sm:$0xff]  ;;  %v339_v17 = vld [vmem:[%s17146_s29 + $0x300] sm:$0xff] }
  0xe2   : > { %13267 = vmatpush.xpose.msk.msrb.mxu0 %vm794_vm0, %v739_v18  ;;  %13301 = vmatpush.xpose.msk.msrb.mxu2 %vm794_vm0, %v771_v20  ;;  %v290_v18 = vld [vmem:[%s17146_s29 + $0x80] sm:$0xff]  ;;  %v322_v20 = vld [vmem:[%s17146_s29 + $0x230] sm:$0xff] }
  0xe3   : > { %13284 = vmatpush.xpose.msk.msrb.mxu1 %vm794_vm0, %v755_v19  ;;  %13318 = vmatpush.xpose.msk.msrb.mxu3 %vm794_vm0, %v787_v21  ;;  %v306_v19 = vld [vmem:[%s17146_s29 + $0x140] sm:$0xff]  ;;  %v338_v21 = vld [vmem:[%s17146_s29 + $0x2f0] sm:$0xff] }
  0xe6   : > { %13268 = vmatpush.xpose.msk.msrb.mxu0 %vm794_vm0, %v738_v22  ;;  %13302 = vmatpush.xpose.msk.msrb.mxu2 %vm794_vm0, %v770_v24  ;;  %v289_v22 = vld [vmem:[%s17146_s29 + $0x78] sm:$0xff]  ;;  %v321_v24 = vld [vmem:[%s17146_s29 + $0x228] sm:$0xff] }
  0xe7   : > { %13285 = vmatpush.xpose.msk.msrb.mxu1 %vm794_vm0, %v754_v23  ;;  %13319 = vmatpush.xpose.msk.msrb.mxu3 %vm794_vm0, %v786_v25  ;;  %v305_v23 = vld [vmem:[%s17146_s29 + $0x138] sm:$0xff]  ;;  %v337_v25 = vld [vmem:[%s17146_s29 + $0x2e8] sm:$0xff] }
  0xea   : > { %13269 = vmatpush.xpose.msk.msrb.mxu0 %vm794_vm0, %v737_v26  ;;  %13303 = vmatpush.xpose.msk.msrb.mxu2 %vm794_vm0, %v769_v28  ;;  %v288_v26 = vld [vmem:[%s17146_s29 + $0x68] sm:$0xff]  ;;  %v320_v28 = vld [vmem:[%s17146_s29 + $0x218] sm:$0xff] }
  0xeb   : > { %13286 = vmatpush.xpose.msk.msrb.mxu1 %vm794_vm0, %v753_v27  ;;  %13320 = vmatpush.xpose.msk.msrb.mxu3 %vm794_vm0, %v785_v29  ;;  %v304_v27 = vld [vmem:[%s17146_s29 + $0x128] sm:$0xff]  ;;  %v336_v29 = vld [vmem:[%s17146_s29 + $0x2d8] sm:$0xff] }
  0xee   : > { %13270 = vmatpush.xpose.msk.msrb.mxu0 %vm794_vm0, %v736_v30  ;;  %13304 = vmatpush.xpose.msk.msrb.mxu2 %vm794_vm0, %v768_v32  ;;  %v287_v30 = vld [vmem:[%s17146_s29 + $0x60] sm:$0xff]  ;;  %v319_v32 = vld [vmem:[%s17146_s29 + $0x210] sm:$0xff] }
  0xef   : > { %13287 = vmatpush.xpose.msk.msrb.mxu1 %vm794_vm0, %v752_v31  ;;  %13321 = vmatpush.xpose.msk.msrb.mxu3 %vm794_vm0, %v784_v33  ;;  %v303_v31 = vld [vmem:[%s17146_s29 + $0x120] sm:$0xff]  ;;  %v335_v33 = vld [vmem:[%s17146_s29 + $0x2d0] sm:$0xff] }
  0xf2   : > { %13271 = vmatpush.xpose.msk.msrb.mxu0 %vm794_vm0, %v735_v35  ;;  %13305 = vmatpush.xpose.msk.msrb.mxu2 %vm794_vm0, %v767_v37  ;;  %v286_v35 = vld [vmem:[%s17146_s29 + $0x50] sm:$0xff]  ;;  %v318_v37 = vld [vmem:[%s17146_s29 + $0x200] sm:$0xff] }
  0xf3   : > { %13288 = vmatpush.xpose.msk.msrb.mxu1 %vm794_vm0, %v751_v36  ;;  %13322 = vmatpush.xpose.msk.msrb.mxu3 %vm794_vm0, %v783_v38  ;;  %v302_v36 = vld [vmem:[%s17146_s29 + $0x110] sm:$0xff]  ;;  %v334_v38 = vld [vmem:[%s17146_s29 + $0x2c0] sm:$0xff] }
  0xf6   : > { %13272 = vmatpush.xpose.msk.msrb.mxu0 %vm794_vm0, %v734_v39  ;;  %13306 = vmatpush.xpose.msk.msrb.mxu2 %vm794_vm0, %v766_v41  ;;  %v285_v39 = vld [vmem:[%s17146_s29 + $0x48] sm:$0xff]  ;;  %v317_v41 = vld [vmem:[%s17146_s29 + $0x1f8] sm:$0xff] }
  0xf7   : > { %13289 = vmatpush.xpose.msk.msrb.mxu1 %vm794_vm0, %v750_v40  ;;  %13323 = vmatpush.xpose.msk.msrb.mxu3 %vm794_vm0, %v782_v42  ;;  %v301_v40 = vld [vmem:[%s17146_s29 + $0x108] sm:$0xff]  ;;  %v333_v42 = vld [vmem:[%s17146_s29 + $0x2b8] sm:$0xff] }
  0xfa   : > { %13273 = vmatpush.xpose.msk.msrb.mxu0 %vm794_vm0, %v733_v43  ;;  %13307 = vmatpush.xpose.msk.msrb.mxu2 %vm794_vm0, %v765_v45  ;;  %v284_v43 = vld [vmem:[%s17146_s29 + $0x38] sm:$0xff]  ;;  %v316_v45 = vld [vmem:[%s17146_s29 + $0x1e8] sm:$0xff] }
  0xfb   : > { %13290 = vmatpush.xpose.msk.msrb.mxu1 %vm794_vm0, %v749_v44  ;;  %13324 = vmatpush.xpose.msk.msrb.mxu3 %vm794_vm0, %v781_v46  ;;  %v300_v44 = vld [vmem:[%s17146_s29 + $0xf8] sm:$0xff]  ;;  %v332_v46 = vld [vmem:[%s17146_s29 + $0x2a8] sm:$0xff] }
  0xfe   : > { %13274 = vmatpush.xpose.msk.msrb.mxu0 %vm794_vm0, %v732_v47  ;;  %13308 = vmatpush.xpose.msk.msrb.mxu2 %vm794_vm0, %v764_v49  ;;  %v283_v47 = vld [vmem:[%s17146_s29 + $0x30] sm:$0xff]  ;;  %v315_v49 = vld [vmem:[%s17146_s29 + $0x1e0] sm:$0xff] }
  0xff   : > { %13291 = vmatpush.xpose.msk.msrb.mxu1 %vm794_vm0, %v748_v48  ;;  %13325 = vmatpush.xpose.msk.msrb.mxu3 %vm794_vm0, %v780_v50  ;;  %v299_v48 = vld [vmem:[%s17146_s29 + $0xf0] sm:$0xff]  ;;  %v331_v50 = vld [vmem:[%s17146_s29 + $0x2a0] sm:$0xff] }
 0x102   : > { %13275 = vmatpush.xpose.msk.msrb.mxu0 %vm794_vm0, %v731_v51  ;;  %13309 = vmatpush.xpose.msk.msrb.mxu2 %vm794_vm0, %v763_v53  ;;  %v282_v51 = vld [vmem:[%s17146_s29 + $0x20] sm:$0xff]  ;;  %v314_v53 = vld [vmem:[%s17146_s29 + $0x1d0] sm:$0xff] }
 0x103   : > { %13292 = vmatpush.xpose.msk.msrb.mxu1 %vm794_vm0, %v747_v52  ;;  %13326 = vmatpush.xpose.msk.msrb.mxu3 %vm794_vm0, %v779_v54  ;;  %v298_v52 = vld [vmem:[%s17146_s29 + $0xe0] sm:$0xff]  ;;  %v330_v54 = vld [vmem:[%s17146_s29 + $0x290] sm:$0xff] }
 0x106   : > { %13276 = vmatpush.xpose.msk.msrb.mxu0 %vm794_vm0, %v730_v55  ;;  %13310 = vmatpush.xpose.msk.msrb.mxu2 %vm794_vm0, %v762_v57  ;;  %v281_v55 = vld [vmem:[%s17146_s29 + $0x18] sm:$0xff]  ;;  %v313_v57 = vld [vmem:[%s17146_s29 + $0x1c8] sm:$0xff] }
 0x107   : > { %13293 = vmatpush.xpose.msk.msrb.mxu1 %vm794_vm0, %v746_v56  ;;  %13327 = vmatpush.xpose.msk.msrb.mxu3 %vm794_vm0, %v778_v58  ;;  %v297_v56 = vld [vmem:[%s17146_s29 + $0xd8] sm:$0xff]  ;;  %v329_v58 = vld [vmem:[%s17146_s29 + $0x288] sm:$0xff] }
 0x10a   : > { %13277 = vmatpush.xpose.msk.msrb.mxu0 %vm794_vm0, %v729_v59  ;;  %13311 = vmatpush.xpose.msk.msrb.mxu2 %vm794_vm0, %v761_v61  ;;  %v280_v59 = vld [vmem:[%s17146_s29 + $0x8] sm:$0xff]  ;;  %v312_v61 = vld [vmem:[%s17146_s29 + $0x1b8] sm:$0xff] }
 0x10b   : > { %13294 = vmatpush.xpose.msk.msrb.mxu1 %vm794_vm0, %v745_v60  ;;  %13328 = vmatpush.xpose.msk.msrb.mxu3 %vm794_vm0, %v777_v62  ;;  %v296_v60 = vld [vmem:[%s17146_s29 + $0xc8] sm:$0xff]  ;;  %v328_v62 = vld [vmem:[%s17146_s29 + $0x278] sm:$0xff] }
 0x10e   : > { %13278 = vmatpush.xpose.msk.msrb.mxu0 %vm794_vm0, %v728_v63  ;;  %13312 = vmatpush.xpose.msk.msrb.mxu2 %vm794_vm0, %v760_v1  ;;  %v279_v63 = vld [vmem:[%s17146_s29] sm:$0xff]  ;;  %v311_v1 = vld [vmem:[%s17146_s29 + $0x1b0] sm:$0xff] }
 0x10f   : > { %13295 = vmatpush.xpose.msk.msrb.mxu1 %vm794_vm0, %v744_v0  ;;  %13329 = vmatpush.xpose.msk.msrb.mxu3 %vm794_vm0, %v776_v2  ;;  %v295_v0 = vld [vmem:[%s17146_s29 + $0xc0] sm:$0xff]  ;;  %v327_v2 = vld [vmem:[%s17146_s29 + $0x270] sm:$0xff] }
 0x111   : > { %13279 = vmatmul.msk.f32.vlgmr.msrb.gmra.mxu0 %vm794_vm0, %v17345_v34  ;;  %13313 = vmatmul.msk.f32.vlgmr.msrb.gmra.mxu2 %vm794_vm0, %v17345_v34 }
 0x112   : > { %13331 = vmatpush.xpose.msk.msra.mxu0 %vm794_vm0, %v294_v3  ;;  %13365 = vmatpush.xpose.msk.msra.mxu2 %vm794_vm0, %v326_v5  ;;  %v358_v3 = vld [vmem:[%s17146_s29 + $0x410] sm:$0xff]  ;;  %v390_v5 = vld [vmem:[%s17146_s29 + $0x5c0] sm:$0xff] }
 0x113   : > { %13348 = vmatpush.xpose.msk.msra.mxu1 %vm794_vm0, %v310_v4  ;;  %13382 = vmatpush.xpose.msk.msra.mxu3 %vm794_vm0, %v342_v6  ;;  %v374_v4 = vld [vmem:[%s17146_s29 + $0x4d0] sm:$0xff]  ;;  %v406_v6 = vld [vmem:[%s17146_s29 + $0x680] sm:$0xff] }
 0x114   : > { %13296 = vmatmul.msk.f32.vlgmr.msrb.gmra.mxu1 %vm794_vm0, %v17345_v34  ;;  %13330 = vmatmul.msk.f32.vlgmr.msrb.gmra.mxu3 %vm794_vm0, %v17345_v34  ;;  %v291_v34 = vld [vmem:[%s17146_s29 + $0x90] sm:$0xff] }
 0x116   : > { %13332 = vmatpush.xpose.msk.msra.mxu0 %vm794_vm0, %v293_v7  ;;  %13366 = vmatpush.xpose.msk.msra.mxu2 %vm794_vm0, %v325_v9  ;;  %v17832_v7 = vld [vmem:[%s22602_s1] sm:$0xff]  ;;  %v373_v9 = vld [vmem:[%s17146_s29 + $0x4c8] sm:$0xff] }
 0x117   : > { %13349 = vmatpush.xpose.msk.msra.mxu1 %vm794_vm0, %v309_v8  ;;  %13383 = vmatpush.xpose.msk.msra.mxu3 %vm794_vm0, %v341_v10  ;;  %v357_v8 = vld [vmem:[%s17146_s29 + $0x408] sm:$0xff]  ;;  %v389_v10 = vld [vmem:[%s17146_s29 + $0x5b8] sm:$0xff] }
 0x11a   : > { %13333 = vmatpush.xpose.msk.msra.mxu0 %vm794_vm0, %v292_v11  ;;  %13367 = vmatpush.xpose.msk.msra.mxu2 %vm794_vm0, %v324_v13  ;;  %v405_v11 = vld [vmem:[%s17146_s29 + $0x678] sm:$0xff] }
 0x11b   : > { %13350 = vmatpush.xpose.msk.msra.mxu1 %vm794_vm0, %v308_v12  ;;  %13384 = vmatpush.xpose.msk.msra.mxu3 %vm794_vm0, %v340_v14  ;;  %v356_v12 = vld [vmem:[%s17146_s29 + $0x3f8] sm:$0xff]  ;;  %v388_v14 = vld [vmem:[%s17146_s29 + $0x5a8] sm:$0xff] }
 0x11c   : > { %v372_v13 = vld [vmem:[%s17146_s29 + $0x4b8] sm:$0xff] }
 0x11e   : > { %13334 = vmatpush.xpose.msk.msra.mxu0 %vm794_vm0, %v291_v34  ;;  %13368 = vmatpush.xpose.msk.msra.mxu2 %vm794_vm0, %v323_v16  ;;  %v404_v34 = vld [vmem:[%s17146_s29 + $0x668] sm:$0xff]  ;;  %v371_v16 = vld [vmem:[%s17146_s29 + $0x4b0] sm:$0xff] }
 0x11f   : > { %13351 = vmatpush.xpose.msk.msra.mxu1 %vm794_vm0, %v307_v15  ;;  %13385 = vmatpush.xpose.msk.msra.mxu3 %vm794_vm0, %v339_v17  ;;  %v355_v15 = vld [vmem:[%s17146_s29 + $0x3f0] sm:$0xff]  ;;  %v387_v17 = vld [vmem:[%s17146_s29 + $0x5a0] sm:$0xff] }
 0x122   : > { %13335 = vmatpush.xpose.msk.msra.mxu0 %vm794_vm0, %v290_v18  ;;  %13369 = vmatpush.xpose.msk.msra.mxu2 %vm794_vm0, %v322_v20  ;;  %v403_v18 = vld [vmem:[%s17146_s29 + $0x660] sm:$0xff] }
 0x123   : > { %13352 = vmatpush.xpose.msk.msra.mxu1 %vm794_vm0, %v306_v19  ;;  %13386 = vmatpush.xpose.msk.msra.mxu3 %vm794_vm0, %v338_v21  ;;  %v354_v19 = vld [vmem:[%s17146_s29 + $0x3e0] sm:$0xff]  ;;  %v386_v21 = vld [vmem:[%s17146_s29 + $0x590] sm:$0xff] }
 0x124   : > { %v370_v20 = vld [vmem:[%s17146_s29 + $0x4a0] sm:$0xff] }
 0x126   : > { %13336 = vmatpush.xpose.msk.msra.mxu0 %vm794_vm0, %v289_v22  ;;  %13370 = vmatpush.xpose.msk.msra.mxu2 %vm794_vm0, %v321_v24  ;;  %v402_v22 = vld [vmem:[%s17146_s29 + $0x650] sm:$0xff]  ;;  %v369_v24 = vld [vmem:[%s17146_s29 + $0x498] sm:$0xff] }
 0x127   : > { %13353 = vmatpush.xpose.msk.msra.mxu1 %vm794_vm0, %v305_v23  ;;  %13387 = vmatpush.xpose.msk.msra.mxu3 %vm794_vm0, %v337_v25  ;;  %v353_v23 = vld [vmem:[%s17146_s29 + $0x3d8] sm:$0xff]  ;;  %v385_v25 = vld [vmem:[%s17146_s29 + $0x588] sm:$0xff] }
 0x12a   : > { %13337 = vmatpush.xpose.msk.msra.mxu0 %vm794_vm0, %v288_v26  ;;  %13371 = vmatpush.xpose.msk.msra.mxu2 %vm794_vm0, %v320_v28  ;;  %v401_v26 = vld [vmem:[%s17146_s29 + $0x648] sm:$0xff] }
 0x12b   : > { %13354 = vmatpush.xpose.msk.msra.mxu1 %vm794_vm0, %v304_v27  ;;  %13388 = vmatpush.xpose.msk.msra.mxu3 %vm794_vm0, %v336_v29  ;;  %v352_v27 = vld [vmem:[%s17146_s29 + $0x3c8] sm:$0xff]  ;;  %v384_v29 = vld [vmem:[%s17146_s29 + $0x578] sm:$0xff] }
 0x12c   : > { %v368_v28 = vld [vmem:[%s17146_s29 + $0x488] sm:$0xff] }
 0x12e   : > { %13338 = vmatpush.xpose.msk.msra.mxu0 %vm794_vm0, %v287_v30  ;;  %13372 = vmatpush.xpose.msk.msra.mxu2 %vm794_vm0, %v319_v32  ;;  %v400_v30 = vld [vmem:[%s17146_s29 + $0x638] sm:$0xff]  ;;  %v367_v32 = vld [vmem:[%s17146_s29 + $0x480] sm:$0xff] }
 0x12f   : > { %13355 = vmatpush.xpose.msk.msra.mxu1 %vm794_vm0, %v303_v31  ;;  %13389 = vmatpush.xpose.msk.msra.mxu3 %vm794_vm0, %v335_v33  ;;  %v351_v31 = vld [vmem:[%s17146_s29 + $0x3c0] sm:$0xff]  ;;  %v383_v33 = vld [vmem:[%s17146_s29 + $0x570] sm:$0xff] }
 0x132   : > { %13339 = vmatpush.xpose.msk.msra.mxu0 %vm794_vm0, %v286_v35  ;;  %13373 = vmatpush.xpose.msk.msra.mxu2 %vm794_vm0, %v318_v37  ;;  %v399_v35 = vld [vmem:[%s17146_s29 + $0x630] sm:$0xff] }
 0x133   : > { %13356 = vmatpush.xpose.msk.msra.mxu1 %vm794_vm0, %v302_v36  ;;  %13390 = vmatpush.xpose.msk.msra.mxu3 %vm794_vm0, %v334_v38  ;;  %v350_v36 = vld [vmem:[%s17146_s29 + $0x3b0] sm:$0xff]  ;;  %v382_v38 = vld [vmem:[%s17146_s29 + $0x560] sm:$0xff] }
 0x134   : > { %v366_v37 = vld [vmem:[%s17146_s29 + $0x470] sm:$0xff] }
 0x136   : > { %13340 = vmatpush.xpose.msk.msra.mxu0 %vm794_vm0, %v285_v39  ;;  %13374 = vmatpush.xpose.msk.msra.mxu2 %vm794_vm0, %v317_v41  ;;  %v398_v39 = vld [vmem:[%s17146_s29 + $0x620] sm:$0xff]  ;;  %v365_v41 = vld [vmem:[%s17146_s29 + $0x468] sm:$0xff] }
 0x137   : > { %13357 = vmatpush.xpose.msk.msra.mxu1 %vm794_vm0, %v301_v40  ;;  %13391 = vmatpush.xpose.msk.msra.mxu3 %vm794_vm0, %v333_v42  ;;  %v349_v40 = vld [vmem:[%s17146_s29 + $0x3a8] sm:$0xff]  ;;  %v381_v42 = vld [vmem:[%s17146_s29 + $0x558] sm:$0xff] }
 0x13a   : > { %13341 = vmatpush.xpose.msk.msra.mxu0 %vm794_vm0, %v284_v43  ;;  %13375 = vmatpush.xpose.msk.msra.mxu2 %vm794_vm0, %v316_v45  ;;  %v397_v43 = vld [vmem:[%s17146_s29 + $0x618] sm:$0xff] }
 0x13b   : > { %13358 = vmatpush.xpose.msk.msra.mxu1 %vm794_vm0, %v300_v44  ;;  %13392 = vmatpush.xpose.msk.msra.mxu3 %vm794_vm0, %v332_v46  ;;  %v348_v44 = vld [vmem:[%s17146_s29 + $0x398] sm:$0xff]  ;;  %v380_v46 = vld [vmem:[%s17146_s29 + $0x548] sm:$0xff] }
 0x13c   : > { %v364_v45 = vld [vmem:[%s17146_s29 + $0x458] sm:$0xff] }
 0x13e   : > { %13342 = vmatpush.xpose.msk.msra.mxu0 %vm794_vm0, %v283_v47  ;;  %13376 = vmatpush.xpose.msk.msra.mxu2 %vm794_vm0, %v315_v49  ;;  %v396_v47 = vld [vmem:[%s17146_s29 + $0x608] sm:$0xff]  ;;  %v363_v49 = vld [vmem:[%s17146_s29 + $0x450] sm:$0xff] }
 0x13f   : > { %13359 = vmatpush.xpose.msk.msra.mxu1 %vm794_vm0, %v299_v48  ;;  %13393 = vmatpush.xpose.msk.msra.mxu3 %vm794_vm0, %v331_v50  ;;  %v347_v48 = vld [vmem:[%s17146_s29 + $0x390] sm:$0xff]  ;;  %v379_v50 = vld [vmem:[%s17146_s29 + $0x540] sm:$0xff] }
 0x142   : > { %13343 = vmatpush.xpose.msk.msra.mxu0 %vm794_vm0, %v282_v51  ;;  %13377 = vmatpush.xpose.msk.msra.mxu2 %vm794_vm0, %v314_v53  ;;  %v395_v51 = vld [vmem:[%s17146_s29 + $0x600] sm:$0xff] }
 0x143   : > { %13360 = vmatpush.xpose.msk.msra.mxu1 %vm794_vm0, %v298_v52  ;;  %13394 = vmatpush.xpose.msk.msra.mxu3 %vm794_vm0, %v330_v54  ;;  %v346_v52 = vld [vmem:[%s17146_s29 + $0x380] sm:$0xff]  ;;  %v378_v54 = vld [vmem:[%s17146_s29 + $0x530] sm:$0xff] }
 0x144   : > { %v362_v53 = vld [vmem:[%s17146_s29 + $0x440] sm:$0xff] }
 0x146   : > { %13344 = vmatpush.xpose.msk.msra.mxu0 %vm794_vm0, %v281_v55  ;;  %13378 = vmatpush.xpose.msk.msra.mxu2 %vm794_vm0, %v313_v57  ;;  %v394_v55 = vld [vmem:[%s17146_s29 + $0x5f0] sm:$0xff]  ;;  %v361_v57 = vld [vmem:[%s17146_s29 + $0x438] sm:$0xff] }
 0x147   : > { %13361 = vmatpush.xpose.msk.msra.mxu1 %vm794_vm0, %v297_v56  ;;  %13395 = vmatpush.xpose.msk.msra.mxu3 %vm794_vm0, %v329_v58  ;;  %v345_v56 = vld [vmem:[%s17146_s29 + $0x378] sm:$0xff]  ;;  %v377_v58 = vld [vmem:[%s17146_s29 + $0x528] sm:$0xff] }
 0x14a   : > { %13345 = vmatpush.xpose.msk.msra.mxu0 %vm794_vm0, %v280_v59  ;;  %13379 = vmatpush.xpose.msk.msra.mxu2 %vm794_vm0, %v312_v61  ;;  %v393_v59 = vld [vmem:[%s17146_s29 + $0x5e8] sm:$0xff] }
 0x14b   : > { %13362 = vmatpush.xpose.msk.msra.mxu1 %vm794_vm0, %v296_v60  ;;  %13396 = vmatpush.xpose.msk.msra.mxu3 %vm794_vm0, %v328_v62  ;;  %v344_v60 = vld [vmem:[%s17146_s29 + $0x368] sm:$0xff]  ;;  %v376_v62 = vld [vmem:[%s17146_s29 + $0x518] sm:$0xff] }
 0x14c   : > { %v360_v61 = vld [vmem:[%s17146_s29 + $0x428] sm:$0xff] }
 0x14e   : > { %13346 = vmatpush.xpose.msk.msra.mxu0 %vm794_vm0, %v279_v63  ;;  %13380 = vmatpush.xpose.msk.msra.mxu2 %vm794_vm0, %v311_v1  ;;  %v392_v63 = vld [vmem:[%s17146_s29 + $0x5d8] sm:$0xff]  ;;  %v359_v1 = vld [vmem:[%s17146_s29 + $0x420] sm:$0xff] }
 0x14f   : > { %13363 = vmatpush.xpose.msk.msra.mxu1 %vm794_vm0, %v295_v0  ;;  %13397 = vmatpush.xpose.msk.msra.mxu3 %vm794_vm0, %v327_v2  ;;  %v343_v0 = vld [vmem:[%s17146_s29 + $0x360] sm:$0xff]  ;;  %v375_v2 = vld [vmem:[%s17146_s29 + $0x510] sm:$0xff] }
 0x151   : > { %13347 = vmatmul.msk.f32.vlgmr.msra.gmra.mxu0 %vm794_vm0, %v17832_v7  ;;  %13381 = vmatmul.msk.f32.vlgmr.msra.gmra.mxu2 %vm794_vm0, %v17832_v7 }
 0x152   : > { %13399 = vmatpush.xpose.msk.msrb.mxu0 %vm794_vm0, %v358_v3  ;;  %13433 = vmatpush.xpose.msk.msrb.mxu2 %vm794_vm0, %v390_v5  ;;  %v391_v3 = vld [vmem:[%s17146_s29 + $0x5d0] sm:$0xff] }
 0x153   : > { %13416 = vmatpush.xpose.msk.msrb.mxu1 %vm794_vm0, %v374_v4  ;;  %13450 = vmatpush.xpose.msk.msrb.mxu3 %vm794_vm0, %v406_v6  ;;  %v422_v4 = vld [vmem:[%s17146_s29 + $0x770] sm:$0xff]  ;;  %v454_v6 = vld [vmem:[%s17146_s29 + $0x920] sm:$0xff] }
 0x154   : > { %13364 = vmatmul.msk.f32.vlgmr.msra.gmra.mxu1 %vm794_vm0, %v17832_v7  ;;  %13398 = vmatmul.msk.f32.vlgmr.msra.gmra.mxu3 %vm794_vm0, %v17832_v7  ;;  %v438_v5 = vld [vmem:[%s17146_s29 + $0x830] sm:$0xff] }
 0x156   : > { %13400 = vmatpush.xpose.msk.msrb.mxu0 %vm794_vm0, %v357_v8  ;;  %13434 = vmatpush.xpose.msk.msrb.mxu2 %vm794_vm0, %v389_v10  ;;  %v470_v8 = vld [vmem:[%s17146_s29 + $0x9e0] sm:$0xff]  ;;  %v437_v10 = vld [vmem:[%s17146_s29 + $0x828] sm:$0xff] }
 0x157   : > { %13417 = vmatpush.xpose.msk.msrb.mxu1 %vm794_vm0, %v373_v9  ;;  %13451 = vmatpush.xpose.msk.msrb.mxu3 %vm794_vm0, %v405_v11  ;;  %v421_v9 = vld [vmem:[%s17146_s29 + $0x768] sm:$0xff]  ;;  %v453_v11 = vld [vmem:[%s17146_s29 + $0x918] sm:$0xff] }
 0x15a   : > { %13401 = vmatpush.xpose.msk.msrb.mxu0 %vm794_vm0, %v356_v12  ;;  %13435 = vmatpush.xpose.msk.msrb.mxu2 %vm794_vm0, %v388_v14  ;;  %v469_v12 = vld [vmem:[%s17146_s29 + $0x9d8] sm:$0xff] }
 0x15b   : > { %13418 = vmatpush.xpose.msk.msrb.mxu1 %vm794_vm0, %v372_v13  ;;  %13452 = vmatpush.xpose.msk.msrb.mxu3 %vm794_vm0, %v404_v34  ;;  %v420_v13 = vld [vmem:[%s17146_s29 + $0x758] sm:$0xff]  ;;  %v452_v34 = vld [vmem:[%s17146_s29 + $0x908] sm:$0xff] }
 0x15c   : > { %v436_v14 = vld [vmem:[%s17146_s29 + $0x818] sm:$0xff] }
 0x15e   : > { %13402 = vmatpush.xpose.msk.msrb.mxu0 %vm794_vm0, %v355_v15  ;;  %13436 = vmatpush.xpose.msk.msrb.mxu2 %vm794_vm0, %v387_v17  ;;  %v468_v15 = vld [vmem:[%s17146_s29 + $0x9c8] sm:$0xff]  ;;  %v435_v17 = vld [vmem:[%s17146_s29 + $0x810] sm:$0xff] }
 0x15f   : > { %13419 = vmatpush.xpose.msk.msrb.mxu1 %vm794_vm0, %v371_v16  ;;  %13453 = vmatpush.xpose.msk.msrb.mxu3 %vm794_vm0, %v403_v18  ;;  %v419_v16 = vld [vmem:[%s17146_s29 + $0x750] sm:$0xff]  ;;  %v451_v18 = vld [vmem:[%s17146_s29 + $0x900] sm:$0xff] }
 0x162   : > { %13403 = vmatpush.xpose.msk.msrb.mxu0 %vm794_vm0, %v354_v19  ;;  %13437 = vmatpush.xpose.msk.msrb.mxu2 %vm794_vm0, %v386_v21  ;;  %v467_v19 = vld [vmem:[%s17146_s29 + $0x9c0] sm:$0xff] }
 0x163   : > { %13420 = vmatpush.xpose.msk.msrb.mxu1 %vm794_vm0, %v370_v20  ;;  %13454 = vmatpush.xpose.msk.msrb.mxu3 %vm794_vm0, %v402_v22  ;;  %v418_v20 = vld [vmem:[%s17146_s29 + $0x740] sm:$0xff]  ;;  %v450_v22 = vld [vmem:[%s17146_s29 + $0x8f0] sm:$0xff] }
 0x164   : > { %v434_v21 = vld [vmem:[%s17146_s29 + $0x800] sm:$0xff] }
 0x166   : > { %13404 = vmatpush.xpose.msk.msrb.mxu0 %vm794_vm0, %v353_v23  ;;  %13438 = vmatpush.xpose.msk.msrb.mxu2 %vm794_vm0, %v385_v25  ;;  %v466_v23 = vld [vmem:[%s17146_s29 + $0x9b0] sm:$0xff]  ;;  %v433_v25 = vld [vmem:[%s17146_s29 + $0x7f8] sm:$0xff] }
 0x167   : > { %13421 = vmatpush.xpose.msk.msrb.mxu1 %vm794_vm0, %v369_v24  ;;  %13455 = vmatpush.xpose.msk.msrb.mxu3 %vm794_vm0, %v401_v26  ;;  %v417_v24 = vld [vmem:[%s17146_s29 + $0x738] sm:$0xff]  ;;  %v449_v26 = vld [vmem:[%s17146_s29 + $0x8e8] sm:$0xff] }
 0x16a   : > { %13405 = vmatpush.xpose.msk.msrb.mxu0 %vm794_vm0, %v352_v27  ;;  %13439 = vmatpush.xpose.msk.msrb.mxu2 %vm794_vm0, %v384_v29  ;;  %v465_v27 = vld [vmem:[%s17146_s29 + $0x9a8] sm:$0xff] }
 0x16b   : > { %13422 = vmatpush.xpose.msk.msrb.mxu1 %vm794_vm0, %v368_v28  ;;  %13456 = vmatpush.xpose.msk.msrb.mxu3 %vm794_vm0, %v400_v30  ;;  %v416_v28 = vld [vmem:[%s17146_s29 + $0x728] sm:$0xff]  ;;  %v448_v30 = vld [vmem:[%s17146_s29 + $0x8d8] sm:$0xff] }
 0x16c   : > { %v432_v29 = vld [vmem:[%s17146_s29 + $0x7e8] sm:$0xff] }
 0x16e   : > { %13406 = vmatpush.xpose.msk.msrb.mxu0 %vm794_vm0, %v351_v31  ;;  %13440 = vmatpush.xpose.msk.msrb.mxu2 %vm794_vm0, %v383_v33  ;;  %v464_v31 = vld [vmem:[%s17146_s29 + $0x998] sm:$0xff]  ;;  %v431_v33 = vld [vmem:[%s17146_s29 + $0x7e0] sm:$0xff] }
 0x16f   : > { %13423 = vmatpush.xpose.msk.msrb.mxu1 %vm794_vm0, %v367_v32  ;;  %13457 = vmatpush.xpose.msk.msrb.mxu3 %vm794_vm0, %v399_v35  ;;  %v415_v32 = vld [vmem:[%s17146_s29 + $0x720] sm:$0xff]  ;;  %v447_v35 = vld [vmem:[%s17146_s29 + $0x8d0] sm:$0xff] }
 0x172   : > { %13407 = vmatpush.xpose.msk.msrb.mxu0 %vm794_vm0, %v350_v36  ;;  %13441 = vmatpush.xpose.msk.msrb.mxu2 %vm794_vm0, %v382_v38  ;;  %v463_v36 = vld [vmem:[%s17146_s29 + $0x990] sm:$0xff] }
 0x173   : > { %13424 = vmatpush.xpose.msk.msrb.mxu1 %vm794_vm0, %v366_v37  ;;  %13458 = vmatpush.xpose.msk.msrb.mxu3 %vm794_vm0, %v398_v39  ;;  %v414_v37 = vld [vmem:[%s17146_s29 + $0x710] sm:$0xff]  ;;  %v446_v39 = vld [vmem:[%s17146_s29 + $0x8c0] sm:$0xff] }
 0x174   : > { %v430_v38 = vld [vmem:[%s17146_s29 + $0x7d0] sm:$0xff] }
 0x176   : > { %13408 = vmatpush.xpose.msk.msrb.mxu0 %vm794_vm0, %v349_v40  ;;  %13442 = vmatpush.xpose.msk.msrb.mxu2 %vm794_vm0, %v381_v42  ;;  %v462_v40 = vld [vmem:[%s17146_s29 + $0x980] sm:$0xff]  ;;  %v429_v42 = vld [vmem:[%s17146_s29 + $0x7c8] sm:$0xff] }
 0x177   : > { %13425 = vmatpush.xpose.msk.msrb.mxu1 %vm794_vm0, %v365_v41  ;;  %13459 = vmatpush.xpose.msk.msrb.mxu3 %vm794_vm0, %v397_v43  ;;  %v413_v41 = vld [vmem:[%s17146_s29 + $0x708] sm:$0xff]  ;;  %v445_v43 = vld [vmem:[%s17146_s29 + $0x8b8] sm:$0xff] }
 0x17a   : > { %13409 = vmatpush.xpose.msk.msrb.mxu0 %vm794_vm0, %v348_v44  ;;  %13443 = vmatpush.xpose.msk.msrb.mxu2 %vm794_vm0, %v380_v46  ;;  %v461_v44 = vld [vmem:[%s17146_s29 + $0x978] sm:$0xff] }
 0x17b   : > { %13426 = vmatpush.xpose.msk.msrb.mxu1 %vm794_vm0, %v364_v45  ;;  %13460 = vmatpush.xpose.msk.msrb.mxu3 %vm794_vm0, %v396_v47  ;;  %v412_v45 = vld [vmem:[%s17146_s29 + $0x6f8] sm:$0xff]  ;;  %v444_v47 = vld [vmem:[%s17146_s29 + $0x8a8] sm:$0xff] }
 0x17c   : > { %v428_v46 = vld [vmem:[%s17146_s29 + $0x7b8] sm:$0xff] }
 0x17e   : > { %13410 = vmatpush.xpose.msk.msrb.mxu0 %vm794_vm0, %v347_v48  ;;  %13444 = vmatpush.xpose.msk.msrb.mxu2 %vm794_vm0, %v379_v50  ;;  %v460_v48 = vld [vmem:[%s17146_s29 + $0x968] sm:$0xff]  ;;  %v427_v50 = vld [vmem:[%s17146_s29 + $0x7b0] sm:$0xff] }
 0x17f   : > { %13427 = vmatpush.xpose.msk.msrb.mxu1 %vm794_vm0, %v363_v49  ;;  %13461 = vmatpush.xpose.msk.msrb.mxu3 %vm794_vm0, %v395_v51  ;;  %v411_v49 = vld [vmem:[%s17146_s29 + $0x6f0] sm:$0xff]  ;;  %v443_v51 = vld [vmem:[%s17146_s29 + $0x8a0] sm:$0xff] }
 0x182   : > { %13411 = vmatpush.xpose.msk.msrb.mxu0 %vm794_vm0, %v346_v52  ;;  %13445 = vmatpush.xpose.msk.msrb.mxu2 %vm794_vm0, %v378_v54  ;;  %v459_v52 = vld [vmem:[%s17146_s29 + $0x960] sm:$0xff] }
 0x183   : > { %13428 = vmatpush.xpose.msk.msrb.mxu1 %vm794_vm0, %v362_v53  ;;  %13462 = vmatpush.xpose.msk.msrb.mxu3 %vm794_vm0, %v394_v55  ;;  %v410_v53 = vld [vmem:[%s17146_s29 + $0x6e0] sm:$0xff]  ;;  %v442_v55 = vld [vmem:[%s17146_s29 + $0x890] sm:$0xff] }
 0x184   : > { %v426_v54 = vld [vmem:[%s17146_s29 + $0x7a0] sm:$0xff] }
 0x186   : > { %13412 = vmatpush.xpose.msk.msrb.mxu0 %vm794_vm0, %v345_v56  ;;  %13446 = vmatpush.xpose.msk.msrb.mxu2 %vm794_vm0, %v377_v58  ;;  %v458_v56 = vld [vmem:[%s17146_s29 + $0x950] sm:$0xff]  ;;  %v425_v58 = vld [vmem:[%s17146_s29 + $0x798] sm:$0xff] }
 0x187   : > { %13429 = vmatpush.xpose.msk.msrb.mxu1 %vm794_vm0, %v361_v57  ;;  %13463 = vmatpush.xpose.msk.msrb.mxu3 %vm794_vm0, %v393_v59  ;;  %v409_v57 = vld [vmem:[%s17146_s29 + $0x6d8] sm:$0xff]  ;;  %v441_v59 = vld [vmem:[%s17146_s29 + $0x888] sm:$0xff] }
 0x18a   : > { %13413 = vmatpush.xpose.msk.msrb.mxu0 %vm794_vm0, %v344_v60  ;;  %13447 = vmatpush.xpose.msk.msrb.mxu2 %vm794_vm0, %v376_v62  ;;  %v457_v60 = vld [vmem:[%s17146_s29 + $0x948] sm:$0xff] }
 0x18b   : > { %13430 = vmatpush.xpose.msk.msrb.mxu1 %vm794_vm0, %v360_v61  ;;  %13464 = vmatpush.xpose.msk.msrb.mxu3 %vm794_vm0, %v392_v63  ;;  %v408_v61 = vld [vmem:[%s17146_s29 + $0x6c8] sm:$0xff]  ;;  %v440_v63 = vld [vmem:[%s17146_s29 + $0x878] sm:$0xff] }
 0x18c   : > { %v424_v62 = vld [vmem:[%s17146_s29 + $0x788] sm:$0xff] }
 0x18e   : > { %13414 = vmatpush.xpose.msk.msrb.mxu0 %vm794_vm0, %v343_v0  ;;  %13448 = vmatpush.xpose.msk.msrb.mxu2 %vm794_vm0, %v375_v2  ;;  %v456_v0 = vld [vmem:[%s17146_s29 + $0x938] sm:$0xff]  ;;  %v423_v2 = vld [vmem:[%s17146_s29 + $0x780] sm:$0xff] }
 0x18f   : > { %13431 = vmatpush.xpose.msk.msrb.mxu1 %vm794_vm0, %v359_v1  ;;  %13465 = vmatpush.xpose.msk.msrb.mxu3 %vm794_vm0, %v391_v3  ;;  %v407_v1 = vld [vmem:[%s17146_s29 + $0x6c0] sm:$0xff]  ;;  %v439_v3 = vld [vmem:[%s17146_s29 + $0x870] sm:$0xff] }
 0x191   : > { %13415 = vmatmul.msk.f32.vlgmr.msrb.gmra.mxu0 %vm794_vm0, %v17832_v7  ;;  %13449 = vmatmul.msk.f32.vlgmr.msrb.gmra.mxu2 %vm794_vm0, %v17832_v7 }
 0x192   : > { %13467 = vmatpush.xpose.msk.msra.mxu0 %vm794_vm0, %v422_v4  ;;  %13501 = vmatpush.xpose.msk.msra.mxu2 %vm794_vm0, %v454_v6  ;;  %v455_v4 = vld [vmem:[%s17146_s29 + $0x930] sm:$0xff] }
 0x193   : > { %13484 = vmatpush.xpose.msk.msra.mxu1 %vm794_vm0, %v438_v5  ;;  %13518 = vmatpush.xpose.msk.msra.mxu3 %vm794_vm0, %v470_v8  ;;  %v486_v5 = vld [vmem:[%s17146_s29 + $0xad0] sm:$0xff]  ;;  %v518_v8 = vld [vmem:[%s17146_s29 + $0xc80] sm:$0xff] }
 0x194   : > { %13432 = vmatmul.msk.f32.vlgmr.msrb.gmra.mxu1 %vm794_vm0, %v17832_v7  ;;  %13466 = vmatmul.msk.f32.vlgmr.msrb.gmra.mxu3 %vm794_vm0, %v17832_v7  ;;  %v502_v6 = vld [vmem:[%s17146_s29 + $0xb90] sm:$0xff] }
 0x196   : > { %13468 = vmatpush.xpose.msk.msra.mxu0 %vm794_vm0, %v421_v9  ;;  %13502 = vmatpush.xpose.msk.msra.mxu2 %vm794_vm0, %v453_v11  ;;  %v534_v9 = vld [vmem:[%s17146_s29 + $0xd40] sm:$0xff]  ;;  %v501_v11 = vld [vmem:[%s17146_s29 + $0xb88] sm:$0xff] }
 0x197   : > { %13485 = vmatpush.xpose.msk.msra.mxu1 %vm794_vm0, %v437_v10  ;;  %13519 = vmatpush.xpose.msk.msra.mxu3 %vm794_vm0, %v469_v12  ;;  %v485_v10 = vld [vmem:[%s17146_s29 + $0xac8] sm:$0xff]  ;;  %v517_v12 = vld [vmem:[%s17146_s29 + $0xc78] sm:$0xff] }
 0x19a   : > { %13469 = vmatpush.xpose.msk.msra.mxu0 %vm794_vm0, %v420_v13  ;;  %13503 = vmatpush.xpose.msk.msra.mxu2 %vm794_vm0, %v452_v34  ;;  %v533_v13 = vld [vmem:[%s17146_s29 + $0xd38] sm:$0xff] }
 0x19b   : > { %13486 = vmatpush.xpose.msk.msra.mxu1 %vm794_vm0, %v436_v14  ;;  %13520 = vmatpush.xpose.msk.msra.mxu3 %vm794_vm0, %v468_v15  ;;  %v484_v14 = vld [vmem:[%s17146_s29 + $0xab8] sm:$0xff]  ;;  %v516_v15 = vld [vmem:[%s17146_s29 + $0xc68] sm:$0xff] }
 0x19c   : > { %v500_v34 = vld [vmem:[%s17146_s29 + $0xb78] sm:$0xff] }
 0x19e   : > { %13470 = vmatpush.xpose.msk.msra.mxu0 %vm794_vm0, %v419_v16  ;;  %13504 = vmatpush.xpose.msk.msra.mxu2 %vm794_vm0, %v451_v18  ;;  %v532_v16 = vld [vmem:[%s17146_s29 + $0xd28] sm:$0xff]  ;;  %v499_v18 = vld [vmem:[%s17146_s29 + $0xb70] sm:$0xff] }
 0x19f   : > { %13487 = vmatpush.xpose.msk.msra.mxu1 %vm794_vm0, %v435_v17  ;;  %13521 = vmatpush.xpose.msk.msra.mxu3 %vm794_vm0, %v467_v19  ;;  %v483_v17 = vld [vmem:[%s17146_s29 + $0xab0] sm:$0xff]  ;;  %v515_v19 = vld [vmem:[%s17146_s29 + $0xc60] sm:$0xff] }
 0x1a2   : > { %13471 = vmatpush.xpose.msk.msra.mxu0 %vm794_vm0, %v418_v20  ;;  %13505 = vmatpush.xpose.msk.msra.mxu2 %vm794_vm0, %v450_v22  ;;  %v531_v20 = vld [vmem:[%s17146_s29 + $0xd20] sm:$0xff] }
 0x1a3   : > { %13488 = vmatpush.xpose.msk.msra.mxu1 %vm794_vm0, %v434_v21  ;;  %13522 = vmatpush.xpose.msk.msra.mxu3 %vm794_vm0, %v466_v23  ;;  %v482_v21 = vld [vmem:[%s17146_s29 + $0xaa0] sm:$0xff]  ;;  %v514_v23 = vld [vmem:[%s17146_s29 + $0xc50] sm:$0xff] }
 0x1a4   : > { %v498_v22 = vld [vmem:[%s17146_s29 + $0xb60] sm:$0xff] }
 0x1a6   : > { %13472 = vmatpush.xpose.msk.msra.mxu0 %vm794_vm0, %v417_v24  ;;  %13506 = vmatpush.xpose.msk.msra.mxu2 %vm794_vm0, %v449_v26  ;;  %v530_v24 = vld [vmem:[%s17146_s29 + $0xd10] sm:$0xff]  ;;  %v497_v26 = vld [vmem:[%s17146_s29 + $0xb58] sm:$0xff] }
 0x1a7   : > { %13489 = vmatpush.xpose.msk.msra.mxu1 %vm794_vm0, %v433_v25  ;;  %13523 = vmatpush.xpose.msk.msra.mxu3 %vm794_vm0, %v465_v27  ;;  %v481_v25 = vld [vmem:[%s17146_s29 + $0xa98] sm:$0xff]  ;;  %v513_v27 = vld [vmem:[%s17146_s29 + $0xc48] sm:$0xff] }
 0x1aa   : > { %13473 = vmatpush.xpose.msk.msra.mxu0 %vm794_vm0, %v416_v28  ;;  %13507 = vmatpush.xpose.msk.msra.mxu2 %vm794_vm0, %v448_v30  ;;  %v529_v28 = vld [vmem:[%s17146_s29 + $0xd08] sm:$0xff] }
 0x1ab   : > { %13490 = vmatpush.xpose.msk.msra.mxu1 %vm794_vm0, %v432_v29  ;;  %13524 = vmatpush.xpose.msk.msra.mxu3 %vm794_vm0, %v464_v31  ;;  %v480_v29 = vld [vmem:[%s17146_s29 + $0xa88] sm:$0xff]  ;;  %v512_v31 = vld [vmem:[%s17146_s29 + $0xc38] sm:$0xff] }
 0x1ac   : > { %v496_v30 = vld [vmem:[%s17146_s29 + $0xb48] sm:$0xff] }
 0x1ae   : > { %13474 = vmatpush.xpose.msk.msra.mxu0 %vm794_vm0, %v415_v32  ;;  %13508 = vmatpush.xpose.msk.msra.mxu2 %vm794_vm0, %v447_v35  ;;  %v528_v32 = vld [vmem:[%s17146_s29 + $0xcf8] sm:$0xff]  ;;  %v495_v35 = vld [vmem:[%s17146_s29 + $0xb40] sm:$0xff] }
 0x1af   : > { %13491 = vmatpush.xpose.msk.msra.mxu1 %vm794_vm0, %v431_v33  ;;  %13525 = vmatpush.xpose.msk.msra.mxu3 %vm794_vm0, %v463_v36  ;;  %v479_v33 = vld [vmem:[%s17146_s29 + $0xa80] sm:$0xff]  ;;  %v511_v36 = vld [vmem:[%s17146_s29 + $0xc30] sm:$0xff] }
 0x1b2   : > { %13475 = vmatpush.xpose.msk.msra.mxu0 %vm794_vm0, %v414_v37  ;;  %13509 = vmatpush.xpose.msk.msra.mxu2 %vm794_vm0, %v446_v39  ;;  %v527_v37 = vld [vmem:[%s17146_s29 + $0xcf0] sm:$0xff] }
 0x1b3   : > { %13492 = vmatpush.xpose.msk.msra.mxu1 %vm794_vm0, %v430_v38  ;;  %13526 = vmatpush.xpose.msk.msra.mxu3 %vm794_vm0, %v462_v40  ;;  %v478_v38 = vld [vmem:[%s17146_s29 + $0xa70] sm:$0xff]  ;;  %v510_v40 = vld [vmem:[%s17146_s29 + $0xc20] sm:$0xff] }
 0x1b4   : > { %v494_v39 = vld [vmem:[%s17146_s29 + $0xb30] sm:$0xff] }
 0x1b6   : > { %13476 = vmatpush.xpose.msk.msra.mxu0 %vm794_vm0, %v413_v41  ;;  %13510 = vmatpush.xpose.msk.msra.mxu2 %vm794_vm0, %v445_v43  ;;  %v526_v41 = vld [vmem:[%s17146_s29 + $0xce0] sm:$0xff]  ;;  %v493_v43 = vld [vmem:[%s17146_s29 + $0xb28] sm:$0xff] }
 0x1b7   : > { %13493 = vmatpush.xpose.msk.msra.mxu1 %vm794_vm0, %v429_v42  ;;  %13527 = vmatpush.xpose.msk.msra.mxu3 %vm794_vm0, %v461_v44  ;;  %v477_v42 = vld [vmem:[%s17146_s29 + $0xa68] sm:$0xff]  ;;  %v509_v44 = vld [vmem:[%s17146_s29 + $0xc18] sm:$0xff] }
 0x1ba   : > { %13477 = vmatpush.xpose.msk.msra.mxu0 %vm794_vm0, %v412_v45  ;;  %13511 = vmatpush.xpose.msk.msra.mxu2 %vm794_vm0, %v444_v47  ;;  %v525_v45 = vld [vmem:[%s17146_s29 + $0xcd8] sm:$0xff] }
 0x1bb   : > { %13494 = vmatpush.xpose.msk.msra.mxu1 %vm794_vm0, %v428_v46  ;;  %13528 = vmatpush.xpose.msk.msra.mxu3 %vm794_vm0, %v460_v48  ;;  %v476_v46 = vld [vmem:[%s17146_s29 + $0xa58] sm:$0xff]  ;;  %v508_v48 = vld [vmem:[%s17146_s29 + $0xc08] sm:$0xff] }
 0x1bc   : > { %v492_v47 = vld [vmem:[%s17146_s29 + $0xb18] sm:$0xff] }
 0x1be   : > { %13478 = vmatpush.xpose.msk.msra.mxu0 %vm794_vm0, %v411_v49  ;;  %13512 = vmatpush.xpose.msk.msra.mxu2 %vm794_vm0, %v443_v51  ;;  %v524_v49 = vld [vmem:[%s17146_s29 + $0xcc8] sm:$0xff]  ;;  %v491_v51 = vld [vmem:[%s17146_s29 + $0xb10] sm:$0xff] }
 0x1bf   : > { %13495 = vmatpush.xpose.msk.msra.mxu1 %vm794_vm0, %v427_v50  ;;  %13529 = vmatpush.xpose.msk.msra.mxu3 %vm794_vm0, %v459_v52  ;;  %v475_v50 = vld [vmem:[%s17146_s29 + $0xa50] sm:$0xff]  ;;  %v507_v52 = vld [vmem:[%s17146_s29 + $0xc00] sm:$0xff] }
 0x1c2   : > { %13479 = vmatpush.xpose.msk.msra.mxu0 %vm794_vm0, %v410_v53  ;;  %13513 = vmatpush.xpose.msk.msra.mxu2 %vm794_vm0, %v442_v55  ;;  %v523_v53 = vld [vmem:[%s17146_s29 + $0xcc0] sm:$0xff] }
 0x1c3   : > { %13496 = vmatpush.xpose.msk.msra.mxu1 %vm794_vm0, %v426_v54  ;;  %13530 = vmatpush.xpose.msk.msra.mxu3 %vm794_vm0, %v458_v56  ;;  %v474_v54 = vld [vmem:[%s17146_s29 + $0xa40] sm:$0xff]  ;;  %v506_v56 = vld [vmem:[%s17146_s29 + $0xbf0] sm:$0xff] }
 0x1c4   : > { %v490_v55 = vld [vmem:[%s17146_s29 + $0xb00] sm:$0xff] }
 0x1c6   : > { %13480 = vmatpush.xpose.msk.msra.mxu0 %vm794_vm0, %v409_v57  ;;  %13514 = vmatpush.xpose.msk.msra.mxu2 %vm794_vm0, %v441_v59  ;;  %v522_v57 = vld [vmem:[%s17146_s29 + $0xcb0] sm:$0xff]  ;;  %v489_v59 = vld [vmem:[%s17146_s29 + $0xaf8] sm:$0xff] }
 0x1c7   : > { %13497 = vmatpush.xpose.msk.msra.mxu1 %vm794_vm0, %v425_v58  ;;  %13531 = vmatpush.xpose.msk.msra.mxu3 %vm794_vm0, %v457_v60  ;;  %v473_v58 = vld [vmem:[%s17146_s29 + $0xa38] sm:$0xff]  ;;  %v505_v60 = vld [vmem:[%s17146_s29 + $0xbe8] sm:$0xff] }
 0x1ca   : > { %13481 = vmatpush.xpose.msk.msra.mxu0 %vm794_vm0, %v408_v61  ;;  %13515 = vmatpush.xpose.msk.msra.mxu2 %vm794_vm0, %v440_v63  ;;  %v521_v61 = vld [vmem:[%s17146_s29 + $0xca8] sm:$0xff] }
 0x1cb   : > { %13498 = vmatpush.xpose.msk.msra.mxu1 %vm794_vm0, %v424_v62  ;;  %13532 = vmatpush.xpose.msk.msra.mxu3 %vm794_vm0, %v456_v0  ;;  %v472_v62 = vld [vmem:[%s17146_s29 + $0xa28] sm:$0xff]  ;;  %v504_v0 = vld [vmem:[%s17146_s29 + $0xbd8] sm:$0xff] }
 0x1cc   : > { %v488_v63 = vld [vmem:[%s17146_s29 + $0xae8] sm:$0xff] }
 0x1ce   : > { %13482 = vmatpush.xpose.msk.msra.mxu0 %vm794_vm0, %v407_v1  ;;  %13516 = vmatpush.xpose.msk.msra.mxu2 %vm794_vm0, %v439_v3  ;;  %v520_v1 = vld [vmem:[%s17146_s29 + $0xc98] sm:$0xff]  ;;  %v487_v3 = vld [vmem:[%s17146_s29 + $0xae0] sm:$0xff] }
 0x1cf   : > { %13499 = vmatpush.xpose.msk.msra.mxu1 %vm794_vm0, %v423_v2  ;;  %13533 = vmatpush.xpose.msk.msra.mxu3 %vm794_vm0, %v455_v4  ;;  %v471_v2 = vld [vmem:[%s17146_s29 + $0xa20] sm:$0xff]  ;;  %v503_v4 = vld [vmem:[%s17146_s29 + $0xbd0] sm:$0xff] }
 0x1d1   : > { %13483 = vmatmul.msk.f32.vlgmr.msra.gmra.mxu0 %vm794_vm0, %v17832_v7  ;;  %13517 = vmatmul.msk.f32.vlgmr.msra.gmra.mxu2 %vm794_vm0, %v17832_v7 }
 0x1d2   : > { %13535 = vmatpush.xpose.msk.msrb.mxu0 %vm794_vm0, %v486_v5  ;;  %13569 = vmatpush.xpose.msk.msrb.mxu2 %vm794_vm0, %v518_v8  ;;  %v519_v5 = vld [vmem:[%s17146_s29 + $0xc90] sm:$0xff] }
 0x1d3   : > { %13552 = vmatpush.xpose.msk.msrb.mxu1 %vm794_vm0, %v502_v6  ;;  %13586 = vmatpush.xpose.msk.msrb.mxu3 %vm794_vm0, %v534_v9  ;;  %v2992_v6 = vld [vmem:[%s17146_s29 + $0xb2] sm:$0xff]  ;;  %v3024_v9 = vld [vmem:[%s17146_s29 + $0x262] sm:$0xff] }
 0x1d4   : > { %13500 = vmatmul.msk.f32.vlgmr.msra.gmra.mxu1 %vm794_vm0, %v17832_v7  ;;  %13534 = vmatmul.msk.f32.vlgmr.msra.gmra.mxu3 %vm794_vm0, %v17832_v7  ;;  %v3008_v8 = vld [vmem:[%s17146_s29 + $0x172] sm:$0xff] }
 0x1d6   : > { %13536 = vmatpush.xpose.msk.msrb.mxu0 %vm794_vm0, %v485_v10  ;;  %13570 = vmatpush.xpose.msk.msrb.mxu2 %vm794_vm0, %v517_v12  ;;  %v3040_v10 = vld [vmem:[%s17146_s29 + $0x322] sm:$0xff]  ;;  %v3007_v12 = vld [vmem:[%s17146_s29 + $0x16a] sm:$0xff] }
 0x1d7   : > { %13553 = vmatpush.xpose.msk.msrb.mxu1 %vm794_vm0, %v501_v11  ;;  %13587 = vmatpush.xpose.msk.msrb.mxu3 %vm794_vm0, %v533_v13  ;;  %v2991_v11 = vld [vmem:[%s17146_s29 + $0xaa] sm:$0xff]  ;;  %v3023_v13 = vld [vmem:[%s17146_s29 + $0x25a] sm:$0xff] }
 0x1da   : > { %13537 = vmatpush.xpose.msk.msrb.mxu0 %vm794_vm0, %v484_v14  ;;  %13571 = vmatpush.xpose.msk.msrb.mxu2 %vm794_vm0, %v516_v15  ;;  %v3039_v14 = vld [vmem:[%s17146_s29 + $0x31a] sm:$0xff] }
 0x1db   : > { %13554 = vmatpush.xpose.msk.msrb.mxu1 %vm794_vm0, %v500_v34  ;;  %13588 = vmatpush.xpose.msk.msrb.mxu3 %vm794_vm0, %v532_v16  ;;  %v2990_v34 = vld [vmem:[%s17146_s29 + $0x9a] sm:$0xff]  ;;  %v3022_v16 = vld [vmem:[%s17146_s29 + $0x24a] sm:$0xff] }
 0x1dc   : > { %v3006_v15 = vld [vmem:[%s17146_s29 + $0x15a] sm:$0xff] }
 0x1de   : > { %13538 = vmatpush.xpose.msk.msrb.mxu0 %vm794_vm0, %v483_v17  ;;  %13572 = vmatpush.xpose.msk.msrb.mxu2 %vm794_vm0, %v515_v19  ;;  %v3038_v17 = vld [vmem:[%s17146_s29 + $0x30a] sm:$0xff]  ;;  %v3021_v19 = vld [vmem:[%s17146_s29 + $0x242] sm:$0xff] }
 0x1df   : > { %13555 = vmatpush.xpose.msk.msrb.mxu1 %vm794_vm0, %v499_v18  ;;  %13589 = vmatpush.xpose.msk.msrb.mxu3 %vm794_vm0, %v531_v20  ;;  %v3005_v18 = vld [vmem:[%s17146_s29 + $0x152] sm:$0xff]  ;;  %v3037_v20 = vld [vmem:[%s17146_s29 + $0x302] sm:$0xff] }
 0x1e2   : > { %13539 = vmatpush.xpose.msk.msrb.mxu0 %vm794_vm0, %v482_v21  ;;  %13573 = vmatpush.xpose.msk.msrb.mxu2 %vm794_vm0, %v514_v23  ;;  %v2988_v21 = vld [vmem:[%s17146_s29 + $0x82] sm:$0xff]  ;;  %v3020_v23 = vld [vmem:[%s17146_s29 + $0x232] sm:$0xff] }
 0x1e3   : > { %13556 = vmatpush.xpose.msk.msrb.mxu1 %vm794_vm0, %v498_v22  ;;  %13590 = vmatpush.xpose.msk.msrb.mxu3 %vm794_vm0, %v530_v24  ;;  %v3004_v22 = vld [vmem:[%s17146_s29 + $0x142] sm:$0xff]  ;;  %v3036_v24 = vld [vmem:[%s17146_s29 + $0x2f2] sm:$0xff] }
 0x1e6   : > { %13540 = vmatpush.xpose.msk.msrb.mxu0 %vm794_vm0, %v481_v25  ;;  %13574 = vmatpush.xpose.msk.msrb.mxu2 %vm794_vm0, %v513_v27  ;;  %v2987_v25 = vld [vmem:[%s17146_s29 + $0x7a] sm:$0xff]  ;;  %v3019_v27 = vld [vmem:[%s17146_s29 + $0x22a] sm:$0xff] }
 0x1e7   : > { %13557 = vmatpush.xpose.msk.msrb.mxu1 %vm794_vm0, %v497_v26  ;;  %13591 = vmatpush.xpose.msk.msrb.mxu3 %vm794_vm0, %v529_v28  ;;  %v3003_v26 = vld [vmem:[%s17146_s29 + $0x13a] sm:$0xff]  ;;  %v3035_v28 = vld [vmem:[%s17146_s29 + $0x2ea] sm:$0xff] }
 0x1ea   : > { %13541 = vmatpush.xpose.msk.msrb.mxu0 %vm794_vm0, %v480_v29  ;;  %13575 = vmatpush.xpose.msk.msrb.mxu2 %vm794_vm0, %v512_v31  ;;  %v2986_v29 = vld [vmem:[%s17146_s29 + $0x6a] sm:$0xff]  ;;  %v3018_v31 = vld [vmem:[%s17146_s29 + $0x21a] sm:$0xff] }
 0x1eb   : > { %13558 = vmatpush.xpose.msk.msrb.mxu1 %vm794_vm0, %v496_v30  ;;  %13592 = vmatpush.xpose.msk.msrb.mxu3 %vm794_vm0, %v528_v32  ;;  %v3002_v30 = vld [vmem:[%s17146_s29 + $0x12a] sm:$0xff]  ;;  %v3034_v32 = vld [vmem:[%s17146_s29 + $0x2da] sm:$0xff] }
 0x1ee   : > { %13542 = vmatpush.xpose.msk.msrb.mxu0 %vm794_vm0, %v479_v33  ;;  %13576 = vmatpush.xpose.msk.msrb.mxu2 %vm794_vm0, %v511_v36  ;;  %v2985_v33 = vld [vmem:[%s17146_s29 + $0x62] sm:$0xff]  ;;  %v3017_v36 = vld [vmem:[%s17146_s29 + $0x212] sm:$0xff] }
 0x1ef   : > { %13559 = vmatpush.xpose.msk.msrb.mxu1 %vm794_vm0, %v495_v35  ;;  %13593 = vmatpush.xpose.msk.msrb.mxu3 %vm794_vm0, %v527_v37  ;;  %v3001_v35 = vld [vmem:[%s17146_s29 + $0x122] sm:$0xff]  ;;  %v3033_v37 = vld [vmem:[%s17146_s29 + $0x2d2] sm:$0xff] }
 0x1f2   : > { %13543 = vmatpush.xpose.msk.msrb.mxu0 %vm794_vm0, %v478_v38  ;;  %13577 = vmatpush.xpose.msk.msrb.mxu2 %vm794_vm0, %v510_v40  ;;  %v2984_v38 = vld [vmem:[%s17146_s29 + $0x52] sm:$0xff]  ;;  %v3016_v40 = vld [vmem:[%s17146_s29 + $0x202] sm:$0xff] }
 0x1f3   : > { %13560 = vmatpush.xpose.msk.msrb.mxu1 %vm794_vm0, %v494_v39  ;;  %13594 = vmatpush.xpose.msk.msrb.mxu3 %vm794_vm0, %v526_v41  ;;  %v3000_v39 = vld [vmem:[%s17146_s29 + $0x112] sm:$0xff]  ;;  %v3032_v41 = vld [vmem:[%s17146_s29 + $0x2c2] sm:$0xff] }
 0x1f6   : > { %13544 = vmatpush.xpose.msk.msrb.mxu0 %vm794_vm0, %v477_v42  ;;  %13578 = vmatpush.xpose.msk.msrb.mxu2 %vm794_vm0, %v509_v44  ;;  %v2983_v42 = vld [vmem:[%s17146_s29 + $0x4a] sm:$0xff]  ;;  %v3015_v44 = vld [vmem:[%s17146_s29 + $0x1fa] sm:$0xff] }
 0x1f7   : > { %13561 = vmatpush.xpose.msk.msrb.mxu1 %vm794_vm0, %v493_v43  ;;  %13595 = vmatpush.xpose.msk.msrb.mxu3 %vm794_vm0, %v525_v45  ;;  %v2999_v43 = vld [vmem:[%s17146_s29 + $0x10a] sm:$0xff]  ;;  %v3031_v45 = vld [vmem:[%s17146_s29 + $0x2ba] sm:$0xff] }
 0x1fa   : > { %13545 = vmatpush.xpose.msk.msrb.mxu0 %vm794_vm0, %v476_v46  ;;  %13579 = vmatpush.xpose.msk.msrb.mxu2 %vm794_vm0, %v508_v48  ;;  %v2982_v46 = vld [vmem:[%s17146_s29 + $0x3a] sm:$0xff]  ;;  %v3014_v48 = vld [vmem:[%s17146_s29 + $0x1ea] sm:$0xff] }
 0x1fb   : > { %13562 = vmatpush.xpose.msk.msrb.mxu1 %vm794_vm0, %v492_v47  ;;  %13596 = vmatpush.xpose.msk.msrb.mxu3 %vm794_vm0, %v524_v49  ;;  %v2998_v47 = vld [vmem:[%s17146_s29 + $0xfa] sm:$0xff]  ;;  %v3030_v49 = vld [vmem:[%s17146_s29 + $0x2aa] sm:$0xff] }
 0x1fe   : > { %13546 = vmatpush.xpose.msk.msrb.mxu0 %vm794_vm0, %v475_v50  ;;  %13580 = vmatpush.xpose.msk.msrb.mxu2 %vm794_vm0, %v507_v52  ;;  %v2981_v50 = vld [vmem:[%s17146_s29 + $0x32] sm:$0xff]  ;;  %v3013_v52 = vld [vmem:[%s17146_s29 + $0x1e2] sm:$0xff] }
 0x1ff   : > { %13563 = vmatpush.xpose.msk.msrb.mxu1 %vm794_vm0, %v491_v51  ;;  %13597 = vmatpush.xpose.msk.msrb.mxu3 %vm794_vm0, %v523_v53  ;;  %v2997_v51 = vld [vmem:[%s17146_s29 + $0xf2] sm:$0xff]  ;;  %v3029_v53 = vld [vmem:[%s17146_s29 + $0x2a2] sm:$0xff] }
 0x202   : > { %13547 = vmatpush.xpose.msk.msrb.mxu0 %vm794_vm0, %v474_v54  ;;  %13581 = vmatpush.xpose.msk.msrb.mxu2 %vm794_vm0, %v506_v56  ;;  %v2980_v54 = vld [vmem:[%s17146_s29 + $0x22] sm:$0xff]  ;;  %v3012_v56 = vld [vmem:[%s17146_s29 + $0x1d2] sm:$0xff] }
 0x203   : > { %13564 = vmatpush.xpose.msk.msrb.mxu1 %vm794_vm0, %v490_v55  ;;  %13598 = vmatpush.xpose.msk.msrb.mxu3 %vm794_vm0, %v522_v57  ;;  %v2996_v55 = vld [vmem:[%s17146_s29 + $0xe2] sm:$0xff]  ;;  %v3028_v57 = vld [vmem:[%s17146_s29 + $0x292] sm:$0xff] }
 0x206   : > { %13548 = vmatpush.xpose.msk.msrb.mxu0 %vm794_vm0, %v473_v58  ;;  %13582 = vmatpush.xpose.msk.msrb.mxu2 %vm794_vm0, %v505_v60  ;;  %v2979_v58 = vld [vmem:[%s17146_s29 + $0x1a] sm:$0xff]  ;;  %v3011_v60 = vld [vmem:[%s17146_s29 + $0x1ca] sm:$0xff] }
 0x207   : > { %13565 = vmatpush.xpose.msk.msrb.mxu1 %vm794_vm0, %v489_v59  ;;  %13599 = vmatpush.xpose.msk.msrb.mxu3 %vm794_vm0, %v521_v61  ;;  %v2995_v59 = vld [vmem:[%s17146_s29 + $0xda] sm:$0xff]  ;;  %v3027_v61 = vld [vmem:[%s17146_s29 + $0x28a] sm:$0xff] }
 0x20a   : > { %13549 = vmatpush.xpose.msk.msrb.mxu0 %vm794_vm0, %v472_v62  ;;  %13583 = vmatpush.xpose.msk.msrb.mxu2 %vm794_vm0, %v504_v0  ;;  %v2978_v62 = vld [vmem:[%s17146_s29 + $0xa] sm:$0xff]  ;;  %v3010_v0 = vld [vmem:[%s17146_s29 + $0x1ba] sm:$0xff] }
 0x20b   : > { %13566 = vmatpush.xpose.msk.msrb.mxu1 %vm794_vm0, %v488_v63  ;;  %13600 = vmatpush.xpose.msk.msrb.mxu3 %vm794_vm0, %v520_v1  ;;  %v2994_v63 = vld [vmem:[%s17146_s29 + $0xca] sm:$0xff]  ;;  %v3026_v1 = vld [vmem:[%s17146_s29 + $0x27a] sm:$0xff] }
 0x20e   : > { %13550 = vmatpush.xpose.msk.msrb.mxu0 %vm794_vm0, %v471_v2  ;;  %13584 = vmatpush.xpose.msk.msrb.mxu2 %vm794_vm0, %v503_v4  ;;  %v2977_v2 = vld [vmem:[%s17146_s29 + $0x2] sm:$0xff]  ;;  %v3009_v4 = vld [vmem:[%s17146_s29 + $0x1b2] sm:$0xff] }
 0x20f   : > { %13567 = vmatpush.xpose.msk.msrb.mxu1 %vm794_vm0, %v487_v3  ;;  %13601 = vmatpush.xpose.msk.msrb.mxu3 %vm794_vm0, %v519_v5  ;;  %v2993_v3 = vld [vmem:[%s17146_s29 + $0xc2] sm:$0xff]  ;;  %v3025_v5 = vld [vmem:[%s17146_s29 + $0x272] sm:$0xff] }
 0x211   : > { %13551 = vmatmul.msk.f32.vlgmr.msrb.gmra.mxu0 %vm794_vm0, %v17832_v7  ;;  %13585 = vmatmul.msk.f32.vlgmr.msrb.gmra.mxu2 %vm794_vm0, %v17832_v7 }
 0x212   : > { %13604 = vmatpush.xpose.msk.msra.mxu0 %vm794_vm0, %v2992_v6  ;;  %13638 = vmatpush.xpose.msk.msra.mxu2 %vm794_vm0, %v3024_v9  ;;  %v3056_v6 = vld [vmem:[%s17146_s29 + $0x412] sm:$0xff]  ;;  %v3088_v9 = vld [vmem:[%s17146_s29 + $0x5c2] sm:$0xff] }
 0x213   : > { %13621 = vmatpush.xpose.msk.msra.mxu1 %vm794_vm0, %v3008_v8  ;;  %13655 = vmatpush.xpose.msk.msra.mxu3 %vm794_vm0, %v3040_v10  ;;  %v3072_v8 = vld [vmem:[%s17146_s29 + $0x4d2] sm:$0xff]  ;;  %v3104_v10 = vld [vmem:[%s17146_s29 + $0x682] sm:$0xff] }
 0x214   : > { %13568 = vmatmul.msk.f32.vlgmr.msrb.gmra.mxu1 %vm794_vm0, %v17832_v7  ;;  %13602 = vmatmul.msk.f32.vlgmr.msrb.gmra.mxu3 %vm794_vm0, %v17832_v7  ;;  %v2989_v7 = vld [vmem:[%s17146_s29 + $0x92] sm:$0xff] }
 0x216   : > { %13605 = vmatpush.xpose.msk.msra.mxu0 %vm794_vm0, %v2991_v11  ;;  %13639 = vmatpush.xpose.msk.msra.mxu2 %vm794_vm0, %v3023_v13  ;;  %v18381_v11 = vld [vmem:[%s22602_s1 + $0x10] sm:$0xff] }
 0x217   : > { %13622 = vmatpush.xpose.msk.msra.mxu1 %vm794_vm0, %v3007_v12  ;;  %13656 = vmatpush.xpose.msk.msra.mxu3 %vm794_vm0, %v3039_v14  ;;  %v3055_v12 = vld [vmem:[%s17146_s29 + $0x40a] sm:$0xff]  ;;  %v3087_v14 = vld [vmem:[%s17146_s29 + $0x5ba] sm:$0xff] }
 0x218   : > { %v3071_v13 = vld [vmem:[%s17146_s29 + $0x4ca] sm:$0xff] }
 0x21a   : > { %13606 = vmatpush.xpose.msk.msra.mxu0 %vm794_vm0, %v2990_v34  ;;  %13640 = vmatpush.xpose.msk.msra.mxu2 %vm794_vm0, %v3022_v16  ;;  %v3103_v34 = vld [vmem:[%s17146_s29 + $0x67a] sm:$0xff] }
 0x21b   : > { %13623 = vmatpush.xpose.msk.msra.mxu1 %vm794_vm0, %v3006_v15  ;;  %13657 = vmatpush.xpose.msk.msra.mxu3 %vm794_vm0, %v3038_v17  ;;  %v3054_v15 = vld [vmem:[%s17146_s29 + $0x3fa] sm:$0xff]  ;;  %v3086_v17 = vld [vmem:[%s17146_s29 + $0x5aa] sm:$0xff] }
 0x21c   : > { %v3070_v16 = vld [vmem:[%s17146_s29 + $0x4ba] sm:$0xff] }
 0x21e   : > { %13607 = vmatpush.xpose.msk.msra.mxu0 %vm794_vm0, %v2989_v7  ;;  %13641 = vmatpush.xpose.msk.msra.mxu2 %vm794_vm0, %v3021_v19  ;;  %v3102_v7 = vld [vmem:[%s17146_s29 + $0x66a] sm:$0xff]  ;;  %v3069_v19 = vld [vmem:[%s17146_s29 + $0x4b2] sm:$0xff] }
 0x21f   : > { %13624 = vmatpush.xpose.msk.msra.mxu1 %vm794_vm0, %v3005_v18  ;;  %13658 = vmatpush.xpose.msk.msra.mxu3 %vm794_vm0, %v3037_v20  ;;  %v3053_v18 = vld [vmem:[%s17146_s29 + $0x3f2] sm:$0xff]  ;;  %v3085_v20 = vld [vmem:[%s17146_s29 + $0x5a2] sm:$0xff] }
 0x222   : > { %13608 = vmatpush.xpose.msk.msra.mxu0 %vm794_vm0, %v2988_v21  ;;  %13642 = vmatpush.xpose.msk.msra.mxu2 %vm794_vm0, %v3020_v23  ;;  %v3101_v21 = vld [vmem:[%s17146_s29 + $0x662] sm:$0xff] }
 0x223   : > { %13625 = vmatpush.xpose.msk.msra.mxu1 %vm794_vm0, %v3004_v22  ;;  %13659 = vmatpush.xpose.msk.msra.mxu3 %vm794_vm0, %v3036_v24  ;;  %v3052_v22 = vld [vmem:[%s17146_s29 + $0x3e2] sm:$0xff]  ;;  %v3084_v24 = vld [vmem:[%s17146_s29 + $0x592] sm:$0xff] }
 0x224   : > { %v3068_v23 = vld [vmem:[%s17146_s29 + $0x4a2] sm:$0xff] }
 0x226   : > { %13609 = vmatpush.xpose.msk.msra.mxu0 %vm794_vm0, %v2987_v25  ;;  %13643 = vmatpush.xpose.msk.msra.mxu2 %vm794_vm0, %v3019_v27  ;;  %v3100_v25 = vld [vmem:[%s17146_s29 + $0x652] sm:$0xff]  ;;  %v3067_v27 = vld [vmem:[%s17146_s29 + $0x49a] sm:$0xff] }
 0x227   : > { %13626 = vmatpush.xpose.msk.msra.mxu1 %vm794_vm0, %v3003_v26  ;;  %13660 = vmatpush.xpose.msk.msra.mxu3 %vm794_vm0, %v3035_v28  ;;  %v3051_v26 = vld [vmem:[%s17146_s29 + $0x3da] sm:$0xff]  ;;  %v3083_v28 = vld [vmem:[%s17146_s29 + $0x58a] sm:$0xff] }
 0x22a   : > { %13610 = vmatpush.xpose.msk.msra.mxu0 %vm794_vm0, %v2986_v29  ;;  %13644 = vmatpush.xpose.msk.msra.mxu2 %vm794_vm0, %v3018_v31  ;;  %v3099_v29 = vld [vmem:[%s17146_s29 + $0x64a] sm:$0xff] }
 0x22b   : > { %13627 = vmatpush.xpose.msk.msra.mxu1 %vm794_vm0, %v3002_v30  ;;  %13661 = vmatpush.xpose.msk.msra.mxu3 %vm794_vm0, %v3034_v32  ;;  %v3050_v30 = vld [vmem:[%s17146_s29 + $0x3ca] sm:$0xff]  ;;  %v3082_v32 = vld [vmem:[%s17146_s29 + $0x57a] sm:$0xff] }
 0x22c   : > { %v3066_v31 = vld [vmem:[%s17146_s29 + $0x48a] sm:$0xff] }
 0x22e   : > { %13611 = vmatpush.xpose.msk.msra.mxu0 %vm794_vm0, %v2985_v33  ;;  %13645 = vmatpush.xpose.msk.msra.mxu2 %vm794_vm0, %v3017_v36  ;;  %v3098_v33 = vld [vmem:[%s17146_s29 + $0x63a] sm:$0xff]  ;;  %v3065_v36 = vld [vmem:[%s17146_s29 + $0x482] sm:$0xff] }
 0x22f   : > { %13628 = vmatpush.xpose.msk.msra.mxu1 %vm794_vm0, %v3001_v35  ;;  %13662 = vmatpush.xpose.msk.msra.mxu3 %vm794_vm0, %v3033_v37  ;;  %v3049_v35 = vld [vmem:[%s17146_s29 + $0x3c2] sm:$0xff]  ;;  %v3081_v37 = vld [vmem:[%s17146_s29 + $0x572] sm:$0xff] }
 0x232   : > { %13612 = vmatpush.xpose.msk.msra.mxu0 %vm794_vm0, %v2984_v38  ;;  %13646 = vmatpush.xpose.msk.msra.mxu2 %vm794_vm0, %v3016_v40  ;;  %v3097_v38 = vld [vmem:[%s17146_s29 + $0x632] sm:$0xff] }
 0x233   : > { %13629 = vmatpush.xpose.msk.msra.mxu1 %vm794_vm0, %v3000_v39  ;;  %13663 = vmatpush.xpose.msk.msra.mxu3 %vm794_vm0, %v3032_v41  ;;  %v3048_v39 = vld [vmem:[%s17146_s29 + $0x3b2] sm:$0xff]  ;;  %v3080_v41 = vld [vmem:[%s17146_s29 + $0x562] sm:$0xff] }
 0x234   : > { %v3064_v40 = vld [vmem:[%s17146_s29 + $0x472] sm:$0xff] }
 0x236   : > { %13613 = vmatpush.xpose.msk.msra.mxu0 %vm794_vm0, %v2983_v42  ;;  %13647 = vmatpush.xpose.msk.msra.mxu2 %vm794_vm0, %v3015_v44  ;;  %v3096_v42 = vld [vmem:[%s17146_s29 + $0x622] sm:$0xff]  ;;  %v3063_v44 = vld [vmem:[%s17146_s29 + $0x46a] sm:$0xff] }
 0x237   : > { %13630 = vmatpush.xpose.msk.msra.mxu1 %vm794_vm0, %v2999_v43  ;;  %13664 = vmatpush.xpose.msk.msra.mxu3 %vm794_vm0, %v3031_v45  ;;  %v3047_v43 = vld [vmem:[%s17146_s29 + $0x3aa] sm:$0xff]  ;;  %v3079_v45 = vld [vmem:[%s17146_s29 + $0x55a] sm:$0xff] }
 0x23a   : > { %13614 = vmatpush.xpose.msk.msra.mxu0 %vm794_vm0, %v2982_v46  ;;  %13648 = vmatpush.xpose.msk.msra.mxu2 %vm794_vm0, %v3014_v48  ;;  %v3095_v46 = vld [vmem:[%s17146_s29 + $0x61a] sm:$0xff] }
 0x23b   : > { %13631 = vmatpush.xpose.msk.msra.mxu1 %vm794_vm0, %v2998_v47  ;;  %13665 = vmatpush.xpose.msk.msra.mxu3 %vm794_vm0, %v3030_v49  ;;  %v3046_v47 = vld [vmem:[%s17146_s29 + $0x39a] sm:$0xff]  ;;  %v3078_v49 = vld [vmem:[%s17146_s29 + $0x54a] sm:$0xff] }
 0x23c   : > { %v3062_v48 = vld [vmem:[%s17146_s29 + $0x45a] sm:$0xff] }
 0x23e   : > { %13615 = vmatpush.xpose.msk.msra.mxu0 %vm794_vm0, %v2981_v50  ;;  %13649 = vmatpush.xpose.msk.msra.mxu2 %vm794_vm0, %v3013_v52  ;;  %v3094_v50 = vld [vmem:[%s17146_s29 + $0x60a] sm:$0xff]  ;;  %v3061_v52 = vld [vmem:[%s17146_s29 + $0x452] sm:$0xff] }
 0x23f   : > { %13632 = vmatpush.xpose.msk.msra.mxu1 %vm794_vm0, %v2997_v51  ;;  %13666 = vmatpush.xpose.msk.msra.mxu3 %vm794_vm0, %v3029_v53  ;;  %v3045_v51 = vld [vmem:[%s17146_s29 + $0x392] sm:$0xff]  ;;  %v3077_v53 = vld [vmem:[%s17146_s29 + $0x542] sm:$0xff] }
 0x242   : > { %13616 = vmatpush.xpose.msk.msra.mxu0 %vm794_vm0, %v2980_v54  ;;  %13650 = vmatpush.xpose.msk.msra.mxu2 %vm794_vm0, %v3012_v56  ;;  %v3093_v54 = vld [vmem:[%s17146_s29 + $0x602] sm:$0xff] }
 0x243   : > { %13633 = vmatpush.xpose.msk.msra.mxu1 %vm794_vm0, %v2996_v55  ;;  %13667 = vmatpush.xpose.msk.msra.mxu3 %vm794_vm0, %v3028_v57  ;;  %v3044_v55 = vld [vmem:[%s17146_s29 + $0x382] sm:$0xff]  ;;  %v3076_v57 = vld [vmem:[%s17146_s29 + $0x532] sm:$0xff] }
 0x244   : > { %v3060_v56 = vld [vmem:[%s17146_s29 + $0x442] sm:$0xff] }
 0x246   : > { %13617 = vmatpush.xpose.msk.msra.mxu0 %vm794_vm0, %v2979_v58  ;;  %13651 = vmatpush.xpose.msk.msra.mxu2 %vm794_vm0, %v3011_v60  ;;  %v3092_v58 = vld [vmem:[%s17146_s29 + $0x5f2] sm:$0xff]  ;;  %v3059_v60 = vld [vmem:[%s17146_s29 + $0x43a] sm:$0xff] }
 0x247   : > { %13634 = vmatpush.xpose.msk.msra.mxu1 %vm794_vm0, %v2995_v59  ;;  %13668 = vmatpush.xpose.msk.msra.mxu3 %vm794_vm0, %v3027_v61  ;;  %v3043_v59 = vld [vmem:[%s17146_s29 + $0x37a] sm:$0xff]  ;;  %v3075_v61 = vld [vmem:[%s17146_s29 + $0x52a] sm:$0xff] }
 0x24a   : > { %13618 = vmatpush.xpose.msk.msra.mxu0 %vm794_vm0, %v2978_v62  ;;  %13652 = vmatpush.xpose.msk.msra.mxu2 %vm794_vm0, %v3010_v0  ;;  %v3091_v62 = vld [vmem:[%s17146_s29 + $0x5ea] sm:$0xff] }
 0x24b   : > { %13635 = vmatpush.xpose.msk.msra.mxu1 %vm794_vm0, %v2994_v63  ;;  %13669 = vmatpush.xpose.msk.msra.mxu3 %vm794_vm0, %v3026_v1  ;;  %v3042_v63 = vld [vmem:[%s17146_s29 + $0x36a] sm:$0xff]  ;;  %v3074_v1 = vld [vmem:[%s17146_s29 + $0x51a] sm:$0xff] }
 0x24c   : > { %v3058_v0 = vld [vmem:[%s17146_s29 + $0x42a] sm:$0xff] }
 0x24e   : > { %13619 = vmatpush.xpose.msk.msra.mxu0 %vm794_vm0, %v2977_v2  ;;  %13653 = vmatpush.xpose.msk.msra.mxu2 %vm794_vm0, %v3009_v4  ;;  %v3090_v2 = vld [vmem:[%s17146_s29 + $0x5da] sm:$0xff]  ;;  %v3057_v4 = vld [vmem:[%s17146_s29 + $0x422] sm:$0xff] }
 0x24f   : > { %13636 = vmatpush.xpose.msk.msra.mxu1 %vm794_vm0, %v2993_v3  ;;  %13670 = vmatpush.xpose.msk.msra.mxu3 %vm794_vm0, %v3025_v5  ;;  %v3041_v3 = vld [vmem:[%s17146_s29 + $0x362] sm:$0xff]  ;;  %v3073_v5 = vld [vmem:[%s17146_s29 + $0x512] sm:$0xff] }
 0x251   : > { %13620 = vmatmul.msk.f32.vlgmr.msra.gmra.mxu0 %vm794_vm0, %v18381_v11  ;;  %13654 = vmatmul.msk.f32.vlgmr.msra.gmra.mxu2 %vm794_vm0, %v18381_v11 }
 0x252   : > { %13672 = vmatpush.xpose.msk.msrb.mxu0 %vm794_vm0, %v3056_v6  ;;  %13706 = vmatpush.xpose.msk.msrb.mxu2 %vm794_vm0, %v3088_v9  ;;  %v3089_v6 = vld [vmem:[%s17146_s29 + $0x5d2] sm:$0xff] }
 0x253   : > { %13689 = vmatpush.xpose.msk.msrb.mxu1 %vm794_vm0, %v3072_v8  ;;  %13723 = vmatpush.xpose.msk.msrb.mxu3 %vm794_vm0, %v3104_v10  ;;  %v3120_v8 = vld [vmem:[%s17146_s29 + $0x772] sm:$0xff]  ;;  %v3152_v10 = vld [vmem:[%s17146_s29 + $0x922] sm:$0xff] }
 0x254   : > { %13637 = vmatmul.msk.f32.vlgmr.msra.gmra.mxu1 %vm794_vm0, %v18381_v11  ;;  %13671 = vmatmul.msk.f32.vlgmr.msra.gmra.mxu3 %vm794_vm0, %v18381_v11  ;;  %v3136_v9 = vld [vmem:[%s17146_s29 + $0x832] sm:$0xff] }
 0x256   : > { %13673 = vmatpush.xpose.msk.msrb.mxu0 %vm794_vm0, %v3055_v12  ;;  %13707 = vmatpush.xpose.msk.msrb.mxu2 %vm794_vm0, %v3087_v14  ;;  %v3168_v12 = vld [vmem:[%s17146_s29 + $0x9e2] sm:$0xff]  ;;  %v3135_v14 = vld [vmem:[%s17146_s29 + $0x82a] sm:$0xff] }
 0x257   : > { %13690 = vmatpush.xpose.msk.msrb.mxu1 %vm794_vm0, %v3071_v13  ;;  %13724 = vmatpush.xpose.msk.msrb.mxu3 %vm794_vm0, %v3103_v34  ;;  %v3119_v13 = vld [vmem:[%s17146_s29 + $0x76a] sm:$0xff]  ;;  %v3151_v34 = vld [vmem:[%s17146_s29 + $0x91a] sm:$0xff] }
 0x25a   : > { %13674 = vmatpush.xpose.msk.msrb.mxu0 %vm794_vm0, %v3054_v15  ;;  %13708 = vmatpush.xpose.msk.msrb.mxu2 %vm794_vm0, %v3086_v17  ;;  %v3167_v15 = vld [vmem:[%s17146_s29 + $0x9da] sm:$0xff] }
 0x25b   : > { %13691 = vmatpush.xpose.msk.msrb.mxu1 %vm794_vm0, %v3070_v16  ;;  %13725 = vmatpush.xpose.msk.msrb.mxu3 %vm794_vm0, %v3102_v7  ;;  %v3118_v16 = vld [vmem:[%s17146_s29 + $0x75a] sm:$0xff]  ;;  %v3150_v7 = vld [vmem:[%s17146_s29 + $0x90a] sm:$0xff] }
 0x25c   : > { %v3134_v17 = vld [vmem:[%s17146_s29 + $0x81a] sm:$0xff] }
 0x25e   : > { %13675 = vmatpush.xpose.msk.msrb.mxu0 %vm794_vm0, %v3053_v18  ;;  %13709 = vmatpush.xpose.msk.msrb.mxu2 %vm794_vm0, %v3085_v20  ;;  %v3166_v18 = vld [vmem:[%s17146_s29 + $0x9ca] sm:$0xff]  ;;  %v3133_v20 = vld [vmem:[%s17146_s29 + $0x812] sm:$0xff] }
 0x25f   : > { %13692 = vmatpush.xpose.msk.msrb.mxu1 %vm794_vm0, %v3069_v19  ;;  %13726 = vmatpush.xpose.msk.msrb.mxu3 %vm794_vm0, %v3101_v21  ;;  %v3117_v19 = vld [vmem:[%s17146_s29 + $0x752] sm:$0xff]  ;;  %v3149_v21 = vld [vmem:[%s17146_s29 + $0x902] sm:$0xff] }
 0x262   : > { %13676 = vmatpush.xpose.msk.msrb.mxu0 %vm794_vm0, %v3052_v22  ;;  %13710 = vmatpush.xpose.msk.msrb.mxu2 %vm794_vm0, %v3084_v24  ;;  %v3165_v22 = vld [vmem:[%s17146_s29 + $0x9c2] sm:$0xff] }
 0x263   : > { %13693 = vmatpush.xpose.msk.msrb.mxu1 %vm794_vm0, %v3068_v23  ;;  %13727 = vmatpush.xpose.msk.msrb.mxu3 %vm794_vm0, %v3100_v25  ;;  %v3116_v23 = vld [vmem:[%s17146_s29 + $0x742] sm:$0xff]  ;;  %v3148_v25 = vld [vmem:[%s17146_s29 + $0x8f2] sm:$0xff] }
 0x264   : > { %v3132_v24 = vld [vmem:[%s17146_s29 + $0x802] sm:$0xff] }
 0x266   : > { %13677 = vmatpush.xpose.msk.msrb.mxu0 %vm794_vm0, %v3051_v26  ;;  %13711 = vmatpush.xpose.msk.msrb.mxu2 %vm794_vm0, %v3083_v28  ;;  %v3164_v26 = vld [vmem:[%s17146_s29 + $0x9b2] sm:$0xff]  ;;  %v3131_v28 = vld [vmem:[%s17146_s29 + $0x7fa] sm:$0xff] }
 0x267   : > { %13694 = vmatpush.xpose.msk.msrb.mxu1 %vm794_vm0, %v3067_v27  ;;  %13728 = vmatpush.xpose.msk.msrb.mxu3 %vm794_vm0, %v3099_v29  ;;  %v3115_v27 = vld [vmem:[%s17146_s29 + $0x73a] sm:$0xff]  ;;  %v3147_v29 = vld [vmem:[%s17146_s29 + $0x8ea] sm:$0xff] }
 0x26a   : > { %13678 = vmatpush.xpose.msk.msrb.mxu0 %vm794_vm0, %v3050_v30  ;;  %13712 = vmatpush.xpose.msk.msrb.mxu2 %vm794_vm0, %v3082_v32  ;;  %v3163_v30 = vld [vmem:[%s17146_s29 + $0x9aa] sm:$0xff] }
 0x26b   : > { %13695 = vmatpush.xpose.msk.msrb.mxu1 %vm794_vm0, %v3066_v31  ;;  %13729 = vmatpush.xpose.msk.msrb.mxu3 %vm794_vm0, %v3098_v33  ;;  %v3114_v31 = vld [vmem:[%s17146_s29 + $0x72a] sm:$0xff]  ;;  %v3146_v33 = vld [vmem:[%s17146_s29 + $0x8da] sm:$0xff] }
 0x26c   : > { %v3130_v32 = vld [vmem:[%s17146_s29 + $0x7ea] sm:$0xff] }
 0x26e   : > { %13679 = vmatpush.xpose.msk.msrb.mxu0 %vm794_vm0, %v3049_v35  ;;  %13713 = vmatpush.xpose.msk.msrb.mxu2 %vm794_vm0, %v3081_v37  ;;  %v3162_v35 = vld [vmem:[%s17146_s29 + $0x99a] sm:$0xff]  ;;  %v3129_v37 = vld [vmem:[%s17146_s29 + $0x7e2] sm:$0xff] }
 0x26f   : > { %13696 = vmatpush.xpose.msk.msrb.mxu1 %vm794_vm0, %v3065_v36  ;;  %13730 = vmatpush.xpose.msk.msrb.mxu3 %vm794_vm0, %v3097_v38  ;;  %v3113_v36 = vld [vmem:[%s17146_s29 + $0x722] sm:$0xff]  ;;  %v3145_v38 = vld [vmem:[%s17146_s29 + $0x8d2] sm:$0xff] }
 0x272   : > { %13680 = vmatpush.xpose.msk.msrb.mxu0 %vm794_vm0, %v3048_v39  ;;  %13714 = vmatpush.xpose.msk.msrb.mxu2 %vm794_vm0, %v3080_v41  ;;  %v3161_v39 = vld [vmem:[%s17146_s29 + $0x992] sm:$0xff] }
 0x273   : > { %13697 = vmatpush.xpose.msk.msrb.mxu1 %vm794_vm0, %v3064_v40  ;;  %13731 = vmatpush.xpose.msk.msrb.mxu3 %vm794_vm0, %v3096_v42  ;;  %v3112_v40 = vld [vmem:[%s17146_s29 + $0x712] sm:$0xff]  ;;  %v3144_v42 = vld [vmem:[%s17146_s29 + $0x8c2] sm:$0xff] }
 0x274   : > { %v3128_v41 = vld [vmem:[%s17146_s29 + $0x7d2] sm:$0xff] }
 0x276   : > { %13681 = vmatpush.xpose.msk.msrb.mxu0 %vm794_vm0, %v3047_v43  ;;  %13715 = vmatpush.xpose.msk.msrb.mxu2 %vm794_vm0, %v3079_v45  ;;  %v3160_v43 = vld [vmem:[%s17146_s29 + $0x982] sm:$0xff]  ;;  %v3127_v45 = vld [vmem:[%s17146_s29 + $0x7ca] sm:$0xff] }
 0x277   : > { %13698 = vmatpush.xpose.msk.msrb.mxu1 %vm794_vm0, %v3063_v44  ;;  %13732 = vmatpush.xpose.msk.msrb.mxu3 %vm794_vm0, %v3095_v46  ;;  %v3111_v44 = vld [vmem:[%s17146_s29 + $0x70a] sm:$0xff]  ;;  %v3143_v46 = vld [vmem:[%s17146_s29 + $0x8ba] sm:$0xff] }
 0x27a   : > { %13682 = vmatpush.xpose.msk.msrb.mxu0 %vm794_vm0, %v3046_v47  ;;  %13716 = vmatpush.xpose.msk.msrb.mxu2 %vm794_vm0, %v3078_v49  ;;  %v3159_v47 = vld [vmem:[%s17146_s29 + $0x97a] sm:$0xff] }
 0x27b   : > { %13699 = vmatpush.xpose.msk.msrb.mxu1 %vm794_vm0, %v3062_v48  ;;  %13733 = vmatpush.xpose.msk.msrb.mxu3 %vm794_vm0, %v3094_v50  ;;  %v3110_v48 = vld [vmem:[%s17146_s29 + $0x6fa] sm:$0xff]  ;;  %v3142_v50 = vld [vmem:[%s17146_s29 + $0x8aa] sm:$0xff] }
 0x27c   : > { %v3126_v49 = vld [vmem:[%s17146_s29 + $0x7ba] sm:$0xff] }
 0x27e   : > { %13683 = vmatpush.xpose.msk.msrb.mxu0 %vm794_vm0, %v3045_v51  ;;  %13717 = vmatpush.xpose.msk.msrb.mxu2 %vm794_vm0, %v3077_v53  ;;  %v3158_v51 = vld [vmem:[%s17146_s29 + $0x96a] sm:$0xff]  ;;  %v3125_v53 = vld [vmem:[%s17146_s29 + $0x7b2] sm:$0xff] }
 0x27f   : > { %13700 = vmatpush.xpose.msk.msrb.mxu1 %vm794_vm0, %v3061_v52  ;;  %13734 = vmatpush.xpose.msk.msrb.mxu3 %vm794_vm0, %v3093_v54  ;;  %v3109_v52 = vld [vmem:[%s17146_s29 + $0x6f2] sm:$0xff]  ;;  %v3141_v54 = vld [vmem:[%s17146_s29 + $0x8a2] sm:$0xff] }
 0x282   : > { %13684 = vmatpush.xpose.msk.msrb.mxu0 %vm794_vm0, %v3044_v55  ;;  %13718 = vmatpush.xpose.msk.msrb.mxu2 %vm794_vm0, %v3076_v57  ;;  %v3157_v55 = vld [vmem:[%s17146_s29 + $0x962] sm:$0xff] }
 0x283   : > { %13701 = vmatpush.xpose.msk.msrb.mxu1 %vm794_vm0, %v3060_v56  ;;  %13735 = vmatpush.xpose.msk.msrb.mxu3 %vm794_vm0, %v3092_v58  ;;  %v3108_v56 = vld [vmem:[%s17146_s29 + $0x6e2] sm:$0xff]  ;;  %v3140_v58 = vld [vmem:[%s17146_s29 + $0x892] sm:$0xff] }
 0x284   : > { %v3124_v57 = vld [vmem:[%s17146_s29 + $0x7a2] sm:$0xff] }
 0x286   : > { %13685 = vmatpush.xpose.msk.msrb.mxu0 %vm794_vm0, %v3043_v59  ;;  %13719 = vmatpush.xpose.msk.msrb.mxu2 %vm794_vm0, %v3075_v61  ;;  %v3156_v59 = vld [vmem:[%s17146_s29 + $0x952] sm:$0xff]  ;;  %v3123_v61 = vld [vmem:[%s17146_s29 + $0x79a] sm:$0xff] }
 0x287   : > { %13702 = vmatpush.xpose.msk.msrb.mxu1 %vm794_vm0, %v3059_v60  ;;  %13736 = vmatpush.xpose.msk.msrb.mxu3 %vm794_vm0, %v3091_v62  ;;  %v3107_v60 = vld [vmem:[%s17146_s29 + $0x6da] sm:$0xff]  ;;  %v3139_v62 = vld [vmem:[%s17146_s29 + $0x88a] sm:$0xff] }
 0x28a   : > { %13686 = vmatpush.xpose.msk.msrb.mxu0 %vm794_vm0, %v3042_v63  ;;  %13720 = vmatpush.xpose.msk.msrb.mxu2 %vm794_vm0, %v3074_v1  ;;  %v3155_v63 = vld [vmem:[%s17146_s29 + $0x94a] sm:$0xff] }
 0x28b   : > { %13703 = vmatpush.xpose.msk.msrb.mxu1 %vm794_vm0, %v3058_v0  ;;  %13737 = vmatpush.xpose.msk.msrb.mxu3 %vm794_vm0, %v3090_v2  ;;  %v3106_v0 = vld [vmem:[%s17146_s29 + $0x6ca] sm:$0xff]  ;;  %v3138_v2 = vld [vmem:[%s17146_s29 + $0x87a] sm:$0xff] }
 0x28c   : > { %v3122_v1 = vld [vmem:[%s17146_s29 + $0x78a] sm:$0xff] }
 0x28e   : > { %13687 = vmatpush.xpose.msk.msrb.mxu0 %vm794_vm0, %v3041_v3  ;;  %13721 = vmatpush.xpose.msk.msrb.mxu2 %vm794_vm0, %v3073_v5  ;;  %v3154_v3 = vld [vmem:[%s17146_s29 + $0x93a] sm:$0xff]  ;;  %v3121_v5 = vld [vmem:[%s17146_s29 + $0x782] sm:$0xff] }
 0x28f   : > { %13704 = vmatpush.xpose.msk.msrb.mxu1 %vm794_vm0, %v3057_v4  ;;  %13738 = vmatpush.xpose.msk.msrb.mxu3 %vm794_vm0, %v3089_v6  ;;  %v3105_v4 = vld [vmem:[%s17146_s29 + $0x6c2] sm:$0xff]  ;;  %v3137_v6 = vld [vmem:[%s17146_s29 + $0x872] sm:$0xff] }
 0x291   : > { %13688 = vmatmul.msk.f32.vlgmr.msrb.gmra.mxu0 %vm794_vm0, %v18381_v11  ;;  %13722 = vmatmul.msk.f32.vlgmr.msrb.gmra.mxu2 %vm794_vm0, %v18381_v11 }
 0x292   : > { %13740 = vmatpush.xpose.msk.msra.mxu0 %vm794_vm0, %v3120_v8  ;;  %13774 = vmatpush.xpose.msk.msra.mxu2 %vm794_vm0, %v3152_v10  ;;  %v3153_v8 = vld [vmem:[%s17146_s29 + $0x932] sm:$0xff] }
 0x293   : > { %13757 = vmatpush.xpose.msk.msra.mxu1 %vm794_vm0, %v3136_v9  ;;  %13791 = vmatpush.xpose.msk.msra.mxu3 %vm794_vm0, %v3168_v12  ;;  %v3184_v9 = vld [vmem:[%s17146_s29 + $0xad2] sm:$0xff]  ;;  %v3216_v12 = vld [vmem:[%s17146_s29 + $0xc82] sm:$0xff] }
 0x294   : > { %13705 = vmatmul.msk.f32.vlgmr.msrb.gmra.mxu1 %vm794_vm0, %v18381_v11  ;;  %13739 = vmatmul.msk.f32.vlgmr.msrb.gmra.mxu3 %vm794_vm0, %v18381_v11  ;;  %v3200_v10 = vld [vmem:[%s17146_s29 + $0xb92] sm:$0xff] }
 0x296   : > { %13741 = vmatpush.xpose.msk.msra.mxu0 %vm794_vm0, %v3119_v13  ;;  %13775 = vmatpush.xpose.msk.msra.mxu2 %vm794_vm0, %v3151_v34  ;;  %v3232_v13 = vld [vmem:[%s17146_s29 + $0xd42] sm:$0xff]  ;;  %v3199_v34 = vld [vmem:[%s17146_s29 + $0xb8a] sm:$0xff] }
 0x297   : > { %13758 = vmatpush.xpose.msk.msra.mxu1 %vm794_vm0, %v3135_v14  ;;  %13792 = vmatpush.xpose.msk.msra.mxu3 %vm794_vm0, %v3167_v15  ;;  %v3183_v14 = vld [vmem:[%s17146_s29 + $0xaca] sm:$0xff]  ;;  %v3215_v15 = vld [vmem:[%s17146_s29 + $0xc7a] sm:$0xff] }
 0x29a   : > { %13742 = vmatpush.xpose.msk.msra.mxu0 %vm794_vm0, %v3118_v16  ;;  %13776 = vmatpush.xpose.msk.msra.mxu2 %vm794_vm0, %v3150_v7  ;;  %v3231_v16 = vld [vmem:[%s17146_s29 + $0xd3a] sm:$0xff] }
 0x29b   : > { %13759 = vmatpush.xpose.msk.msra.mxu1 %vm794_vm0, %v3134_v17  ;;  %13793 = vmatpush.xpose.msk.msra.mxu3 %vm794_vm0, %v3166_v18  ;;  %v3182_v17 = vld [vmem:[%s17146_s29 + $0xaba] sm:$0xff]  ;;  %v3214_v18 = vld [vmem:[%s17146_s29 + $0xc6a] sm:$0xff] }
 0x29c   : > { %v3198_v7 = vld [vmem:[%s17146_s29 + $0xb7a] sm:$0xff] }
 0x29e   : > { %13743 = vmatpush.xpose.msk.msra.mxu0 %vm794_vm0, %v3117_v19  ;;  %13777 = vmatpush.xpose.msk.msra.mxu2 %vm794_vm0, %v3149_v21  ;;  %v3230_v19 = vld [vmem:[%s17146_s29 + $0xd2a] sm:$0xff]  ;;  %v3197_v21 = vld [vmem:[%s17146_s29 + $0xb72] sm:$0xff] }
 0x29f   : > { %13760 = vmatpush.xpose.msk.msra.mxu1 %vm794_vm0, %v3133_v20  ;;  %13794 = vmatpush.xpose.msk.msra.mxu3 %vm794_vm0, %v3165_v22  ;;  %v3181_v20 = vld [vmem:[%s17146_s29 + $0xab2] sm:$0xff]  ;;  %v3213_v22 = vld [vmem:[%s17146_s29 + $0xc62] sm:$0xff] }
 0x2a2   : > { %13744 = vmatpush.xpose.msk.msra.mxu0 %vm794_vm0, %v3116_v23  ;;  %13778 = vmatpush.xpose.msk.msra.mxu2 %vm794_vm0, %v3148_v25  ;;  %v3229_v23 = vld [vmem:[%s17146_s29 + $0xd22] sm:$0xff] }
 0x2a3   : > { %13761 = vmatpush.xpose.msk.msra.mxu1 %vm794_vm0, %v3132_v24  ;;  %13795 = vmatpush.xpose.msk.msra.mxu3 %vm794_vm0, %v3164_v26  ;;  %v3180_v24 = vld [vmem:[%s17146_s29 + $0xaa2] sm:$0xff]  ;;  %v3212_v26 = vld [vmem:[%s17146_s29 + $0xc52] sm:$0xff] }
 0x2a4   : > { %v3196_v25 = vld [vmem:[%s17146_s29 + $0xb62] sm:$0xff] }
 0x2a6   : > { %13745 = vmatpush.xpose.msk.msra.mxu0 %vm794_vm0, %v3115_v27  ;;  %13779 = vmatpush.xpose.msk.msra.mxu2 %vm794_vm0, %v3147_v29  ;;  %v3228_v27 = vld [vmem:[%s17146_s29 + $0xd12] sm:$0xff]  ;;  %v3195_v29 = vld [vmem:[%s17146_s29 + $0xb5a] sm:$0xff] }
 0x2a7   : > { %13762 = vmatpush.xpose.msk.msra.mxu1 %vm794_vm0, %v3131_v28  ;;  %13796 = vmatpush.xpose.msk.msra.mxu3 %vm794_vm0, %v3163_v30  ;;  %v3179_v28 = vld [vmem:[%s17146_s29 + $0xa9a] sm:$0xff]  ;;  %v3211_v30 = vld [vmem:[%s17146_s29 + $0xc4a] sm:$0xff] }
 0x2aa   : > { %13746 = vmatpush.xpose.msk.msra.mxu0 %vm794_vm0, %v3114_v31  ;;  %13780 = vmatpush.xpose.msk.msra.mxu2 %vm794_vm0, %v3146_v33  ;;  %v3227_v31 = vld [vmem:[%s17146_s29 + $0xd0a] sm:$0xff] }
 0x2ab   : > { %13763 = vmatpush.xpose.msk.msra.mxu1 %vm794_vm0, %v3130_v32  ;;  %13797 = vmatpush.xpose.msk.msra.mxu3 %vm794_vm0, %v3162_v35  ;;  %v3178_v32 = vld [vmem:[%s17146_s29 + $0xa8a] sm:$0xff]  ;;  %v3210_v35 = vld [vmem:[%s17146_s29 + $0xc3a] sm:$0xff] }
 0x2ac   : > { %v3194_v33 = vld [vmem:[%s17146_s29 + $0xb4a] sm:$0xff] }
 0x2ae   : > { %13747 = vmatpush.xpose.msk.msra.mxu0 %vm794_vm0, %v3113_v36  ;;  %13781 = vmatpush.xpose.msk.msra.mxu2 %vm794_vm0, %v3145_v38  ;;  %v3226_v36 = vld [vmem:[%s17146_s29 + $0xcfa] sm:$0xff]  ;;  %v3193_v38 = vld [vmem:[%s17146_s29 + $0xb42] sm:$0xff] }
 0x2af   : > { %13764 = vmatpush.xpose.msk.msra.mxu1 %vm794_vm0, %v3129_v37  ;;  %13798 = vmatpush.xpose.msk.msra.mxu3 %vm794_vm0, %v3161_v39  ;;  %v3177_v37 = vld [vmem:[%s17146_s29 + $0xa82] sm:$0xff]  ;;  %v3209_v39 = vld [vmem:[%s17146_s29 + $0xc32] sm:$0xff] }
 0x2b2   : > { %13748 = vmatpush.xpose.msk.msra.mxu0 %vm794_vm0, %v3112_v40  ;;  %13782 = vmatpush.xpose.msk.msra.mxu2 %vm794_vm0, %v3144_v42  ;;  %v3225_v40 = vld [vmem:[%s17146_s29 + $0xcf2] sm:$0xff] }
 0x2b3   : > { %13765 = vmatpush.xpose.msk.msra.mxu1 %vm794_vm0, %v3128_v41  ;;  %13799 = vmatpush.xpose.msk.msra.mxu3 %vm794_vm0, %v3160_v43  ;;  %v3176_v41 = vld [vmem:[%s17146_s29 + $0xa72] sm:$0xff]  ;;  %v3208_v43 = vld [vmem:[%s17146_s29 + $0xc22] sm:$0xff] }
 0x2b4   : > { %v3192_v42 = vld [vmem:[%s17146_s29 + $0xb32] sm:$0xff] }
 0x2b6   : > { %13749 = vmatpush.xpose.msk.msra.mxu0 %vm794_vm0, %v3111_v44  ;;  %13783 = vmatpush.xpose.msk.msra.mxu2 %vm794_vm0, %v3143_v46  ;;  %v3224_v44 = vld [vmem:[%s17146_s29 + $0xce2] sm:$0xff]  ;;  %v3191_v46 = vld [vmem:[%s17146_s29 + $0xb2a] sm:$0xff] }
 0x2b7   : > { %13766 = vmatpush.xpose.msk.msra.mxu1 %vm794_vm0, %v3127_v45  ;;  %13800 = vmatpush.xpose.msk.msra.mxu3 %vm794_vm0, %v3159_v47  ;;  %v3175_v45 = vld [vmem:[%s17146_s29 + $0xa6a] sm:$0xff]  ;;  %v3207_v47 = vld [vmem:[%s17146_s29 + $0xc1a] sm:$0xff] }
 0x2ba   : > { %13750 = vmatpush.xpose.msk.msra.mxu0 %vm794_vm0, %v3110_v48  ;;  %13784 = vmatpush.xpose.msk.msra.mxu2 %vm794_vm0, %v3142_v50  ;;  %v3223_v48 = vld [vmem:[%s17146_s29 + $0xcda] sm:$0xff] }
 0x2bb   : > { %13767 = vmatpush.xpose.msk.msra.mxu1 %vm794_vm0, %v3126_v49  ;;  %13801 = vmatpush.xpose.msk.msra.mxu3 %vm794_vm0, %v3158_v51  ;;  %v3174_v49 = vld [vmem:[%s17146_s29 + $0xa5a] sm:$0xff]  ;;  %v3206_v51 = vld [vmem:[%s17146_s29 + $0xc0a] sm:$0xff] }
 0x2bc   : > { %v3190_v50 = vld [vmem:[%s17146_s29 + $0xb1a] sm:$0xff] }
 0x2be   : > { %13751 = vmatpush.xpose.msk.msra.mxu0 %vm794_vm0, %v3109_v52  ;;  %13785 = vmatpush.xpose.msk.msra.mxu2 %vm794_vm0, %v3141_v54  ;;  %v3222_v52 = vld [vmem:[%s17146_s29 + $0xcca] sm:$0xff]  ;;  %v3189_v54 = vld [vmem:[%s17146_s29 + $0xb12] sm:$0xff] }
 0x2bf   : > { %13768 = vmatpush.xpose.msk.msra.mxu1 %vm794_vm0, %v3125_v53  ;;  %13802 = vmatpush.xpose.msk.msra.mxu3 %vm794_vm0, %v3157_v55  ;;  %v3173_v53 = vld [vmem:[%s17146_s29 + $0xa52] sm:$0xff]  ;;  %v3205_v55 = vld [vmem:[%s17146_s29 + $0xc02] sm:$0xff] }
 0x2c2   : > { %13752 = vmatpush.xpose.msk.msra.mxu0 %vm794_vm0, %v3108_v56  ;;  %13786 = vmatpush.xpose.msk.msra.mxu2 %vm794_vm0, %v3140_v58  ;;  %v3221_v56 = vld [vmem:[%s17146_s29 + $0xcc2] sm:$0xff] }
 0x2c3   : > { %13769 = vmatpush.xpose.msk.msra.mxu1 %vm794_vm0, %v3124_v57  ;;  %13803 = vmatpush.xpose.msk.msra.mxu3 %vm794_vm0, %v3156_v59  ;;  %v3172_v57 = vld [vmem:[%s17146_s29 + $0xa42] sm:$0xff]  ;;  %v3204_v59 = vld [vmem:[%s17146_s29 + $0xbf2] sm:$0xff] }
 0x2c4   : > { %v3188_v58 = vld [vmem:[%s17146_s29 + $0xb02] sm:$0xff] }
 0x2c6   : > { %13753 = vmatpush.xpose.msk.msra.mxu0 %vm794_vm0, %v3107_v60  ;;  %13787 = vmatpush.xpose.msk.msra.mxu2 %vm794_vm0, %v3139_v62  ;;  %v3220_v60 = vld [vmem:[%s17146_s29 + $0xcb2] sm:$0xff]  ;;  %v3187_v62 = vld [vmem:[%s17146_s29 + $0xafa] sm:$0xff] }
 0x2c7   : > { %13770 = vmatpush.xpose.msk.msra.mxu1 %vm794_vm0, %v3123_v61  ;;  %13804 = vmatpush.xpose.msk.msra.mxu3 %vm794_vm0, %v3155_v63  ;;  %v3171_v61 = vld [vmem:[%s17146_s29 + $0xa3a] sm:$0xff]  ;;  %v3203_v63 = vld [vmem:[%s17146_s29 + $0xbea] sm:$0xff] }
 0x2ca   : > { %13754 = vmatpush.xpose.msk.msra.mxu0 %vm794_vm0, %v3106_v0  ;;  %13788 = vmatpush.xpose.msk.msra.mxu2 %vm794_vm0, %v3138_v2  ;;  %v3219_v0 = vld [vmem:[%s17146_s29 + $0xcaa] sm:$0xff] }
 0x2cb   : > { %13771 = vmatpush.xpose.msk.msra.mxu1 %vm794_vm0, %v3122_v1  ;;  %13805 = vmatpush.xpose.msk.msra.mxu3 %vm794_vm0, %v3154_v3  ;;  %v3170_v1 = vld [vmem:[%s17146_s29 + $0xa2a] sm:$0xff]  ;;  %v3202_v3 = vld [vmem:[%s17146_s29 + $0xbda] sm:$0xff] }
 0x2cc   : > { %v3186_v2 = vld [vmem:[%s17146_s29 + $0xaea] sm:$0xff] }
 0x2ce   : > { %13755 = vmatpush.xpose.msk.msra.mxu0 %vm794_vm0, %v3105_v4  ;;  %13789 = vmatpush.xpose.msk.msra.mxu2 %vm794_vm0, %v3137_v6  ;;  %v3218_v4 = vld [vmem:[%s17146_s29 + $0xc9a] sm:$0xff]  ;;  %v3185_v6 = vld [vmem:[%s17146_s29 + $0xae2] sm:$0xff] }
 0x2cf   : > { %13772 = vmatpush.xpose.msk.msra.mxu1 %vm794_vm0, %v3121_v5  ;;  %13806 = vmatpush.xpose.msk.msra.mxu3 %vm794_vm0, %v3153_v8  ;;  %v3169_v5 = vld [vmem:[%s17146_s29 + $0xa22] sm:$0xff]  ;;  %v3201_v8 = vld [vmem:[%s17146_s29 + $0xbd2] sm:$0xff] }
 0x2d1   : > { %13756 = vmatmul.msk.f32.vlgmr.msra.gmra.mxu0 %vm794_vm0, %v18381_v11  ;;  %13790 = vmatmul.msk.f32.vlgmr.msra.gmra.mxu2 %vm794_vm0, %v18381_v11 }
 0x2d2   : > { %13808 = vmatpush.xpose.msk.msrb.mxu0 %vm794_vm0, %v3184_v9  ;;  %13842 = vmatpush.xpose.msk.msrb.mxu2 %vm794_vm0, %v3216_v12  ;;  %v3217_v9 = vld [vmem:[%s17146_s29 + $0xc92] sm:$0xff]  ;;  %v13907_v12 = vld [vmem:[%s17146_s29 + $0x188] sm:$0xff] }
 0x2d3   : > { %13825 = vmatpush.xpose.msk.msrb.mxu1 %vm794_vm0, %v3200_v10  ;;  %13859 = vmatpush.xpose.msk.msrb.mxu3 %vm794_vm0, %v3232_v13  ;;  %v13891_v10 = vld [vmem:[%s17146_s29 + $0xc8] sm:$0xff]  ;;  %v13923_v13 = vld [vmem:[%s17146_s29 + $0x278] sm:$0xff] }
 0x2d4   : > { %13773 = vmatmul.msk.f32.vlgmr.msra.gmra.mxu1 %vm794_vm0, %v18381_v11  ;;  %13807 = vmatmul.msk.f32.vlgmr.msra.gmra.mxu3 %vm794_vm0, %v18381_v11 }
 0x2d6   : > { %13809 = vmatpush.xpose.msk.msrb.mxu0 %vm794_vm0, %v3183_v14  ;;  %13843 = vmatpush.xpose.msk.msrb.mxu2 %vm794_vm0, %v3215_v15  ;;  %v13939_v14 = vld [vmem:[%s17146_s29 + $0x338] sm:$0xff]  ;;  %v13906_v15 = vld [vmem:[%s17146_s29 + $0x180] sm:$0xff] }
 0x2d7   : > { %13826 = vmatpush.xpose.msk.msrb.mxu1 %vm794_vm0, %v3199_v34  ;;  %13860 = vmatpush.xpose.msk.msrb.mxu3 %vm794_vm0, %v3231_v16  ;;  %v13890_v34 = vld [vmem:[%s17146_s29 + $0xc0] sm:$0xff]  ;;  %v13922_v16 = vld [vmem:[%s17146_s29 + $0x270] sm:$0xff] }
 0x2da   : > { %13810 = vmatpush.xpose.msk.msrb.mxu0 %vm794_vm0, %v3182_v17  ;;  %13844 = vmatpush.xpose.msk.msrb.mxu2 %vm794_vm0, %v3214_v18  ;;  %v13938_v17 = vld [vmem:[%s17146_s29 + $0x330] sm:$0xff] }
 0x2db   : > { %13827 = vmatpush.xpose.msk.msrb.mxu1 %vm794_vm0, %v3198_v7  ;;  %13861 = vmatpush.xpose.msk.msrb.mxu3 %vm794_vm0, %v3230_v19  ;;  %v13889_v7 = vld [vmem:[%s17146_s29 + $0xb0] sm:$0xff]  ;;  %v13921_v19 = vld [vmem:[%s17146_s29 + $0x260] sm:$0xff] }
 0x2dc   : > { %v13905_v18 = vld [vmem:[%s17146_s29 + $0x170] sm:$0xff] }
 0x2de   : > { %13811 = vmatpush.xpose.msk.msrb.mxu0 %vm794_vm0, %v3181_v20  ;;  %13845 = vmatpush.xpose.msk.msrb.mxu2 %vm794_vm0, %v3213_v22  ;;  %v13937_v20 = vld [vmem:[%s17146_s29 + $0x320] sm:$0xff]  ;;  %v13920_v22 = vld [vmem:[%s17146_s29 + $0x258] sm:$0xff] }
 0x2df   : > { %13828 = vmatpush.xpose.msk.msrb.mxu1 %vm794_vm0, %v3197_v21  ;;  %13862 = vmatpush.xpose.msk.msrb.mxu3 %vm794_vm0, %v3229_v23  ;;  %v13904_v21 = vld [vmem:[%s17146_s29 + $0x168] sm:$0xff]  ;;  %v13936_v23 = vld [vmem:[%s17146_s29 + $0x318] sm:$0xff] }
 0x2e2   : > { %13812 = vmatpush.xpose.msk.msrb.mxu0 %vm794_vm0, %v3180_v24  ;;  %13846 = vmatpush.xpose.msk.msrb.mxu2 %vm794_vm0, %v3212_v26  ;;  %v13887_v24 = vld [vmem:[%s17146_s29 + $0x98] sm:$0xff]  ;;  %v13919_v26 = vld [vmem:[%s17146_s29 + $0x248] sm:$0xff] }
 0x2e3   : > { %13829 = vmatpush.xpose.msk.msrb.mxu1 %vm794_vm0, %v3196_v25  ;;  %13863 = vmatpush.xpose.msk.msrb.mxu3 %vm794_vm0, %v3228_v27  ;;  %v13903_v25 = vld [vmem:[%s17146_s29 + $0x158] sm:$0xff]  ;;  %v13935_v27 = vld [vmem:[%s17146_s29 + $0x308] sm:$0xff] }
 0x2e6   : > { %13813 = vmatpush.xpose.msk.msrb.mxu0 %vm794_vm0, %v3179_v28  ;;  %13847 = vmatpush.xpose.msk.msrb.mxu2 %vm794_vm0, %v3211_v30  ;;  %v13886_v28 = vld [vmem:[%s17146_s29 + $0x90] sm:$0xff]  ;;  %v13918_v30 = vld [vmem:[%s17146_s29 + $0x240] sm:$0xff] }
 0x2e7   : > { %13830 = vmatpush.xpose.msk.msrb.mxu1 %vm794_vm0, %v3195_v29  ;;  %13864 = vmatpush.xpose.msk.msrb.mxu3 %vm794_vm0, %v3227_v31  ;;  %v13902_v29 = vld [vmem:[%s17146_s29 + $0x150] sm:$0xff]  ;;  %v13934_v31 = vld [vmem:[%s17146_s29 + $0x300] sm:$0xff] }
 0x2ea   : > { %13814 = vmatpush.xpose.msk.msrb.mxu0 %vm794_vm0, %v3178_v32  ;;  %13848 = vmatpush.xpose.msk.msrb.mxu2 %vm794_vm0, %v3210_v35  ;;  %v13885_v32 = vld [vmem:[%s17146_s29 + $0x80] sm:$0xff]  ;;  %v13917_v35 = vld [vmem:[%s17146_s29 + $0x230] sm:$0xff] }
 0x2eb   : > { %13831 = vmatpush.xpose.msk.msrb.mxu1 %vm794_vm0, %v3194_v33  ;;  %13865 = vmatpush.xpose.msk.msrb.mxu3 %vm794_vm0, %v3226_v36  ;;  %v13901_v33 = vld [vmem:[%s17146_s29 + $0x140] sm:$0xff]  ;;  %v13933_v36 = vld [vmem:[%s17146_s29 + $0x2f0] sm:$0xff] }
 0x2ee   : > { %13815 = vmatpush.xpose.msk.msrb.mxu0 %vm794_vm0, %v3177_v37  ;;  %13849 = vmatpush.xpose.msk.msrb.mxu2 %vm794_vm0, %v3209_v39  ;;  %v13884_v37 = vld [vmem:[%s17146_s29 + $0x78] sm:$0xff]  ;;  %v13916_v39 = vld [vmem:[%s17146_s29 + $0x228] sm:$0xff] }
 0x2ef   : > { %13832 = vmatpush.xpose.msk.msrb.mxu1 %vm794_vm0, %v3193_v38  ;;  %13866 = vmatpush.xpose.msk.msrb.mxu3 %vm794_vm0, %v3225_v40  ;;  %v13900_v38 = vld [vmem:[%s17146_s29 + $0x138] sm:$0xff]  ;;  %v13932_v40 = vld [vmem:[%s17146_s29 + $0x2e8] sm:$0xff] }
 0x2f2   : > { %13816 = vmatpush.xpose.msk.msrb.mxu0 %vm794_vm0, %v3176_v41  ;;  %13850 = vmatpush.xpose.msk.msrb.mxu2 %vm794_vm0, %v3208_v43  ;;  %v13883_v41 = vld [vmem:[%s17146_s29 + $0x68] sm:$0xff]  ;;  %v13915_v43 = vld [vmem:[%s17146_s29 + $0x218] sm:$0xff] }
 0x2f3   : > { %13833 = vmatpush.xpose.msk.msrb.mxu1 %vm794_vm0, %v3192_v42  ;;  %13867 = vmatpush.xpose.msk.msrb.mxu3 %vm794_vm0, %v3224_v44  ;;  %v13899_v42 = vld [vmem:[%s17146_s29 + $0x128] sm:$0xff]  ;;  %v13931_v44 = vld [vmem:[%s17146_s29 + $0x2d8] sm:$0xff] }
 0x2f6   : > { %13817 = vmatpush.xpose.msk.msrb.mxu0 %vm794_vm0, %v3175_v45  ;;  %13851 = vmatpush.xpose.msk.msrb.mxu2 %vm794_vm0, %v3207_v47  ;;  %v13882_v45 = vld [vmem:[%s17146_s29 + $0x60] sm:$0xff]  ;;  %v13914_v47 = vld [vmem:[%s17146_s29 + $0x210] sm:$0xff] }
 0x2f7   : > { %13834 = vmatpush.xpose.msk.msrb.mxu1 %vm794_vm0, %v3191_v46  ;;  %13868 = vmatpush.xpose.msk.msrb.mxu3 %vm794_vm0, %v3223_v48  ;;  %v13898_v46 = vld [vmem:[%s17146_s29 + $0x120] sm:$0xff]  ;;  %v13930_v48 = vld [vmem:[%s17146_s29 + $0x2d0] sm:$0xff] }
 0x2fa   : > { %13818 = vmatpush.xpose.msk.msrb.mxu0 %vm794_vm0, %v3174_v49  ;;  %13852 = vmatpush.xpose.msk.msrb.mxu2 %vm794_vm0, %v3206_v51  ;;  %v13881_v49 = vld [vmem:[%s17146_s29 + $0x50] sm:$0xff]  ;;  %v13913_v51 = vld [vmem:[%s17146_s29 + $0x200] sm:$0xff] }
 0x2fb   : > { %13835 = vmatpush.xpose.msk.msrb.mxu1 %vm794_vm0, %v3190_v50  ;;  %13869 = vmatpush.xpose.msk.msrb.mxu3 %vm794_vm0, %v3222_v52  ;;  %v13897_v50 = vld [vmem:[%s17146_s29 + $0x110] sm:$0xff]  ;;  %v13929_v52 = vld [vmem:[%s17146_s29 + $0x2c0] sm:$0xff] }
 0x2fe   : > { %13819 = vmatpush.xpose.msk.msrb.mxu0 %vm794_vm0, %v3173_v53  ;;  %13853 = vmatpush.xpose.msk.msrb.mxu2 %vm794_vm0, %v3205_v55  ;;  %v13880_v53 = vld [vmem:[%s17146_s29 + $0x48] sm:$0xff]  ;;  %v13912_v55 = vld [vmem:[%s17146_s29 + $0x1f8] sm:$0xff] }
 0x2ff   : > { %13836 = vmatpush.xpose.msk.msrb.mxu1 %vm794_vm0, %v3189_v54  ;;  %13870 = vmatpush.xpose.msk.msrb.mxu3 %vm794_vm0, %v3221_v56  ;;  %v13896_v54 = vld [vmem:[%s17146_s29 + $0x108] sm:$0xff]  ;;  %v13928_v56 = vld [vmem:[%s17146_s29 + $0x2b8] sm:$0xff] }
 0x302   : > { %13820 = vmatpush.xpose.msk.msrb.mxu0 %vm794_vm0, %v3172_v57  ;;  %13854 = vmatpush.xpose.msk.msrb.mxu2 %vm794_vm0, %v3204_v59  ;;  %v13879_v57 = vld [vmem:[%s17146_s29 + $0x38] sm:$0xff]  ;;  %v13911_v59 = vld [vmem:[%s17146_s29 + $0x1e8] sm:$0xff] }
 0x303   : > { %13837 = vmatpush.xpose.msk.msrb.mxu1 %vm794_vm0, %v3188_v58  ;;  %13871 = vmatpush.xpose.msk.msrb.mxu3 %vm794_vm0, %v3220_v60  ;;  %v13895_v58 = vld [vmem:[%s17146_s29 + $0xf8] sm:$0xff]  ;;  %v13927_v60 = vld [vmem:[%s17146_s29 + $0x2a8] sm:$0xff] }
 0x306   : > { %13821 = vmatpush.xpose.msk.msrb.mxu0 %vm794_vm0, %v3171_v61  ;;  %13855 = vmatpush.xpose.msk.msrb.mxu2 %vm794_vm0, %v3203_v63  ;;  %v13878_v61 = vld [vmem:[%s17146_s29 + $0x30] sm:$0xff]  ;;  %v13910_v63 = vld [vmem:[%s17146_s29 + $0x1e0] sm:$0xff] }
 0x307   : > { %13838 = vmatpush.xpose.msk.msrb.mxu1 %vm794_vm0, %v3187_v62  ;;  %13872 = vmatpush.xpose.msk.msrb.mxu3 %vm794_vm0, %v3219_v0  ;;  %v13894_v62 = vld [vmem:[%s17146_s29 + $0xf0] sm:$0xff]  ;;  %v13926_v0 = vld [vmem:[%s17146_s29 + $0x2a0] sm:$0xff] }
 0x30a   : > { %13822 = vmatpush.xpose.msk.msrb.mxu0 %vm794_vm0, %v3170_v1  ;;  %13856 = vmatpush.xpose.msk.msrb.mxu2 %vm794_vm0, %v3202_v3  ;;  %v13877_v1 = vld [vmem:[%s17146_s29 + $0x20] sm:$0xff]  ;;  %v13909_v3 = vld [vmem:[%s17146_s29 + $0x1d0] sm:$0xff] }
 0x30b   : > { %13839 = vmatpush.xpose.msk.msrb.mxu1 %vm794_vm0, %v3186_v2  ;;  %13873 = vmatpush.xpose.msk.msrb.mxu3 %vm794_vm0, %v3218_v4  ;;  %v13893_v2 = vld [vmem:[%s17146_s29 + $0xe0] sm:$0xff]  ;;  %v13925_v4 = vld [vmem:[%s17146_s29 + $0x290] sm:$0xff] }
 0x30e   : > { %13823 = vmatpush.xpose.msk.msrb.mxu0 %vm794_vm0, %v3169_v5  ;;  %13857 = vmatpush.xpose.msk.msrb.mxu2 %vm794_vm0, %v3201_v8  ;;  %v13876_v5 = vld [vmem:[%s17146_s29 + $0x18] sm:$0xff]  ;;  %v13908_v8 = vld [vmem:[%s17146_s29 + $0x1c8] sm:$0xff] }
 0x30f   : > { %13840 = vmatpush.xpose.msk.msrb.mxu1 %vm794_vm0, %v3185_v6  ;;  %13874 = vmatpush.xpose.msk.msrb.mxu3 %vm794_vm0, %v3217_v9  ;;  %v13892_v6 = vld [vmem:[%s17146_s29 + $0xd8] sm:$0xff]  ;;  %v13924_v9 = vld [vmem:[%s17146_s29 + $0x288] sm:$0xff] }
 0x311   : > { %13824 = vmatmul.msk.f32.vlgmr.msrb.gmra.mxu0 %vm794_vm0, %v18381_v11  ;;  %13858 = vmatmul.msk.f32.vlgmr.msrb.gmra.mxu2 %vm794_vm0, %v18381_v11 }
 0x312   : > { %14133 = vmatpush.xpose.msk.msra.mxu0 %vm794_vm0, %v13891_v10  ;;  %14167 = vmatpush.xpose.msk.msra.mxu2 %vm794_vm0, %v13923_v13  ;;  %v13955_v10 = vld [vmem:[%s17146_s29 + $0x428] sm:$0xff]  ;;  %v13987_v13 = vld [vmem:[%s17146_s29 + $0x5d8] sm:$0xff] }
 0x313   : > { %14150 = vmatpush.xpose.msk.msra.mxu1 %vm794_vm0, %v13907_v12  ;;  %14184 = vmatpush.xpose.msk.msra.mxu3 %vm794_vm0, %v13939_v14  ;;  %v13971_v12 = vld [vmem:[%s17146_s29 + $0x4e8] sm:$0xff]  ;;  %v14003_v14 = vld [vmem:[%s17146_s29 + $0x698] sm:$0xff] }
 0x314   : > { %13841 = vmatmul.msk.f32.vlgmr.msrb.gmra.mxu1 %vm794_vm0, %v18381_v11  ;;  %13875 = vmatmul.msk.f32.vlgmr.msrb.gmra.mxu3 %vm794_vm0, %v18381_v11  ;;  %v13888_v11 = vld [vmem:[%s17146_s29 + $0xa8] sm:$0xff] }
 0x316   : > { %14134 = vmatpush.xpose.msk.msra.mxu0 %vm794_vm0, %v13890_v34  ;;  %14168 = vmatpush.xpose.msk.msra.mxu2 %vm794_vm0, %v13922_v16  ;;  %v18930_v34 = vld [vmem:[%s22602_s1 + $0x18] sm:$0xff]  ;;  %v13970_v16 = vld [vmem:[%s17146_s29 + $0x4e0] sm:$0xff] }
 0x317   : > { %14151 = vmatpush.xpose.msk.msra.mxu1 %vm794_vm0, %v13906_v15  ;;  %14185 = vmatpush.xpose.msk.msra.mxu3 %vm794_vm0, %v13938_v17  ;;  %v13954_v15 = vld [vmem:[%s17146_s29 + $0x420] sm:$0xff]  ;;  %v13986_v17 = vld [vmem:[%s17146_s29 + $0x5d0] sm:$0xff] }
 0x31a   : > { %14135 = vmatpush.xpose.msk.msra.mxu0 %vm794_vm0, %v13889_v7  ;;  %14169 = vmatpush.xpose.msk.msra.mxu2 %vm794_vm0, %v13921_v19  ;;  %v14002_v7 = vld [vmem:[%s17146_s29 + $0x690] sm:$0xff] }
 0x31b   : > { %14152 = vmatpush.xpose.msk.msra.mxu1 %vm794_vm0, %v13905_v18  ;;  %14186 = vmatpush.xpose.msk.msra.mxu3 %vm794_vm0, %v13937_v20  ;;  %v13953_v18 = vld [vmem:[%s17146_s29 + $0x410] sm:$0xff]  ;;  %v13985_v20 = vld [vmem:[%s17146_s29 + $0x5c0] sm:$0xff] }
 0x31c   : > { %v13969_v19 = vld [vmem:[%s17146_s29 + $0x4d0] sm:$0xff] }
 0x31e   : > { %14136 = vmatpush.xpose.msk.msra.mxu0 %vm794_vm0, %v13888_v11  ;;  %14170 = vmatpush.xpose.msk.msra.mxu2 %vm794_vm0, %v13920_v22  ;;  %v14001_v11 = vld [vmem:[%s17146_s29 + $0x680] sm:$0xff]  ;;  %v13968_v22 = vld [vmem:[%s17146_s29 + $0x4c8] sm:$0xff] }
 0x31f   : > { %14153 = vmatpush.xpose.msk.msra.mxu1 %vm794_vm0, %v13904_v21  ;;  %14187 = vmatpush.xpose.msk.msra.mxu3 %vm794_vm0, %v13936_v23  ;;  %v13952_v21 = vld [vmem:[%s17146_s29 + $0x408] sm:$0xff]  ;;  %v13984_v23 = vld [vmem:[%s17146_s29 + $0x5b8] sm:$0xff] }
 0x322   : > { %14137 = vmatpush.xpose.msk.msra.mxu0 %vm794_vm0, %v13887_v24  ;;  %14171 = vmatpush.xpose.msk.msra.mxu2 %vm794_vm0, %v13919_v26  ;;  %v14000_v24 = vld [vmem:[%s17146_s29 + $0x678] sm:$0xff] }
 0x323   : > { %14154 = vmatpush.xpose.msk.msra.mxu1 %vm794_vm0, %v13903_v25  ;;  %14188 = vmatpush.xpose.msk.msra.mxu3 %vm794_vm0, %v13935_v27  ;;  %v13951_v25 = vld [vmem:[%s17146_s29 + $0x3f8] sm:$0xff]  ;;  %v13983_v27 = vld [vmem:[%s17146_s29 + $0x5a8] sm:$0xff] }
 0x324   : > { %v13967_v26 = vld [vmem:[%s17146_s29 + $0x4b8] sm:$0xff] }
 0x326   : > { %14138 = vmatpush.xpose.msk.msra.mxu0 %vm794_vm0, %v13886_v28  ;;  %14172 = vmatpush.xpose.msk.msra.mxu2 %vm794_vm0, %v13918_v30  ;;  %v13999_v28 = vld [vmem:[%s17146_s29 + $0x668] sm:$0xff]  ;;  %v13966_v30 = vld [vmem:[%s17146_s29 + $0x4b0] sm:$0xff] }
 0x327   : > { %14155 = vmatpush.xpose.msk.msra.mxu1 %vm794_vm0, %v13902_v29  ;;  %14189 = vmatpush.xpose.msk.msra.mxu3 %vm794_vm0, %v13934_v31  ;;  %v13950_v29 = vld [vmem:[%s17146_s29 + $0x3f0] sm:$0xff]  ;;  %v13982_v31 = vld [vmem:[%s17146_s29 + $0x5a0] sm:$0xff] }
 0x32a   : > { %14139 = vmatpush.xpose.msk.msra.mxu0 %vm794_vm0, %v13885_v32  ;;  %14173 = vmatpush.xpose.msk.msra.mxu2 %vm794_vm0, %v13917_v35  ;;  %v13998_v32 = vld [vmem:[%s17146_s29 + $0x660] sm:$0xff] }
 0x32b   : > { %14156 = vmatpush.xpose.msk.msra.mxu1 %vm794_vm0, %v13901_v33  ;;  %14190 = vmatpush.xpose.msk.msra.mxu3 %vm794_vm0, %v13933_v36  ;;  %v13949_v33 = vld [vmem:[%s17146_s29 + $0x3e0] sm:$0xff]  ;;  %v13981_v36 = vld [vmem:[%s17146_s29 + $0x590] sm:$0xff] }
 0x32c   : > { %v13965_v35 = vld [vmem:[%s17146_s29 + $0x4a0] sm:$0xff] }
 0x32e   : > { %14140 = vmatpush.xpose.msk.msra.mxu0 %vm794_vm0, %v13884_v37  ;;  %14174 = vmatpush.xpose.msk.msra.mxu2 %vm794_vm0, %v13916_v39  ;;  %v13997_v37 = vld [vmem:[%s17146_s29 + $0x650] sm:$0xff]  ;;  %v13964_v39 = vld [vmem:[%s17146_s29 + $0x498] sm:$0xff] }
 0x32f   : > { %14157 = vmatpush.xpose.msk.msra.mxu1 %vm794_vm0, %v13900_v38  ;;  %14191 = vmatpush.xpose.msk.msra.mxu3 %vm794_vm0, %v13932_v40  ;;  %v13948_v38 = vld [vmem:[%s17146_s29 + $0x3d8] sm:$0xff]  ;;  %v13980_v40 = vld [vmem:[%s17146_s29 + $0x588] sm:$0xff] }
 0x332   : > { %14141 = vmatpush.xpose.msk.msra.mxu0 %vm794_vm0, %v13883_v41  ;;  %14175 = vmatpush.xpose.msk.msra.mxu2 %vm794_vm0, %v13915_v43  ;;  %v13996_v41 = vld [vmem:[%s17146_s29 + $0x648] sm:$0xff] }
 0x333   : > { %14158 = vmatpush.xpose.msk.msra.mxu1 %vm794_vm0, %v13899_v42  ;;  %14192 = vmatpush.xpose.msk.msra.mxu3 %vm794_vm0, %v13931_v44  ;;  %v13947_v42 = vld [vmem:[%s17146_s29 + $0x3c8] sm:$0xff]  ;;  %v13979_v44 = vld [vmem:[%s17146_s29 + $0x578] sm:$0xff] }
 0x334   : > { %v13963_v43 = vld [vmem:[%s17146_s29 + $0x488] sm:$0xff] }
 0x336   : > { %14142 = vmatpush.xpose.msk.msra.mxu0 %vm794_vm0, %v13882_v45  ;;  %14176 = vmatpush.xpose.msk.msra.mxu2 %vm794_vm0, %v13914_v47  ;;  %v13995_v45 = vld [vmem:[%s17146_s29 + $0x638] sm:$0xff]  ;;  %v13962_v47 = vld [vmem:[%s17146_s29 + $0x480] sm:$0xff] }
 0x337   : > { %14159 = vmatpush.xpose.msk.msra.mxu1 %vm794_vm0, %v13898_v46  ;;  %14193 = vmatpush.xpose.msk.msra.mxu3 %vm794_vm0, %v13930_v48  ;;  %v13946_v46 = vld [vmem:[%s17146_s29 + $0x3c0] sm:$0xff]  ;;  %v13978_v48 = vld [vmem:[%s17146_s29 + $0x570] sm:$0xff] }
 0x33a   : > { %14143 = vmatpush.xpose.msk.msra.mxu0 %vm794_vm0, %v13881_v49  ;;  %14177 = vmatpush.xpose.msk.msra.mxu2 %vm794_vm0, %v13913_v51  ;;  %v13994_v49 = vld [vmem:[%s17146_s29 + $0x630] sm:$0xff] }
 0x33b   : > { %14160 = vmatpush.xpose.msk.msra.mxu1 %vm794_vm0, %v13897_v50  ;;  %14194 = vmatpush.xpose.msk.msra.mxu3 %vm794_vm0, %v13929_v52  ;;  %v13945_v50 = vld [vmem:[%s17146_s29 + $0x3b0] sm:$0xff]  ;;  %v13977_v52 = vld [vmem:[%s17146_s29 + $0x560] sm:$0xff] }
 0x33c   : > { %v13961_v51 = vld [vmem:[%s17146_s29 + $0x470] sm:$0xff] }
 0x33e   : > { %14144 = vmatpush.xpose.msk.msra.mxu0 %vm794_vm0, %v13880_v53  ;;  %14178 = vmatpush.xpose.msk.msra.mxu2 %vm794_vm0, %v13912_v55  ;;  %v13993_v53 = vld [vmem:[%s17146_s29 + $0x620] sm:$0xff]  ;;  %v13960_v55 = vld [vmem:[%s17146_s29 + $0x468] sm:$0xff] }
 0x33f   : > { %14161 = vmatpush.xpose.msk.msra.mxu1 %vm794_vm0, %v13896_v54  ;;  %14195 = vmatpush.xpose.msk.msra.mxu3 %vm794_vm0, %v13928_v56  ;;  %v13944_v54 = vld [vmem:[%s17146_s29 + $0x3a8] sm:$0xff]  ;;  %v13976_v56 = vld [vmem:[%s17146_s29 + $0x558] sm:$0xff] }
 0x342   : > { %14145 = vmatpush.xpose.msk.msra.mxu0 %vm794_vm0, %v13879_v57  ;;  %14179 = vmatpush.xpose.msk.msra.mxu2 %vm794_vm0, %v13911_v59  ;;  %v13992_v57 = vld [vmem:[%s17146_s29 + $0x618] sm:$0xff] }
 0x343   : > { %14162 = vmatpush.xpose.msk.msra.mxu1 %vm794_vm0, %v13895_v58  ;;  %14196 = vmatpush.xpose.msk.msra.mxu3 %vm794_vm0, %v13927_v60  ;;  %v13943_v58 = vld [vmem:[%s17146_s29 + $0x398] sm:$0xff]  ;;  %v13975_v60 = vld [vmem:[%s17146_s29 + $0x548] sm:$0xff] }
 0x344   : > { %v13959_v59 = vld [vmem:[%s17146_s29 + $0x458] sm:$0xff] }
 0x346   : > { %14146 = vmatpush.xpose.msk.msra.mxu0 %vm794_vm0, %v13878_v61  ;;  %14180 = vmatpush.xpose.msk.msra.mxu2 %vm794_vm0, %v13910_v63  ;;  %v13991_v61 = vld [vmem:[%s17146_s29 + $0x608] sm:$0xff]  ;;  %v13958_v63 = vld [vmem:[%s17146_s29 + $0x450] sm:$0xff] }
 0x347   : > { %14163 = vmatpush.xpose.msk.msra.mxu1 %vm794_vm0, %v13894_v62  ;;  %14197 = vmatpush.xpose.msk.msra.mxu3 %vm794_vm0, %v13926_v0  ;;  %v13942_v62 = vld [vmem:[%s17146_s29 + $0x390] sm:$0xff]  ;;  %v13974_v0 = vld [vmem:[%s17146_s29 + $0x540] sm:$0xff] }
 0x34a   : > { %14147 = vmatpush.xpose.msk.msra.mxu0 %vm794_vm0, %v13877_v1  ;;  %14181 = vmatpush.xpose.msk.msra.mxu2 %vm794_vm0, %v13909_v3  ;;  %v13990_v1 = vld [vmem:[%s17146_s29 + $0x600] sm:$0xff] }
 0x34b   : > { %14164 = vmatpush.xpose.msk.msra.mxu1 %vm794_vm0, %v13893_v2  ;;  %14198 = vmatpush.xpose.msk.msra.mxu3 %vm794_vm0, %v13925_v4  ;;  %v13941_v2 = vld [vmem:[%s17146_s29 + $0x380] sm:$0xff]  ;;  %v13973_v4 = vld [vmem:[%s17146_s29 + $0x530] sm:$0xff] }
 0x34c   : > { %v13957_v3 = vld [vmem:[%s17146_s29 + $0x440] sm:$0xff] }
 0x34e   : > { %14148 = vmatpush.xpose.msk.msra.mxu0 %vm794_vm0, %v13876_v5  ;;  %14182 = vmatpush.xpose.msk.msra.mxu2 %vm794_vm0, %v13908_v8  ;;  %v13989_v5 = vld [vmem:[%s17146_s29 + $0x5f0] sm:$0xff]  ;;  %v13956_v8 = vld [vmem:[%s17146_s29 + $0x438] sm:$0xff] }
 0x34f   : > { %14165 = vmatpush.xpose.msk.msra.mxu1 %vm794_vm0, %v13892_v6  ;;  %14199 = vmatpush.xpose.msk.msra.mxu3 %vm794_vm0, %v13924_v9  ;;  %v13940_v6 = vld [vmem:[%s17146_s29 + $0x378] sm:$0xff]  ;;  %v13972_v9 = vld [vmem:[%s17146_s29 + $0x528] sm:$0xff] }
 0x351   : > { %14149 = vmatmul.msk.f32.vlgmr.msra.gmra.mxu0 %vm794_vm0, %v18930_v34  ;;  %14183 = vmatmul.msk.f32.vlgmr.msra.gmra.mxu2 %vm794_vm0, %v18930_v34 }
 0x352   : > { %14201 = vmatpush.xpose.msk.msrb.mxu0 %vm794_vm0, %v13955_v10  ;;  %14235 = vmatpush.xpose.msk.msrb.mxu2 %vm794_vm0, %v13987_v13  ;;  %v13988_v10 = vld [vmem:[%s17146_s29 + $0x5e8] sm:$0xff] }
 0x353   : > { %14218 = vmatpush.xpose.msk.msrb.mxu1 %vm794_vm0, %v13971_v12  ;;  %14252 = vmatpush.xpose.msk.msrb.mxu3 %vm794_vm0, %v14003_v14  ;;  %v14019_v12 = vld [vmem:[%s17146_s29 + $0x788] sm:$0xff]  ;;  %v14051_v14 = vld [vmem:[%s17146_s29 + $0x938] sm:$0xff] }
 0x354   : > { %14166 = vmatmul.msk.f32.vlgmr.msra.gmra.mxu1 %vm794_vm0, %v18930_v34  ;;  %14200 = vmatmul.msk.f32.vlgmr.msra.gmra.mxu3 %vm794_vm0, %v18930_v34  ;;  %v14035_v13 = vld [vmem:[%s17146_s29 + $0x848] sm:$0xff] }
 0x356   : > { %14202 = vmatpush.xpose.msk.msrb.mxu0 %vm794_vm0, %v13954_v15  ;;  %14236 = vmatpush.xpose.msk.msrb.mxu2 %vm794_vm0, %v13986_v17  ;;  %v14067_v15 = vld [vmem:[%s17146_s29 + $0x9f8] sm:$0xff]  ;;  %v14034_v17 = vld [vmem:[%s17146_s29 + $0x840] sm:$0xff] }
 0x357   : > { %14219 = vmatpush.xpose.msk.msrb.mxu1 %vm794_vm0, %v13970_v16  ;;  %14253 = vmatpush.xpose.msk.msrb.mxu3 %vm794_vm0, %v14002_v7  ;;  %v14018_v16 = vld [vmem:[%s17146_s29 + $0x780] sm:$0xff]  ;;  %v14050_v7 = vld [vmem:[%s17146_s29 + $0x930] sm:$0xff] }
 0x35a   : > { %14203 = vmatpush.xpose.msk.msrb.mxu0 %vm794_vm0, %v13953_v18  ;;  %14237 = vmatpush.xpose.msk.msrb.mxu2 %vm794_vm0, %v13985_v20  ;;  %v14066_v18 = vld [vmem:[%s17146_s29 + $0x9f0] sm:$0xff] }
 0x35b   : > { %14220 = vmatpush.xpose.msk.msrb.mxu1 %vm794_vm0, %v13969_v19  ;;  %14254 = vmatpush.xpose.msk.msrb.mxu3 %vm794_vm0, %v14001_v11  ;;  %v14017_v19 = vld [vmem:[%s17146_s29 + $0x770] sm:$0xff]  ;;  %v14049_v11 = vld [vmem:[%s17146_s29 + $0x920] sm:$0xff] }
 0x35c   : > { %v14033_v20 = vld [vmem:[%s17146_s29 + $0x830] sm:$0xff] }
 0x35e   : > { %14204 = vmatpush.xpose.msk.msrb.mxu0 %vm794_vm0, %v13952_v21  ;;  %14238 = vmatpush.xpose.msk.msrb.mxu2 %vm794_vm0, %v13984_v23  ;;  %v14065_v21 = vld [vmem:[%s17146_s29 + $0x9e0] sm:$0xff]  ;;  %v14032_v23 = vld [vmem:[%s17146_s29 + $0x828] sm:$0xff] }
 0x35f   : > { %14221 = vmatpush.xpose.msk.msrb.mxu1 %vm794_vm0, %v13968_v22  ;;  %14255 = vmatpush.xpose.msk.msrb.mxu3 %vm794_vm0, %v14000_v24  ;;  %v14016_v22 = vld [vmem:[%s17146_s29 + $0x768] sm:$0xff]  ;;  %v14048_v24 = vld [vmem:[%s17146_s29 + $0x918] sm:$0xff] }
 0x362   : > { %14205 = vmatpush.xpose.msk.msrb.mxu0 %vm794_vm0, %v13951_v25  ;;  %14239 = vmatpush.xpose.msk.msrb.mxu2 %vm794_vm0, %v13983_v27  ;;  %v14064_v25 = vld [vmem:[%s17146_s29 + $0x9d8] sm:$0xff] }
 0x363   : > { %14222 = vmatpush.xpose.msk.msrb.mxu1 %vm794_vm0, %v13967_v26  ;;  %14256 = vmatpush.xpose.msk.msrb.mxu3 %vm794_vm0, %v13999_v28  ;;  %v14015_v26 = vld [vmem:[%s17146_s29 + $0x758] sm:$0xff]  ;;  %v14047_v28 = vld [vmem:[%s17146_s29 + $0x908] sm:$0xff] }
 0x364   : > { %v14031_v27 = vld [vmem:[%s17146_s29 + $0x818] sm:$0xff] }
 0x366   : > { %14206 = vmatpush.xpose.msk.msrb.mxu0 %vm794_vm0, %v13950_v29  ;;  %14240 = vmatpush.xpose.msk.msrb.mxu2 %vm794_vm0, %v13982_v31  ;;  %v14063_v29 = vld [vmem:[%s17146_s29 + $0x9c8] sm:$0xff]  ;;  %v14030_v31 = vld [vmem:[%s17146_s29 + $0x810] sm:$0xff] }
 0x367   : > { %14223 = vmatpush.xpose.msk.msrb.mxu1 %vm794_vm0, %v13966_v30  ;;  %14257 = vmatpush.xpose.msk.msrb.mxu3 %vm794_vm0, %v13998_v32  ;;  %v14014_v30 = vld [vmem:[%s17146_s29 + $0x750] sm:$0xff]  ;;  %v14046_v32 = vld [vmem:[%s17146_s29 + $0x900] sm:$0xff] }
 0x36a   : > { %14207 = vmatpush.xpose.msk.msrb.mxu0 %vm794_vm0, %v13949_v33  ;;  %14241 = vmatpush.xpose.msk.msrb.mxu2 %vm794_vm0, %v13981_v36  ;;  %v14062_v33 = vld [vmem:[%s17146_s29 + $0x9c0] sm:$0xff] }
 0x36b   : > { %14224 = vmatpush.xpose.msk.msrb.mxu1 %vm794_vm0, %v13965_v35  ;;  %14258 = vmatpush.xpose.msk.msrb.mxu3 %vm794_vm0, %v13997_v37  ;;  %v14013_v35 = vld [vmem:[%s17146_s29 + $0x740] sm:$0xff]  ;;  %v14045_v37 = vld [vmem:[%s17146_s29 + $0x8f0] sm:$0xff] }
 0x36c   : > { %v14029_v36 = vld [vmem:[%s17146_s29 + $0x800] sm:$0xff] }
 0x36e   : > { %14208 = vmatpush.xpose.msk.msrb.mxu0 %vm794_vm0, %v13948_v38  ;;  %14242 = vmatpush.xpose.msk.msrb.mxu2 %vm794_vm0, %v13980_v40  ;;  %v14061_v38 = vld [vmem:[%s17146_s29 + $0x9b0] sm:$0xff]  ;;  %v14028_v40 = vld [vmem:[%s17146_s29 + $0x7f8] sm:$0xff] }
 0x36f   : > { %14225 = vmatpush.xpose.msk.msrb.mxu1 %vm794_vm0, %v13964_v39  ;;  %14259 = vmatpush.xpose.msk.msrb.mxu3 %vm794_vm0, %v13996_v41  ;;  %v14012_v39 = vld [vmem:[%s17146_s29 + $0x738] sm:$0xff]  ;;  %v14044_v41 = vld [vmem:[%s17146_s29 + $0x8e8] sm:$0xff] }
 0x372   : > { %14209 = vmatpush.xpose.msk.msrb.mxu0 %vm794_vm0, %v13947_v42  ;;  %14243 = vmatpush.xpose.msk.msrb.mxu2 %vm794_vm0, %v13979_v44  ;;  %v14060_v42 = vld [vmem:[%s17146_s29 + $0x9a8] sm:$0xff] }
 0x373   : > { %14226 = vmatpush.xpose.msk.msrb.mxu1 %vm794_vm0, %v13963_v43  ;;  %14260 = vmatpush.xpose.msk.msrb.mxu3 %vm794_vm0, %v13995_v45  ;;  %v14011_v43 = vld [vmem:[%s17146_s29 + $0x728] sm:$0xff]  ;;  %v14043_v45 = vld [vmem:[%s17146_s29 + $0x8d8] sm:$0xff] }
 0x374   : > { %v14027_v44 = vld [vmem:[%s17146_s29 + $0x7e8] sm:$0xff] }
 0x376   : > { %14210 = vmatpush.xpose.msk.msrb.mxu0 %vm794_vm0, %v13946_v46  ;;  %14244 = vmatpush.xpose.msk.msrb.mxu2 %vm794_vm0, %v13978_v48  ;;  %v14059_v46 = vld [vmem:[%s17146_s29 + $0x998] sm:$0xff]  ;;  %v14026_v48 = vld [vmem:[%s17146_s29 + $0x7e0] sm:$0xff] }
 0x377   : > { %14227 = vmatpush.xpose.msk.msrb.mxu1 %vm794_vm0, %v13962_v47  ;;  %14261 = vmatpush.xpose.msk.msrb.mxu3 %vm794_vm0, %v13994_v49  ;;  %v14010_v47 = vld [vmem:[%s17146_s29 + $0x720] sm:$0xff]  ;;  %v14042_v49 = vld [vmem:[%s17146_s29 + $0x8d0] sm:$0xff] }
 0x37a   : > { %14211 = vmatpush.xpose.msk.msrb.mxu0 %vm794_vm0, %v13945_v50  ;;  %14245 = vmatpush.xpose.msk.msrb.mxu2 %vm794_vm0, %v13977_v52  ;;  %v14058_v50 = vld [vmem:[%s17146_s29 + $0x990] sm:$0xff] }
 0x37b   : > { %14228 = vmatpush.xpose.msk.msrb.mxu1 %vm794_vm0, %v13961_v51  ;;  %14262 = vmatpush.xpose.msk.msrb.mxu3 %vm794_vm0, %v13993_v53  ;;  %v14009_v51 = vld [vmem:[%s17146_s29 + $0x710] sm:$0xff]  ;;  %v14041_v53 = vld [vmem:[%s17146_s29 + $0x8c0] sm:$0xff] }
 0x37c   : > { %v14025_v52 = vld [vmem:[%s17146_s29 + $0x7d0] sm:$0xff] }
 0x37e   : > { %14212 = vmatpush.xpose.msk.msrb.mxu0 %vm794_vm0, %v13944_v54  ;;  %14246 = vmatpush.xpose.msk.msrb.mxu2 %vm794_vm0, %v13976_v56  ;;  %v14057_v54 = vld [vmem:[%s17146_s29 + $0x980] sm:$0xff]  ;;  %v14024_v56 = vld [vmem:[%s17146_s29 + $0x7c8] sm:$0xff] }
 0x37f   : > { %14229 = vmatpush.xpose.msk.msrb.mxu1 %vm794_vm0, %v13960_v55  ;;  %14263 = vmatpush.xpose.msk.msrb.mxu3 %vm794_vm0, %v13992_v57  ;;  %v14008_v55 = vld [vmem:[%s17146_s29 + $0x708] sm:$0xff]  ;;  %v14040_v57 = vld [vmem:[%s17146_s29 + $0x8b8] sm:$0xff] }
 0x382   : > { %14213 = vmatpush.xpose.msk.msrb.mxu0 %vm794_vm0, %v13943_v58  ;;  %14247 = vmatpush.xpose.msk.msrb.mxu2 %vm794_vm0, %v13975_v60  ;;  %v14056_v58 = vld [vmem:[%s17146_s29 + $0x978] sm:$0xff] }
 0x383   : > { %14230 = vmatpush.xpose.msk.msrb.mxu1 %vm794_vm0, %v13959_v59  ;;  %14264 = vmatpush.xpose.msk.msrb.mxu3 %vm794_vm0, %v13991_v61  ;;  %v14007_v59 = vld [vmem:[%s17146_s29 + $0x6f8] sm:$0xff]  ;;  %v14039_v61 = vld [vmem:[%s17146_s29 + $0x8a8] sm:$0xff] }
 0x384   : > { %v14023_v60 = vld [vmem:[%s17146_s29 + $0x7b8] sm:$0xff] }
 0x386   : > { %14214 = vmatpush.xpose.msk.msrb.mxu0 %vm794_vm0, %v13942_v62  ;;  %14248 = vmatpush.xpose.msk.msrb.mxu2 %vm794_vm0, %v13974_v0  ;;  %v14055_v62 = vld [vmem:[%s17146_s29 + $0x968] sm:$0xff]  ;;  %v14022_v0 = vld [vmem:[%s17146_s29 + $0x7b0] sm:$0xff] }
 0x387   : > { %14231 = vmatpush.xpose.msk.msrb.mxu1 %vm794_vm0, %v13958_v63  ;;  %14265 = vmatpush.xpose.msk.msrb.mxu3 %vm794_vm0, %v13990_v1  ;;  %v14006_v63 = vld [vmem:[%s17146_s29 + $0x6f0] sm:$0xff]  ;;  %v14038_v1 = vld [vmem:[%s17146_s29 + $0x8a0] sm:$0xff] }
 0x38a   : > { %14215 = vmatpush.xpose.msk.msrb.mxu0 %vm794_vm0, %v13941_v2  ;;  %14249 = vmatpush.xpose.msk.msrb.mxu2 %vm794_vm0, %v13973_v4  ;;  %v14054_v2 = vld [vmem:[%s17146_s29 + $0x960] sm:$0xff] }
 0x38b   : > { %14232 = vmatpush.xpose.msk.msrb.mxu1 %vm794_vm0, %v13957_v3  ;;  %14266 = vmatpush.xpose.msk.msrb.mxu3 %vm794_vm0, %v13989_v5  ;;  %v14005_v3 = vld [vmem:[%s17146_s29 + $0x6e0] sm:$0xff]  ;;  %v14037_v5 = vld [vmem:[%s17146_s29 + $0x890] sm:$0xff] }
 0x38c   : > { %v14021_v4 = vld [vmem:[%s17146_s29 + $0x7a0] sm:$0xff] }
 0x38e   : > { %14216 = vmatpush.xpose.msk.msrb.mxu0 %vm794_vm0, %v13940_v6  ;;  %14250 = vmatpush.xpose.msk.msrb.mxu2 %vm794_vm0, %v13972_v9  ;;  %v14053_v6 = vld [vmem:[%s17146_s29 + $0x950] sm:$0xff]  ;;  %v14020_v9 = vld [vmem:[%s17146_s29 + $0x798] sm:$0xff] }
 0x38f   : > { %14233 = vmatpush.xpose.msk.msrb.mxu1 %vm794_vm0, %v13956_v8  ;;  %14267 = vmatpush.xpose.msk.msrb.mxu3 %vm794_vm0, %v13988_v10  ;;  %v14004_v8 = vld [vmem:[%s17146_s29 + $0x6d8] sm:$0xff]  ;;  %v14036_v10 = vld [vmem:[%s17146_s29 + $0x888] sm:$0xff] }
 0x391   : > { %14217 = vmatmul.msk.f32.vlgmr.msrb.gmra.mxu0 %vm794_vm0, %v18930_v34  ;;  %14251 = vmatmul.msk.f32.vlgmr.msrb.gmra.mxu2 %vm794_vm0, %v18930_v34 }
 0x392   : > { %14269 = vmatpush.xpose.msk.msra.mxu0 %vm794_vm0, %v14019_v12  ;;  %14303 = vmatpush.xpose.msk.msra.mxu2 %vm794_vm0, %v14051_v14  ;;  %v14052_v12 = vld [vmem:[%s17146_s29 + $0x948] sm:$0xff] }
 0x393   : > { %14286 = vmatpush.xpose.msk.msra.mxu1 %vm794_vm0, %v14035_v13  ;;  %14320 = vmatpush.xpose.msk.msra.mxu3 %vm794_vm0, %v14067_v15  ;;  %v14083_v13 = vld [vmem:[%s17146_s29 + $0xae8] sm:$0xff]  ;;  %v14115_v15 = vld [vmem:[%s17146_s29 + $0xc98] sm:$0xff] }
 0x394   : > { %14234 = vmatmul.msk.f32.vlgmr.msrb.gmra.mxu1 %vm794_vm0, %v18930_v34  ;;  %14268 = vmatmul.msk.f32.vlgmr.msrb.gmra.mxu3 %vm794_vm0, %v18930_v34  ;;  %v14099_v14 = vld [vmem:[%s17146_s29 + $0xba8] sm:$0xff] }
 0x396   : > { %14270 = vmatpush.xpose.msk.msra.mxu0 %vm794_vm0, %v14018_v16  ;;  %14304 = vmatpush.xpose.msk.msra.mxu2 %vm794_vm0, %v14050_v7  ;;  %v14131_v16 = vld [vmem:[%s17146_s29 + $0xd58] sm:$0xff]  ;;  %v14098_v7 = vld [vmem:[%s17146_s29 + $0xba0] sm:$0xff] }
 0x397   : > { %14287 = vmatpush.xpose.msk.msra.mxu1 %vm794_vm0, %v14034_v17  ;;  %14321 = vmatpush.xpose.msk.msra.mxu3 %vm794_vm0, %v14066_v18  ;;  %v14082_v17 = vld [vmem:[%s17146_s29 + $0xae0] sm:$0xff]  ;;  %v14114_v18 = vld [vmem:[%s17146_s29 + $0xc90] sm:$0xff] }
 0x39a   : > { %14271 = vmatpush.xpose.msk.msra.mxu0 %vm794_vm0, %v14017_v19  ;;  %14305 = vmatpush.xpose.msk.msra.mxu2 %vm794_vm0, %v14049_v11  ;;  %v14130_v19 = vld [vmem:[%s17146_s29 + $0xd50] sm:$0xff] }
 0x39b   : > { %14288 = vmatpush.xpose.msk.msra.mxu1 %vm794_vm0, %v14033_v20  ;;  %14322 = vmatpush.xpose.msk.msra.mxu3 %vm794_vm0, %v14065_v21  ;;  %v14081_v20 = vld [vmem:[%s17146_s29 + $0xad0] sm:$0xff]  ;;  %v14113_v21 = vld [vmem:[%s17146_s29 + $0xc80] sm:$0xff] }
 0x39c   : > { %v14097_v11 = vld [vmem:[%s17146_s29 + $0xb90] sm:$0xff] }
 0x39e   : > { %14272 = vmatpush.xpose.msk.msra.mxu0 %vm794_vm0, %v14016_v22  ;;  %14306 = vmatpush.xpose.msk.msra.mxu2 %vm794_vm0, %v14048_v24  ;;  %v14129_v22 = vld [vmem:[%s17146_s29 + $0xd40] sm:$0xff]  ;;  %v14096_v24 = vld [vmem:[%s17146_s29 + $0xb88] sm:$0xff] }
 0x39f   : > { %14289 = vmatpush.xpose.msk.msra.mxu1 %vm794_vm0, %v14032_v23  ;;  %14323 = vmatpush.xpose.msk.msra.mxu3 %vm794_vm0, %v14064_v25  ;;  %v14080_v23 = vld [vmem:[%s17146_s29 + $0xac8] sm:$0xff]  ;;  %v14112_v25 = vld [vmem:[%s17146_s29 + $0xc78] sm:$0xff] }
 0x3a2   : > { %14273 = vmatpush.xpose.msk.msra.mxu0 %vm794_vm0, %v14015_v26  ;;  %14307 = vmatpush.xpose.msk.msra.mxu2 %vm794_vm0, %v14047_v28  ;;  %v14128_v26 = vld [vmem:[%s17146_s29 + $0xd38] sm:$0xff] }
 0x3a3   : > { %14290 = vmatpush.xpose.msk.msra.mxu1 %vm794_vm0, %v14031_v27  ;;  %14324 = vmatpush.xpose.msk.msra.mxu3 %vm794_vm0, %v14063_v29  ;;  %v14079_v27 = vld [vmem:[%s17146_s29 + $0xab8] sm:$0xff]  ;;  %v14111_v29 = vld [vmem:[%s17146_s29 + $0xc68] sm:$0xff] }
 0x3a4   : > { %v14095_v28 = vld [vmem:[%s17146_s29 + $0xb78] sm:$0xff] }
 0x3a6   : > { %14274 = vmatpush.xpose.msk.msra.mxu0 %vm794_vm0, %v14014_v30  ;;  %14308 = vmatpush.xpose.msk.msra.mxu2 %vm794_vm0, %v14046_v32  ;;  %v14127_v30 = vld [vmem:[%s17146_s29 + $0xd28] sm:$0xff]  ;;  %v14094_v32 = vld [vmem:[%s17146_s29 + $0xb70] sm:$0xff] }
 0x3a7   : > { %14291 = vmatpush.xpose.msk.msra.mxu1 %vm794_vm0, %v14030_v31  ;;  %14325 = vmatpush.xpose.msk.msra.mxu3 %vm794_vm0, %v14062_v33  ;;  %v14078_v31 = vld [vmem:[%s17146_s29 + $0xab0] sm:$0xff]  ;;  %v14110_v33 = vld [vmem:[%s17146_s29 + $0xc60] sm:$0xff] }
 0x3aa   : > { %14275 = vmatpush.xpose.msk.msra.mxu0 %vm794_vm0, %v14013_v35  ;;  %14309 = vmatpush.xpose.msk.msra.mxu2 %vm794_vm0, %v14045_v37  ;;  %v14126_v35 = vld [vmem:[%s17146_s29 + $0xd20] sm:$0xff] }
 0x3ab   : > { %14292 = vmatpush.xpose.msk.msra.mxu1 %vm794_vm0, %v14029_v36  ;;  %14326 = vmatpush.xpose.msk.msra.mxu3 %vm794_vm0, %v14061_v38  ;;  %v14077_v36 = vld [vmem:[%s17146_s29 + $0xaa0] sm:$0xff]  ;;  %v14109_v38 = vld [vmem:[%s17146_s29 + $0xc50] sm:$0xff] }
 0x3ac   : > { %v14093_v37 = vld [vmem:[%s17146_s29 + $0xb60] sm:$0xff] }
 0x3ae   : > { %14276 = vmatpush.xpose.msk.msra.mxu0 %vm794_vm0, %v14012_v39  ;;  %14310 = vmatpush.xpose.msk.msra.mxu2 %vm794_vm0, %v14044_v41  ;;  %v14125_v39 = vld [vmem:[%s17146_s29 + $0xd10] sm:$0xff]  ;;  %v14092_v41 = vld [vmem:[%s17146_s29 + $0xb58] sm:$0xff] }
 0x3af   : > { %14293 = vmatpush.xpose.msk.msra.mxu1 %vm794_vm0, %v14028_v40  ;;  %14327 = vmatpush.xpose.msk.msra.mxu3 %vm794_vm0, %v14060_v42  ;;  %v14076_v40 = vld [vmem:[%s17146_s29 + $0xa98] sm:$0xff]  ;;  %v14108_v42 = vld [vmem:[%s17146_s29 + $0xc48] sm:$0xff] }
 0x3b2   : > { %14277 = vmatpush.xpose.msk.msra.mxu0 %vm794_vm0, %v14011_v43  ;;  %14311 = vmatpush.xpose.msk.msra.mxu2 %vm794_vm0, %v14043_v45  ;;  %v14124_v43 = vld [vmem:[%s17146_s29 + $0xd08] sm:$0xff] }
 0x3b3   : > { %14294 = vmatpush.xpose.msk.msra.mxu1 %vm794_vm0, %v14027_v44  ;;  %14328 = vmatpush.xpose.msk.msra.mxu3 %vm794_vm0, %v14059_v46  ;;  %v14075_v44 = vld [vmem:[%s17146_s29 + $0xa88] sm:$0xff]  ;;  %v14107_v46 = vld [vmem:[%s17146_s29 + $0xc38] sm:$0xff] }
 0x3b4   : > { %v14091_v45 = vld [vmem:[%s17146_s29 + $0xb48] sm:$0xff] }
 0x3b6   : > { %14278 = vmatpush.xpose.msk.msra.mxu0 %vm794_vm0, %v14010_v47  ;;  %14312 = vmatpush.xpose.msk.msra.mxu2 %vm794_vm0, %v14042_v49  ;;  %v14123_v47 = vld [vmem:[%s17146_s29 + $0xcf8] sm:$0xff]  ;;  %v14090_v49 = vld [vmem:[%s17146_s29 + $0xb40] sm:$0xff] }
 0x3b7   : > { %14295 = vmatpush.xpose.msk.msra.mxu1 %vm794_vm0, %v14026_v48  ;;  %14329 = vmatpush.xpose.msk.msra.mxu3 %vm794_vm0, %v14058_v50  ;;  %v14074_v48 = vld [vmem:[%s17146_s29 + $0xa80] sm:$0xff]  ;;  %v14106_v50 = vld [vmem:[%s17146_s29 + $0xc30] sm:$0xff] }
 0x3ba   : > { %14279 = vmatpush.xpose.msk.msra.mxu0 %vm794_vm0, %v14009_v51  ;;  %14313 = vmatpush.xpose.msk.msra.mxu2 %vm794_vm0, %v14041_v53  ;;  %v14122_v51 = vld [vmem:[%s17146_s29 + $0xcf0] sm:$0xff] }
 0x3bb   : > { %14296 = vmatpush.xpose.msk.msra.mxu1 %vm794_vm0, %v14025_v52  ;;  %14330 = vmatpush.xpose.msk.msra.mxu3 %vm794_vm0, %v14057_v54  ;;  %v14073_v52 = vld [vmem:[%s17146_s29 + $0xa70] sm:$0xff]  ;;  %v14105_v54 = vld [vmem:[%s17146_s29 + $0xc20] sm:$0xff] }
 0x3bc   : > { %v14089_v53 = vld [vmem:[%s17146_s29 + $0xb30] sm:$0xff] }
 0x3be   : > { %14280 = vmatpush.xpose.msk.msra.mxu0 %vm794_vm0, %v14008_v55  ;;  %14314 = vmatpush.xpose.msk.msra.mxu2 %vm794_vm0, %v14040_v57  ;;  %v14121_v55 = vld [vmem:[%s17146_s29 + $0xce0] sm:$0xff]  ;;  %v14088_v57 = vld [vmem:[%s17146_s29 + $0xb28] sm:$0xff] }
 0x3bf   : > { %14297 = vmatpush.xpose.msk.msra.mxu1 %vm794_vm0, %v14024_v56  ;;  %14331 = vmatpush.xpose.msk.msra.mxu3 %vm794_vm0, %v14056_v58  ;;  %v14072_v56 = vld [vmem:[%s17146_s29 + $0xa68] sm:$0xff]  ;;  %v14104_v58 = vld [vmem:[%s17146_s29 + $0xc18] sm:$0xff] }
 0x3c2   : > { %14281 = vmatpush.xpose.msk.msra.mxu0 %vm794_vm0, %v14007_v59  ;;  %14315 = vmatpush.xpose.msk.msra.mxu2 %vm794_vm0, %v14039_v61  ;;  %v14120_v59 = vld [vmem:[%s17146_s29 + $0xcd8] sm:$0xff] }
 0x3c3   : > { %14298 = vmatpush.xpose.msk.msra.mxu1 %vm794_vm0, %v14023_v60  ;;  %14332 = vmatpush.xpose.msk.msra.mxu3 %vm794_vm0, %v14055_v62  ;;  %v14071_v60 = vld [vmem:[%s17146_s29 + $0xa58] sm:$0xff]  ;;  %v14103_v62 = vld [vmem:[%s17146_s29 + $0xc08] sm:$0xff] }
 0x3c4   : > { %v14087_v61 = vld [vmem:[%s17146_s29 + $0xb18] sm:$0xff] }
 0x3c6   : > { %14282 = vmatpush.xpose.msk.msra.mxu0 %vm794_vm0, %v14006_v63  ;;  %14316 = vmatpush.xpose.msk.msra.mxu2 %vm794_vm0, %v14038_v1  ;;  %v14119_v63 = vld [vmem:[%s17146_s29 + $0xcc8] sm:$0xff]  ;;  %v14086_v1 = vld [vmem:[%s17146_s29 + $0xb10] sm:$0xff] }
 0x3c7   : > { %14299 = vmatpush.xpose.msk.msra.mxu1 %vm794_vm0, %v14022_v0  ;;  %14333 = vmatpush.xpose.msk.msra.mxu3 %vm794_vm0, %v14054_v2  ;;  %v14070_v0 = vld [vmem:[%s17146_s29 + $0xa50] sm:$0xff]  ;;  %v14102_v2 = vld [vmem:[%s17146_s29 + $0xc00] sm:$0xff] }
 0x3ca   : > { %14283 = vmatpush.xpose.msk.msra.mxu0 %vm794_vm0, %v14005_v3  ;;  %14317 = vmatpush.xpose.msk.msra.mxu2 %vm794_vm0, %v14037_v5  ;;  %v14118_v3 = vld [vmem:[%s17146_s29 + $0xcc0] sm:$0xff] }
 0x3cb   : > { %14300 = vmatpush.xpose.msk.msra.mxu1 %vm794_vm0, %v14021_v4  ;;  %14334 = vmatpush.xpose.msk.msra.mxu3 %vm794_vm0, %v14053_v6  ;;  %v14069_v4 = vld [vmem:[%s17146_s29 + $0xa40] sm:$0xff]  ;;  %v14101_v6 = vld [vmem:[%s17146_s29 + $0xbf0] sm:$0xff] }
 0x3cc   : > { %v14085_v5 = vld [vmem:[%s17146_s29 + $0xb00] sm:$0xff] }
 0x3ce   : > { %14284 = vmatpush.xpose.msk.msra.mxu0 %vm794_vm0, %v14004_v8  ;;  %14318 = vmatpush.xpose.msk.msra.mxu2 %vm794_vm0, %v14036_v10  ;;  %v14117_v8 = vld [vmem:[%s17146_s29 + $0xcb0] sm:$0xff]  ;;  %v14084_v10 = vld [vmem:[%s17146_s29 + $0xaf8] sm:$0xff] }
 0x3cf   : > { %14301 = vmatpush.xpose.msk.msra.mxu1 %vm794_vm0, %v14020_v9  ;;  %14335 = vmatpush.xpose.msk.msra.mxu3 %vm794_vm0, %v14052_v12  ;;  %v14068_v9 = vld [vmem:[%s17146_s29 + $0xa38] sm:$0xff]  ;;  %v14100_v12 = vld [vmem:[%s17146_s29 + $0xbe8] sm:$0xff] }
 0x3d1   : > { %14285 = vmatmul.msk.f32.vlgmr.msra.gmra.mxu0 %vm794_vm0, %v18930_v34  ;;  %14319 = vmatmul.msk.f32.vlgmr.msra.gmra.mxu2 %vm794_vm0, %v18930_v34 }
 0x3d2   : > { %14337 = vmatpush.xpose.msk.msrb.mxu0 %vm794_vm0, %v14083_v13  ;;  %14371 = vmatpush.xpose.msk.msrb.mxu2 %vm794_vm0, %v14115_v15  ;;  %v14116_v13 = vld [vmem:[%s17146_s29 + $0xca8] sm:$0xff] }
 0x3d3   : > { %14354 = vmatpush.xpose.msk.msrb.mxu1 %vm794_vm0, %v14099_v14  ;;  %14388 = vmatpush.xpose.msk.msrb.mxu3 %vm794_vm0, %v14131_v16  ;;  %v14420_v14 = vld [vmem:[%s17146_s29 + $0xc9] sm:$0xff]  ;;  %v14452_v16 = vld [vmem:[%s17146_s29 + $0x279] sm:$0xff] }
 0x3d4   : > { %14302 = vmatmul.msk.f32.vlgmr.msra.gmra.mxu1 %vm794_vm0, %v18930_v34  ;;  %14336 = vmatmul.msk.f32.vlgmr.msra.gmra.mxu3 %vm794_vm0, %v18930_v34  ;;  %v14436_v15 = vld [vmem:[%s17146_s29 + $0x189] sm:$0xff] }
 0x3d6   : > { %14338 = vmatpush.xpose.msk.msrb.mxu0 %vm794_vm0, %v14082_v17  ;;  %14372 = vmatpush.xpose.msk.msrb.mxu2 %vm794_vm0, %v14114_v18  ;;  %v14468_v17 = vld [vmem:[%s17146_s29 + $0x339] sm:$0xff]  ;;  %v14435_v18 = vld [vmem:[%s17146_s29 + $0x181] sm:$0xff] }
 0x3d7   : > { %14355 = vmatpush.xpose.msk.msrb.mxu1 %vm794_vm0, %v14098_v7  ;;  %14389 = vmatpush.xpose.msk.msrb.mxu3 %vm794_vm0, %v14130_v19  ;;  %v14419_v7 = vld [vmem:[%s17146_s29 + $0xc1] sm:$0xff]  ;;  %v14451_v19 = vld [vmem:[%s17146_s29 + $0x271] sm:$0xff] }
 0x3da   : > { %14339 = vmatpush.xpose.msk.msrb.mxu0 %vm794_vm0, %v14081_v20  ;;  %14373 = vmatpush.xpose.msk.msrb.mxu2 %vm794_vm0, %v14113_v21  ;;  %v14467_v20 = vld [vmem:[%s17146_s29 + $0x331] sm:$0xff] }
 0x3db   : > { %14356 = vmatpush.xpose.msk.msrb.mxu1 %vm794_vm0, %v14097_v11  ;;  %14390 = vmatpush.xpose.msk.msrb.mxu3 %vm794_vm0, %v14129_v22  ;;  %v14418_v11 = vld [vmem:[%s17146_s29 + $0xb1] sm:$0xff]  ;;  %v14450_v22 = vld [vmem:[%s17146_s29 + $0x261] sm:$0xff] }
 0x3dc   : > { %v14434_v21 = vld [vmem:[%s17146_s29 + $0x171] sm:$0xff] }
 0x3de   : > { %14340 = vmatpush.xpose.msk.msrb.mxu0 %vm794_vm0, %v14080_v23  ;;  %14374 = vmatpush.xpose.msk.msrb.mxu2 %vm794_vm0, %v14112_v25  ;;  %v14466_v23 = vld [vmem:[%s17146_s29 + $0x321] sm:$0xff]  ;;  %v14449_v25 = vld [vmem:[%s17146_s29 + $0x259] sm:$0xff] }
 0x3df   : > { %14357 = vmatpush.xpose.msk.msrb.mxu1 %vm794_vm0, %v14096_v24  ;;  %14391 = vmatpush.xpose.msk.msrb.mxu3 %vm794_vm0, %v14128_v26  ;;  %v14433_v24 = vld [vmem:[%s17146_s29 + $0x169] sm:$0xff]  ;;  %v14465_v26 = vld [vmem:[%s17146_s29 + $0x319] sm:$0xff] }
 0x3e2   : > { %14341 = vmatpush.xpose.msk.msrb.mxu0 %vm794_vm0, %v14079_v27  ;;  %14375 = vmatpush.xpose.msk.msrb.mxu2 %vm794_vm0, %v14111_v29  ;;  %v14416_v27 = vld [vmem:[%s17146_s29 + $0x99] sm:$0xff]  ;;  %v14448_v29 = vld [vmem:[%s17146_s29 + $0x249] sm:$0xff] }
 0x3e3   : > { %14358 = vmatpush.xpose.msk.msrb.mxu1 %vm794_vm0, %v14095_v28  ;;  %14392 = vmatpush.xpose.msk.msrb.mxu3 %vm794_vm0, %v14127_v30  ;;  %v14432_v28 = vld [vmem:[%s17146_s29 + $0x159] sm:$0xff]  ;;  %v14464_v30 = vld [vmem:[%s17146_s29 + $0x309] sm:$0xff] }
 0x3e6   : > { %14342 = vmatpush.xpose.msk.msrb.mxu0 %vm794_vm0, %v14078_v31  ;;  %14376 = vmatpush.xpose.msk.msrb.mxu2 %vm794_vm0, %v14110_v33  ;;  %v14415_v31 = vld [vmem:[%s17146_s29 + $0x91] sm:$0xff]  ;;  %v14447_v33 = vld [vmem:[%s17146_s29 + $0x241] sm:$0xff] }
 0x3e7   : > { %14359 = vmatpush.xpose.msk.msrb.mxu1 %vm794_vm0, %v14094_v32  ;;  %14393 = vmatpush.xpose.msk.msrb.mxu3 %vm794_vm0, %v14126_v35  ;;  %v14431_v32 = vld [vmem:[%s17146_s29 + $0x151] sm:$0xff]  ;;  %v14463_v35 = vld [vmem:[%s17146_s29 + $0x301] sm:$0xff] }
 0x3ea   : > { %14343 = vmatpush.xpose.msk.msrb.mxu0 %vm794_vm0, %v14077_v36  ;;  %14377 = vmatpush.xpose.msk.msrb.mxu2 %vm794_vm0, %v14109_v38  ;;  %v14414_v36 = vld [vmem:[%s17146_s29 + $0x81] sm:$0xff]  ;;  %v14446_v38 = vld [vmem:[%s17146_s29 + $0x231] sm:$0xff] }
 0x3eb   : > { %14360 = vmatpush.xpose.msk.msrb.mxu1 %vm794_vm0, %v14093_v37  ;;  %14394 = vmatpush.xpose.msk.msrb.mxu3 %vm794_vm0, %v14125_v39  ;;  %v14430_v37 = vld [vmem:[%s17146_s29 + $0x141] sm:$0xff]  ;;  %v14462_v39 = vld [vmem:[%s17146_s29 + $0x2f1] sm:$0xff] }
 0x3ee   : > { %14344 = vmatpush.xpose.msk.msrb.mxu0 %vm794_vm0, %v14076_v40  ;;  %14378 = vmatpush.xpose.msk.msrb.mxu2 %vm794_vm0, %v14108_v42  ;;  %v14413_v40 = vld [vmem:[%s17146_s29 + $0x79] sm:$0xff]  ;;  %v14445_v42 = vld [vmem:[%s17146_s29 + $0x229] sm:$0xff] }
 0x3ef   : > { %14361 = vmatpush.xpose.msk.msrb.mxu1 %vm794_vm0, %v14092_v41  ;;  %14395 = vmatpush.xpose.msk.msrb.mxu3 %vm794_vm0, %v14124_v43  ;;  %v14429_v41 = vld [vmem:[%s17146_s29 + $0x139] sm:$0xff]  ;;  %v14461_v43 = vld [vmem:[%s17146_s29 + $0x2e9] sm:$0xff] }
 0x3f2   : > { %14345 = vmatpush.xpose.msk.msrb.mxu0 %vm794_vm0, %v14075_v44  ;;  %14379 = vmatpush.xpose.msk.msrb.mxu2 %vm794_vm0, %v14107_v46  ;;  %v14412_v44 = vld [vmem:[%s17146_s29 + $0x69] sm:$0xff]  ;;  %v14444_v46 = vld [vmem:[%s17146_s29 + $0x219] sm:$0xff] }
 0x3f3   : > { %14362 = vmatpush.xpose.msk.msrb.mxu1 %vm794_vm0, %v14091_v45  ;;  %14396 = vmatpush.xpose.msk.msrb.mxu3 %vm794_vm0, %v14123_v47  ;;  %v14428_v45 = vld [vmem:[%s17146_s29 + $0x129] sm:$0xff]  ;;  %v14460_v47 = vld [vmem:[%s17146_s29 + $0x2d9] sm:$0xff] }
 0x3f6   : > { %14346 = vmatpush.xpose.msk.msrb.mxu0 %vm794_vm0, %v14074_v48  ;;  %14380 = vmatpush.xpose.msk.msrb.mxu2 %vm794_vm0, %v14106_v50  ;;  %v14411_v48 = vld [vmem:[%s17146_s29 + $0x61] sm:$0xff]  ;;  %v14443_v50 = vld [vmem:[%s17146_s29 + $0x211] sm:$0xff] }
 0x3f7   : > { %14363 = vmatpush.xpose.msk.msrb.mxu1 %vm794_vm0, %v14090_v49  ;;  %14397 = vmatpush.xpose.msk.msrb.mxu3 %vm794_vm0, %v14122_v51  ;;  %v14427_v49 = vld [vmem:[%s17146_s29 + $0x121] sm:$0xff]  ;;  %v14459_v51 = vld [vmem:[%s17146_s29 + $0x2d1] sm:$0xff] }
 0x3fa   : > { %14347 = vmatpush.xpose.msk.msrb.mxu0 %vm794_vm0, %v14073_v52  ;;  %14381 = vmatpush.xpose.msk.msrb.mxu2 %vm794_vm0, %v14105_v54  ;;  %v14410_v52 = vld [vmem:[%s17146_s29 + $0x51] sm:$0xff]  ;;  %v14442_v54 = vld [vmem:[%s17146_s29 + $0x201] sm:$0xff] }
 0x3fb   : > { %14364 = vmatpush.xpose.msk.msrb.mxu1 %vm794_vm0, %v14089_v53  ;;  %14398 = vmatpush.xpose.msk.msrb.mxu3 %vm794_vm0, %v14121_v55  ;;  %v14426_v53 = vld [vmem:[%s17146_s29 + $0x111] sm:$0xff]  ;;  %v14458_v55 = vld [vmem:[%s17146_s29 + $0x2c1] sm:$0xff] }
 0x3fe   : > { %14348 = vmatpush.xpose.msk.msrb.mxu0 %vm794_vm0, %v14072_v56  ;;  %14382 = vmatpush.xpose.msk.msrb.mxu2 %vm794_vm0, %v14104_v58  ;;  %v14409_v56 = vld [vmem:[%s17146_s29 + $0x49] sm:$0xff]  ;;  %v14441_v58 = vld [vmem:[%s17146_s29 + $0x1f9] sm:$0xff] }
 0x3ff   : > { %14365 = vmatpush.xpose.msk.msrb.mxu1 %vm794_vm0, %v14088_v57  ;;  %14399 = vmatpush.xpose.msk.msrb.mxu3 %vm794_vm0, %v14120_v59  ;;  %v14425_v57 = vld [vmem:[%s17146_s29 + $0x109] sm:$0xff]  ;;  %v14457_v59 = vld [vmem:[%s17146_s29 + $0x2b9] sm:$0xff] }
 0x402   : > { %14349 = vmatpush.xpose.msk.msrb.mxu0 %vm794_vm0, %v14071_v60  ;;  %14383 = vmatpush.xpose.msk.msrb.mxu2 %vm794_vm0, %v14103_v62  ;;  %v14408_v60 = vld [vmem:[%s17146_s29 + $0x39] sm:$0xff]  ;;  %v14440_v62 = vld [vmem:[%s17146_s29 + $0x1e9] sm:$0xff] }
 0x403   : > { %14366 = vmatpush.xpose.msk.msrb.mxu1 %vm794_vm0, %v14087_v61  ;;  %14400 = vmatpush.xpose.msk.msrb.mxu3 %vm794_vm0, %v14119_v63  ;;  %v14424_v61 = vld [vmem:[%s17146_s29 + $0xf9] sm:$0xff]  ;;  %v14456_v63 = vld [vmem:[%s17146_s29 + $0x2a9] sm:$0xff] }
 0x406   : > { %14350 = vmatpush.xpose.msk.msrb.mxu0 %vm794_vm0, %v14070_v0  ;;  %14384 = vmatpush.xpose.msk.msrb.mxu2 %vm794_vm0, %v14102_v2  ;;  %v14407_v0 = vld [vmem:[%s17146_s29 + $0x31] sm:$0xff]  ;;  %v14439_v2 = vld [vmem:[%s17146_s29 + $0x1e1] sm:$0xff] }
 0x407   : > { %14367 = vmatpush.xpose.msk.msrb.mxu1 %vm794_vm0, %v14086_v1  ;;  %14401 = vmatpush.xpose.msk.msrb.mxu3 %vm794_vm0, %v14118_v3  ;;  %v14423_v1 = vld [vmem:[%s17146_s29 + $0xf1] sm:$0xff]  ;;  %v14455_v3 = vld [vmem:[%s17146_s29 + $0x2a1] sm:$0xff] }
 0x40a   : > { %14351 = vmatpush.xpose.msk.msrb.mxu0 %vm794_vm0, %v14069_v4  ;;  %14385 = vmatpush.xpose.msk.msrb.mxu2 %vm794_vm0, %v14101_v6  ;;  %v14406_v4 = vld [vmem:[%s17146_s29 + $0x21] sm:$0xff]  ;;  %v14438_v6 = vld [vmem:[%s17146_s29 + $0x1d1] sm:$0xff] }
 0x40b   : > { %14368 = vmatpush.xpose.msk.msrb.mxu1 %vm794_vm0, %v14085_v5  ;;  %14402 = vmatpush.xpose.msk.msrb.mxu3 %vm794_vm0, %v14117_v8  ;;  %v14422_v5 = vld [vmem:[%s17146_s29 + $0xe1] sm:$0xff]  ;;  %v14454_v8 = vld [vmem:[%s17146_s29 + $0x291] sm:$0xff] }
 0x40e   : > { %14352 = vmatpush.xpose.msk.msrb.mxu0 %vm794_vm0, %v14068_v9  ;;  %14386 = vmatpush.xpose.msk.msrb.mxu2 %vm794_vm0, %v14100_v12  ;;  %v14405_v9 = vld [vmem:[%s17146_s29 + $0x19] sm:$0xff]  ;;  %v14437_v12 = vld [vmem:[%s17146_s29 + $0x1c9] sm:$0xff] }
 0x40f   : > { %14369 = vmatpush.xpose.msk.msrb.mxu1 %vm794_vm0, %v14084_v10  ;;  %14403 = vmatpush.xpose.msk.msrb.mxu3 %vm794_vm0, %v14116_v13  ;;  %v14421_v10 = vld [vmem:[%s17146_s29 + $0xd9] sm:$0xff]  ;;  %v14453_v13 = vld [vmem:[%s17146_s29 + $0x289] sm:$0xff] }
 0x411   : > { %14353 = vmatmul.msk.f32.vlgmr.msrb.gmra.mxu0 %vm794_vm0, %v18930_v34  ;;  %14387 = vmatmul.msk.f32.vlgmr.msrb.gmra.mxu2 %vm794_vm0, %v18930_v34 }
 0x412   : > { %14662 = vmatpush.xpose.msk.msra.mxu0 %vm794_vm0, %v14420_v14  ;;  %14696 = vmatpush.xpose.msk.msra.mxu2 %vm794_vm0, %v14452_v16  ;;  %v14484_v14 = vld [vmem:[%s17146_s29 + $0x429] sm:$0xff]  ;;  %v14516_v16 = vld [vmem:[%s17146_s29 + $0x5d9] sm:$0xff] }
 0x413   : > { %14679 = vmatpush.xpose.msk.msra.mxu1 %vm794_vm0, %v14436_v15  ;;  %14713 = vmatpush.xpose.msk.msra.mxu3 %vm794_vm0, %v14468_v17  ;;  %v14500_v15 = vld [vmem:[%s17146_s29 + $0x4e9] sm:$0xff]  ;;  %v14532_v17 = vld [vmem:[%s17146_s29 + $0x699] sm:$0xff] }
 0x414   : > { %14370 = vmatmul.msk.f32.vlgmr.msrb.gmra.mxu1 %vm794_vm0, %v18930_v34  ;;  %14404 = vmatmul.msk.f32.vlgmr.msrb.gmra.mxu3 %vm794_vm0, %v18930_v34  ;;  %v14417_v34 = vld [vmem:[%s17146_s29 + $0xa9] sm:$0xff] }
 0x416   : > { %14663 = vmatpush.xpose.msk.msra.mxu0 %vm794_vm0, %v14419_v7  ;;  %14697 = vmatpush.xpose.msk.msra.mxu2 %vm794_vm0, %v14451_v19  ;;  %v19479_v7 = vld [vmem:[%s22602_s1 + $0x20] sm:$0xff] }
 0x417   : > { %14680 = vmatpush.xpose.msk.msra.mxu1 %vm794_vm0, %v14435_v18  ;;  %14714 = vmatpush.xpose.msk.msra.mxu3 %vm794_vm0, %v14467_v20  ;;  %v14483_v18 = vld [vmem:[%s17146_s29 + $0x421] sm:$0xff]  ;;  %v14515_v20 = vld [vmem:[%s17146_s29 + $0x5d1] sm:$0xff] }
 0x418   : > { %v14499_v19 = vld [vmem:[%s17146_s29 + $0x4e1] sm:$0xff] }
 0x41a   : > { %14664 = vmatpush.xpose.msk.msra.mxu0 %vm794_vm0, %v14418_v11  ;;  %14698 = vmatpush.xpose.msk.msra.mxu2 %vm794_vm0, %v14450_v22  ;;  %v14531_v11 = vld [vmem:[%s17146_s29 + $0x691] sm:$0xff] }
 0x41b   : > { %14681 = vmatpush.xpose.msk.msra.mxu1 %vm794_vm0, %v14434_v21  ;;  %14715 = vmatpush.xpose.msk.msra.mxu3 %vm794_vm0, %v14466_v23  ;;  %v14482_v21 = vld [vmem:[%s17146_s29 + $0x411] sm:$0xff]  ;;  %v14514_v23 = vld [vmem:[%s17146_s29 + $0x5c1] sm:$0xff] }
 0x41c   : > { %v14498_v22 = vld [vmem:[%s17146_s29 + $0x4d1] sm:$0xff] }
 0x41e   : > { %14665 = vmatpush.xpose.msk.msra.mxu0 %vm794_vm0, %v14417_v34  ;;  %14699 = vmatpush.xpose.msk.msra.mxu2 %vm794_vm0, %v14449_v25  ;;  %v14530_v34 = vld [vmem:[%s17146_s29 + $0x681] sm:$0xff]  ;;  %v14497_v25 = vld [vmem:[%s17146_s29 + $0x4c9] sm:$0xff] }
 0x41f   : > { %14682 = vmatpush.xpose.msk.msra.mxu1 %vm794_vm0, %v14433_v24  ;;  %14716 = vmatpush.xpose.msk.msra.mxu3 %vm794_vm0, %v14465_v26  ;;  %v14481_v24 = vld [vmem:[%s17146_s29 + $0x409] sm:$0xff]  ;;  %v14513_v26 = vld [vmem:[%s17146_s29 + $0x5b9] sm:$0xff] }
 0x422   : > { %14666 = vmatpush.xpose.msk.msra.mxu0 %vm794_vm0, %v14416_v27  ;;  %14700 = vmatpush.xpose.msk.msra.mxu2 %vm794_vm0, %v14448_v29  ;;  %v14529_v27 = vld [vmem:[%s17146_s29 + $0x679] sm:$0xff] }
 0x423   : > { %14683 = vmatpush.xpose.msk.msra.mxu1 %vm794_vm0, %v14432_v28  ;;  %14717 = vmatpush.xpose.msk.msra.mxu3 %vm794_vm0, %v14464_v30  ;;  %v14480_v28 = vld [vmem:[%s17146_s29 + $0x3f9] sm:$0xff]  ;;  %v14512_v30 = vld [vmem:[%s17146_s29 + $0x5a9] sm:$0xff] }
 0x424   : > { %v14496_v29 = vld [vmem:[%s17146_s29 + $0x4b9] sm:$0xff] }
 0x426   : > { %14667 = vmatpush.xpose.msk.msra.mxu0 %vm794_vm0, %v14415_v31  ;;  %14701 = vmatpush.xpose.msk.msra.mxu2 %vm794_vm0, %v14447_v33  ;;  %v14528_v31 = vld [vmem:[%s17146_s29 + $0x669] sm:$0xff]  ;;  %v14495_v33 = vld [vmem:[%s17146_s29 + $0x4b1] sm:$0xff] }
 0x427   : > { %14684 = vmatpush.xpose.msk.msra.mxu1 %vm794_vm0, %v14431_v32  ;;  %14718 = vmatpush.xpose.msk.msra.mxu3 %vm794_vm0, %v14463_v35  ;;  %v14479_v32 = vld [vmem:[%s17146_s29 + $0x3f1] sm:$0xff]  ;;  %v14511_v35 = vld [vmem:[%s17146_s29 + $0x5a1] sm:$0xff] }
 0x42a   : > { %14668 = vmatpush.xpose.msk.msra.mxu0 %vm794_vm0, %v14414_v36  ;;  %14702 = vmatpush.xpose.msk.msra.mxu2 %vm794_vm0, %v14446_v38  ;;  %v14527_v36 = vld [vmem:[%s17146_s29 + $0x661] sm:$0xff] }
 0x42b   : > { %14685 = vmatpush.xpose.msk.msra.mxu1 %vm794_vm0, %v14430_v37  ;;  %14719 = vmatpush.xpose.msk.msra.mxu3 %vm794_vm0, %v14462_v39  ;;  %v14478_v37 = vld [vmem:[%s17146_s29 + $0x3e1] sm:$0xff]  ;;  %v14510_v39 = vld [vmem:[%s17146_s29 + $0x591] sm:$0xff] }
 0x42c   : > { %v14494_v38 = vld [vmem:[%s17146_s29 + $0x4a1] sm:$0xff] }
 0x42e   : > { %14669 = vmatpush.xpose.msk.msra.mxu0 %vm794_vm0, %v14413_v40  ;;  %14703 = vmatpush.xpose.msk.msra.mxu2 %vm794_vm0, %v14445_v42  ;;  %v14526_v40 = vld [vmem:[%s17146_s29 + $0x651] sm:$0xff]  ;;  %v14493_v42 = vld [vmem:[%s17146_s29 + $0x499] sm:$0xff] }
 0x42f   : > { %14686 = vmatpush.xpose.msk.msra.mxu1 %vm794_vm0, %v14429_v41  ;;  %14720 = vmatpush.xpose.msk.msra.mxu3 %vm794_vm0, %v14461_v43  ;;  %v14477_v41 = vld [vmem:[%s17146_s29 + $0x3d9] sm:$0xff]  ;;  %v14509_v43 = vld [vmem:[%s17146_s29 + $0x589] sm:$0xff] }
 0x432   : > { %14670 = vmatpush.xpose.msk.msra.mxu0 %vm794_vm0, %v14412_v44  ;;  %14704 = vmatpush.xpose.msk.msra.mxu2 %vm794_vm0, %v14444_v46  ;;  %v14525_v44 = vld [vmem:[%s17146_s29 + $0x649] sm:$0xff] }
 0x433   : > { %14687 = vmatpush.xpose.msk.msra.mxu1 %vm794_vm0, %v14428_v45  ;;  %14721 = vmatpush.xpose.msk.msra.mxu3 %vm794_vm0, %v14460_v47  ;;  %v14476_v45 = vld [vmem:[%s17146_s29 + $0x3c9] sm:$0xff]  ;;  %v14508_v47 = vld [vmem:[%s17146_s29 + $0x579] sm:$0xff] }
 0x434   : > { %v14492_v46 = vld [vmem:[%s17146_s29 + $0x489] sm:$0xff] }
 0x436   : > { %14671 = vmatpush.xpose.msk.msra.mxu0 %vm794_vm0, %v14411_v48  ;;  %14705 = vmatpush.xpose.msk.msra.mxu2 %vm794_vm0, %v14443_v50  ;;  %v14524_v48 = vld [vmem:[%s17146_s29 + $0x639] sm:$0xff]  ;;  %v14491_v50 = vld [vmem:[%s17146_s29 + $0x481] sm:$0xff] }
 0x437   : > { %14688 = vmatpush.xpose.msk.msra.mxu1 %vm794_vm0, %v14427_v49  ;;  %14722 = vmatpush.xpose.msk.msra.mxu3 %vm794_vm0, %v14459_v51  ;;  %v14475_v49 = vld [vmem:[%s17146_s29 + $0x3c1] sm:$0xff]  ;;  %v14507_v51 = vld [vmem:[%s17146_s29 + $0x571] sm:$0xff] }
 0x43a   : > { %14672 = vmatpush.xpose.msk.msra.mxu0 %vm794_vm0, %v14410_v52  ;;  %14706 = vmatpush.xpose.msk.msra.mxu2 %vm794_vm0, %v14442_v54  ;;  %v14523_v52 = vld [vmem:[%s17146_s29 + $0x631] sm:$0xff] }
 0x43b   : > { %14689 = vmatpush.xpose.msk.msra.mxu1 %vm794_vm0, %v14426_v53  ;;  %14723 = vmatpush.xpose.msk.msra.mxu3 %vm794_vm0, %v14458_v55  ;;  %v14474_v53 = vld [vmem:[%s17146_s29 + $0x3b1] sm:$0xff]  ;;  %v14506_v55 = vld [vmem:[%s17146_s29 + $0x561] sm:$0xff] }
 0x43c   : > { %v14490_v54 = vld [vmem:[%s17146_s29 + $0x471] sm:$0xff] }
 0x43e   : > { %14673 = vmatpush.xpose.msk.msra.mxu0 %vm794_vm0, %v14409_v56  ;;  %14707 = vmatpush.xpose.msk.msra.mxu2 %vm794_vm0, %v14441_v58  ;;  %v14522_v56 = vld [vmem:[%s17146_s29 + $0x621] sm:$0xff]  ;;  %v14489_v58 = vld [vmem:[%s17146_s29 + $0x469] sm:$0xff] }
 0x43f   : > { %14690 = vmatpush.xpose.msk.msra.mxu1 %vm794_vm0, %v14425_v57  ;;  %14724 = vmatpush.xpose.msk.msra.mxu3 %vm794_vm0, %v14457_v59  ;;  %v14473_v57 = vld [vmem:[%s17146_s29 + $0x3a9] sm:$0xff]  ;;  %v14505_v59 = vld [vmem:[%s17146_s29 + $0x559] sm:$0xff] }
 0x442   : > { %14674 = vmatpush.xpose.msk.msra.mxu0 %vm794_vm0, %v14408_v60  ;;  %14708 = vmatpush.xpose.msk.msra.mxu2 %vm794_vm0, %v14440_v62  ;;  %v14521_v60 = vld [vmem:[%s17146_s29 + $0x619] sm:$0xff] }
 0x443   : > { %14691 = vmatpush.xpose.msk.msra.mxu1 %vm794_vm0, %v14424_v61  ;;  %14725 = vmatpush.xpose.msk.msra.mxu3 %vm794_vm0, %v14456_v63  ;;  %v14472_v61 = vld [vmem:[%s17146_s29 + $0x399] sm:$0xff]  ;;  %v14504_v63 = vld [vmem:[%s17146_s29 + $0x549] sm:$0xff] }
 0x444   : > { %v14488_v62 = vld [vmem:[%s17146_s29 + $0x459] sm:$0xff] }
 0x446   : > { %14675 = vmatpush.xpose.msk.msra.mxu0 %vm794_vm0, %v14407_v0  ;;  %14709 = vmatpush.xpose.msk.msra.mxu2 %vm794_vm0, %v14439_v2  ;;  %v14520_v0 = vld [vmem:[%s17146_s29 + $0x609] sm:$0xff]  ;;  %v14487_v2 = vld [vmem:[%s17146_s29 + $0x451] sm:$0xff] }
 0x447   : > { %14692 = vmatpush.xpose.msk.msra.mxu1 %vm794_vm0, %v14423_v1  ;;  %14726 = vmatpush.xpose.msk.msra.mxu3 %vm794_vm0, %v14455_v3  ;;  %v14471_v1 = vld [vmem:[%s17146_s29 + $0x391] sm:$0xff]  ;;  %v14503_v3 = vld [vmem:[%s17146_s29 + $0x541] sm:$0xff] }
 0x44a   : > { %14676 = vmatpush.xpose.msk.msra.mxu0 %vm794_vm0, %v14406_v4  ;;  %14710 = vmatpush.xpose.msk.msra.mxu2 %vm794_vm0, %v14438_v6  ;;  %v14519_v4 = vld [vmem:[%s17146_s29 + $0x601] sm:$0xff] }
 0x44b   : > { %14693 = vmatpush.xpose.msk.msra.mxu1 %vm794_vm0, %v14422_v5  ;;  %14727 = vmatpush.xpose.msk.msra.mxu3 %vm794_vm0, %v14454_v8  ;;  %v14470_v5 = vld [vmem:[%s17146_s29 + $0x381] sm:$0xff]  ;;  %v14502_v8 = vld [vmem:[%s17146_s29 + $0x531] sm:$0xff] }
 0x44c   : > { %v14486_v6 = vld [vmem:[%s17146_s29 + $0x441] sm:$0xff] }
 0x44e   : > { %14677 = vmatpush.xpose.msk.msra.mxu0 %vm794_vm0, %v14405_v9  ;;  %14711 = vmatpush.xpose.msk.msra.mxu2 %vm794_vm0, %v14437_v12  ;;  %v14518_v9 = vld [vmem:[%s17146_s29 + $0x5f1] sm:$0xff]  ;;  %v14485_v12 = vld [vmem:[%s17146_s29 + $0x439] sm:$0xff] }
 0x44f   : > { %14694 = vmatpush.xpose.msk.msra.mxu1 %vm794_vm0, %v14421_v10  ;;  %14728 = vmatpush.xpose.msk.msra.mxu3 %vm794_vm0, %v14453_v13  ;;  %v14469_v10 = vld [vmem:[%s17146_s29 + $0x379] sm:$0xff]  ;;  %v14501_v13 = vld [vmem:[%s17146_s29 + $0x529] sm:$0xff] }
 0x451   : > { %14678 = vmatmul.msk.f32.vlgmr.msra.gmra.mxu0 %vm794_vm0, %v19479_v7  ;;  %14712 = vmatmul.msk.f32.vlgmr.msra.gmra.mxu2 %vm794_vm0, %v19479_v7 }
 0x452   : > { %14730 = vmatpush.xpose.msk.msrb.mxu0 %vm794_vm0, %v14484_v14  ;;  %14764 = vmatpush.xpose.msk.msrb.mxu2 %vm794_vm0, %v14516_v16  ;;  %v14517_v14 = vld [vmem:[%s17146_s29 + $0x5e9] sm:$0xff] }
 0x453   : > { %14747 = vmatpush.xpose.msk.msrb.mxu1 %vm794_vm0, %v14500_v15  ;;  %14781 = vmatpush.xpose.msk.msrb.mxu3 %vm794_vm0, %v14532_v17  ;;  %v14548_v15 = vld [vmem:[%s17146_s29 + $0x789] sm:$0xff]  ;;  %v14580_v17 = vld [vmem:[%s17146_s29 + $0x939] sm:$0xff] }
 0x454   : > { %14695 = vmatmul.msk.f32.vlgmr.msra.gmra.mxu1 %vm794_vm0, %v19479_v7  ;;  %14729 = vmatmul.msk.f32.vlgmr.msra.gmra.mxu3 %vm794_vm0, %v19479_v7  ;;  %v14564_v16 = vld [vmem:[%s17146_s29 + $0x849] sm:$0xff] }
 0x456   : > { %14731 = vmatpush.xpose.msk.msrb.mxu0 %vm794_vm0, %v14483_v18  ;;  %14765 = vmatpush.xpose.msk.msrb.mxu2 %vm794_vm0, %v14515_v20  ;;  %v14596_v18 = vld [vmem:[%s17146_s29 + $0x9f9] sm:$0xff]  ;;  %v14563_v20 = vld [vmem:[%s17146_s29 + $0x841] sm:$0xff] }
 0x457   : > { %14748 = vmatpush.xpose.msk.msrb.mxu1 %vm794_vm0, %v14499_v19  ;;  %14782 = vmatpush.xpose.msk.msrb.mxu3 %vm794_vm0, %v14531_v11  ;;  %v14547_v19 = vld [vmem:[%s17146_s29 + $0x781] sm:$0xff]  ;;  %v14579_v11 = vld [vmem:[%s17146_s29 + $0x931] sm:$0xff] }
 0x45a   : > { %14732 = vmatpush.xpose.msk.msrb.mxu0 %vm794_vm0, %v14482_v21  ;;  %14766 = vmatpush.xpose.msk.msrb.mxu2 %vm794_vm0, %v14514_v23  ;;  %v14595_v21 = vld [vmem:[%s17146_s29 + $0x9f1] sm:$0xff] }
 0x45b   : > { %14749 = vmatpush.xpose.msk.msrb.mxu1 %vm794_vm0, %v14498_v22  ;;  %14783 = vmatpush.xpose.msk.msrb.mxu3 %vm794_vm0, %v14530_v34  ;;  %v14546_v22 = vld [vmem:[%s17146_s29 + $0x771] sm:$0xff]  ;;  %v14578_v34 = vld [vmem:[%s17146_s29 + $0x921] sm:$0xff] }
 0x45c   : > { %v14562_v23 = vld [vmem:[%s17146_s29 + $0x831] sm:$0xff] }
 0x45e   : > { %14733 = vmatpush.xpose.msk.msrb.mxu0 %vm794_vm0, %v14481_v24  ;;  %14767 = vmatpush.xpose.msk.msrb.mxu2 %vm794_vm0, %v14513_v26  ;;  %v14594_v24 = vld [vmem:[%s17146_s29 + $0x9e1] sm:$0xff]  ;;  %v14561_v26 = vld [vmem:[%s17146_s29 + $0x829] sm:$0xff] }
 0x45f   : > { %14750 = vmatpush.xpose.msk.msrb.mxu1 %vm794_vm0, %v14497_v25  ;;  %14784 = vmatpush.xpose.msk.msrb.mxu3 %vm794_vm0, %v14529_v27  ;;  %v14545_v25 = vld [vmem:[%s17146_s29 + $0x769] sm:$0xff]  ;;  %v14577_v27 = vld [vmem:[%s17146_s29 + $0x919] sm:$0xff] }
 0x462   : > { %14734 = vmatpush.xpose.msk.msrb.mxu0 %vm794_vm0, %v14480_v28  ;;  %14768 = vmatpush.xpose.msk.msrb.mxu2 %vm794_vm0, %v14512_v30  ;;  %v14593_v28 = vld [vmem:[%s17146_s29 + $0x9d9] sm:$0xff] }
 0x463   : > { %14751 = vmatpush.xpose.msk.msrb.mxu1 %vm794_vm0, %v14496_v29  ;;  %14785 = vmatpush.xpose.msk.msrb.mxu3 %vm794_vm0, %v14528_v31  ;;  %v14544_v29 = vld [vmem:[%s17146_s29 + $0x759] sm:$0xff]  ;;  %v14576_v31 = vld [vmem:[%s17146_s29 + $0x909] sm:$0xff] }
 0x464   : > { %v14560_v30 = vld [vmem:[%s17146_s29 + $0x819] sm:$0xff] }
 0x466   : > { %14735 = vmatpush.xpose.msk.msrb.mxu0 %vm794_vm0, %v14479_v32  ;;  %14769 = vmatpush.xpose.msk.msrb.mxu2 %vm794_vm0, %v14511_v35  ;;  %v14592_v32 = vld [vmem:[%s17146_s29 + $0x9c9] sm:$0xff]  ;;  %v14559_v35 = vld [vmem:[%s17146_s29 + $0x811] sm:$0xff] }
 0x467   : > { %14752 = vmatpush.xpose.msk.msrb.mxu1 %vm794_vm0, %v14495_v33  ;;  %14786 = vmatpush.xpose.msk.msrb.mxu3 %vm794_vm0, %v14527_v36  ;;  %v14543_v33 = vld [vmem:[%s17146_s29 + $0x751] sm:$0xff]  ;;  %v14575_v36 = vld [vmem:[%s17146_s29 + $0x901] sm:$0xff] }
 0x46a   : > { %14736 = vmatpush.xpose.msk.msrb.mxu0 %vm794_vm0, %v14478_v37  ;;  %14770 = vmatpush.xpose.msk.msrb.mxu2 %vm794_vm0, %v14510_v39  ;;  %v14591_v37 = vld [vmem:[%s17146_s29 + $0x9c1] sm:$0xff] }
 0x46b   : > { %14753 = vmatpush.xpose.msk.msrb.mxu1 %vm794_vm0, %v14494_v38  ;;  %14787 = vmatpush.xpose.msk.msrb.mxu3 %vm794_vm0, %v14526_v40  ;;  %v14542_v38 = vld [vmem:[%s17146_s29 + $0x741] sm:$0xff]  ;;  %v14574_v40 = vld [vmem:[%s17146_s29 + $0x8f1] sm:$0xff] }
 0x46c   : > { %v14558_v39 = vld [vmem:[%s17146_s29 + $0x801] sm:$0xff] }
 0x46e   : > { %14737 = vmatpush.xpose.msk.msrb.mxu0 %vm794_vm0, %v14477_v41  ;;  %14771 = vmatpush.xpose.msk.msrb.mxu2 %vm794_vm0, %v14509_v43  ;;  %v14590_v41 = vld [vmem:[%s17146_s29 + $0x9b1] sm:$0xff]  ;;  %v14557_v43 = vld [vmem:[%s17146_s29 + $0x7f9] sm:$0xff] }
 0x46f   : > { %14754 = vmatpush.xpose.msk.msrb.mxu1 %vm794_vm0, %v14493_v42  ;;  %14788 = vmatpush.xpose.msk.msrb.mxu3 %vm794_vm0, %v14525_v44  ;;  %v14541_v42 = vld [vmem:[%s17146_s29 + $0x739] sm:$0xff]  ;;  %v14573_v44 = vld [vmem:[%s17146_s29 + $0x8e9] sm:$0xff] }
 0x472   : > { %14738 = vmatpush.xpose.msk.msrb.mxu0 %vm794_vm0, %v14476_v45  ;;  %14772 = vmatpush.xpose.msk.msrb.mxu2 %vm794_vm0, %v14508_v47  ;;  %v14589_v45 = vld [vmem:[%s17146_s29 + $0x9a9] sm:$0xff] }
 0x473   : > { %14755 = vmatpush.xpose.msk.msrb.mxu1 %vm794_vm0, %v14492_v46  ;;  %14789 = vmatpush.xpose.msk.msrb.mxu3 %vm794_vm0, %v14524_v48  ;;  %v14540_v46 = vld [vmem:[%s17146_s29 + $0x729] sm:$0xff]  ;;  %v14572_v48 = vld [vmem:[%s17146_s29 + $0x8d9] sm:$0xff] }
 0x474   : > { %v14556_v47 = vld [vmem:[%s17146_s29 + $0x7e9] sm:$0xff] }
 0x476   : > { %14739 = vmatpush.xpose.msk.msrb.mxu0 %vm794_vm0, %v14475_v49  ;;  %14773 = vmatpush.xpose.msk.msrb.mxu2 %vm794_vm0, %v14507_v51  ;;  %v14588_v49 = vld [vmem:[%s17146_s29 + $0x999] sm:$0xff]  ;;  %v14555_v51 = vld [vmem:[%s17146_s29 + $0x7e1] sm:$0xff] }
 0x477   : > { %14756 = vmatpush.xpose.msk.msrb.mxu1 %vm794_vm0, %v14491_v50  ;;  %14790 = vmatpush.xpose.msk.msrb.mxu3 %vm794_vm0, %v14523_v52  ;;  %v14539_v50 = vld [vmem:[%s17146_s29 + $0x721] sm:$0xff]  ;;  %v14571_v52 = vld [vmem:[%s17146_s29 + $0x8d1] sm:$0xff] }
 0x47a   : > { %14740 = vmatpush.xpose.msk.msrb.mxu0 %vm794_vm0, %v14474_v53  ;;  %14774 = vmatpush.xpose.msk.msrb.mxu2 %vm794_vm0, %v14506_v55  ;;  %v14587_v53 = vld [vmem:[%s17146_s29 + $0x991] sm:$0xff] }
 0x47b   : > { %14757 = vmatpush.xpose.msk.msrb.mxu1 %vm794_vm0, %v14490_v54  ;;  %14791 = vmatpush.xpose.msk.msrb.mxu3 %vm794_vm0, %v14522_v56  ;;  %v14538_v54 = vld [vmem:[%s17146_s29 + $0x711] sm:$0xff]  ;;  %v14570_v56 = vld [vmem:[%s17146_s29 + $0x8c1] sm:$0xff] }
 0x47c   : > { %v14554_v55 = vld [vmem:[%s17146_s29 + $0x7d1] sm:$0xff] }
 0x47e   : > { %14741 = vmatpush.xpose.msk.msrb.mxu0 %vm794_vm0, %v14473_v57  ;;  %14775 = vmatpush.xpose.msk.msrb.mxu2 %vm794_vm0, %v14505_v59  ;;  %v14586_v57 = vld [vmem:[%s17146_s29 + $0x981] sm:$0xff]  ;;  %v14553_v59 = vld [vmem:[%s17146_s29 + $0x7c9] sm:$0xff] }
 0x47f   : > { %14758 = vmatpush.xpose.msk.msrb.mxu1 %vm794_vm0, %v14489_v58  ;;  %14792 = vmatpush.xpose.msk.msrb.mxu3 %vm794_vm0, %v14521_v60  ;;  %v14537_v58 = vld [vmem:[%s17146_s29 + $0x709] sm:$0xff]  ;;  %v14569_v60 = vld [vmem:[%s17146_s29 + $0x8b9] sm:$0xff] }
 0x482   : > { %14742 = vmatpush.xpose.msk.msrb.mxu0 %vm794_vm0, %v14472_v61  ;;  %14776 = vmatpush.xpose.msk.msrb.mxu2 %vm794_vm0, %v14504_v63  ;;  %v14585_v61 = vld [vmem:[%s17146_s29 + $0x979] sm:$0xff] }
 0x483   : > { %14759 = vmatpush.xpose.msk.msrb.mxu1 %vm794_vm0, %v14488_v62  ;;  %14793 = vmatpush.xpose.msk.msrb.mxu3 %vm794_vm0, %v14520_v0  ;;  %v14536_v62 = vld [vmem:[%s17146_s29 + $0x6f9] sm:$0xff]  ;;  %v14568_v0 = vld [vmem:[%s17146_s29 + $0x8a9] sm:$0xff] }
 0x484   : > { %v14552_v63 = vld [vmem:[%s17146_s29 + $0x7b9] sm:$0xff] }
 0x486   : > { %14743 = vmatpush.xpose.msk.msrb.mxu0 %vm794_vm0, %v14471_v1  ;;  %14777 = vmatpush.xpose.msk.msrb.mxu2 %vm794_vm0, %v14503_v3  ;;  %v14584_v1 = vld [vmem:[%s17146_s29 + $0x969] sm:$0xff]  ;;  %v14551_v3 = vld [vmem:[%s17146_s29 + $0x7b1] sm:$0xff] }
 0x487   : > { %14760 = vmatpush.xpose.msk.msrb.mxu1 %vm794_vm0, %v14487_v2  ;;  %14794 = vmatpush.xpose.msk.msrb.mxu3 %vm794_vm0, %v14519_v4  ;;  %v14535_v2 = vld [vmem:[%s17146_s29 + $0x6f1] sm:$0xff]  ;;  %v14567_v4 = vld [vmem:[%s17146_s29 + $0x8a1] sm:$0xff] }
 0x48a   : > { %14744 = vmatpush.xpose.msk.msrb.mxu0 %vm794_vm0, %v14470_v5  ;;  %14778 = vmatpush.xpose.msk.msrb.mxu2 %vm794_vm0, %v14502_v8  ;;  %v14583_v5 = vld [vmem:[%s17146_s29 + $0x961] sm:$0xff] }
 0x48b   : > { %14761 = vmatpush.xpose.msk.msrb.mxu1 %vm794_vm0, %v14486_v6  ;;  %14795 = vmatpush.xpose.msk.msrb.mxu3 %vm794_vm0, %v14518_v9  ;;  %v14534_v6 = vld [vmem:[%s17146_s29 + $0x6e1] sm:$0xff]  ;;  %v14566_v9 = vld [vmem:[%s17146_s29 + $0x891] sm:$0xff] }
 0x48c   : > { %v14550_v8 = vld [vmem:[%s17146_s29 + $0x7a1] sm:$0xff] }
 0x48e   : > { %14745 = vmatpush.xpose.msk.msrb.mxu0 %vm794_vm0, %v14469_v10  ;;  %14779 = vmatpush.xpose.msk.msrb.mxu2 %vm794_vm0, %v14501_v13  ;;  %v14582_v10 = vld [vmem:[%s17146_s29 + $0x951] sm:$0xff]  ;;  %v14549_v13 = vld [vmem:[%s17146_s29 + $0x799] sm:$0xff] }
 0x48f   : > { %14762 = vmatpush.xpose.msk.msrb.mxu1 %vm794_vm0, %v14485_v12  ;;  %14796 = vmatpush.xpose.msk.msrb.mxu3 %vm794_vm0, %v14517_v14  ;;  %v14533_v12 = vld [vmem:[%s17146_s29 + $0x6d9] sm:$0xff]  ;;  %v14565_v14 = vld [vmem:[%s17146_s29 + $0x889] sm:$0xff] }
 0x491   : > { %14746 = vmatmul.msk.f32.vlgmr.msrb.gmra.mxu0 %vm794_vm0, %v19479_v7  ;;  %14780 = vmatmul.msk.f32.vlgmr.msrb.gmra.mxu2 %vm794_vm0, %v19479_v7 }
 0x492   : > { %14798 = vmatpush.xpose.msk.msra.mxu0 %vm794_vm0, %v14548_v15  ;;  %14832 = vmatpush.xpose.msk.msra.mxu2 %vm794_vm0, %v14580_v17  ;;  %v14581_v15 = vld [vmem:[%s17146_s29 + $0x949] sm:$0xff] }
 0x493   : > { %14815 = vmatpush.xpose.msk.msra.mxu1 %vm794_vm0, %v14564_v16  ;;  %14849 = vmatpush.xpose.msk.msra.mxu3 %vm794_vm0, %v14596_v18  ;;  %v14612_v16 = vld [vmem:[%s17146_s29 + $0xae9] sm:$0xff]  ;;  %v14644_v18 = vld [vmem:[%s17146_s29 + $0xc99] sm:$0xff] }
 0x494   : > { %14763 = vmatmul.msk.f32.vlgmr.msrb.gmra.mxu1 %vm794_vm0, %v19479_v7  ;;  %14797 = vmatmul.msk.f32.vlgmr.msrb.gmra.mxu3 %vm794_vm0, %v19479_v7  ;;  %v14628_v17 = vld [vmem:[%s17146_s29 + $0xba9] sm:$0xff] }
 0x496   : > { %14799 = vmatpush.xpose.msk.msra.mxu0 %vm794_vm0, %v14547_v19  ;;  %14833 = vmatpush.xpose.msk.msra.mxu2 %vm794_vm0, %v14579_v11  ;;  %v14660_v19 = vld [vmem:[%s17146_s29 + $0xd59] sm:$0xff]  ;;  %v14627_v11 = vld [vmem:[%s17146_s29 + $0xba1] sm:$0xff] }
 0x497   : > { %14816 = vmatpush.xpose.msk.msra.mxu1 %vm794_vm0, %v14563_v20  ;;  %14850 = vmatpush.xpose.msk.msra.mxu3 %vm794_vm0, %v14595_v21  ;;  %v14611_v20 = vld [vmem:[%s17146_s29 + $0xae1] sm:$0xff]  ;;  %v14643_v21 = vld [vmem:[%s17146_s29 + $0xc91] sm:$0xff] }
 0x49a   : > { %14800 = vmatpush.xpose.msk.msra.mxu0 %vm794_vm0, %v14546_v22  ;;  %14834 = vmatpush.xpose.msk.msra.mxu2 %vm794_vm0, %v14578_v34  ;;  %v14659_v22 = vld [vmem:[%s17146_s29 + $0xd51] sm:$0xff] }
 0x49b   : > { %14817 = vmatpush.xpose.msk.msra.mxu1 %vm794_vm0, %v14562_v23  ;;  %14851 = vmatpush.xpose.msk.msra.mxu3 %vm794_vm0, %v14594_v24  ;;  %v14610_v23 = vld [vmem:[%s17146_s29 + $0xad1] sm:$0xff]  ;;  %v14642_v24 = vld [vmem:[%s17146_s29 + $0xc81] sm:$0xff] }
 0x49c   : > { %v14626_v34 = vld [vmem:[%s17146_s29 + $0xb91] sm:$0xff] }
 0x49e   : > { %14801 = vmatpush.xpose.msk.msra.mxu0 %vm794_vm0, %v14545_v25  ;;  %14835 = vmatpush.xpose.msk.msra.mxu2 %vm794_vm0, %v14577_v27  ;;  %v14658_v25 = vld [vmem:[%s17146_s29 + $0xd41] sm:$0xff]  ;;  %v14625_v27 = vld [vmem:[%s17146_s29 + $0xb89] sm:$0xff] }
 0x49f   : > { %14818 = vmatpush.xpose.msk.msra.mxu1 %vm794_vm0, %v14561_v26  ;;  %14852 = vmatpush.xpose.msk.msra.mxu3 %vm794_vm0, %v14593_v28  ;;  %v14609_v26 = vld [vmem:[%s17146_s29 + $0xac9] sm:$0xff]  ;;  %v14641_v28 = vld [vmem:[%s17146_s29 + $0xc79] sm:$0xff] }
 0x4a2   : > { %14802 = vmatpush.xpose.msk.msra.mxu0 %vm794_vm0, %v14544_v29  ;;  %14836 = vmatpush.xpose.msk.msra.mxu2 %vm794_vm0, %v14576_v31  ;;  %v14657_v29 = vld [vmem:[%s17146_s29 + $0xd39] sm:$0xff] }
 0x4a3   : > { %14819 = vmatpush.xpose.msk.msra.mxu1 %vm794_vm0, %v14560_v30  ;;  %14853 = vmatpush.xpose.msk.msra.mxu3 %vm794_vm0, %v14592_v32  ;;  %v14608_v30 = vld [vmem:[%s17146_s29 + $0xab9] sm:$0xff]  ;;  %v14640_v32 = vld [vmem:[%s17146_s29 + $0xc69] sm:$0xff] }
 0x4a4   : > { %v14624_v31 = vld [vmem:[%s17146_s29 + $0xb79] sm:$0xff] }
 0x4a6   : > { %14803 = vmatpush.xpose.msk.msra.mxu0 %vm794_vm0, %v14543_v33  ;;  %14837 = vmatpush.xpose.msk.msra.mxu2 %vm794_vm0, %v14575_v36  ;;  %v14656_v33 = vld [vmem:[%s17146_s29 + $0xd29] sm:$0xff]  ;;  %v14623_v36 = vld [vmem:[%s17146_s29 + $0xb71] sm:$0xff] }
 0x4a7   : > { %14820 = vmatpush.xpose.msk.msra.mxu1 %vm794_vm0, %v14559_v35  ;;  %14854 = vmatpush.xpose.msk.msra.mxu3 %vm794_vm0, %v14591_v37  ;;  %v14607_v35 = vld [vmem:[%s17146_s29 + $0xab1] sm:$0xff]  ;;  %v14639_v37 = vld [vmem:[%s17146_s29 + $0xc61] sm:$0xff] }
 0x4aa   : > { %14804 = vmatpush.xpose.msk.msra.mxu0 %vm794_vm0, %v14542_v38  ;;  %14838 = vmatpush.xpose.msk.msra.mxu2 %vm794_vm0, %v14574_v40  ;;  %v14655_v38 = vld [vmem:[%s17146_s29 + $0xd21] sm:$0xff] }
 0x4ab   : > { %14821 = vmatpush.xpose.msk.msra.mxu1 %vm794_vm0, %v14558_v39  ;;  %14855 = vmatpush.xpose.msk.msra.mxu3 %vm794_vm0, %v14590_v41  ;;  %v14606_v39 = vld [vmem:[%s17146_s29 + $0xaa1] sm:$0xff]  ;;  %v14638_v41 = vld [vmem:[%s17146_s29 + $0xc51] sm:$0xff] }
 0x4ac   : > { %v14622_v40 = vld [vmem:[%s17146_s29 + $0xb61] sm:$0xff] }
 0x4ae   : > { %14805 = vmatpush.xpose.msk.msra.mxu0 %vm794_vm0, %v14541_v42  ;;  %14839 = vmatpush.xpose.msk.msra.mxu2 %vm794_vm0, %v14573_v44  ;;  %v14654_v42 = vld [vmem:[%s17146_s29 + $0xd11] sm:$0xff]  ;;  %v14621_v44 = vld [vmem:[%s17146_s29 + $0xb59] sm:$0xff] }
 0x4af   : > { %14822 = vmatpush.xpose.msk.msra.mxu1 %vm794_vm0, %v14557_v43  ;;  %14856 = vmatpush.xpose.msk.msra.mxu3 %vm794_vm0, %v14589_v45  ;;  %v14605_v43 = vld [vmem:[%s17146_s29 + $0xa99] sm:$0xff]  ;;  %v14637_v45 = vld [vmem:[%s17146_s29 + $0xc49] sm:$0xff] }
 0x4b2   : > { %14806 = vmatpush.xpose.msk.msra.mxu0 %vm794_vm0, %v14540_v46  ;;  %14840 = vmatpush.xpose.msk.msra.mxu2 %vm794_vm0, %v14572_v48  ;;  %v14653_v46 = vld [vmem:[%s17146_s29 + $0xd09] sm:$0xff] }
 0x4b3   : > { %14823 = vmatpush.xpose.msk.msra.mxu1 %vm794_vm0, %v14556_v47  ;;  %14857 = vmatpush.xpose.msk.msra.mxu3 %vm794_vm0, %v14588_v49  ;;  %v14604_v47 = vld [vmem:[%s17146_s29 + $0xa89] sm:$0xff]  ;;  %v14636_v49 = vld [vmem:[%s17146_s29 + $0xc39] sm:$0xff] }
 0x4b4   : > { %v14620_v48 = vld [vmem:[%s17146_s29 + $0xb49] sm:$0xff] }
 0x4b6   : > { %14807 = vmatpush.xpose.msk.msra.mxu0 %vm794_vm0, %v14539_v50  ;;  %14841 = vmatpush.xpose.msk.msra.mxu2 %vm794_vm0, %v14571_v52  ;;  %v14652_v50 = vld [vmem:[%s17146_s29 + $0xcf9] sm:$0xff]  ;;  %v14619_v52 = vld [vmem:[%s17146_s29 + $0xb41] sm:$0xff] }
 0x4b7   : > { %14824 = vmatpush.xpose.msk.msra.mxu1 %vm794_vm0, %v14555_v51  ;;  %14858 = vmatpush.xpose.msk.msra.mxu3 %vm794_vm0, %v14587_v53  ;;  %v14603_v51 = vld [vmem:[%s17146_s29 + $0xa81] sm:$0xff]  ;;  %v14635_v53 = vld [vmem:[%s17146_s29 + $0xc31] sm:$0xff] }
 0x4ba   : > { %14808 = vmatpush.xpose.msk.msra.mxu0 %vm794_vm0, %v14538_v54  ;;  %14842 = vmatpush.xpose.msk.msra.mxu2 %vm794_vm0, %v14570_v56  ;;  %v14651_v54 = vld [vmem:[%s17146_s29 + $0xcf1] sm:$0xff] }
 0x4bb   : > { %14825 = vmatpush.xpose.msk.msra.mxu1 %vm794_vm0, %v14554_v55  ;;  %14859 = vmatpush.xpose.msk.msra.mxu3 %vm794_vm0, %v14586_v57  ;;  %v14602_v55 = vld [vmem:[%s17146_s29 + $0xa71] sm:$0xff]  ;;  %v14634_v57 = vld [vmem:[%s17146_s29 + $0xc21] sm:$0xff] }
 0x4bc   : > { %v14618_v56 = vld [vmem:[%s17146_s29 + $0xb31] sm:$0xff] }
 0x4be   : > { %14809 = vmatpush.xpose.msk.msra.mxu0 %vm794_vm0, %v14537_v58  ;;  %14843 = vmatpush.xpose.msk.msra.mxu2 %vm794_vm0, %v14569_v60  ;;  %v14650_v58 = vld [vmem:[%s17146_s29 + $0xce1] sm:$0xff]  ;;  %v14617_v60 = vld [vmem:[%s17146_s29 + $0xb29] sm:$0xff] }
 0x4bf   : > { %14826 = vmatpush.xpose.msk.msra.mxu1 %vm794_vm0, %v14553_v59  ;;  %14860 = vmatpush.xpose.msk.msra.mxu3 %vm794_vm0, %v14585_v61  ;;  %v14601_v59 = vld [vmem:[%s17146_s29 + $0xa69] sm:$0xff]  ;;  %v14633_v61 = vld [vmem:[%s17146_s29 + $0xc19] sm:$0xff] }
 0x4c2   : > { %14810 = vmatpush.xpose.msk.msra.mxu0 %vm794_vm0, %v14536_v62  ;;  %14844 = vmatpush.xpose.msk.msra.mxu2 %vm794_vm0, %v14568_v0  ;;  %v14649_v62 = vld [vmem:[%s17146_s29 + $0xcd9] sm:$0xff] }
 0x4c3   : > { %14827 = vmatpush.xpose.msk.msra.mxu1 %vm794_vm0, %v14552_v63  ;;  %14861 = vmatpush.xpose.msk.msra.mxu3 %vm794_vm0, %v14584_v1  ;;  %v14600_v63 = vld [vmem:[%s17146_s29 + $0xa59] sm:$0xff]  ;;  %v14632_v1 = vld [vmem:[%s17146_s29 + $0xc09] sm:$0xff] }
 0x4c4   : > { %v14616_v0 = vld [vmem:[%s17146_s29 + $0xb19] sm:$0xff] }
 0x4c6   : > { %14811 = vmatpush.xpose.msk.msra.mxu0 %vm794_vm0, %v14535_v2  ;;  %14845 = vmatpush.xpose.msk.msra.mxu2 %vm794_vm0, %v14567_v4  ;;  %v14648_v2 = vld [vmem:[%s17146_s29 + $0xcc9] sm:$0xff]  ;;  %v14615_v4 = vld [vmem:[%s17146_s29 + $0xb11] sm:$0xff] }
 0x4c7   : > { %14828 = vmatpush.xpose.msk.msra.mxu1 %vm794_vm0, %v14551_v3  ;;  %14862 = vmatpush.xpose.msk.msra.mxu3 %vm794_vm0, %v14583_v5  ;;  %v14599_v3 = vld [vmem:[%s17146_s29 + $0xa51] sm:$0xff]  ;;  %v14631_v5 = vld [vmem:[%s17146_s29 + $0xc01] sm:$0xff] }
 0x4ca   : > { %14812 = vmatpush.xpose.msk.msra.mxu0 %vm794_vm0, %v14534_v6  ;;  %14846 = vmatpush.xpose.msk.msra.mxu2 %vm794_vm0, %v14566_v9  ;;  %v14647_v6 = vld [vmem:[%s17146_s29 + $0xcc1] sm:$0xff] }
 0x4cb   : > { %14829 = vmatpush.xpose.msk.msra.mxu1 %vm794_vm0, %v14550_v8  ;;  %14863 = vmatpush.xpose.msk.msra.mxu3 %vm794_vm0, %v14582_v10  ;;  %v14598_v8 = vld [vmem:[%s17146_s29 + $0xa41] sm:$0xff]  ;;  %v14630_v10 = vld [vmem:[%s17146_s29 + $0xbf1] sm:$0xff] }
 0x4cc   : > { %v14614_v9 = vld [vmem:[%s17146_s29 + $0xb01] sm:$0xff] }
 0x4ce   : > { %14813 = vmatpush.xpose.msk.msra.mxu0 %vm794_vm0, %v14533_v12  ;;  %14847 = vmatpush.xpose.msk.msra.mxu2 %vm794_vm0, %v14565_v14  ;;  %v14646_v12 = vld [vmem:[%s17146_s29 + $0xcb1] sm:$0xff]  ;;  %v14613_v14 = vld [vmem:[%s17146_s29 + $0xaf9] sm:$0xff] }
 0x4cf   : > { %14830 = vmatpush.xpose.msk.msra.mxu1 %vm794_vm0, %v14549_v13  ;;  %14864 = vmatpush.xpose.msk.msra.mxu3 %vm794_vm0, %v14581_v15  ;;  %v14597_v13 = vld [vmem:[%s17146_s29 + $0xa39] sm:$0xff]  ;;  %v14629_v15 = vld [vmem:[%s17146_s29 + $0xbe9] sm:$0xff] }
 0x4d1   : > { %14814 = vmatmul.msk.f32.vlgmr.msra.gmra.mxu0 %vm794_vm0, %v19479_v7  ;;  %14848 = vmatmul.msk.f32.vlgmr.msra.gmra.mxu2 %vm794_vm0, %v19479_v7 }
 0x4d2   : > { %14866 = vmatpush.xpose.msk.msrb.mxu0 %vm794_vm0, %v14612_v16  ;;  %14900 = vmatpush.xpose.msk.msrb.mxu2 %vm794_vm0, %v14644_v18  ;;  %v14645_v16 = vld [vmem:[%s17146_s29 + $0xca9] sm:$0xff] }
 0x4d3   : > { %14883 = vmatpush.xpose.msk.msrb.mxu1 %vm794_vm0, %v14628_v17  ;;  %14917 = vmatpush.xpose.msk.msrb.mxu3 %vm794_vm0, %v14660_v19  ;;  %v14949_v17 = vld [vmem:[%s17146_s29 + $0xca] sm:$0xff]  ;;  %v14981_v19 = vld [vmem:[%s17146_s29 + $0x27a] sm:$0xff] }
 0x4d4   : > { %14831 = vmatmul.msk.f32.vlgmr.msra.gmra.mxu1 %vm794_vm0, %v19479_v7  ;;  %14865 = vmatmul.msk.f32.vlgmr.msra.gmra.mxu3 %vm794_vm0, %v19479_v7  ;;  %v14965_v18 = vld [vmem:[%s17146_s29 + $0x18a] sm:$0xff] }
 0x4d6   : > { %14867 = vmatpush.xpose.msk.msrb.mxu0 %vm794_vm0, %v14611_v20  ;;  %14901 = vmatpush.xpose.msk.msrb.mxu2 %vm794_vm0, %v14643_v21  ;;  %v14997_v20 = vld [vmem:[%s17146_s29 + $0x33a] sm:$0xff]  ;;  %v14964_v21 = vld [vmem:[%s17146_s29 + $0x182] sm:$0xff] }
 0x4d7   : > { %14884 = vmatpush.xpose.msk.msrb.mxu1 %vm794_vm0, %v14627_v11  ;;  %14918 = vmatpush.xpose.msk.msrb.mxu3 %vm794_vm0, %v14659_v22  ;;  %v14948_v11 = vld [vmem:[%s17146_s29 + $0xc2] sm:$0xff]  ;;  %v14980_v22 = vld [vmem:[%s17146_s29 + $0x272] sm:$0xff] }
 0x4da   : > { %14868 = vmatpush.xpose.msk.msrb.mxu0 %vm794_vm0, %v14610_v23  ;;  %14902 = vmatpush.xpose.msk.msrb.mxu2 %vm794_vm0, %v14642_v24  ;;  %v14996_v23 = vld [vmem:[%s17146_s29 + $0x332] sm:$0xff] }
 0x4db   : > { %14885 = vmatpush.xpose.msk.msrb.mxu1 %vm794_vm0, %v14626_v34  ;;  %14919 = vmatpush.xpose.msk.msrb.mxu3 %vm794_vm0, %v14658_v25  ;;  %v14947_v34 = vld [vmem:[%s17146_s29 + $0xb2] sm:$0xff]  ;;  %v14979_v25 = vld [vmem:[%s17146_s29 + $0x262] sm:$0xff] }
 0x4dc   : > { %v14963_v24 = vld [vmem:[%s17146_s29 + $0x172] sm:$0xff] }
 0x4de   : > { %14869 = vmatpush.xpose.msk.msrb.mxu0 %vm794_vm0, %v14609_v26  ;;  %14903 = vmatpush.xpose.msk.msrb.mxu2 %vm794_vm0, %v14641_v28  ;;  %v14995_v26 = vld [vmem:[%s17146_s29 + $0x322] sm:$0xff]  ;;  %v14978_v28 = vld [vmem:[%s17146_s29 + $0x25a] sm:$0xff] }
 0x4df   : > { %14886 = vmatpush.xpose.msk.msrb.mxu1 %vm794_vm0, %v14625_v27  ;;  %14920 = vmatpush.xpose.msk.msrb.mxu3 %vm794_vm0, %v14657_v29  ;;  %v14962_v27 = vld [vmem:[%s17146_s29 + $0x16a] sm:$0xff]  ;;  %v14994_v29 = vld [vmem:[%s17146_s29 + $0x31a] sm:$0xff] }
 0x4e2   : > { %14870 = vmatpush.xpose.msk.msrb.mxu0 %vm794_vm0, %v14608_v30  ;;  %14904 = vmatpush.xpose.msk.msrb.mxu2 %vm794_vm0, %v14640_v32  ;;  %v14945_v30 = vld [vmem:[%s17146_s29 + $0x9a] sm:$0xff]  ;;  %v14977_v32 = vld [vmem:[%s17146_s29 + $0x24a] sm:$0xff] }
 0x4e3   : > { %14887 = vmatpush.xpose.msk.msrb.mxu1 %vm794_vm0, %v14624_v31  ;;  %14921 = vmatpush.xpose.msk.msrb.mxu3 %vm794_vm0, %v14656_v33  ;;  %v14961_v31 = vld [vmem:[%s17146_s29 + $0x15a] sm:$0xff]  ;;  %v14993_v33 = vld [vmem:[%s17146_s29 + $0x30a] sm:$0xff] }
 0x4e6   : > { %14871 = vmatpush.xpose.msk.msrb.mxu0 %vm794_vm0, %v14607_v35  ;;  %14905 = vmatpush.xpose.msk.msrb.mxu2 %vm794_vm0, %v14639_v37  ;;  %v14944_v35 = vld [vmem:[%s17146_s29 + $0x92] sm:$0xff]  ;;  %v14976_v37 = vld [vmem:[%s17146_s29 + $0x242] sm:$0xff] }
 0x4e7   : > { %14888 = vmatpush.xpose.msk.msrb.mxu1 %vm794_vm0, %v14623_v36  ;;  %14922 = vmatpush.xpose.msk.msrb.mxu3 %vm794_vm0, %v14655_v38  ;;  %v14960_v36 = vld [vmem:[%s17146_s29 + $0x152] sm:$0xff]  ;;  %v14992_v38 = vld [vmem:[%s17146_s29 + $0x302] sm:$0xff] }
 0x4ea   : > { %14872 = vmatpush.xpose.msk.msrb.mxu0 %vm794_vm0, %v14606_v39  ;;  %14906 = vmatpush.xpose.msk.msrb.mxu2 %vm794_vm0, %v14638_v41  ;;  %v14943_v39 = vld [vmem:[%s17146_s29 + $0x82] sm:$0xff]  ;;  %v14975_v41 = vld [vmem:[%s17146_s29 + $0x232] sm:$0xff] }
 0x4eb   : > { %14889 = vmatpush.xpose.msk.msrb.mxu1 %vm794_vm0, %v14622_v40  ;;  %14923 = vmatpush.xpose.msk.msrb.mxu3 %vm794_vm0, %v14654_v42  ;;  %v14959_v40 = vld [vmem:[%s17146_s29 + $0x142] sm:$0xff]  ;;  %v14991_v42 = vld [vmem:[%s17146_s29 + $0x2f2] sm:$0xff] }
 0x4ee   : > { %14873 = vmatpush.xpose.msk.msrb.mxu0 %vm794_vm0, %v14605_v43  ;;  %14907 = vmatpush.xpose.msk.msrb.mxu2 %vm794_vm0, %v14637_v45  ;;  %v14942_v43 = vld [vmem:[%s17146_s29 + $0x7a] sm:$0xff]  ;;  %v14974_v45 = vld [vmem:[%s17146_s29 + $0x22a] sm:$0xff] }
 0x4ef   : > { %14890 = vmatpush.xpose.msk.msrb.mxu1 %vm794_vm0, %v14621_v44  ;;  %14924 = vmatpush.xpose.msk.msrb.mxu3 %vm794_vm0, %v14653_v46  ;;  %v14958_v44 = vld [vmem:[%s17146_s29 + $0x13a] sm:$0xff]  ;;  %v14990_v46 = vld [vmem:[%s17146_s29 + $0x2ea] sm:$0xff] }
 0x4f2   : > { %14874 = vmatpush.xpose.msk.msrb.mxu0 %vm794_vm0, %v14604_v47  ;;  %14908 = vmatpush.xpose.msk.msrb.mxu2 %vm794_vm0, %v14636_v49  ;;  %v19953_v47 = vpop.f32.mrf.mxu0  ;;  %v14941_v49 = vld [vmem:[%s17146_s29 + $0x6a] sm:$0xff] }
 0x4f3   : > { %14891 = vmatpush.xpose.msk.msrb.mxu1 %vm794_vm0, %v14620_v48  ;;  %14925 = vmatpush.xpose.msk.msrb.mxu3 %vm794_vm0, %v14652_v50  ;;  %v19955_v48 = vpop.f32.mrf.mxu1  ;;  %v14957_v50 = vld [vmem:[%s17146_s29 + $0x12a] sm:$0xff] }
 0x4f6   : > { %14875 = vmatpush.xpose.msk.msrb.mxu0 %vm794_vm0, %v14603_v51  ;;  %14909 = vmatpush.xpose.msk.msrb.mxu2 %vm794_vm0, %v14635_v53  ;;  %v14973_v51 = vld [vmem:[%s17146_s29 + $0x21a] sm:$0xff]  ;;  %v14940_v53 = vld [vmem:[%s17146_s29 + $0x62] sm:$0xff] }
 0x4f7   : > { %14892 = vmatpush.xpose.msk.msrb.mxu1 %vm794_vm0, %v14619_v52  ;;  %14926 = vmatpush.xpose.msk.msrb.mxu3 %vm794_vm0, %v14651_v54  ;;  %v14989_v52 = vld [vmem:[%s17146_s29 + $0x2da] sm:$0xff]  ;;  %v14956_v54 = vld [vmem:[%s17146_s29 + $0x122] sm:$0xff] }
 0x4fa   : > { %14876 = vmatpush.xpose.msk.msrb.mxu0 %vm794_vm0, %v14602_v55  ;;  %14910 = vmatpush.xpose.msk.msrb.mxu2 %vm794_vm0, %v14634_v57  ;;  %v19971_v55 = vpop.f32.mrf.mxu2  ;;  %v14972_v57 = vld [vmem:[%s17146_s29 + $0x212] sm:$0xff] }
 0x4fb   : > { %14893 = vmatpush.xpose.msk.msrb.mxu1 %vm794_vm0, %v14618_v56  ;;  %14927 = vmatpush.xpose.msk.msrb.mxu3 %vm794_vm0, %v14650_v58  ;;  %v19973_v56 = vpop.f32.mrf.mxu3  ;;  %v14988_v58 = vld [vmem:[%s17146_s29 + $0x2d2] sm:$0xff] }
 0x4fe   : > { %14877 = vmatpush.xpose.msk.msrb.mxu0 %vm794_vm0, %v14601_v59  ;;  %14911 = vmatpush.xpose.msk.msrb.mxu2 %vm794_vm0, %v14633_v61  ;;  %v19977_v59 = vpop.f32.mrf.mxu0  ;;  %v14939_v61 = vld [vmem:[%s17146_s29 + $0x52] sm:$0xff] }
 0x4ff   : > { %14894 = vmatpush.xpose.msk.msrb.mxu1 %vm794_vm0, %v14617_v60  ;;  %14928 = vmatpush.xpose.msk.msrb.mxu3 %vm794_vm0, %v14649_v62  ;;  %v19979_v60 = vpop.f32.mrf.mxu1  ;;  %v14955_v62 = vld [vmem:[%s17146_s29 + $0x112] sm:$0xff] }
 0x502   : > { %14878 = vmatpush.xpose.msk.msrb.mxu0 %vm794_vm0, %v14600_v63  ;;  %14912 = vmatpush.xpose.msk.msrb.mxu2 %vm794_vm0, %v14632_v1  ;;  %v14971_v63 = vld [vmem:[%s17146_s29 + $0x202] sm:$0xff]  ;;  %v14938_v1 = vld [vmem:[%s17146_s29 + $0x4a] sm:$0xff] }
 0x503   : > { %14895 = vmatpush.xpose.msk.msrb.mxu1 %vm794_vm0, %v14616_v0  ;;  %14929 = vmatpush.xpose.msk.msrb.mxu3 %vm794_vm0, %v14648_v2  ;;  %v14987_v0 = vld [vmem:[%s17146_s29 + $0x2c2] sm:$0xff]  ;;  %v14954_v2 = vld [vmem:[%s17146_s29 + $0x10a] sm:$0xff] }
 0x506   : > { %14879 = vmatpush.xpose.msk.msrb.mxu0 %vm794_vm0, %v14599_v3  ;;  %14913 = vmatpush.xpose.msk.msrb.mxu2 %vm794_vm0, %v14631_v5  ;;  %v19995_v3 = vpop.f32.mrf.mxu2  ;;  %v14970_v5 = vld [vmem:[%s17146_s29 + $0x1fa] sm:$0xff] }
 0x507   : > { %14896 = vmatpush.xpose.msk.msrb.mxu1 %vm794_vm0, %v14615_v4  ;;  %14930 = vmatpush.xpose.msk.msrb.mxu3 %vm794_vm0, %v14647_v6  ;;  %v19997_v4 = vpop.f32.mrf.mxu3  ;;  %v14986_v6 = vld [vmem:[%s17146_s29 + $0x2ba] sm:$0xff] }
 0x50a   : > { %14880 = vmatpush.xpose.msk.msrb.mxu0 %vm794_vm0, %v14598_v8  ;;  %14914 = vmatpush.xpose.msk.msrb.mxu2 %vm794_vm0, %v14630_v10  ;;  %v20001_v8 = vpop.f32.mrf.mxu0  ;;  %v14937_v10 = vld [vmem:[%s17146_s29 + $0x3a] sm:$0xff] }
 0x50b   : > { %14897 = vmatpush.xpose.msk.msrb.mxu1 %vm794_vm0, %v14614_v9  ;;  %14931 = vmatpush.xpose.msk.msrb.mxu3 %vm794_vm0, %v14646_v12  ;;  %v20003_v9 = vpop.f32.mrf.mxu1  ;;  %v14953_v12 = vld [vmem:[%s17146_s29 + $0xfa] sm:$0xff] }
 0x50e   : > { %14881 = vmatpush.xpose.msk.msrb.mxu0 %vm794_vm0, %v14597_v13  ;;  %14915 = vmatpush.xpose.msk.msrb.mxu2 %vm794_vm0, %v14629_v15  ;;  %v14969_v13 = vld [vmem:[%s17146_s29 + $0x1ea] sm:$0xff]  ;;  %v14936_v15 = vld [vmem:[%s17146_s29 + $0x32] sm:$0xff] }
 0x50f   : > { %14898 = vmatpush.xpose.msk.msrb.mxu1 %vm794_vm0, %v14613_v14  ;;  %14932 = vmatpush.xpose.msk.msrb.mxu3 %vm794_vm0, %v14645_v16  ;;  %v14985_v14 = vld [vmem:[%s17146_s29 + $0x2aa] sm:$0xff]  ;;  %v14952_v16 = vld [vmem:[%s17146_s29 + $0xf2] sm:$0xff] }
 0x511   : > { %14882 = vmatmul.msk.f32.vlgmr.msrb.gmra.mxu0 %vm794_vm0, %v19479_v7  ;;  %14916 = vmatmul.msk.f32.vlgmr.msrb.gmra.mxu2 %vm794_vm0, %v19479_v7 }
 0x512   : > { %15191 = vmatpush.xpose.msk.msra.mxu0 %vm794_vm0, %v14949_v17  ;;  %15225 = vmatpush.xpose.msk.msra.mxu2 %vm794_vm0, %v14981_v19  ;;  %v20019_v17 = vpop.f32.mrf.mxu2  ;;  %v14968_v19 = vld [vmem:[%s17146_s29 + $0x1e2] sm:$0xff] }
 0x513   : > { %15208 = vmatpush.xpose.msk.msra.mxu1 %vm794_vm0, %v14965_v18  ;;  %15242 = vmatpush.xpose.msk.msra.mxu3 %vm794_vm0, %v14997_v20  ;;  %v20021_v18 = vpop.f32.mrf.mxu3  ;;  %v14984_v20 = vld [vmem:[%s17146_s29 + $0x2a2] sm:$0xff] }
 0x514   : > { %14899 = vmatmul.msk.f32.vlgmr.msrb.gmra.mxu1 %vm794_vm0, %v19479_v7  ;;  %14933 = vmatmul.msk.f32.vlgmr.msrb.gmra.mxu3 %vm794_vm0, %v19479_v7  ;;  %v14946_v7 = vld [vmem:[%s17146_s29 + $0xaa] sm:$0xff]  ;;  %22609 = vst [vmem:[#allocation2_spill] sm:$0xff] %v20021_v18 }
 0x515   : > { %v15141_v18 = vld [vmem:[%s17146_s29 + $0xaea] sm:$0xff] }
 0x516   : > { %15192 = vmatpush.xpose.msk.msra.mxu0 %vm794_vm0, %v14948_v11  ;;  %15226 = vmatpush.xpose.msk.msra.mxu2 %vm794_vm0, %v14980_v22  ;;  %v20025_v11 = vpop.f32.mrf.mxu0  ;;  %v14935_v22 = vld [vmem:[%s17146_s29 + $0x22] sm:$0xff] }
 0x517   : > { %15209 = vmatpush.xpose.msk.msra.mxu1 %vm794_vm0, %v14964_v21  ;;  %15243 = vmatpush.xpose.msk.msra.mxu3 %vm794_vm0, %v14996_v23  ;;  %22610 = vst [vmem:[#allocation3_spill] sm:$0xff] %v20025_v11  ;;  %v20027_v21 = vpop.f32.mrf.mxu1  ;;  %v14951_v23 = vld [vmem:[%s17146_s29 + $0xe2] sm:$0xff] }
 0x518   : > { %22611 = vst [vmem:[#allocation4_spill] sm:$0xff] %v20027_v21  ;;  %v15098_v21 = vld [vmem:[%s17146_s29 + $0x8ba] sm:$0xff] }
 0x51a   : > { %15193 = vmatpush.xpose.msk.msra.mxu0 %vm794_vm0, %v14947_v34  ;;  %15227 = vmatpush.xpose.msk.msra.mxu2 %vm794_vm0, %v14979_v25  ;;  %v14967_v34 = vld [vmem:[%s17146_s29 + $0x1d2] sm:$0xff]  ;;  %v14934_v25 = vld [vmem:[%s17146_s29 + $0x1a] sm:$0xff] }
 0x51b   : > { %15210 = vmatpush.xpose.msk.msra.mxu1 %vm794_vm0, %v14963_v24  ;;  %15244 = vmatpush.xpose.msk.msra.mxu3 %vm794_vm0, %v14995_v26  ;;  %v14983_v24 = vld [vmem:[%s17146_s29 + $0x292] sm:$0xff]  ;;  %v14950_v26 = vld [vmem:[%s17146_s29 + $0xda] sm:$0xff] }
 0x51e   : > { %15194 = vmatpush.xpose.msk.msra.mxu0 %vm794_vm0, %v14946_v7  ;;  %15228 = vmatpush.xpose.msk.msra.mxu2 %vm794_vm0, %v14978_v28  ;;  %v20043_v7 = vpop.f32.mrf.mxu2  ;;  %v14966_v28 = vld [vmem:[%s17146_s29 + $0x1ca] sm:$0xff] }
 0x51f   : > { %15211 = vmatpush.xpose.msk.msra.mxu1 %vm794_vm0, %v14962_v27  ;;  %15245 = vmatpush.xpose.msk.msra.mxu3 %vm794_vm0, %v14994_v29  ;;  %22612 = vst [vmem:[#allocation5_spill] sm:$0xff] %v20043_v7  ;;  %v20045_v27 = vpop.f32.mrf.mxu3  ;;  %v14982_v29 = vld [vmem:[%s17146_s29 + $0x28a] sm:$0xff] }
 0x520   : > { %22613 = vst [vmem:[#allocation6_spill] sm:$0xff] %v20045_v27  ;;  %v15102_v7 = vld [vmem:[%s17146_s29 + $0x8ea] sm:$0xff] }
 0x522   : > { %15195 = vmatpush.xpose.msk.msra.mxu0 %vm794_vm0, %v14945_v30  ;;  %15229 = vmatpush.xpose.msk.msra.mxu2 %vm794_vm0, %v14977_v32  ;;  %v15013_v30 = vld [vmem:[%s17146_s29 + $0x42a] sm:$0xff]  ;;  %v15045_v32 = vld [vmem:[%s17146_s29 + $0x5da] sm:$0xff] }
 0x523   : > { %15212 = vmatpush.xpose.msk.msra.mxu1 %vm794_vm0, %v14961_v31  ;;  %15246 = vmatpush.xpose.msk.msra.mxu3 %vm794_vm0, %v14993_v33  ;;  %v15029_v31 = vld [vmem:[%s17146_s29 + $0x4ea] sm:$0xff]  ;;  %v15061_v33 = vld [vmem:[%s17146_s29 + $0x69a] sm:$0xff] }
 0x526   : > { %15196 = vmatpush.xpose.msk.msra.mxu0 %vm794_vm0, %v14944_v35  ;;  %15230 = vmatpush.xpose.msk.msra.mxu2 %vm794_vm0, %v14976_v37  ;;  %v20055_v35 = vpop.f32.mrf.mxu0  ;;  %v20064_v37 = vld [vmem:[%s22602_s1 + $0x28] sm:$0xff] }
 0x527   : > { %15213 = vmatpush.xpose.msk.msra.mxu1 %vm794_vm0, %v14960_v36  ;;  %15247 = vmatpush.xpose.msk.msra.mxu3 %vm794_vm0, %v14992_v38  ;;  %v20057_v36 = vpop.f32.mrf.mxu1  ;;  %v15012_v38 = vld [vmem:[%s17146_s29 + $0x422] sm:$0xff] }
 0x52a   : > { %15197 = vmatpush.xpose.msk.msra.mxu0 %vm794_vm0, %v14943_v39  ;;  %15231 = vmatpush.xpose.msk.msra.mxu2 %vm794_vm0, %v14975_v41  ;;  %v15028_v39 = vld [vmem:[%s17146_s29 + $0x4e2] sm:$0xff]  ;;  %v15060_v41 = vld [vmem:[%s17146_s29 + $0x692] sm:$0xff] }
 0x52b   : > { %15214 = vmatpush.xpose.msk.msra.mxu1 %vm794_vm0, %v14959_v40  ;;  %15248 = vmatpush.xpose.msk.msra.mxu3 %vm794_vm0, %v14991_v42  ;;  %v15044_v40 = vld [vmem:[%s17146_s29 + $0x5d2] sm:$0xff] }
 0x52c   : > { %v15011_v42 = vld [vmem:[%s17146_s29 + $0x412] sm:$0xff] }
 0x52e   : > { %15198 = vmatpush.xpose.msk.msra.mxu0 %vm794_vm0, %v14942_v43  ;;  %15232 = vmatpush.xpose.msk.msra.mxu2 %vm794_vm0, %v14974_v45  ;;  %v15027_v43 = vld [vmem:[%s17146_s29 + $0x4d2] sm:$0xff]  ;;  %v20090_v45 = vpop.f32.mrf.mxu3 }
 0x52f   : > { %15215 = vmatpush.xpose.msk.msra.mxu1 %vm794_vm0, %v14958_v44  ;;  %15249 = vmatpush.xpose.msk.msra.mxu3 %vm794_vm0, %v14990_v46  ;;  %v20088_v44 = vpop.f32.mrf.mxu2  ;;  %v15043_v46 = vld [vmem:[%s17146_s29 + $0x5c2] sm:$0xff] }
 0x532   : > { %15199 = vmatpush.xpose.msk.msra.mxu0 %vm794_vm0, %v14941_v49  ;;  %15233 = vmatpush.xpose.msk.msra.mxu2 %vm794_vm0, %v14973_v51  ;;  %v15059_v49 = vld [vmem:[%s17146_s29 + $0x682] sm:$0xff]  ;;  %v20096_v51 = vpop.f32.mrf.mxu1 }
 0x533   : > { %15216 = vmatpush.xpose.msk.msra.mxu1 %vm794_vm0, %v14957_v50  ;;  %15250 = vmatpush.xpose.msk.msra.mxu3 %vm794_vm0, %v14989_v52  ;;  %v20094_v50 = vpop.f32.mrf.mxu0  ;;  %v15010_v52 = vld [vmem:[%s17146_s29 + $0x40a] sm:$0xff] }
 0x536   : > { %15200 = vmatpush.xpose.msk.msra.mxu0 %vm794_vm0, %v14940_v53  ;;  %15234 = vmatpush.xpose.msk.msra.mxu2 %vm794_vm0, %v14972_v57  ;;  %v15026_v53 = vld [vmem:[%s17146_s29 + $0x4ca] sm:$0xff]  ;;  %v15058_v57 = vld [vmem:[%s17146_s29 + $0x67a] sm:$0xff] }
 0x537   : > { %15217 = vmatpush.xpose.msk.msra.mxu1 %vm794_vm0, %v14956_v54  ;;  %15251 = vmatpush.xpose.msk.msra.mxu3 %vm794_vm0, %v14988_v58  ;;  %v15042_v54 = vld [vmem:[%s17146_s29 + $0x5ba] sm:$0xff] }
 0x538   : > { %v15009_v58 = vld [vmem:[%s17146_s29 + $0x3fa] sm:$0xff] }
 0x53a   : > { %15201 = vmatpush.xpose.msk.msra.mxu0 %vm794_vm0, %v14939_v61  ;;  %15235 = vmatpush.xpose.msk.msra.mxu2 %vm794_vm0, %v14971_v63  ;;  %v15025_v61 = vld [vmem:[%s17146_s29 + $0x4ba] sm:$0xff]  ;;  %v20114_v63 = vpop.f32.mrf.mxu3 }
 0x53b   : > { %15218 = vmatpush.xpose.msk.msra.mxu1 %vm794_vm0, %v14955_v62  ;;  %15252 = vmatpush.xpose.msk.msra.mxu3 %vm794_vm0, %v14987_v0  ;;  %v20112_v62 = vpop.f32.mrf.mxu2  ;;  %v15041_v0 = vld [vmem:[%s17146_s29 + $0x5aa] sm:$0xff] }
 0x53e   : > { %15202 = vmatpush.xpose.msk.msra.mxu0 %vm794_vm0, %v14938_v1  ;;  %15236 = vmatpush.xpose.msk.msra.mxu2 %vm794_vm0, %v14970_v5  ;;  %v15057_v1 = vld [vmem:[%s17146_s29 + $0x66a] sm:$0xff]  ;;  %v20120_v5 = vpop.f32.mrf.mxu1 }
 0x53f   : > { %15219 = vmatpush.xpose.msk.msra.mxu1 %vm794_vm0, %v14954_v2  ;;  %15253 = vmatpush.xpose.msk.msra.mxu3 %vm794_vm0, %v14986_v6  ;;  %v20118_v2 = vpop.f32.mrf.mxu0  ;;  %v15008_v6 = vld [vmem:[%s17146_s29 + $0x3f2] sm:$0xff] }
 0x542   : > { %15203 = vmatpush.xpose.msk.msra.mxu0 %vm794_vm0, %v14937_v10  ;;  %15237 = vmatpush.xpose.msk.msra.mxu2 %vm794_vm0, %v14969_v13  ;;  %v15024_v10 = vld [vmem:[%s17146_s29 + $0x4b2] sm:$0xff]  ;;  %v15056_v13 = vld [vmem:[%s17146_s29 + $0x662] sm:$0xff] }
 0x543   : > { %15220 = vmatpush.xpose.msk.msra.mxu1 %vm794_vm0, %v14953_v12  ;;  %15254 = vmatpush.xpose.msk.msra.mxu3 %vm794_vm0, %v14985_v14  ;;  %v15040_v12 = vld [vmem:[%s17146_s29 + $0x5a2] sm:$0xff] }
 0x544   : > { %v15007_v14 = vld [vmem:[%s17146_s29 + $0x3e2] sm:$0xff] }
 0x546   : > { %15204 = vmatpush.xpose.msk.msra.mxu0 %vm794_vm0, %v14936_v15  ;;  %15238 = vmatpush.xpose.msk.msra.mxu2 %vm794_vm0, %v14968_v19  ;;  %v15023_v15 = vld [vmem:[%s17146_s29 + $0x4a2] sm:$0xff]  ;;  %v20138_v19 = vpop.f32.mrf.mxu3 }
 0x547   : > { %15221 = vmatpush.xpose.msk.msra.mxu1 %vm794_vm0, %v14952_v16  ;;  %15255 = vmatpush.xpose.msk.msra.mxu3 %vm794_vm0, %v14984_v20  ;;  %v20136_v16 = vpop.f32.mrf.mxu2  ;;  %22615 = vst [vmem:[#allocation8_spill] sm:$0xff] %v20138_v19  ;;  %v15039_v20 = vld [vmem:[%s17146_s29 + $0x592] sm:$0xff] }
 0x548   : > { %22614 = vst [vmem:[#allocation7_spill] sm:$0xff] %v20136_v16  ;;  %v15189_v16 = vld [vmem:[%s17146_s29 + $0xd5a] sm:$0xff] }
 0x54a   : > { %15205 = vmatpush.xpose.msk.msra.mxu0 %vm794_vm0, %v14935_v22  ;;  %15239 = vmatpush.xpose.msk.msra.mxu2 %vm794_vm0, %v14967_v34  ;;  %v15055_v22 = vld [vmem:[%s17146_s29 + $0x652] sm:$0xff]  ;;  %v20144_v34 = vpop.f32.mrf.mxu1 }
 0x54b   : > { %15222 = vmatpush.xpose.msk.msra.mxu1 %vm794_vm0, %v14951_v23  ;;  %15256 = vmatpush.xpose.msk.msra.mxu3 %vm794_vm0, %v14983_v24  ;;  %v20142_v23 = vpop.f32.mrf.mxu0  ;;  %22617 = vst [vmem:[#allocation10_spill] sm:$0xff] %v20144_v34  ;;  %v15006_v24 = vld [vmem:[%s17146_s29 + $0x3da] sm:$0xff] }
 0x54c   : > { %22616 = vst [vmem:[#allocation9_spill] sm:$0xff] %v20142_v23  ;;  %v15114_v23 = vld [vmem:[%s17146_s29 + $0x97a] sm:$0xff] }
 0x54e   : > { %15206 = vmatpush.xpose.msk.msra.mxu0 %vm794_vm0, %v14934_v25  ;;  %15240 = vmatpush.xpose.msk.msra.mxu2 %vm794_vm0, %v14966_v28  ;;  %v15022_v25 = vld [vmem:[%s17146_s29 + $0x49a] sm:$0xff]  ;;  %v15054_v28 = vld [vmem:[%s17146_s29 + $0x64a] sm:$0xff] }
 0x54f   : > { %15223 = vmatpush.xpose.msk.msra.mxu1 %vm794_vm0, %v14950_v26  ;;  %15257 = vmatpush.xpose.msk.msra.mxu3 %vm794_vm0, %v14982_v29  ;;  %v15038_v26 = vld [vmem:[%s17146_s29 + $0x58a] sm:$0xff] }
 0x550   : > { %v15005_v29 = vld [vmem:[%s17146_s29 + $0x3ca] sm:$0xff] }
 0x551   : > { %15207 = vmatmul.msk.f32.vlgmr.msra.gmra.mxu0 %vm794_vm0, %v20064_v37  ;;  %15241 = vmatmul.msk.f32.vlgmr.msra.gmra.mxu2 %vm794_vm0, %v20064_v37 }
 0x552   : > { %15259 = vmatpush.xpose.msk.msrb.mxu0 %vm794_vm0, %v15013_v30  ;;  %15293 = vmatpush.xpose.msk.msrb.mxu2 %vm794_vm0, %v15045_v32  ;;  %v15021_v30 = vld [vmem:[%s17146_s29 + $0x48a] sm:$0xff]  ;;  %v20162_v32 = vpop.f32.mrf.mxu3 }
 0x553   : > { %15276 = vmatpush.xpose.msk.msrb.mxu1 %vm794_vm0, %v15029_v31  ;;  %15310 = vmatpush.xpose.msk.msrb.mxu3 %vm794_vm0, %v15061_v33  ;;  %v20160_v31 = vpop.f32.mrf.mxu2  ;;  %22619 = vst [vmem:[#allocation12_spill] sm:$0xff] %v20162_v32  ;;  %v15037_v33 = vld [vmem:[%s17146_s29 + $0x57a] sm:$0xff]  ;;  %v15120_v32 = vld [vmem:[%s17146_s29 + $0x9c2] sm:$0xff] }
 0x554   : > { %15224 = vmatmul.msk.f32.vlgmr.msra.gmra.mxu1 %vm794_vm0, %v20064_v37  ;;  %15258 = vmatmul.msk.f32.vlgmr.msra.gmra.mxu3 %vm794_vm0, %v20064_v37  ;;  %22618 = vst [vmem:[#allocation11_spill] sm:$0xff] %v20160_v31 }
 0x556   : > { %15260 = vmatpush.xpose.msk.msrb.mxu0 %vm794_vm0, %v15012_v38  ;;  %15294 = vmatpush.xpose.msk.msrb.mxu2 %vm794_vm0, %v15044_v40  ;;  %v15053_v38 = vld [vmem:[%s17146_s29 + $0x63a] sm:$0xff]  ;;  %v20168_v40 = vpop.f32.mrf.mxu1 }
 0x557   : > { %15277 = vmatpush.xpose.msk.msrb.mxu1 %vm794_vm0, %v15028_v39  ;;  %15311 = vmatpush.xpose.msk.msrb.mxu3 %vm794_vm0, %v15060_v41  ;;  %v20166_v39 = vpop.f32.mrf.mxu0  ;;  %v15004_v41 = vld [vmem:[%s17146_s29 + $0x3c2] sm:$0xff] }
 0x55a   : > { %15261 = vmatpush.xpose.msk.msrb.mxu0 %vm794_vm0, %v15011_v42  ;;  %15295 = vmatpush.xpose.msk.msrb.mxu2 %vm794_vm0, %v15043_v46  ;;  %v15020_v42 = vld [vmem:[%s17146_s29 + $0x482] sm:$0xff]  ;;  %v15052_v46 = vld [vmem:[%s17146_s29 + $0x632] sm:$0xff] }
 0x55b   : > { %15278 = vmatpush.xpose.msk.msrb.mxu1 %vm794_vm0, %v15027_v43  ;;  %15312 = vmatpush.xpose.msk.msrb.mxu3 %vm794_vm0, %v15059_v49  ;;  %v15036_v43 = vld [vmem:[%s17146_s29 + $0x572] sm:$0xff] }
 0x55c   : > { %v15003_v49 = vld [vmem:[%s17146_s29 + $0x3b2] sm:$0xff] }
 0x55e   : > { %15262 = vmatpush.xpose.msk.msrb.mxu0 %vm794_vm0, %v15010_v52  ;;  %15296 = vmatpush.xpose.msk.msrb.mxu2 %vm794_vm0, %v15042_v54  ;;  %v15019_v52 = vld [vmem:[%s17146_s29 + $0x472] sm:$0xff]  ;;  %v20186_v54 = vpop.f32.mrf.mxu3 }
 0x55f   : > { %15279 = vmatpush.xpose.msk.msrb.mxu1 %vm794_vm0, %v15026_v53  ;;  %15313 = vmatpush.xpose.msk.msrb.mxu3 %vm794_vm0, %v15058_v57  ;;  %v20184_v53 = vpop.f32.mrf.mxu2  ;;  %v15035_v57 = vld [vmem:[%s17146_s29 + $0x562] sm:$0xff] }
 0x562   : > { %15263 = vmatpush.xpose.msk.msrb.mxu0 %vm794_vm0, %v15009_v58  ;;  %15297 = vmatpush.xpose.msk.msrb.mxu2 %vm794_vm0, %v15041_v0  ;;  %v15051_v58 = vld [vmem:[%s17146_s29 + $0x622] sm:$0xff]  ;;  %v20192_v0 = vpop.f32.mrf.mxu1 }
 0x563   : > { %15280 = vmatpush.xpose.msk.msrb.mxu1 %vm794_vm0, %v15025_v61  ;;  %15314 = vmatpush.xpose.msk.msrb.mxu3 %vm794_vm0, %v15057_v1  ;;  %v20190_v61 = vpop.f32.mrf.mxu0  ;;  %v15002_v1 = vld [vmem:[%s17146_s29 + $0x3aa] sm:$0xff] }
 0x566   : > { %15264 = vmatpush.xpose.msk.msrb.mxu0 %vm794_vm0, %v15008_v6  ;;  %15298 = vmatpush.xpose.msk.msrb.mxu2 %vm794_vm0, %v15040_v12  ;;  %v15018_v6 = vld [vmem:[%s17146_s29 + $0x46a] sm:$0xff]  ;;  %v15050_v12 = vld [vmem:[%s17146_s29 + $0x61a] sm:$0xff] }
 0x567   : > { %15281 = vmatpush.xpose.msk.msrb.mxu1 %vm794_vm0, %v15024_v10  ;;  %15315 = vmatpush.xpose.msk.msrb.mxu3 %vm794_vm0, %v15056_v13  ;;  %v15034_v10 = vld [vmem:[%s17146_s29 + $0x55a] sm:$0xff] }
 0x568   : > { %v15001_v13 = vld [vmem:[%s17146_s29 + $0x39a] sm:$0xff] }
 0x56a   : > { %15265 = vmatpush.xpose.msk.msrb.mxu0 %vm794_vm0, %v15007_v14  ;;  %15299 = vmatpush.xpose.msk.msrb.mxu2 %vm794_vm0, %v15039_v20  ;;  %v15017_v14 = vld [vmem:[%s17146_s29 + $0x45a] sm:$0xff]  ;;  %v20210_v20 = vpop.f32.mrf.mxu3 }
 0x56b   : > { %15282 = vmatpush.xpose.msk.msrb.mxu1 %vm794_vm0, %v15023_v15  ;;  %15316 = vmatpush.xpose.msk.msrb.mxu3 %vm794_vm0, %v15055_v22  ;;  %v20208_v15 = vpop.f32.mrf.mxu2  ;;  %v15033_v22 = vld [vmem:[%s17146_s29 + $0x54a] sm:$0xff] }
 0x56e   : > { %15266 = vmatpush.xpose.msk.msrb.mxu0 %vm794_vm0, %v15006_v24  ;;  %15300 = vmatpush.xpose.msk.msrb.mxu2 %vm794_vm0, %v15038_v26  ;;  %v15049_v24 = vld [vmem:[%s17146_s29 + $0x60a] sm:$0xff]  ;;  %v20216_v26 = vpop.f32.mrf.mxu1 }
 0x56f   : > { %15283 = vmatpush.xpose.msk.msrb.mxu1 %vm794_vm0, %v15022_v25  ;;  %15317 = vmatpush.xpose.msk.msrb.mxu3 %vm794_vm0, %v15054_v28  ;;  %v20214_v25 = vpop.f32.mrf.mxu0  ;;  %v15000_v28 = vld [vmem:[%s17146_s29 + $0x392] sm:$0xff] }
 0x572   : > { %15267 = vmatpush.xpose.msk.msrb.mxu0 %vm794_vm0, %v15005_v29  ;;  %15301 = vmatpush.xpose.msk.msrb.mxu2 %vm794_vm0, %v15037_v33  ;;  %v15016_v29 = vld [vmem:[%s17146_s29 + $0x452] sm:$0xff]  ;;  %v15048_v33 = vld [vmem:[%s17146_s29 + $0x602] sm:$0xff] }
 0x573   : > { %15284 = vmatpush.xpose.msk.msrb.mxu1 %vm794_vm0, %v15021_v30  ;;  %15318 = vmatpush.xpose.msk.msrb.mxu3 %vm794_vm0, %v15053_v38  ;;  %v15032_v30 = vld [vmem:[%s17146_s29 + $0x542] sm:$0xff] }
 0x574   : > { %v14999_v38 = vld [vmem:[%s17146_s29 + $0x382] sm:$0xff] }
 0x576   : > { %15268 = vmatpush.xpose.msk.msrb.mxu0 %vm794_vm0, %v15004_v41  ;;  %15302 = vmatpush.xpose.msk.msrb.mxu2 %vm794_vm0, %v15036_v43  ;;  %v15015_v41 = vld [vmem:[%s17146_s29 + $0x442] sm:$0xff]  ;;  %v20234_v43 = vpop.f32.mrf.mxu3 }
 0x577   : > { %15285 = vmatpush.xpose.msk.msrb.mxu1 %vm794_vm0, %v15020_v42  ;;  %15319 = vmatpush.xpose.msk.msrb.mxu3 %vm794_vm0, %v15052_v46  ;;  %v20232_v42 = vpop.f32.mrf.mxu2  ;;  %22621 = vst [vmem:[#allocation14_spill] sm:$0xff] %v20234_v43  ;;  %v15031_v46 = vld [vmem:[%s17146_s29 + $0x532] sm:$0xff]  ;;  %v15112_v43 = vld [vmem:[%s17146_s29 + $0x962] sm:$0xff] }
 0x578   : > { %22620 = vst [vmem:[#allocation13_spill] sm:$0xff] %v20232_v42 }
 0x57a   : > { %15269 = vmatpush.xpose.msk.msrb.mxu0 %vm794_vm0, %v15003_v49  ;;  %15303 = vmatpush.xpose.msk.msrb.mxu2 %vm794_vm0, %v15035_v57  ;;  %v15047_v49 = vld [vmem:[%s17146_s29 + $0x5f2] sm:$0xff]  ;;  %v20240_v57 = vpop.f32.mrf.mxu1 }
 0x57b   : > { %15286 = vmatpush.xpose.msk.msrb.mxu1 %vm794_vm0, %v15019_v52  ;;  %15320 = vmatpush.xpose.msk.msrb.mxu3 %vm794_vm0, %v15051_v58  ;;  %v20238_v52 = vpop.f32.mrf.mxu0  ;;  %22623 = vst [vmem:[#allocation16_spill] sm:$0xff] %v20240_v57  ;;  %v14998_v58 = vld [vmem:[%s17146_s29 + $0x37a] sm:$0xff]  ;;  %v15118_v57 = vld [vmem:[%s17146_s29 + $0x9aa] sm:$0xff] }
 0x57c   : > { %22622 = vst [vmem:[#allocation15_spill] sm:$0xff] %v20238_v52  ;;  %v15116_v52 = vld [vmem:[%s17146_s29 + $0x992] sm:$0xff] }
 0x57e   : > { %15270 = vmatpush.xpose.msk.msrb.mxu0 %vm794_vm0, %v15002_v1  ;;  %15304 = vmatpush.xpose.msk.msrb.mxu2 %vm794_vm0, %v15034_v10  ;;  %v15014_v1 = vld [vmem:[%s17146_s29 + $0x43a] sm:$0xff]  ;;  %v15046_v10 = vld [vmem:[%s17146_s29 + $0x5ea] sm:$0xff] }
 0x57f   : > { %15287 = vmatpush.xpose.msk.msrb.mxu1 %vm794_vm0, %v15018_v6  ;;  %15321 = vmatpush.xpose.msk.msrb.mxu3 %vm794_vm0, %v15050_v12  ;;  %v15030_v6 = vld [vmem:[%s17146_s29 + $0x52a] sm:$0xff] }
 0x580   : > { %v15077_v12 = vld [vmem:[%s17146_s29 + $0x78a] sm:$0xff] }
 0x582   : > { %15271 = vmatpush.xpose.msk.msrb.mxu0 %vm794_vm0, %v15001_v13  ;;  %15305 = vmatpush.xpose.msk.msrb.mxu2 %vm794_vm0, %v15033_v22  ;;  %v15093_v13 = vld [vmem:[%s17146_s29 + $0x84a] sm:$0xff]  ;;  %v15125_v22 = vld [vmem:[%s17146_s29 + $0x9fa] sm:$0xff] }
 0x583   : > { %15288 = vmatpush.xpose.msk.msrb.mxu1 %vm794_vm0, %v15017_v14  ;;  %15322 = vmatpush.xpose.msk.msrb.mxu3 %vm794_vm0, %v15049_v24  ;;  %v15109_v14 = vld [vmem:[%s17146_s29 + $0x93a] sm:$0xff]  ;;  %v20258_v24 = vpop.f32.mrf.mxu2 }
 0x584   : > { %22624 = vst [vmem:[#allocation17_spill] sm:$0xff] %v20258_v24  ;;  %v15104_v24 = vld [vmem:[%s17146_s29 + $0x902] sm:$0xff] }
 0x586   : > { %15272 = vmatpush.xpose.msk.msrb.mxu0 %vm794_vm0, %v15000_v28  ;;  %15306 = vmatpush.xpose.msk.msrb.mxu2 %vm794_vm0, %v15032_v30  ;;  %v20260_v28 = vpop.f32.mrf.mxu3  ;;  %v20266_v30 = vpop.f32.mrf.mxu1 }
 0x587   : > { %15289 = vmatpush.xpose.msk.msrb.mxu1 %vm794_vm0, %v15016_v29  ;;  %15323 = vmatpush.xpose.msk.msrb.mxu3 %vm794_vm0, %v15048_v33  ;;  %22625 = vst [vmem:[#allocation18_spill] sm:$0xff] %v20260_v28  ;;  %v20264_v29 = vpop.f32.mrf.mxu0  ;;  %v15076_v33 = vld [vmem:[%s17146_s29 + $0x782] sm:$0xff] }
 0x58a   : > { %15273 = vmatpush.xpose.msk.msrb.mxu0 %vm794_vm0, %v14999_v38  ;;  %15307 = vmatpush.xpose.msk.msrb.mxu2 %vm794_vm0, %v15031_v46  ;;  %v15092_v38 = vld [vmem:[%s17146_s29 + $0x842] sm:$0xff]  ;;  %v15124_v46 = vld [vmem:[%s17146_s29 + $0x9f2] sm:$0xff] }
 0x58b   : > { %15290 = vmatpush.xpose.msk.msrb.mxu1 %vm794_vm0, %v15015_v41  ;;  %15324 = vmatpush.xpose.msk.msrb.mxu3 %vm794_vm0, %v15047_v49  ;;  %v15108_v41 = vld [vmem:[%s17146_s29 + $0x932] sm:$0xff] }
 0x58c   : > { %v15075_v49 = vld [vmem:[%s17146_s29 + $0x772] sm:$0xff] }
 0x58e   : > { %15274 = vmatpush.xpose.msk.msrb.mxu0 %vm794_vm0, %v14998_v58  ;;  %15308 = vmatpush.xpose.msk.msrb.mxu2 %vm794_vm0, %v15030_v6  ;;  %v15091_v58 = vld [vmem:[%s17146_s29 + $0x832] sm:$0xff]  ;;  %v15123_v6 = vld [vmem:[%s17146_s29 + $0x9e2] sm:$0xff] }
 0x58f   : > { %15291 = vmatpush.xpose.msk.msrb.mxu1 %vm794_vm0, %v15014_v1  ;;  %15325 = vmatpush.xpose.msk.msrb.mxu3 %vm794_vm0, %v15046_v10  ;;  %v15107_v1 = vld [vmem:[%s17146_s29 + $0x922] sm:$0xff]  ;;  %v20290_v10 = vpop.f32.mrf.mxu2 }
 0x591   : > { %15275 = vmatmul.msk.f32.vlgmr.msrb.gmra.mxu0 %vm794_vm0, %v20064_v37  ;;  %15309 = vmatmul.msk.f32.vlgmr.msrb.gmra.mxu2 %vm794_vm0, %v20064_v37 }
 0x592   : > { %15327 = vmatpush.xpose.msk.msra.mxu0 %vm794_vm0, %v15077_v12  ;;  %15361 = vmatpush.xpose.msk.msra.mxu2 %vm794_vm0, %v15109_v14  ;;  %v20292_v12 = vpop.f32.mrf.mxu3  ;;  %v20298_v14 = vpop.f32.mrf.mxu1 }
 0x593   : > { %15344 = vmatpush.xpose.msk.msra.mxu1 %vm794_vm0, %v15093_v13  ;;  %15378 = vmatpush.xpose.msk.msra.mxu3 %vm794_vm0, %v15125_v22  ;;  %v20296_v13 = vpop.f32.mrf.mxu0  ;;  %v15074_v22 = vld [vmem:[%s17146_s29 + $0x76a] sm:$0xff] }
 0x594   : > { %15292 = vmatmul.msk.f32.vlgmr.msrb.gmra.mxu1 %vm794_vm0, %v20064_v37  ;;  %15326 = vmatmul.msk.f32.vlgmr.msrb.gmra.mxu3 %vm794_vm0, %v20064_v37 }
 0x596   : > { %15328 = vmatpush.xpose.msk.msra.mxu0 %vm794_vm0, %v15076_v33  ;;  %15362 = vmatpush.xpose.msk.msra.mxu2 %vm794_vm0, %v15108_v41  ;;  %v15090_v33 = vld [vmem:[%s17146_s29 + $0x82a] sm:$0xff]  ;;  %v15122_v41 = vld [vmem:[%s17146_s29 + $0x9da] sm:$0xff] }
 0x597   : > { %15345 = vmatpush.xpose.msk.msra.mxu1 %vm794_vm0, %v15092_v38  ;;  %15379 = vmatpush.xpose.msk.msra.mxu3 %vm794_vm0, %v15124_v46  ;;  %v15106_v38 = vld [vmem:[%s17146_s29 + $0x91a] sm:$0xff] }
 0x598   : > { %v15073_v46 = vld [vmem:[%s17146_s29 + $0x75a] sm:$0xff] }
 0x59a   : > { %15329 = vmatpush.xpose.msk.msra.mxu0 %vm794_vm0, %v15075_v49  ;;  %15363 = vmatpush.xpose.msk.msra.mxu2 %vm794_vm0, %v15107_v1  ;;  %v15089_v49 = vld [vmem:[%s17146_s29 + $0x81a] sm:$0xff]  ;;  %v15121_v1 = vld [vmem:[%s17146_s29 + $0x9ca] sm:$0xff]  ;;  %v20316_v28 = vpop.f32.mrf.mxu3 }
 0x59b   : > { %15346 = vmatpush.xpose.msk.msra.mxu1 %vm794_vm0, %v15091_v58  ;;  %15380 = vmatpush.xpose.msk.msra.mxu3 %vm794_vm0, %v15123_v6  ;;  %v15105_v58 = vld [vmem:[%s17146_s29 + $0x90a] sm:$0xff]  ;;  %v20314_v6 = vpop.f32.mrf.mxu2 }
 0x59e   : > { %15330 = vmatpush.xpose.msk.msra.mxu0 %vm794_vm0, %v15074_v22  ;;  %15364 = vmatpush.xpose.msk.msra.mxu2 %vm794_vm0, %v15106_v38  ;;  %v20320_v22 = vpop.f32.mrf.mxu0  ;;  %v15072_v38 = vld [vmem:[%s17146_s29 + $0x752] sm:$0xff] }
 0x59f   : > { %15347 = vmatpush.xpose.msk.msra.mxu1 %vm794_vm0, %v15090_v33  ;;  %15381 = vmatpush.xpose.msk.msra.mxu3 %vm794_vm0, %v15122_v41  ;;  %v20322_v33 = vpop.f32.mrf.mxu1  ;;  %v15088_v41 = vld [vmem:[%s17146_s29 + $0x812] sm:$0xff] }
 0x5a2   : > { %15331 = vmatpush.xpose.msk.msra.mxu0 %vm794_vm0, %v15073_v46  ;;  %15365 = vmatpush.xpose.msk.msra.mxu2 %vm794_vm0, %v15105_v58  ;;  %v15071_v46 = vld [vmem:[%s17146_s29 + $0x742] sm:$0xff]  ;;  %v15103_v58 = vld [vmem:[%s17146_s29 + $0x8f2] sm:$0xff]  ;;  %v20340_v31 = vpop.f32.mrf.mxu3 }
 0x5a3   : > { %15348 = vmatpush.xpose.msk.msra.mxu1 %vm794_vm0, %v15089_v49  ;;  %15382 = vmatpush.xpose.msk.msra.mxu3 %vm794_vm0, %v15121_v1  ;;  %v15087_v49 = vld [vmem:[%s17146_s29 + $0x802] sm:$0xff]  ;;  %v15119_v1 = vld [vmem:[%s17146_s29 + $0x9b2] sm:$0xff]  ;;  %v20338_v27 = vpop.f32.mrf.mxu2  ;;  %22627 = vst [vmem:[#allocation20_spill] sm:$0xff] %v20340_v31 }
 0x5a4   : > { %22626 = vst [vmem:[#allocation19_spill] sm:$0xff] %v20338_v27  ;;  %v15096_v27 = vld [vmem:[%s17146_s29 + $0x8a2] sm:$0xff] }
 0x5a6   : > { %15332 = vmatpush.xpose.msk.msra.mxu0 %vm794_vm0, %v15072_v38  ;;  %15366 = vmatpush.xpose.msk.msra.mxu2 %vm794_vm0, %v15104_v24  ;;  %v20344_v24 = vpop.f32.mrf.mxu0  ;;  %v15070_v38 = vld [vmem:[%s17146_s29 + $0x73a] sm:$0xff] }
 0x5a7   : > { %15349 = vmatpush.xpose.msk.msra.mxu1 %vm794_vm0, %v15088_v41  ;;  %15383 = vmatpush.xpose.msk.msra.mxu3 %vm794_vm0, %v15120_v32  ;;  %22628 = vst [vmem:[#allocation21_spill] sm:$0xff] %v20344_v24  ;;  %v20346_v32 = vpop.f32.mrf.mxu1  ;;  %v15086_v41 = vld [vmem:[%s17146_s29 + $0x7fa] sm:$0xff] }
 0x5a8   : > { %22629 = vst [vmem:[#allocation22_spill] sm:$0xff] %v20346_v32 }
 0x5aa   : > { %15333 = vmatpush.xpose.msk.msra.mxu0 %vm794_vm0, %v15071_v46  ;;  %15367 = vmatpush.xpose.msk.msra.mxu2 %vm794_vm0, %v15103_v58  ;;  %v15069_v46 = vld [vmem:[%s17146_s29 + $0x72a] sm:$0xff]  ;;  %v15101_v58 = vld [vmem:[%s17146_s29 + $0x8da] sm:$0xff]  ;;  %v20364_v24 = vpop.f32.mrf.mxu3 }
 0x5ab   : > { %15350 = vmatpush.xpose.msk.msra.mxu1 %vm794_vm0, %v15087_v49  ;;  %15384 = vmatpush.xpose.msk.msra.mxu3 %vm794_vm0, %v15119_v1  ;;  %v15085_v49 = vld [vmem:[%s17146_s29 + $0x7ea] sm:$0xff]  ;;  %v15117_v1 = vld [vmem:[%s17146_s29 + $0x99a] sm:$0xff]  ;;  %v20362_v32 = vpop.f32.mrf.mxu2  ;;  %22631 = vst [vmem:[#allocation24_spill] sm:$0xff] %v20364_v24 }
 0x5ac   : > { %22630 = vst [vmem:[#allocation23_spill] sm:$0xff] %v20362_v32  ;;  %v15100_v32 = vld [vmem:[%s17146_s29 + $0x8d2] sm:$0xff] }
 0x5ae   : > { %15334 = vmatpush.xpose.msk.msra.mxu0 %vm794_vm0, %v15070_v38  ;;  %15368 = vmatpush.xpose.msk.msra.mxu2 %vm794_vm0, %v15102_v7  ;;  %v20368_v7 = vpop.f32.mrf.mxu0  ;;  %v15068_v38 = vld [vmem:[%s17146_s29 + $0x722] sm:$0xff] }
 0x5af   : > { %15351 = vmatpush.xpose.msk.msra.mxu1 %vm794_vm0, %v15086_v41  ;;  %15385 = vmatpush.xpose.msk.msra.mxu3 %vm794_vm0, %v15118_v57  ;;  %v20370_v57 = vpop.f32.mrf.mxu1  ;;  %v15084_v41 = vld [vmem:[%s17146_s29 + $0x7e2] sm:$0xff] }
 0x5b2   : > { %15335 = vmatpush.xpose.msk.msra.mxu0 %vm794_vm0, %v15069_v46  ;;  %15369 = vmatpush.xpose.msk.msra.mxu2 %vm794_vm0, %v15101_v58  ;;  %v15067_v46 = vld [vmem:[%s17146_s29 + $0x712] sm:$0xff]  ;;  %v15099_v58 = vld [vmem:[%s17146_s29 + $0x8c2] sm:$0xff]  ;;  %v20388_v34 = vpop.f32.mrf.mxu3 }
 0x5b3   : > { %15352 = vmatpush.xpose.msk.msra.mxu1 %vm794_vm0, %v15085_v49  ;;  %15386 = vmatpush.xpose.msk.msra.mxu3 %vm794_vm0, %v15117_v1  ;;  %v15083_v49 = vld [vmem:[%s17146_s29 + $0x7d2] sm:$0xff]  ;;  %v15115_v1 = vld [vmem:[%s17146_s29 + $0x982] sm:$0xff]  ;;  %v20386_v24 = vpop.f32.mrf.mxu2 }
 0x5b6   : > { %15336 = vmatpush.xpose.msk.msra.mxu0 %vm794_vm0, %v15068_v38  ;;  %15370 = vmatpush.xpose.msk.msra.mxu2 %vm794_vm0, %v15100_v32  ;;  %v20392_v32 = vpop.f32.mrf.mxu0  ;;  %v15066_v38 = vld [vmem:[%s17146_s29 + $0x70a] sm:$0xff] }
 0x5b7   : > { %15353 = vmatpush.xpose.msk.msra.mxu1 %vm794_vm0, %v15084_v41  ;;  %15387 = vmatpush.xpose.msk.msra.mxu3 %vm794_vm0, %v15116_v52  ;;  %v20394_v52 = vpop.f32.mrf.mxu1  ;;  %v15082_v41 = vld [vmem:[%s17146_s29 + $0x7ca] sm:$0xff] }
 0x5ba   : > { %15337 = vmatpush.xpose.msk.msra.mxu0 %vm794_vm0, %v15067_v46  ;;  %15371 = vmatpush.xpose.msk.msra.mxu2 %vm794_vm0, %v15099_v58  ;;  %v15065_v46 = vld [vmem:[%s17146_s29 + $0x6fa] sm:$0xff]  ;;  %v15097_v58 = vld [vmem:[%s17146_s29 + $0x8aa] sm:$0xff]  ;;  %v20412_v31 = vpop.f32.mrf.mxu3 }
 0x5bb   : > { %15354 = vmatpush.xpose.msk.msra.mxu1 %vm794_vm0, %v15083_v49  ;;  %15388 = vmatpush.xpose.msk.msra.mxu3 %vm794_vm0, %v15115_v1  ;;  %v15081_v49 = vld [vmem:[%s17146_s29 + $0x7ba] sm:$0xff]  ;;  %v15113_v1 = vld [vmem:[%s17146_s29 + $0x96a] sm:$0xff]  ;;  %v20410_v11 = vpop.f32.mrf.mxu2 }
 0x5be   : > { %15338 = vmatpush.xpose.msk.msra.mxu0 %vm794_vm0, %v15066_v38  ;;  %15372 = vmatpush.xpose.msk.msra.mxu2 %vm794_vm0, %v15098_v21  ;;  %v20416_v21 = vpop.f32.mrf.mxu0  ;;  %v15064_v38 = vld [vmem:[%s17146_s29 + $0x6f2] sm:$0xff] }
 0x5bf   : > { %15355 = vmatpush.xpose.msk.msra.mxu1 %vm794_vm0, %v15082_v41  ;;  %15389 = vmatpush.xpose.msk.msra.mxu3 %vm794_vm0, %v15114_v23  ;;  %v20418_v23 = vpop.f32.mrf.mxu1  ;;  %v15080_v41 = vld [vmem:[%s17146_s29 + $0x7b2] sm:$0xff] }
 0x5c2   : > { %15339 = vmatpush.xpose.msk.msra.mxu0 %vm794_vm0, %v15065_v46  ;;  %15373 = vmatpush.xpose.msk.msra.mxu2 %vm794_vm0, %v15097_v58  ;;  %v15063_v46 = vld [vmem:[%s17146_s29 + $0x6e2] sm:$0xff]  ;;  %v15095_v58 = vld [vmem:[%s17146_s29 + $0x892] sm:$0xff]  ;;  %v20436_v19 = vpop.f32.mrf.mxu3 }
 0x5c3   : > { %15356 = vmatpush.xpose.msk.msra.mxu1 %vm794_vm0, %v15081_v49  ;;  %15390 = vmatpush.xpose.msk.msra.mxu3 %vm794_vm0, %v15113_v1  ;;  %v15079_v49 = vld [vmem:[%s17146_s29 + $0x7a2] sm:$0xff]  ;;  %v15111_v1 = vld [vmem:[%s17146_s29 + $0x952] sm:$0xff]  ;;  %v20434_v42 = vpop.f32.mrf.mxu2  ;;  %22633 = vst [vmem:[#allocation26_spill] sm:$0xff] %v20436_v19  ;;  %v15094_v19 = vld [vmem:[%s17146_s29 + $0x88a] sm:$0xff] }
 0x5c4   : > { %22632 = vst [vmem:[#allocation25_spill] sm:$0xff] %v20434_v42  ;;  %v2675_v42 = vadd.f32 %v20055_v35, %v19953_v47  ;;  %v15140_v35 = vld [vmem:[%s17146_s29 + $0xae2] sm:$0xff] }
 0x5c6   : > { %15340 = vmatpush.xpose.msk.msra.mxu0 %vm794_vm0, %v15064_v38  ;;  %15374 = vmatpush.xpose.msk.msra.mxu2 %vm794_vm0, %v15096_v27  ;;  %v20440_v38 = vpop.f32.mrf.mxu0 }
 0x5c7   : > { %15357 = vmatpush.xpose.msk.msra.mxu1 %vm794_vm0, %v15080_v41  ;;  %15391 = vmatpush.xpose.msk.msra.mxu3 %vm794_vm0, %v15112_v43  ;;  %22634 = vst [vmem:[#allocation27_spill] sm:$0xff] %v20440_v38  ;;  %v20442_v27 = vpop.f32.mrf.mxu1  ;;  %v15062_v43 = vld [vmem:[%s17146_s29 + $0x6da] sm:$0xff]  ;;  %v15157_v38 = vld [vmem:[%s17146_s29 + $0xbaa] sm:$0xff] }
 0x5c8   : > { %22635 = vst [vmem:[#allocation28_spill] sm:$0xff] %v20442_v27  ;;  %v15078_v41 = vld [vmem:[%s17146_s29 + $0x79a] sm:$0xff]  ;;  %v4326_v27 = vadd.f32 %v20166_v39, %v2675_v42 }
 0x5ca   : > { %15341 = vmatpush.xpose.msk.msra.mxu0 %vm794_vm0, %v15063_v46  ;;  %15375 = vmatpush.xpose.msk.msra.mxu2 %vm794_vm0, %v15095_v58  ;;  %v2695_v46 = vadd.f32 %v20057_v36, %v19955_v48  ;;  %v5692_v47 = vadd.f32 %v20264_v29, %v4326_v27  ;;  %v15156_v36 = vld [vmem:[%s17146_s29 + $0xba2] sm:$0xff]  ;;  %v20476_v42 = vpop.f32.mrf.mxu3  ;;  %v15188_v29 = vld [vmem:[%s17146_s29 + $0xd52] sm:$0xff] }
 0x5cb   : > { %15358 = vmatpush.xpose.msk.msra.mxu1 %vm794_vm0, %v15079_v49  ;;  %15392 = vmatpush.xpose.msk.msra.mxu3 %vm794_vm0, %v15111_v1  ;;  %v15110_v49 = vld [vmem:[%s17146_s29 + $0x94a] sm:$0xff]  ;;  %v15173_v1 = vld [vmem:[%s17146_s29 + $0xc9a] sm:$0xff]  ;;  %v15155_v27 = vld [vmem:[%s17146_s29 + $0xb92] sm:$0xff] }
 0x5cc   : > { %v4327_v58 = vadd.f32 %v20168_v40, %v2695_v46  ;;  %v20474_v40 = vpop.f32.mrf.mxu2 }
 0x5ce   : > { %15342 = vmatpush.xpose.msk.msra.mxu0 %vm794_vm0, %v15062_v43  ;;  %15376 = vmatpush.xpose.msk.msra.mxu2 %vm794_vm0, %v15094_v19  ;;  %v5693_v48 = vadd.f32 %v20266_v30, %v4327_v58  ;;  %v7057_v19 = vadd.f32 %v20368_v7, %v5692_v47  ;;  %v2735_v30 = vadd.f32 %v20090_v45, %v19973_v56  ;;  %v8119_v7 = vpop.f32.mrf.mxu0  ;;  %v15139_v45 = vld [vmem:[%s17146_s29 + $0xad2] sm:$0xff]  ;;  %v15171_v43 = vld [vmem:[%s17146_s29 + $0xc82] sm:$0xff]  ;;  %v15138_v58 = vld [vmem:[%s17146_s29 + $0xaca] sm:$0xff] }
 0x5cf   : > { %15359 = vmatpush.xpose.msk.msra.mxu1 %vm794_vm0, %v15078_v41  ;;  %15393 = vmatpush.xpose.msk.msra.mxu3 %vm794_vm0, %v15110_v49  ;;  %v15187_v41 = vld [vmem:[%s17146_s29 + $0xd42] sm:$0xff]  ;;  %v15170_v47 = vld [vmem:[%s17146_s29 + $0xc7a] sm:$0xff] }
 0x5d0   : > { %v7058_v39 = vadd.f32 %v20370_v57, %v5693_v48  ;;  %v4329_v56 = vadd.f32 %v20186_v54, %v2735_v30  ;;  %v15186_v48 = vld [vmem:[%s17146_s29 + $0xd3a] sm:$0xff]  ;;  %v15184_v30 = vld [vmem:[%s17146_s29 + $0xd22] sm:$0xff] }
 0x5d1   : > { %15343 = vmatmul.msk.f32.vlgmr.msra.gmra.mxu0 %vm794_vm0, %v20064_v37  ;;  %15377 = vmatmul.msk.f32.vlgmr.msra.gmra.mxu2 %vm794_vm0, %v20064_v37  ;;  %v8139_v57 = vpop.f32.mrf.mxu1 }
 0x5d2   : > { %15395 = vmatpush.xpose.msk.msrb.mxu0 %vm794_vm0, %v15141_v18  ;;  %15429 = vmatpush.xpose.msk.msrb.mxu2 %vm794_vm0, %v15173_v1  ;;  %v15172_v18 = vld [vmem:[%s17146_s29 + $0xc92] sm:$0xff]  ;;  %v5695_v49 = vadd.f32 %v20292_v12, %v4329_v56 }
 0x5d3   : > { %15412 = vmatpush.xpose.msk.msrb.mxu1 %vm794_vm0, %v15157_v38  ;;  %15446 = vmatpush.xpose.msk.msrb.mxu3 %vm794_vm0, %v15189_v16  ;;  %v2715_v16 = vadd.f32 %v20088_v44, %v19971_v55  ;;  %v20494_v38 = vadd.f32 %v8119_v7, %v7057_v19  ;;  %v20496_v55 = vadd.f32 %v8139_v57, %v7058_v39  ;;  %v15169_v19 = vld [vmem:[%s17146_s29 + $0xc6a] sm:$0xff]  ;;  %v15135_v7 = vld [vmem:[%s17146_s29 + $0xaa2] sm:$0xff]  ;;  %v15183_v56 = vld [vmem:[%s17146_s29 + $0xd12] sm:$0xff] }
 0x5d4   : > { %15360 = vmatmul.msk.f32.vlgmr.msra.gmra.mxu1 %vm794_vm0, %v20064_v37  ;;  %15394 = vmatmul.msk.f32.vlgmr.msra.gmra.mxu3 %vm794_vm0, %v20064_v37  ;;  %v7060_v54 = vadd.f32 %v20388_v34, %v5695_v49  ;;  %v8159_v1 = vpop.f32.mrf.mxu2  ;;  %v15137_v34 = vld [vmem:[%s17146_s29 + $0xaba] sm:$0xff]  ;;  %v15185_v39 = vld [vmem:[%s17146_s29 + $0xd2a] sm:$0xff]  ;;  %v15151_v57 = vld [vmem:[%s17146_s29 + $0xb62] sm:$0xff] }
 0x5d5   : > { %v4328_v44 = vadd.f32 %v20184_v53, %v2715_v16  ;;  %v15168_v16 = vld [vmem:[%s17146_s29 + $0xc62] sm:$0xff]  ;;  %v15149_v49 = vld [vmem:[%s17146_s29 + $0xb4a] sm:$0xff] }
 0x5d6   : > { %15396 = vmatpush.xpose.msk.msrb.mxu0 %vm794_vm0, %v15140_v35  ;;  %15430 = vmatpush.xpose.msk.msrb.mxu2 %vm794_vm0, %v15172_v18  ;;  %v15136_v18 = vld [vmem:[%s17146_s29 + $0xab2] sm:$0xff] }
 0x5d7   : > { %15413 = vmatpush.xpose.msk.msrb.mxu1 %vm794_vm0, %v15156_v36  ;;  %15447 = vmatpush.xpose.msk.msrb.mxu3 %vm794_vm0, %v15188_v29  ;;  %v5694_v46 = vadd.f32 %v20290_v10, %v4328_v44  ;;  %v15154_v10 = vld [vmem:[%s17146_s29 + $0xb8a] sm:$0xff]  ;;  %v8179_v12 = vpop.f32.mrf.mxu3  ;;  %v15153_v36 = vld [vmem:[%s17146_s29 + $0xb7a] sm:$0xff]  ;;  %v15152_v29 = vld [vmem:[%s17146_s29 + $0xb72] sm:$0xff] }
 0x5d8   : > { %v15167_v44 = vld [vmem:[%s17146_s29 + $0xc52] sm:$0xff] }
 0x5d9   : > { %v7059_v53 = vadd.f32 %v20386_v24, %v5694_v46  ;;  %v20520_v24 = vadd.f32 %v8179_v12, %v7060_v54  ;;  %v15133_v46 = vld [vmem:[%s17146_s29 + $0xa8a] sm:$0xff]  ;;  %v15181_v54 = vld [vmem:[%s17146_s29 + $0xcfa] sm:$0xff]  ;;  %v15180_v12 = vld [vmem:[%s17146_s29 + $0xcf2] sm:$0xff] }
 0x5da   : > { %15397 = vmatpush.xpose.msk.msrb.mxu0 %vm794_vm0, %v15139_v45  ;;  %15431 = vmatpush.xpose.msk.msrb.mxu2 %vm794_vm0, %v15171_v43  ;;  %v15134_v45 = vld [vmem:[%s17146_s29 + $0xa9a] sm:$0xff]  ;;  %v15166_v43 = vld [vmem:[%s17146_s29 + $0xc4a] sm:$0xff] }
 0x5db   : > { %15414 = vmatpush.xpose.msk.msrb.mxu1 %vm794_vm0, %v15155_v27  ;;  %15448 = vmatpush.xpose.msk.msrb.mxu3 %vm794_vm0, %v15187_v41  ;;  %v20518_v35 = vadd.f32 %v8159_v1, %v7059_v53  ;;  %v15150_v27 = vld [vmem:[%s17146_s29 + $0xb5a] sm:$0xff]  ;;  %v15182_v41 = vld [vmem:[%s17146_s29 + $0xd0a] sm:$0xff]  ;;  %v15164_v1 = vld [vmem:[%s17146_s29 + $0xc32] sm:$0xff] }
 0x5dc   : > { %v15165_v53 = vld [vmem:[%s17146_s29 + $0xc3a] sm:$0xff] }
 0x5de   : > { %15398 = vmatpush.xpose.msk.msrb.mxu0 %vm794_vm0, %v15138_v58  ;;  %15432 = vmatpush.xpose.msk.msrb.mxu2 %vm794_vm0, %v15170_v47  ;;  %v15132_v58 = vld [vmem:[%s17146_s29 + $0xa82] sm:$0xff]  ;;  %v15131_v47 = vld [vmem:[%s17146_s29 + $0xa72] sm:$0xff] }
 0x5df   : > { %15415 = vmatpush.xpose.msk.msrb.mxu1 %vm794_vm0, %v15154_v10  ;;  %15449 = vmatpush.xpose.msk.msrb.mxu3 %vm794_vm0, %v15186_v48  ;;  %v15148_v10 = vld [vmem:[%s17146_s29 + $0xb42] sm:$0xff]  ;;  %v15147_v48 = vld [vmem:[%s17146_s29 + $0xb32] sm:$0xff] }
 0x5e2   : > { %15399 = vmatpush.xpose.msk.msrb.mxu0 %vm794_vm0, %v15137_v34  ;;  %15433 = vmatpush.xpose.msk.msrb.mxu2 %vm794_vm0, %v15169_v19  ;;  %v15163_v34 = vld [vmem:[%s17146_s29 + $0xc22] sm:$0xff]  ;;  %v15130_v19 = vld [vmem:[%s17146_s29 + $0xa6a] sm:$0xff] }
 0x5e3   : > { %15416 = vmatpush.xpose.msk.msrb.mxu1 %vm794_vm0, %v15153_v36  ;;  %15450 = vmatpush.xpose.msk.msrb.mxu3 %vm794_vm0, %v15185_v39  ;;  %v15179_v36 = vld [vmem:[%s17146_s29 + $0xce2] sm:$0xff]  ;;  %v15146_v39 = vld [vmem:[%s17146_s29 + $0xb2a] sm:$0xff] }
 0x5e6   : > { %15400 = vmatpush.xpose.msk.msrb.mxu0 %vm794_vm0, %v15136_v18  ;;  %15434 = vmatpush.xpose.msk.msrb.mxu2 %vm794_vm0, %v15168_v16  ;;  %v15162_v18 = vld [vmem:[%s17146_s29 + $0xc1a] sm:$0xff] }
 0x5e7   : > { %15417 = vmatpush.xpose.msk.msrb.mxu1 %vm794_vm0, %v15152_v29  ;;  %15451 = vmatpush.xpose.msk.msrb.mxu3 %vm794_vm0, %v15184_v30  ;;  %v15178_v29 = vld [vmem:[%s17146_s29 + $0xcda] sm:$0xff] }
 0x5e8   : > { %v15129_v16 = vld [vmem:[%s17146_s29 + $0xa5a] sm:$0xff] }
 0x5e9   : > { %v15145_v30 = vld [vmem:[%s17146_s29 + $0xb1a] sm:$0xff] }
 0x5ea   : > { %15401 = vmatpush.xpose.msk.msrb.mxu0 %vm794_vm0, %v15135_v7  ;;  %15435 = vmatpush.xpose.msk.msrb.mxu2 %vm794_vm0, %v15167_v44  ;;  %v15161_v7 = vld [vmem:[%s17146_s29 + $0xc0a] sm:$0xff]  ;;  %v15128_v44 = vld [vmem:[%s17146_s29 + $0xa52] sm:$0xff] }
 0x5eb   : > { %15418 = vmatpush.xpose.msk.msrb.mxu1 %vm794_vm0, %v15151_v57  ;;  %15452 = vmatpush.xpose.msk.msrb.mxu3 %vm794_vm0, %v15183_v56  ;;  %v15177_v57 = vld [vmem:[%s17146_s29 + $0xcca] sm:$0xff]  ;;  %v15144_v56 = vld [vmem:[%s17146_s29 + $0xb12] sm:$0xff] }
 0x5ee   : > { %15402 = vmatpush.xpose.msk.msrb.mxu0 %vm794_vm0, %v15134_v45  ;;  %15436 = vmatpush.xpose.msk.msrb.mxu2 %vm794_vm0, %v15166_v43  ;;  %v15160_v45 = vld [vmem:[%s17146_s29 + $0xc02] sm:$0xff] }
 0x5ef   : > { %15419 = vmatpush.xpose.msk.msrb.mxu1 %vm794_vm0, %v15150_v27  ;;  %15453 = vmatpush.xpose.msk.msrb.mxu3 %vm794_vm0, %v15182_v41  ;;  %v15176_v27 = vld [vmem:[%s17146_s29 + $0xcc2] sm:$0xff] }
 0x5f0   : > { %v15127_v43 = vld [vmem:[%s17146_s29 + $0xa42] sm:$0xff] }
 0x5f1   : > { %v15143_v41 = vld [vmem:[%s17146_s29 + $0xb02] sm:$0xff] }
 0x5f2   : > { %15403 = vmatpush.xpose.msk.msrb.mxu0 %vm794_vm0, %v15133_v46  ;;  %15437 = vmatpush.xpose.msk.msrb.mxu2 %vm794_vm0, %v15165_v53  ;;  %v15159_v46 = vld [vmem:[%s17146_s29 + $0xbf2] sm:$0xff]  ;;  %v15126_v53 = vld [vmem:[%s17146_s29 + $0xa3a] sm:$0xff] }
 0x5f3   : > { %15420 = vmatpush.xpose.msk.msrb.mxu1 %vm794_vm0, %v15149_v49  ;;  %15454 = vmatpush.xpose.msk.msrb.mxu3 %vm794_vm0, %v15181_v54  ;;  %v15175_v49 = vld [vmem:[%s17146_s29 + $0xcb2] sm:$0xff]  ;;  %v15142_v54 = vld [vmem:[%s17146_s29 + $0xafa] sm:$0xff] }
 0x5f6   : > { %15404 = vmatpush.xpose.msk.msrb.mxu0 %vm794_vm0, %v15132_v58  ;;  %15438 = vmatpush.xpose.msk.msrb.mxu2 %vm794_vm0, %v15164_v1  ;;  %v2755_v58 = vadd.f32 %v20094_v50, %v19977_v59  ;;  %v15158_v1 = vld [vmem:[%s17146_s29 + $0xbea] sm:$0xff] }
 0x5f7   : > { %15421 = vmatpush.xpose.msk.msrb.mxu1 %vm794_vm0, %v15148_v10  ;;  %15455 = vmatpush.xpose.msk.msrb.mxu3 %vm794_vm0, %v15180_v12  ;;  %v2775_v10 = vadd.f32 %v20096_v51, %v19979_v60  ;;  %v15174_v12 = vld [vmem:[%s17146_s29 + $0xcaa] sm:$0xff]  ;;  %v15477_v51 = vld [vmem:[%s17146_s29 + $0xd8] sm:$0xff] }
 0x5f8   : > { %v15526_v59 = vld [vmem:[%s17146_s29 + $0x350] sm:$0xff] }
 0x5fa   : > { %15405 = vmatpush.xpose.msk.msrb.mxu0 %vm794_vm0, %v15131_v47  ;;  %15439 = vmatpush.xpose.msk.msrb.mxu2 %vm794_vm0, %v15163_v34  ;;  %v15478_v47 = vld [vmem:[%s17146_s29 + $0xe0] sm:$0xff]  ;;  %v4330_v34 = vadd.f32 %v20190_v61, %v2755_v58  ;;  %v15493_v61 = vld [vmem:[%s17146_s29 + $0x198] sm:$0xff]  ;;  %v15489_v58 = vld [vmem:[%s17146_s29 + $0x168] sm:$0xff] }
 0x5fb   : > { %15422 = vmatpush.xpose.msk.msrb.mxu1 %vm794_vm0, %v15147_v48  ;;  %15456 = vmatpush.xpose.msk.msrb.mxu3 %vm794_vm0, %v15179_v36  ;;  %v15494_v48 = vld [vmem:[%s17146_s29 + $0x1a0] sm:$0xff]  ;;  %v4331_v36 = vadd.f32 %v20192_v0, %v2775_v10  ;;  %v15505_v10 = vld [vmem:[%s17146_s29 + $0x258] sm:$0xff] }
 0x5fc   : > { %v5696_v60 = vadd.f32 %v20296_v13, %v4330_v34  ;;  %v15509_v13 = vld [vmem:[%s17146_s29 + $0x288] sm:$0xff] }
 0x5fd   : > { %v5697_v50 = vadd.f32 %v20298_v14, %v4331_v36  ;;  %v15525_v14 = vld [vmem:[%s17146_s29 + $0x348] sm:$0xff]  ;;  %v15471_v36 = vld [vmem:[%s17146_s29 + $0x90] sm:$0xff] }
 0x5fe   : > { %15406 = vmatpush.xpose.msk.msrb.mxu0 %vm794_vm0, %v15130_v19  ;;  %15440 = vmatpush.xpose.msk.msrb.mxu2 %vm794_vm0, %v15162_v18  ;;  %v15510_v19 = vld [vmem:[%s17146_s29 + $0x290] sm:$0xff]  ;;  %v7061_v0 = vadd.f32 %v20392_v32, %v5696_v60  ;;  %v2795_v18 = vadd.f32 %v20112_v62, %v19995_v3  ;;  %v15520_v34 = vld [vmem:[%s17146_s29 + $0x308] sm:$0xff]  ;;  %v15519_v60 = vld [vmem:[%s17146_s29 + $0x300] sm:$0xff] }
 0x5ff   : > { %15423 = vmatpush.xpose.msk.msrb.mxu1 %vm794_vm0, %v15146_v39  ;;  %15457 = vmatpush.xpose.msk.msrb.mxu3 %vm794_vm0, %v15178_v29  ;;  %v7062_v39 = vadd.f32 %v20394_v52, %v5697_v50  ;;  %v2815_v29 = vadd.f32 %v20114_v63, %v19997_v4  ;;  %v15492_v63 = vld [vmem:[%s17146_s29 + $0x188] sm:$0xff]  ;;  %v15470_v50 = vld [vmem:[%s17146_s29 + $0x80] sm:$0xff] }
 0x600   : > { %v4332_v62 = vadd.f32 %v20208_v15, %v2795_v18  ;;  %v15517_v18 = vld [vmem:[%s17146_s29 + $0x2e8] sm:$0xff] }
 0x601   : > { %v4333_v4 = vadd.f32 %v20210_v20, %v2815_v29  ;;  %v15468_v29 = vld [vmem:[%s17146_s29 + $0x68] sm:$0xff] }
 0x602   : > { %15407 = vmatpush.xpose.msk.msrb.mxu0 %vm794_vm0, %v15129_v16  ;;  %15441 = vmatpush.xpose.msk.msrb.mxu2 %vm794_vm0, %v15161_v7  ;;  %v15524_v7 = vld [vmem:[%s17146_s29 + $0x338] sm:$0xff] }
 0x603   : > { %15424 = vmatpush.xpose.msk.msrb.mxu1 %vm794_vm0, %v15145_v30  ;;  %15458 = vmatpush.xpose.msk.msrb.mxu3 %vm794_vm0, %v15177_v57  ;;  %v15508_v30 = vld [vmem:[%s17146_s29 + $0x278] sm:$0xff]  ;;  %v5698_v57 = vadd.f32 %v20314_v6, %v4332_v62  ;;  %v15491_v6 = vld [vmem:[%s17146_s29 + $0x180] sm:$0xff] }
 0x604   : > { %v15516_v62 = vld [vmem:[%s17146_s29 + $0x2d8] sm:$0xff] }
 0x605   : > { %v7063_v15 = vadd.f32 %v20410_v11, %v5698_v57  ;;  %v15482_v57 = vld [vmem:[%s17146_s29 + $0x110] sm:$0xff] }
 0x606   : > { %15408 = vmatpush.xpose.msk.msrb.mxu0 %vm794_vm0, %v15128_v44  ;;  %15442 = vmatpush.xpose.msk.msrb.mxu2 %vm794_vm0, %v15160_v45  ;;  %v5699_v44 = vadd.f32 %v20316_v28, %v4333_v4  ;;  %v15467_v4 = vld [vmem:[%s17146_s29 + $0x60] sm:$0xff] }
 0x607   : > { %15425 = vmatpush.xpose.msk.msrb.mxu1 %vm794_vm0, %v15144_v56  ;;  %15459 = vmatpush.xpose.msk.msrb.mxu3 %vm794_vm0, %v15176_v27  ;;  %v15475_v56 = vld [vmem:[%s17146_s29 + $0xc0] sm:$0xff]  ;;  %v15507_v27 = vld [vmem:[%s17146_s29 + $0x270] sm:$0xff] }
 0x608   : > { %v7064_v20 = vadd.f32 %v20412_v31, %v5699_v44  ;;  %v15474_v31 = vld [vmem:[%s17146_s29 + $0xb0] sm:$0xff]  ;;  %v15498_v44 = vld [vmem:[%s17146_s29 + $0x200] sm:$0xff] }
 0x60a   : > { %15409 = vmatpush.xpose.msk.msrb.mxu0 %vm794_vm0, %v15127_v43  ;;  %15443 = vmatpush.xpose.msk.msrb.mxu2 %vm794_vm0, %v15159_v46  ;;  %v15523_v43 = vld [vmem:[%s17146_s29 + $0x330] sm:$0xff] }
 0x60b   : > { %15426 = vmatpush.xpose.msk.msrb.mxu1 %vm794_vm0, %v15143_v41  ;;  %15460 = vmatpush.xpose.msk.msrb.mxu3 %vm794_vm0, %v15175_v49  ;;  %v15490_v46 = vld [vmem:[%s17146_s29 + $0x170] sm:$0xff]  ;;  %v15506_v49 = vld [vmem:[%s17146_s29 + $0x260] sm:$0xff] }
 0x60e   : > { %15410 = vmatpush.xpose.msk.msrb.mxu0 %vm794_vm0, %v15126_v53  ;;  %15444 = vmatpush.xpose.msk.msrb.mxu2 %vm794_vm0, %v15158_v1  ;;  %v8199_v32 = vpop.f32.mrf.mxu0  ;;  %v15522_v53 = vld [vmem:[%s17146_s29 + $0x320] sm:$0xff]  ;;  %v15521_v1 = vld [vmem:[%s17146_s29 + $0x318] sm:$0xff] }
 0x60f   : > { %15427 = vmatpush.xpose.msk.msrb.mxu1 %vm794_vm0, %v15142_v54  ;;  %15461 = vmatpush.xpose.msk.msrb.mxu3 %vm794_vm0, %v15174_v12  ;;  %v20658_v16 = vadd.f32 %v8199_v32, %v7061_v0  ;;  %v15473_v54 = vld [vmem:[%s17146_s29 + $0xa8] sm:$0xff]  ;;  %v15472_v12 = vld [vmem:[%s17146_s29 + $0x98] sm:$0xff]  ;;  %v15518_v0 = vld [vmem:[%s17146_s29 + $0x2f0] sm:$0xff] }
 0x610   : > { %v15484_v32 = vld [vmem:[%s17146_s29 + $0x128] sm:$0xff] }
 0x611   : > { %15411 = vmatmul.msk.f32.vlgmr.msrb.gmra.mxu0 %vm794_vm0, %v20064_v37  ;;  %15445 = vmatmul.msk.f32.vlgmr.msrb.gmra.mxu2 %vm794_vm0, %v20064_v37  ;;  %v8219_v52 = vpop.f32.mrf.mxu1 }
 0x612   : > { %15720 = vmatpush.xpose.msk.msra.mxu0 %vm794_vm0, %v15478_v47  ;;  %15754 = vmatpush.xpose.msk.msra.mxu2 %vm794_vm0, %v15510_v19  ;;  %v20660_v3 = vadd.f32 %v8219_v52, %v7062_v39  ;;  %v15488_v47 = vld [vmem:[%s17146_s29 + $0x158] sm:$0xff]  ;;  %v15487_v19 = vld [vmem:[%s17146_s29 + $0x150] sm:$0xff] }
 0x613   : > { %15737 = vmatpush.xpose.msk.msra.mxu1 %vm794_vm0, %v15494_v48  ;;  %15771 = vmatpush.xpose.msk.msra.mxu3 %vm794_vm0, %v15526_v59  ;;  %v15504_v48 = vld [vmem:[%s17146_s29 + $0x248] sm:$0xff]  ;;  %v15503_v59 = vld [vmem:[%s17146_s29 + $0x240] sm:$0xff]  ;;  %v15469_v39 = vld [vmem:[%s17146_s29 + $0x78] sm:$0xff] }
 0x614   : > { %15428 = vmatmul.msk.f32.vlgmr.msrb.gmra.mxu1 %vm794_vm0, %v20064_v37  ;;  %15462 = vmatmul.msk.f32.vlgmr.msrb.gmra.mxu3 %vm794_vm0, %v20064_v37  ;;  %v15476_v37 = vld [vmem:[%s17146_s29 + $0xc8] sm:$0xff]  ;;  %v8239_v45 = vpop.f32.mrf.mxu2  ;;  %v15500_v52 = vld [vmem:[%s17146_s29 + $0x218] sm:$0xff] }
 0x615   : > { %v20682_v41 = vadd.f32 %v8239_v45, %v7063_v15  ;;  %v15514_v15 = vld [vmem:[%s17146_s29 + $0x2c0] sm:$0xff]  ;;  %v15513_v45 = vld [vmem:[%s17146_s29 + $0x2b8] sm:$0xff] }
 0x616   : > { %15721 = vmatpush.xpose.msk.msra.mxu0 %vm794_vm0, %v15477_v51  ;;  %15755 = vmatpush.xpose.msk.msra.mxu2 %vm794_vm0, %v15509_v13  ;;  %v15486_v51 = vld [vmem:[%s17146_s29 + $0x140] sm:$0xff]  ;;  %v15485_v13 = vld [vmem:[%s17146_s29 + $0x138] sm:$0xff] }
 0x617   : > { %15738 = vmatpush.xpose.msk.msra.mxu1 %vm794_vm0, %v15493_v61  ;;  %15772 = vmatpush.xpose.msk.msra.mxu3 %vm794_vm0, %v15525_v14  ;;  %v8259_v28 = vpop.f32.mrf.mxu3  ;;  %v15502_v61 = vld [vmem:[%s17146_s29 + $0x230] sm:$0xff]  ;;  %v15501_v14 = vld [vmem:[%s17146_s29 + $0x228] sm:$0xff] }
 0x618   : > { %v20684_v11 = vadd.f32 %v8259_v28, %v7064_v20  ;;  %v15465_v20 = vld [vmem:[%s17146_s29 + $0x48] sm:$0xff]  ;;  %v15464_v28 = vld [vmem:[%s17146_s29 + $0x38] sm:$0xff] }
 0x61a   : > { %15722 = vmatpush.xpose.msk.msra.mxu0 %vm794_vm0, %v15476_v37  ;;  %15756 = vmatpush.xpose.msk.msra.mxu2 %vm794_vm0, %v15508_v30  ;;  %v15483_v37 = vld [vmem:[%s17146_s29 + $0x120] sm:$0xff]  ;;  %v15515_v30 = vld [vmem:[%s17146_s29 + $0x2d0] sm:$0xff] }
 0x61b   : > { %15739 = vmatpush.xpose.msk.msra.mxu1 %vm794_vm0, %v15492_v63  ;;  %15773 = vmatpush.xpose.msk.msra.mxu3 %vm794_vm0, %v15524_v7  ;;  %v15499_v63 = vld [vmem:[%s17146_s29 + $0x210] sm:$0xff] }
 0x61c   : > { %v15466_v7 = vld [vmem:[%s17146_s29 + $0x50] sm:$0xff] }
 0x61e   : > { %15723 = vmatpush.xpose.msk.msra.mxu0 %vm794_vm0, %v15475_v56  ;;  %15757 = vmatpush.xpose.msk.msra.mxu2 %vm794_vm0, %v15507_v27  ;;  %v15481_v56 = vld [vmem:[%s17146_s29 + $0x108] sm:$0xff]  ;;  %v15480_v27 = vld [vmem:[%s17146_s29 + $0xf8] sm:$0xff] }
 0x61f   : > { %15740 = vmatpush.xpose.msk.msra.mxu1 %vm794_vm0, %v15491_v6  ;;  %15774 = vmatpush.xpose.msk.msra.mxu3 %vm794_vm0, %v15523_v43  ;;  %v15497_v6 = vld [vmem:[%s17146_s29 + $0x1f8] sm:$0xff]  ;;  %v15496_v43 = vld [vmem:[%s17146_s29 + $0x1e8] sm:$0xff] }
 0x622   : > { %15724 = vmatpush.xpose.msk.msra.mxu0 %vm794_vm0, %v15474_v31  ;;  %15758 = vmatpush.xpose.msk.msra.mxu2 %vm794_vm0, %v15506_v49  ;;  %v15512_v31 = vld [vmem:[%s17146_s29 + $0x2a8] sm:$0xff]  ;;  %v15479_v49 = vld [vmem:[%s17146_s29 + $0xf0] sm:$0xff] }
 0x623   : > { %15741 = vmatpush.xpose.msk.msra.mxu1 %vm794_vm0, %v15490_v46  ;;  %15775 = vmatpush.xpose.msk.msra.mxu3 %vm794_vm0, %v15522_v53  ;;  %v15463_v46 = vld [vmem:[%s17146_s29 + $0x30] sm:$0xff]  ;;  %v2835_v53 = vadd.f32 %v20118_v2, %v20001_v8 }
 0x624   : > { %v20799_v8 = vld [vmem:[%s22602_s1 + $0x30] sm:$0xff] }
 0x626   : > { %15725 = vmatpush.xpose.msk.msra.mxu0 %vm794_vm0, %v15473_v54  ;;  %15759 = vmatpush.xpose.msk.msra.mxu2 %vm794_vm0, %v15505_v10  ;;  %v2855_v54 = vadd.f32 %v20120_v5, %v20003_v9  ;;  %v15511_v10 = vld [vmem:[%s17146_s29 + $0x2a0] sm:$0xff]  ;;  %v15541_v5 = vld [vmem:[%s17146_s29 + $0x438] sm:$0xff] }
 0x627   : > { %15742 = vmatpush.xpose.msk.msra.mxu1 %vm794_vm0, %v15489_v58  ;;  %15776 = vmatpush.xpose.msk.msra.mxu3 %vm794_vm0, %v15521_v1  ;;  %v15495_v58 = vld [vmem:[%s17146_s29 + $0x1e0] sm:$0xff] }
 0x628   : > { %v15542_v1 = vld [vmem:[%s17146_s29 + $0x440] sm:$0xff] }
 0x62a   : > { %15726 = vmatpush.xpose.msk.msra.mxu0 %vm794_vm0, %v15472_v12  ;;  %15760 = vmatpush.xpose.msk.msra.mxu2 %vm794_vm0, %v15504_v48  ;;  %v15558_v12 = vld [vmem:[%s17146_s29 + $0x500] sm:$0xff]  ;;  %v4335_v48 = vadd.f32 %v20216_v26, %v2855_v54 }
 0x62b   : > { %15743 = vmatpush.xpose.msk.msra.mxu1 %vm794_vm0, %v15488_v47  ;;  %15777 = vmatpush.xpose.msk.msra.mxu3 %vm794_vm0, %v15520_v34  ;;  %v4334_v47 = vadd.f32 %v20214_v25, %v2835_v53  ;;  %v15574_v34 = vld [vmem:[%s17146_s29 + $0x5f0] sm:$0xff]  ;;  %v15557_v25 = vld [vmem:[%s17146_s29 + $0x4f8] sm:$0xff]  ;;  %v15570_v53 = vld [vmem:[%s17146_s29 + $0x5c0] sm:$0xff] }
 0x62c   : > { %v5701_v2 = vadd.f32 %v20322_v33, %v4335_v48  ;;  %v15589_v33 = vld [vmem:[%s17146_s29 + $0x6a8] sm:$0xff]  ;;  %v15586_v54 = vld [vmem:[%s17146_s29 + $0x680] sm:$0xff]  ;;  %v15552_v48 = vld [vmem:[%s17146_s29 + $0x4b8] sm:$0xff] }
 0x62d   : > { %v5700_v9 = vadd.f32 %v20320_v22, %v4334_v47  ;;  %v15573_v22 = vld [vmem:[%s17146_s29 + $0x5e8] sm:$0xff]  ;;  %v15536_v47 = vld [vmem:[%s17146_s29 + $0x3f8] sm:$0xff] }
 0x62e   : > { %15727 = vmatpush.xpose.msk.msra.mxu0 %vm794_vm0, %v15471_v36  ;;  %15761 = vmatpush.xpose.msk.msra.mxu2 %vm794_vm0, %v15503_v59  ;;  %v15590_v36 = vld [vmem:[%s17146_s29 + $0x6b0] sm:$0xff]  ;;  %v22636_v59 = vld [vmem:[#allocation7_spill] sm:$0xff] }
 0x62f   : > { %15744 = vmatpush.xpose.msk.msra.mxu1 %vm794_vm0, %v15487_v19  ;;  %15778 = vmatpush.xpose.msk.msra.mxu3 %vm794_vm0, %v15519_v60  ;;  %v7065_v26 = vadd.f32 %v20416_v21, %v5700_v9  ;;  %v7066_v19 = vadd.f32 %v20418_v23, %v5701_v2  ;;  %v2875_v60 = vadd.f32 %v22636_v59, %v20019_v17  ;;  %v15535_v9 = vld [vmem:[%s17146_s29 + $0x3f0] sm:$0xff]  ;;  %v15533_v59 = vld [vmem:[%s17146_s29 + $0x3d8] sm:$0xff] }
 0x630   : > { %v15551_v2 = vld [vmem:[%s17146_s29 + $0x4b0] sm:$0xff] }
 0x632   : > { %15728 = vmatpush.xpose.msk.msra.mxu0 %vm794_vm0, %v15470_v50  ;;  %15762 = vmatpush.xpose.msk.msra.mxu2 %vm794_vm0, %v15502_v61  ;;  %v22637_v50 = vld [vmem:[#allocation2_spill] sm:$0xff] }
 0x633   : > { %15745 = vmatpush.xpose.msk.msra.mxu1 %vm794_vm0, %v15486_v51  ;;  %15779 = vmatpush.xpose.msk.msra.mxu3 %vm794_vm0, %v15518_v0  ;;  %v22638_v51 = vld [vmem:[#allocation8_spill] sm:$0xff] }
 0x634   : > { %v2895_v61 = vadd.f32 %v22638_v51, %v22637_v50  ;;  %v15565_v50 = vld [vmem:[%s17146_s29 + $0x588] sm:$0xff] }
 0x635   : > { %v15581_v51 = vld [vmem:[%s17146_s29 + $0x648] sm:$0xff] }
 0x636   : > { %15729 = vmatpush.xpose.msk.msra.mxu0 %vm794_vm0, %v15469_v39  ;;  %15763 = vmatpush.xpose.msk.msra.mxu2 %vm794_vm0, %v15501_v14  ;;  %v22639_v39 = vld [vmem:[#allocation13_spill] sm:$0xff]  ;;  %v22640_v14 = vld [vmem:[#allocation14_spill] sm:$0xff] }
 0x637   : > { %15746 = vmatpush.xpose.msk.msra.mxu1 %vm794_vm0, %v15485_v13  ;;  %15780 = vmatpush.xpose.msk.msra.mxu3 %vm794_vm0, %v15517_v18  ;;  %v4336_v13 = vadd.f32 %v22639_v39, %v2875_v60  ;;  %v4337_v18 = vadd.f32 %v22640_v14, %v2895_v61  ;;  %v15549_v60 = vld [vmem:[%s17146_s29 + $0x498] sm:$0xff]  ;;  %v15532_v61 = vld [vmem:[%s17146_s29 + $0x3c8] sm:$0xff]  ;;  %v15547_v14 = vld [vmem:[%s17146_s29 + $0x480] sm:$0xff] }
 0x638   : > { %v15580_v39 = vld [vmem:[%s17146_s29 + $0x638] sm:$0xff] }
 0x63a   : > { %15730 = vmatpush.xpose.msk.msra.mxu0 %vm794_vm0, %v15468_v29  ;;  %15764 = vmatpush.xpose.msk.msra.mxu2 %vm794_vm0, %v15500_v52  ;;  %v15540_v29 = vld [vmem:[%s17146_s29 + $0x428] sm:$0xff]  ;;  %v15572_v52 = vld [vmem:[%s17146_s29 + $0x5d8] sm:$0xff] }
 0x63b   : > { %15747 = vmatpush.xpose.msk.msra.mxu1 %vm794_vm0, %v15484_v32  ;;  %15781 = vmatpush.xpose.msk.msra.mxu3 %vm794_vm0, %v15516_v62  ;;  %v15556_v32 = vld [vmem:[%s17146_s29 + $0x4e8] sm:$0xff]  ;;  %v15588_v62 = vld [vmem:[%s17146_s29 + $0x698] sm:$0xff] }
 0x63e   : > { %15731 = vmatpush.xpose.msk.msra.mxu0 %vm794_vm0, %v15467_v4  ;;  %15765 = vmatpush.xpose.msk.msra.mxu2 %vm794_vm0, %v15499_v63  ;;  %v22641_v4 = vld [vmem:[#allocation19_spill] sm:$0xff]  ;;  %v22642_v63 = vld [vmem:[#allocation20_spill] sm:$0xff] }
 0x63f   : > { %15748 = vmatpush.xpose.msk.msra.mxu1 %vm794_vm0, %v15483_v37  ;;  %15782 = vmatpush.xpose.msk.msra.mxu3 %vm794_vm0, %v15515_v30  ;;  %v5702_v37 = vadd.f32 %v22641_v4, %v4336_v13  ;;  %v5703_v30 = vadd.f32 %v22642_v63, %v4337_v18  ;;  %v15531_v13 = vld [vmem:[%s17146_s29 + $0x3c0] sm:$0xff]  ;;  %v15563_v18 = vld [vmem:[%s17146_s29 + $0x570] sm:$0xff]  ;;  %v15545_v63 = vld [vmem:[%s17146_s29 + $0x468] sm:$0xff] }
 0x640   : > { %v15578_v4 = vld [vmem:[%s17146_s29 + $0x620] sm:$0xff] }
 0x642   : > { %15732 = vmatpush.xpose.msk.msra.mxu0 %vm794_vm0, %v15466_v7  ;;  %15766 = vmatpush.xpose.msk.msra.mxu2 %vm794_vm0, %v15498_v44  ;;  %v22643_v7 = vld [vmem:[#allocation25_spill] sm:$0xff]  ;;  %v22644_v44 = vld [vmem:[#allocation26_spill] sm:$0xff] }
 0x643   : > { %15749 = vmatpush.xpose.msk.msra.mxu1 %vm794_vm0, %v15482_v57  ;;  %15783 = vmatpush.xpose.msk.msra.mxu3 %vm794_vm0, %v15514_v15  ;;  %v7067_v57 = vadd.f32 %v22643_v7, %v5702_v37  ;;  %v7068_v15 = vadd.f32 %v22644_v44, %v5703_v30  ;;  %v15529_v37 = vld [vmem:[%s17146_s29 + $0x3a8] sm:$0xff]  ;;  %v15561_v30 = vld [vmem:[%s17146_s29 + $0x558] sm:$0xff] }
 0x644   : > { %v15577_v7 = vld [vmem:[%s17146_s29 + $0x618] sm:$0xff] }
 0x645   : > { %v15544_v44 = vld [vmem:[%s17146_s29 + $0x458] sm:$0xff] }
 0x646   : > { %15733 = vmatpush.xpose.msk.msra.mxu0 %vm794_vm0, %v15465_v20  ;;  %15767 = vmatpush.xpose.msk.msra.mxu2 %vm794_vm0, %v15497_v6  ;;  %v15539_v20 = vld [vmem:[%s17146_s29 + $0x420] sm:$0xff] }
 0x647   : > { %15750 = vmatpush.xpose.msk.msra.mxu1 %vm794_vm0, %v15481_v56  ;;  %15784 = vmatpush.xpose.msk.msra.mxu3 %vm794_vm0, %v15513_v45  ;;  %v15555_v56 = vld [vmem:[%s17146_s29 + $0x4e0] sm:$0xff] }
 0x64a   : > { %15734 = vmatpush.xpose.msk.msra.mxu0 %vm794_vm0, %v15464_v28  ;;  %15768 = vmatpush.xpose.msk.msra.mxu2 %vm794_vm0, %v15496_v43  ;;  %v15571_v28 = vld [vmem:[%s17146_s29 + $0x5d0] sm:$0xff] }
 0x64b   : > { %15751 = vmatpush.xpose.msk.msra.mxu1 %vm794_vm0, %v15480_v27  ;;  %15785 = vmatpush.xpose.msk.msra.mxu3 %vm794_vm0, %v15512_v31  ;;  %v15587_v27 = vld [vmem:[%s17146_s29 + $0x690] sm:$0xff] }
 0x64e   : > { %15735 = vmatpush.xpose.msk.msra.mxu0 %vm794_vm0, %v15463_v46  ;;  %15769 = vmatpush.xpose.msk.msra.mxu2 %vm794_vm0, %v15495_v58  ;;  %v8279_v21 = vpop.f32.mrf.mxu0  ;;  %v15538_v46 = vld [vmem:[%s17146_s29 + $0x410] sm:$0xff]  ;;  %v15537_v58 = vld [vmem:[%s17146_s29 + $0x408] sm:$0xff] }
 0x64f   : > { %15752 = vmatpush.xpose.msk.msra.mxu1 %vm794_vm0, %v15479_v49  ;;  %15786 = vmatpush.xpose.msk.msra.mxu3 %vm794_vm0, %v15511_v10  ;;  %v20827_v0 = vadd.f32 %v8279_v21, %v7065_v26  ;;  %v15554_v49 = vld [vmem:[%s17146_s29 + $0x4d0] sm:$0xff]  ;;  %v15553_v10 = vld [vmem:[%s17146_s29 + $0x4c8] sm:$0xff]  ;;  %v15534_v26 = vld [vmem:[%s17146_s29 + $0x3e0] sm:$0xff] }
 0x650   : > { %v15548_v21 = vld [vmem:[%s17146_s29 + $0x488] sm:$0xff] }
 0x651   : > { %15736 = vmatmul.msk.f32.vlgmr.msra.gmra.mxu0 %vm794_vm0, %v20799_v8  ;;  %15770 = vmatmul.msk.f32.vlgmr.msra.gmra.mxu2 %vm794_vm0, %v20799_v8  ;;  %v8299_v23 = vpop.f32.mrf.mxu1 }
 0x652   : > { %15788 = vmatpush.xpose.msk.msrb.mxu0 %vm794_vm0, %v15542_v1  ;;  %15822 = vmatpush.xpose.msk.msrb.mxu2 %vm794_vm0, %v15574_v34  ;;  %v20829_v17 = vadd.f32 %v8299_v23, %v7066_v19  ;;  %v15569_v1 = vld [vmem:[%s17146_s29 + $0x5b8] sm:$0xff]  ;;  %v15568_v34 = vld [vmem:[%s17146_s29 + $0x5a8] sm:$0xff]  ;;  %v15550_v19 = vld [vmem:[%s17146_s29 + $0x4a0] sm:$0xff] }
 0x653   : > { %15805 = vmatpush.xpose.msk.msrb.mxu1 %vm794_vm0, %v15558_v12  ;;  %15839 = vmatpush.xpose.msk.msrb.mxu3 %vm794_vm0, %v15590_v36  ;;  %v15585_v12 = vld [vmem:[%s17146_s29 + $0x678] sm:$0xff]  ;;  %v15584_v36 = vld [vmem:[%s17146_s29 + $0x668] sm:$0xff] }
 0x654   : > { %15753 = vmatmul.msk.f32.vlgmr.msra.gmra.mxu1 %vm794_vm0, %v20799_v8  ;;  %15787 = vmatmul.msk.f32.vlgmr.msra.gmra.mxu3 %vm794_vm0, %v20799_v8  ;;  %v8319_v6 = vpop.f32.mrf.mxu2  ;;  %v15564_v23 = vld [vmem:[%s17146_s29 + $0x578] sm:$0xff] }
 0x655   : > { %v20851_v43 = vadd.f32 %v8319_v6, %v7067_v57  ;;  %v15528_v57 = vld [vmem:[%s17146_s29 + $0x398] sm:$0xff]  ;;  %v15543_v6 = vld [vmem:[%s17146_s29 + $0x450] sm:$0xff] }
 0x656   : > { %15789 = vmatpush.xpose.msk.msrb.mxu0 %vm794_vm0, %v15541_v5  ;;  %15823 = vmatpush.xpose.msk.msrb.mxu2 %vm794_vm0, %v15573_v22  ;;  %v15567_v5 = vld [vmem:[%s17146_s29 + $0x5a0] sm:$0xff]  ;;  %v15566_v22 = vld [vmem:[%s17146_s29 + $0x590] sm:$0xff] }
 0x657   : > { %15806 = vmatpush.xpose.msk.msrb.mxu1 %vm794_vm0, %v15557_v25  ;;  %15840 = vmatpush.xpose.msk.msrb.mxu3 %vm794_vm0, %v15589_v33  ;;  %v8339_v45 = vpop.f32.mrf.mxu3  ;;  %v15583_v25 = vld [vmem:[%s17146_s29 + $0x660] sm:$0xff]  ;;  %v15582_v33 = vld [vmem:[%s17146_s29 + $0x650] sm:$0xff] }
 0x658   : > { %v20853_v31 = vadd.f32 %v8339_v45, %v7068_v15  ;;  %v15560_v15 = vld [vmem:[%s17146_s29 + $0x548] sm:$0xff] }
 0x659   : > { %v22645_v45 = vld [vmem:[#allocation3_spill] sm:$0xff] }
 0x65a   : > { %15790 = vmatpush.xpose.msk.msrb.mxu0 %vm794_vm0, %v15540_v29  ;;  %15824 = vmatpush.xpose.msk.msrb.mxu2 %vm794_vm0, %v15572_v52  ;;  %v15579_v29 = vld [vmem:[%s17146_s29 + $0x630] sm:$0xff] }
 0x65b   : > { %15807 = vmatpush.xpose.msk.msrb.mxu1 %vm794_vm0, %v15556_v32  ;;  %15841 = vmatpush.xpose.msk.msrb.mxu3 %vm794_vm0, %v15588_v62  ;;  %v15530_v32 = vld [vmem:[%s17146_s29 + $0x3b0] sm:$0xff]  ;;  %v15562_v62 = vld [vmem:[%s17146_s29 + $0x560] sm:$0xff] }
 0x65c   : > { %v15546_v52 = vld [vmem:[%s17146_s29 + $0x470] sm:$0xff] }
 0x65e   : > { %15791 = vmatpush.xpose.msk.msrb.mxu0 %vm794_vm0, %v15539_v20  ;;  %15825 = vmatpush.xpose.msk.msrb.mxu2 %vm794_vm0, %v15571_v28  ;;  %v15576_v20 = vld [vmem:[%s17146_s29 + $0x608] sm:$0xff]  ;;  %v22646_v28 = vld [vmem:[#allocation9_spill] sm:$0xff] }
 0x65f   : > { %15808 = vmatpush.xpose.msk.msrb.mxu1 %vm794_vm0, %v15555_v56  ;;  %15842 = vmatpush.xpose.msk.msrb.mxu3 %vm794_vm0, %v15587_v27  ;;  %v15527_v56 = vld [vmem:[%s17146_s29 + $0x390] sm:$0xff]  ;;  %v2915_v27 = vadd.f32 %v22646_v28, %v22645_v45 }
 0x662   : > { %15792 = vmatpush.xpose.msk.msrb.mxu0 %vm794_vm0, %v15538_v46  ;;  %15826 = vmatpush.xpose.msk.msrb.mxu2 %vm794_vm0, %v15570_v53  ;;  %v22647_v46 = vld [vmem:[#allocation4_spill] sm:$0xff] }
 0x663   : > { %15809 = vmatpush.xpose.msk.msrb.mxu1 %vm794_vm0, %v15554_v49  ;;  %15843 = vmatpush.xpose.msk.msrb.mxu3 %vm794_vm0, %v15586_v54  ;;  %v22648_v49 = vld [vmem:[#allocation10_spill] sm:$0xff] }
 0x664   : > { %v2935_v53 = vadd.f32 %v22648_v49, %v22647_v46  ;;  %v15559_v54 = vld [vmem:[%s17146_s29 + $0x540] sm:$0xff] }
 0x665   : > { %v15603_v46 = vld [vmem:[%s17146_s29 + $0x780] sm:$0xff] }
 0x666   : > { %15793 = vmatpush.xpose.msk.msrb.mxu0 %vm794_vm0, %v15537_v58  ;;  %15827 = vmatpush.xpose.msk.msrb.mxu2 %vm794_vm0, %v15569_v1  ;;  %v15575_v58 = vld [vmem:[%s17146_s29 + $0x600] sm:$0xff] }
 0x667   : > { %15810 = vmatpush.xpose.msk.msrb.mxu1 %vm794_vm0, %v15553_v10  ;;  %15844 = vmatpush.xpose.msk.msrb.mxu3 %vm794_vm0, %v15585_v12  ;;  %v15606_v10 = vld [vmem:[%s17146_s29 + $0x7a0] sm:$0xff]  ;;  %v22649_v12 = vld [vmem:[#allocation15_spill] sm:$0xff] }
 0x668   : > { %v15622_v1 = vld [vmem:[%s17146_s29 + $0x860] sm:$0xff] }
 0x669   : > { %v15619_v49 = vld [vmem:[%s17146_s29 + $0x840] sm:$0xff] }
 0x66a   : > { %15794 = vmatpush.xpose.msk.msrb.mxu0 %vm794_vm0, %v15536_v47  ;;  %15828 = vmatpush.xpose.msk.msrb.mxu2 %vm794_vm0, %v15568_v34  ;;  %v4338_v47 = vadd.f32 %v22649_v12, %v2915_v27  ;;  %v15618_v12 = vld [vmem:[%s17146_s29 + $0x830] sm:$0xff] }
 0x66b   : > { %15811 = vmatpush.xpose.msk.msrb.mxu1 %vm794_vm0, %v15552_v48  ;;  %15845 = vmatpush.xpose.msk.msrb.mxu3 %vm794_vm0, %v15584_v36  ;;  %v22650_v48 = vld [vmem:[#allocation16_spill] sm:$0xff] }
 0x66c   : > { %v4339_v34 = vadd.f32 %v22650_v48, %v2935_v53  ;;  %v15638_v36 = vld [vmem:[%s17146_s29 + $0x950] sm:$0xff]  ;;  %v15650_v48 = vld [vmem:[%s17146_s29 + $0x9e0] sm:$0xff] }
 0x66e   : > { %15795 = vmatpush.xpose.msk.msrb.mxu0 %vm794_vm0, %v15535_v9  ;;  %15829 = vmatpush.xpose.msk.msrb.mxu2 %vm794_vm0, %v15567_v5  ;;  %v15654_v9 = vld [vmem:[%s17146_s29 + $0xa10] sm:$0xff] }
 0x66f   : > { %15812 = vmatpush.xpose.msk.msrb.mxu1 %vm794_vm0, %v15551_v2  ;;  %15846 = vmatpush.xpose.msk.msrb.mxu3 %vm794_vm0, %v15583_v25  ;;  %v22651_v2 = vld [vmem:[#allocation21_spill] sm:$0xff]  ;;  %v22652_v25 = vld [vmem:[#allocation22_spill] sm:$0xff] }
 0x670   : > { %v5704_v5 = vadd.f32 %v22651_v2, %v4338_v47  ;;  %v15634_v47 = vld [vmem:[%s17146_s29 + $0x920] sm:$0xff]  ;;  %v15649_v2 = vld [vmem:[%s17146_s29 + $0x9d8] sm:$0xff] }
 0x672   : > { %15796 = vmatpush.xpose.msk.msrb.mxu0 %vm794_vm0, %v15534_v26  ;;  %15830 = vmatpush.xpose.msk.msrb.mxu2 %vm794_vm0, %v15566_v22  ;;  %v5705_v26 = vadd.f32 %v22652_v25, %v4339_v34  ;;  %v15621_v22 = vld [vmem:[%s17146_s29 + $0x858] sm:$0xff]  ;;  %v15601_v34 = vld [vmem:[%s17146_s29 + $0x768] sm:$0xff] }
 0x673   : > { %15813 = vmatpush.xpose.msk.msrb.mxu1 %vm794_vm0, %v15550_v19  ;;  %15847 = vmatpush.xpose.msk.msrb.mxu3 %vm794_vm0, %v15582_v33  ;;  %v15605_v19 = vld [vmem:[%s17146_s29 + $0x798] sm:$0xff]  ;;  %v22653_v33 = vld [vmem:[#allocation27_spill] sm:$0xff] }
 0x674   : > { %v15616_v25 = vld [vmem:[%s17146_s29 + $0x818] sm:$0xff] }
 0x676   : > { %15797 = vmatpush.xpose.msk.msrb.mxu0 %vm794_vm0, %v15533_v59  ;;  %15831 = vmatpush.xpose.msk.msrb.mxu2 %vm794_vm0, %v15565_v50  ;;  %v7069_v59 = vadd.f32 %v22653_v33, %v5704_v5  ;;  %v15600_v5 = vld [vmem:[%s17146_s29 + $0x758] sm:$0xff]  ;;  %v15615_v33 = vld [vmem:[%s17146_s29 + $0x810] sm:$0xff] }
 0x677   : > { %15814 = vmatpush.xpose.msk.msrb.mxu1 %vm794_vm0, %v15549_v60  ;;  %15848 = vmatpush.xpose.msk.msrb.mxu3 %vm794_vm0, %v15581_v51  ;;  %v22654_v60 = vld [vmem:[#allocation28_spill] sm:$0xff]  ;;  %v15637_v51 = vld [vmem:[%s17146_s29 + $0x948] sm:$0xff] }
 0x678   : > { %v7070_v50 = vadd.f32 %v22654_v60, %v5705_v26  ;;  %v15632_v26 = vld [vmem:[%s17146_s29 + $0x908] sm:$0xff]  ;;  %v15647_v60 = vld [vmem:[%s17146_s29 + $0x9c0] sm:$0xff] }
 0x67a   : > { %15798 = vmatpush.xpose.msk.msrb.mxu0 %vm794_vm0, %v15532_v61  ;;  %15832 = vmatpush.xpose.msk.msrb.mxu2 %vm794_vm0, %v15564_v23  ;;  %v15653_v61 = vld [vmem:[%s17146_s29 + $0xa08] sm:$0xff] }
 0x67b   : > { %15815 = vmatpush.xpose.msk.msrb.mxu1 %vm794_vm0, %v15548_v21  ;;  %15849 = vmatpush.xpose.msk.msrb.mxu3 %vm794_vm0, %v15580_v39  ;;  %v22655_v21 = vld [vmem:[#allocation5_spill] sm:$0xff]  ;;  %v22656_v23 = vld [vmem:[#allocation11_spill] sm:$0xff] }
 0x67c   : > { %v2955_v39 = vadd.f32 %v22656_v23, %v22655_v21  ;;  %v15646_v21 = vld [vmem:[%s17146_s29 + $0x9b0] sm:$0xff]  ;;  %v15597_v23 = vld [vmem:[%s17146_s29 + $0x738] sm:$0xff] }
 0x67e   : > { %15799 = vmatpush.xpose.msk.msrb.mxu0 %vm794_vm0, %v15531_v13  ;;  %15833 = vmatpush.xpose.msk.msrb.mxu2 %vm794_vm0, %v15563_v18  ;;  %v22657_v13 = vld [vmem:[#allocation6_spill] sm:$0xff] }
 0x67f   : > { %15816 = vmatpush.xpose.msk.msrb.mxu1 %vm794_vm0, %v15547_v14  ;;  %15850 = vmatpush.xpose.msk.msrb.mxu3 %vm794_vm0, %v15579_v29  ;;  %v22658_v14 = vld [vmem:[#allocation12_spill] sm:$0xff] }
 0x680   : > { %v2975_v18 = vadd.f32 %v22658_v14, %v22657_v13  ;;  %v15629_v13 = vld [vmem:[%s17146_s29 + $0x8e8] sm:$0xff] }
 0x681   : > { %v15645_v14 = vld [vmem:[%s17146_s29 + $0x9a8] sm:$0xff] }
 0x682   : > { %15800 = vmatpush.xpose.msk.msrb.mxu0 %vm794_vm0, %v15530_v32  ;;  %15834 = vmatpush.xpose.msk.msrb.mxu2 %vm794_vm0, %v15562_v62 }
 0x683   : > { %15817 = vmatpush.xpose.msk.msrb.mxu1 %vm794_vm0, %v15546_v52  ;;  %15851 = vmatpush.xpose.msk.msrb.mxu3 %vm794_vm0, %v15578_v4  ;;  %v22659_v4 = vld [vmem:[#allocation17_spill] sm:$0xff] }
 0x686   : > { %15801 = vmatpush.xpose.msk.msrb.mxu0 %vm794_vm0, %v15529_v37  ;;  %15835 = vmatpush.xpose.msk.msrb.mxu2 %vm794_vm0, %v15561_v30  ;;  %v4340_v37 = vadd.f32 %v22659_v4, %v2955_v39  ;;  %v15613_v39 = vld [vmem:[%s17146_s29 + $0x7f8] sm:$0xff] }
 0x687   : > { %15818 = vmatpush.xpose.msk.msrb.mxu1 %vm794_vm0, %v15545_v63  ;;  %15852 = vmatpush.xpose.msk.msrb.mxu3 %vm794_vm0, %v15577_v7  ;;  %v22660_v63 = vld [vmem:[#allocation18_spill] sm:$0xff]  ;;  %v15604_v7 = vld [vmem:[%s17146_s29 + $0x788] sm:$0xff]  ;;  %v15644_v4 = vld [vmem:[%s17146_s29 + $0x998] sm:$0xff] }
 0x688   : > { %v4341_v30 = vadd.f32 %v22660_v63, %v2975_v18  ;;  %v15596_v18 = vld [vmem:[%s17146_s29 + $0x728] sm:$0xff]  ;;  %v15611_v63 = vld [vmem:[%s17146_s29 + $0x7e0] sm:$0xff] }
 0x68a   : > { %15802 = vmatpush.xpose.msk.msrb.mxu0 %vm794_vm0, %v15528_v57  ;;  %15836 = vmatpush.xpose.msk.msrb.mxu2 %vm794_vm0, %v15560_v15  ;;  %v15620_v57 = vld [vmem:[%s17146_s29 + $0x848] sm:$0xff]  ;;  %v15652_v15 = vld [vmem:[%s17146_s29 + $0x9f8] sm:$0xff] }
 0x68b   : > { %15819 = vmatpush.xpose.msk.msrb.mxu1 %vm794_vm0, %v15544_v44  ;;  %15853 = vmatpush.xpose.msk.msrb.mxu3 %vm794_vm0, %v15576_v20  ;;  %v15636_v44 = vld [vmem:[%s17146_s29 + $0x938] sm:$0xff]  ;;  %v22661_v20 = vld [vmem:[#allocation23_spill] sm:$0xff] }
 0x68e   : > { %15803 = vmatpush.xpose.msk.msrb.mxu0 %vm794_vm0, %v15527_v56  ;;  %15837 = vmatpush.xpose.msk.msrb.mxu2 %vm794_vm0, %v15559_v54  ;;  %v8359_v29 = vpop.f32.mrf.mxu0  ;;  %v5706_v56 = vadd.f32 %v22661_v20, %v4340_v37  ;;  %v15595_v37 = vld [vmem:[%s17146_s29 + $0x720] sm:$0xff] }
 0x68f   : > { %15820 = vmatpush.xpose.msk.msrb.mxu1 %vm794_vm0, %v15543_v6  ;;  %15854 = vmatpush.xpose.msk.msrb.mxu3 %vm794_vm0, %v15575_v58  ;;  %v20991_v52 = vadd.f32 %v8359_v29, %v7069_v59  ;;  %v22662_v6 = vld [vmem:[#allocation24_spill] sm:$0xff]  ;;  %v15631_v59 = vld [vmem:[%s17146_s29 + $0x900] sm:$0xff]  ;;  %v15612_v29 = vld [vmem:[%s17146_s29 + $0x7e8] sm:$0xff] }
 0x690   : > { %v5707_v45 = vadd.f32 %v22662_v6, %v4341_v30  ;;  %v7071_v28 = vadd.f32 %v20474_v40, %v5706_v56  ;;  %v15635_v58 = vld [vmem:[%s17146_s29 + $0x930] sm:$0xff]  ;;  %v15642_v20 = vld [vmem:[%s17146_s29 + $0x980] sm:$0xff]  ;;  %v15593_v56 = vld [vmem:[%s17146_s29 + $0x708] sm:$0xff] }
 0x691   : > { %15804 = vmatmul.msk.f32.vlgmr.msrb.gmra.mxu0 %vm794_vm0, %v20799_v8  ;;  %15838 = vmatmul.msk.f32.vlgmr.msrb.gmra.mxu2 %vm794_vm0, %v20799_v8  ;;  %v8379_v32 = vpop.f32.mrf.mxu1  ;;  %v15627_v30 = vld [vmem:[%s17146_s29 + $0x8d0] sm:$0xff]  ;;  %v15609_v6 = vld [vmem:[%s17146_s29 + $0x7c8] sm:$0xff] }
 0x692   : > { %15856 = vmatpush.xpose.msk.msra.mxu0 %vm794_vm0, %v15606_v10  ;;  %15890 = vmatpush.xpose.msk.msra.mxu2 %vm794_vm0, %v15638_v36  ;;  %v20993_v62 = vadd.f32 %v8379_v32, %v7070_v50  ;;  %v7072_v27 = vadd.f32 %v20476_v42, %v5707_v45  ;;  %v15651_v10 = vld [vmem:[%s17146_s29 + $0x9f0] sm:$0xff]  ;;  %v15617_v36 = vld [vmem:[%s17146_s29 + $0x828] sm:$0xff]  ;;  %v15598_v50 = vld [vmem:[%s17146_s29 + $0x740] sm:$0xff] }
 0x693   : > { %15873 = vmatpush.xpose.msk.msra.mxu1 %vm794_vm0, %v15622_v1  ;;  %15907 = vmatpush.xpose.msk.msra.mxu3 %vm794_vm0, %v15654_v9  ;;  %v15602_v42 = vld [vmem:[%s17146_s29 + $0x770] sm:$0xff]  ;;  %v15633_v9 = vld [vmem:[%s17146_s29 + $0x918] sm:$0xff] }
 0x694   : > { %15821 = vmatmul.msk.f32.vlgmr.msrb.gmra.mxu1 %vm794_vm0, %v20799_v8  ;;  %15855 = vmatmul.msk.f32.vlgmr.msrb.gmra.mxu3 %vm794_vm0, %v20799_v8  ;;  %v8399_v53 = vpop.f32.mrf.mxu2  ;;  %v15628_v32 = vld [vmem:[%s17146_s29 + $0x8d8] sm:$0xff] }
 0x695   : > { %v21015_v1 = vadd.f32 %v8399_v53, %v7071_v28  ;;  %v15625_v45 = vld [vmem:[%s17146_s29 + $0x8b8] sm:$0xff]  ;;  %v15640_v53 = vld [vmem:[%s17146_s29 + $0x968] sm:$0xff] }
 0x696   : > { %15857 = vmatpush.xpose.msk.msra.mxu0 %vm794_vm0, %v15605_v19  ;;  %15891 = vmatpush.xpose.msk.msra.mxu2 %vm794_vm0, %v15637_v51  ;;  %v15648_v19 = vld [vmem:[%s17146_s29 + $0x9c8] sm:$0xff]  ;;  %v15614_v51 = vld [vmem:[%s17146_s29 + $0x800] sm:$0xff]  ;;  %v15641_v28 = vld [vmem:[%s17146_s29 + $0x978] sm:$0xff] }
 0x697   : > { %15874 = vmatpush.xpose.msk.msra.mxu1 %vm794_vm0, %v15621_v22  ;;  %15908 = vmatpush.xpose.msk.msra.mxu3 %vm794_vm0, %v15653_v61  ;;  %v8419_v54 = vpop.f32.mrf.mxu3  ;;  %v15599_v22 = vld [vmem:[%s17146_s29 + $0x750] sm:$0xff] }
 0x698   : > { %v21017_v40 = vadd.f32 %v8419_v54, %v7072_v27  ;;  %v15630_v61 = vld [vmem:[%s17146_s29 + $0x8f0] sm:$0xff]  ;;  %v15592_v27 = vld [vmem:[%s17146_s29 + $0x6f8] sm:$0xff] }
 0x699   : > { %v15591_v54 = vld [vmem:[%s17146_s29 + $0x6f0] sm:$0xff] }
 0x69a   : > { %15858 = vmatpush.xpose.msk.msra.mxu0 %vm794_vm0, %v15604_v7  ;;  %15892 = vmatpush.xpose.msk.msra.mxu2 %vm794_vm0, %v15636_v44  ;;  %v15643_v7 = vld [vmem:[%s17146_s29 + $0x990] sm:$0xff] }
 0x69b   : > { %15875 = vmatpush.xpose.msk.msra.mxu1 %vm794_vm0, %v15620_v57  ;;  %15909 = vmatpush.xpose.msk.msra.mxu3 %vm794_vm0, %v15652_v15  ;;  %v15594_v57 = vld [vmem:[%s17146_s29 + $0x710] sm:$0xff]  ;;  %v15626_v15 = vld [vmem:[%s17146_s29 + $0x8c0] sm:$0xff] }
 0x69c   : > { %v15610_v44 = vld [vmem:[%s17146_s29 + $0x7d0] sm:$0xff] }
 0x69e   : > { %15859 = vmatpush.xpose.msk.msra.mxu0 %vm794_vm0, %v15603_v46  ;;  %15893 = vmatpush.xpose.msk.msra.mxu2 %vm794_vm0, %v15635_v58  ;;  %v15608_v46 = vld [vmem:[%s17146_s29 + $0x7b8] sm:$0xff]  ;;  %v15607_v58 = vld [vmem:[%s17146_s29 + $0x7b0] sm:$0xff] }
 0x69f   : > { %15876 = vmatpush.xpose.msk.msra.mxu1 %vm794_vm0, %v15619_v49  ;;  %15910 = vmatpush.xpose.msk.msra.mxu3 %vm794_vm0, %v15651_v10  ;;  %v15624_v49 = vld [vmem:[%s17146_s29 + $0x8a8] sm:$0xff]  ;;  %v15623_v10 = vld [vmem:[%s17146_s29 + $0x8a0] sm:$0xff] }
 0x6a2   : > { %15860 = vmatpush.xpose.msk.msra.mxu0 %vm794_vm0, %v15602_v42  ;;  %15894 = vmatpush.xpose.msk.msra.mxu2 %vm794_vm0, %v15634_v47  ;;  %v15639_v42 = vld [vmem:[%s17146_s29 + $0x960] sm:$0xff] }
 0x6a3   : > { %15877 = vmatpush.xpose.msk.msra.mxu1 %vm794_vm0, %v15618_v12  ;;  %15911 = vmatpush.xpose.msk.msra.mxu3 %vm794_vm0, %v15650_v48  ;;  %v15670_v12 = vld [vmem:[%s17146_s29 + $0xb00] sm:$0xff]  ;;  %v15702_v48 = vld [vmem:[%s17146_s29 + $0xcb0] sm:$0xff] }
 0x6a4   : > { %v15686_v47 = vld [vmem:[%s17146_s29 + $0xbc0] sm:$0xff] }
 0x6a6   : > { %15861 = vmatpush.xpose.msk.msra.mxu0 %vm794_vm0, %v15601_v34  ;;  %15895 = vmatpush.xpose.msk.msra.mxu2 %vm794_vm0, %v15633_v9  ;;  %v15718_v34 = vld [vmem:[%s17146_s29 + $0xd70] sm:$0xff]  ;;  %v15685_v9 = vld [vmem:[%s17146_s29 + $0xbb8] sm:$0xff] }
 0x6a7   : > { %15878 = vmatpush.xpose.msk.msra.mxu1 %vm794_vm0, %v15617_v36  ;;  %15912 = vmatpush.xpose.msk.msra.mxu3 %vm794_vm0, %v15649_v2  ;;  %v15669_v36 = vld [vmem:[%s17146_s29 + $0xaf8] sm:$0xff]  ;;  %v15701_v2 = vld [vmem:[%s17146_s29 + $0xca8] sm:$0xff] }
 0x6aa   : > { %15862 = vmatpush.xpose.msk.msra.mxu0 %vm794_vm0, %v15600_v5  ;;  %15896 = vmatpush.xpose.msk.msra.mxu2 %vm794_vm0, %v15632_v26  ;;  %v15717_v5 = vld [vmem:[%s17146_s29 + $0xd68] sm:$0xff] }
 0x6ab   : > { %15879 = vmatpush.xpose.msk.msra.mxu1 %vm794_vm0, %v15616_v25  ;;  %15913 = vmatpush.xpose.msk.msra.mxu3 %vm794_vm0, %v15648_v19  ;;  %v15668_v25 = vld [vmem:[%s17146_s29 + $0xae8] sm:$0xff]  ;;  %v15700_v19 = vld [vmem:[%s17146_s29 + $0xc98] sm:$0xff] }
 0x6ac   : > { %v15684_v26 = vld [vmem:[%s17146_s29 + $0xba8] sm:$0xff] }
 0x6ae   : > { %15863 = vmatpush.xpose.msk.msra.mxu0 %vm794_vm0, %v15599_v22  ;;  %15897 = vmatpush.xpose.msk.msra.mxu2 %vm794_vm0, %v15631_v59  ;;  %v15716_v22 = vld [vmem:[%s17146_s29 + $0xd58] sm:$0xff]  ;;  %v15683_v59 = vld [vmem:[%s17146_s29 + $0xba0] sm:$0xff] }
 0x6af   : > { %15880 = vmatpush.xpose.msk.msra.mxu1 %vm794_vm0, %v15615_v33  ;;  %15914 = vmatpush.xpose.msk.msra.mxu3 %vm794_vm0, %v15647_v60  ;;  %v15667_v33 = vld [vmem:[%s17146_s29 + $0xae0] sm:$0xff]  ;;  %v15699_v60 = vld [vmem:[%s17146_s29 + $0xc90] sm:$0xff] }
 0x6b2   : > { %15864 = vmatpush.xpose.msk.msra.mxu0 %vm794_vm0, %v15598_v50  ;;  %15898 = vmatpush.xpose.msk.msra.mxu2 %vm794_vm0, %v15630_v61  ;;  %v15715_v50 = vld [vmem:[%s17146_s29 + $0xd50] sm:$0xff] }
 0x6b3   : > { %15881 = vmatpush.xpose.msk.msra.mxu1 %vm794_vm0, %v15614_v51  ;;  %15915 = vmatpush.xpose.msk.msra.mxu3 %vm794_vm0, %v15646_v21  ;;  %v15666_v51 = vld [vmem:[%s17146_s29 + $0xad0] sm:$0xff]  ;;  %v15698_v21 = vld [vmem:[%s17146_s29 + $0xc80] sm:$0xff] }
 0x6b4   : > { %v15682_v61 = vld [vmem:[%s17146_s29 + $0xb90] sm:$0xff] }
 0x6b6   : > { %15865 = vmatpush.xpose.msk.msra.mxu0 %vm794_vm0, %v15597_v23  ;;  %15899 = vmatpush.xpose.msk.msra.mxu2 %vm794_vm0, %v15629_v13  ;;  %v15714_v23 = vld [vmem:[%s17146_s29 + $0xd40] sm:$0xff]  ;;  %v15681_v13 = vld [vmem:[%s17146_s29 + $0xb88] sm:$0xff] }
 0x6b7   : > { %15882 = vmatpush.xpose.msk.msra.mxu1 %vm794_vm0, %v15613_v39  ;;  %15916 = vmatpush.xpose.msk.msra.mxu3 %vm794_vm0, %v15645_v14  ;;  %v15665_v39 = vld [vmem:[%s17146_s29 + $0xac8] sm:$0xff]  ;;  %v15697_v14 = vld [vmem:[%s17146_s29 + $0xc78] sm:$0xff] }
 0x6ba   : > { %15866 = vmatpush.xpose.msk.msra.mxu0 %vm794_vm0, %v15596_v18  ;;  %15900 = vmatpush.xpose.msk.msra.mxu2 %vm794_vm0, %v15628_v32  ;;  %v15713_v18 = vld [vmem:[%s17146_s29 + $0xd38] sm:$0xff] }
 0x6bb   : > { %15883 = vmatpush.xpose.msk.msra.mxu1 %vm794_vm0, %v15612_v29  ;;  %15917 = vmatpush.xpose.msk.msra.mxu3 %vm794_vm0, %v15644_v4  ;;  %v15664_v29 = vld [vmem:[%s17146_s29 + $0xab8] sm:$0xff]  ;;  %v15696_v4 = vld [vmem:[%s17146_s29 + $0xc68] sm:$0xff] }
 0x6bc   : > { %v15680_v32 = vld [vmem:[%s17146_s29 + $0xb78] sm:$0xff] }
 0x6be   : > { %15867 = vmatpush.xpose.msk.msra.mxu0 %vm794_vm0, %v15595_v37  ;;  %15901 = vmatpush.xpose.msk.msra.mxu2 %vm794_vm0, %v15627_v30  ;;  %v15712_v37 = vld [vmem:[%s17146_s29 + $0xd28] sm:$0xff]  ;;  %v15679_v30 = vld [vmem:[%s17146_s29 + $0xb70] sm:$0xff] }
 0x6bf   : > { %15884 = vmatpush.xpose.msk.msra.mxu1 %vm794_vm0, %v15611_v63  ;;  %15918 = vmatpush.xpose.msk.msra.mxu3 %vm794_vm0, %v15643_v7  ;;  %v15663_v63 = vld [vmem:[%s17146_s29 + $0xab0] sm:$0xff]  ;;  %v15695_v7 = vld [vmem:[%s17146_s29 + $0xc60] sm:$0xff] }
 0x6c2   : > { %15868 = vmatpush.xpose.msk.msra.mxu0 %vm794_vm0, %v15594_v57  ;;  %15902 = vmatpush.xpose.msk.msra.mxu2 %vm794_vm0, %v15626_v15  ;;  %v15711_v57 = vld [vmem:[%s17146_s29 + $0xd20] sm:$0xff] }
 0x6c3   : > { %15885 = vmatpush.xpose.msk.msra.mxu1 %vm794_vm0, %v15610_v44  ;;  %15919 = vmatpush.xpose.msk.msra.mxu3 %vm794_vm0, %v15642_v20  ;;  %v15662_v44 = vld [vmem:[%s17146_s29 + $0xaa0] sm:$0xff]  ;;  %v15694_v20 = vld [vmem:[%s17146_s29 + $0xc50] sm:$0xff] }
 0x6c4   : > { %v15678_v15 = vld [vmem:[%s17146_s29 + $0xb60] sm:$0xff] }
 0x6c6   : > { %15869 = vmatpush.xpose.msk.msra.mxu0 %vm794_vm0, %v15593_v56  ;;  %15903 = vmatpush.xpose.msk.msra.mxu2 %vm794_vm0, %v15625_v45  ;;  %v15710_v56 = vld [vmem:[%s17146_s29 + $0xd10] sm:$0xff]  ;;  %v15677_v45 = vld [vmem:[%s17146_s29 + $0xb58] sm:$0xff] }
 0x6c7   : > { %15886 = vmatpush.xpose.msk.msra.mxu1 %vm794_vm0, %v15609_v6  ;;  %15920 = vmatpush.xpose.msk.msra.mxu3 %vm794_vm0, %v15641_v28  ;;  %v15661_v6 = vld [vmem:[%s17146_s29 + $0xa98] sm:$0xff]  ;;  %v15693_v28 = vld [vmem:[%s17146_s29 + $0xc48] sm:$0xff] }
 0x6ca   : > { %15870 = vmatpush.xpose.msk.msra.mxu0 %vm794_vm0, %v15592_v27  ;;  %15904 = vmatpush.xpose.msk.msra.mxu2 %vm794_vm0, %v15624_v49  ;;  %v15709_v27 = vld [vmem:[%s17146_s29 + $0xd08] sm:$0xff] }
 0x6cb   : > { %15887 = vmatpush.xpose.msk.msra.mxu1 %vm794_vm0, %v15608_v46  ;;  %15921 = vmatpush.xpose.msk.msra.mxu3 %vm794_vm0, %v15640_v53  ;;  %v15660_v46 = vld [vmem:[%s17146_s29 + $0xa88] sm:$0xff]  ;;  %v15692_v53 = vld [vmem:[%s17146_s29 + $0xc38] sm:$0xff] }
 0x6cc   : > { %v15676_v49 = vld [vmem:[%s17146_s29 + $0xb48] sm:$0xff] }
 0x6ce   : > { %15871 = vmatpush.xpose.msk.msra.mxu0 %vm794_vm0, %v15591_v54  ;;  %15905 = vmatpush.xpose.msk.msra.mxu2 %vm794_vm0, %v15623_v10  ;;  %v15708_v54 = vld [vmem:[%s17146_s29 + $0xcf8] sm:$0xff]  ;;  %v15675_v10 = vld [vmem:[%s17146_s29 + $0xb40] sm:$0xff] }
 0x6cf   : > { %15888 = vmatpush.xpose.msk.msra.mxu1 %vm794_vm0, %v15607_v58  ;;  %15922 = vmatpush.xpose.msk.msra.mxu3 %vm794_vm0, %v15639_v42  ;;  %v15659_v58 = vld [vmem:[%s17146_s29 + $0xa80] sm:$0xff]  ;;  %v15691_v42 = vld [vmem:[%s17146_s29 + $0xc30] sm:$0xff] }
 0x6d1   : > { %15872 = vmatmul.msk.f32.vlgmr.msra.gmra.mxu0 %vm794_vm0, %v20799_v8  ;;  %15906 = vmatmul.msk.f32.vlgmr.msra.gmra.mxu2 %vm794_vm0, %v20799_v8 }
 0x6d2   : > { %15924 = vmatpush.xpose.msk.msrb.mxu0 %vm794_vm0, %v15670_v12  ;;  %15958 = vmatpush.xpose.msk.msrb.mxu2 %vm794_vm0, %v15702_v48  ;;  %v15707_v12 = vld [vmem:[%s17146_s29 + $0xcf0] sm:$0xff] }
 0x6d3   : > { %15941 = vmatpush.xpose.msk.msrb.mxu1 %vm794_vm0, %v15686_v47  ;;  %15975 = vmatpush.xpose.msk.msrb.mxu3 %vm794_vm0, %v15718_v34  ;;  %v15658_v47 = vld [vmem:[%s17146_s29 + $0xa70] sm:$0xff]  ;;  %v15690_v34 = vld [vmem:[%s17146_s29 + $0xc20] sm:$0xff] }
 0x6d4   : > { %15889 = vmatmul.msk.f32.vlgmr.msra.gmra.mxu1 %vm794_vm0, %v20799_v8  ;;  %15923 = vmatmul.msk.f32.vlgmr.msra.gmra.mxu3 %vm794_vm0, %v20799_v8  ;;  %v15674_v48 = vld [vmem:[%s17146_s29 + $0xb30] sm:$0xff] }
 0x6d6   : > { %15925 = vmatpush.xpose.msk.msrb.mxu0 %vm794_vm0, %v15669_v36  ;;  %15959 = vmatpush.xpose.msk.msrb.mxu2 %vm794_vm0, %v15701_v2  ;;  %v15706_v36 = vld [vmem:[%s17146_s29 + $0xce0] sm:$0xff]  ;;  %v15673_v2 = vld [vmem:[%s17146_s29 + $0xb28] sm:$0xff] }
 0x6d7   : > { %15942 = vmatpush.xpose.msk.msrb.mxu1 %vm794_vm0, %v15685_v9  ;;  %15976 = vmatpush.xpose.msk.msrb.mxu3 %vm794_vm0, %v15717_v5  ;;  %v15657_v9 = vld [vmem:[%s17146_s29 + $0xa68] sm:$0xff]  ;;  %v15689_v5 = vld [vmem:[%s17146_s29 + $0xc18] sm:$0xff] }
 0x6da   : > { %15926 = vmatpush.xpose.msk.msrb.mxu0 %vm794_vm0, %v15668_v25  ;;  %15960 = vmatpush.xpose.msk.msrb.mxu2 %vm794_vm0, %v15700_v19  ;;  %v15705_v25 = vld [vmem:[%s17146_s29 + $0xcd8] sm:$0xff] }
 0x6db   : > { %15943 = vmatpush.xpose.msk.msrb.mxu1 %vm794_vm0, %v15684_v26  ;;  %15977 = vmatpush.xpose.msk.msrb.mxu3 %vm794_vm0, %v15716_v22  ;;  %v15656_v26 = vld [vmem:[%s17146_s29 + $0xa58] sm:$0xff]  ;;  %v15688_v22 = vld [vmem:[%s17146_s29 + $0xc08] sm:$0xff] }
 0x6dc   : > { %v15672_v19 = vld [vmem:[%s17146_s29 + $0xb18] sm:$0xff] }
 0x6de   : > { %15927 = vmatpush.xpose.msk.msrb.mxu0 %vm794_vm0, %v15667_v33  ;;  %15961 = vmatpush.xpose.msk.msrb.mxu2 %vm794_vm0, %v15699_v60  ;;  %v15704_v33 = vld [vmem:[%s17146_s29 + $0xcc8] sm:$0xff]  ;;  %v15671_v60 = vld [vmem:[%s17146_s29 + $0xb10] sm:$0xff] }
 0x6df   : > { %15944 = vmatpush.xpose.msk.msrb.mxu1 %vm794_vm0, %v15683_v59  ;;  %15978 = vmatpush.xpose.msk.msrb.mxu3 %vm794_vm0, %v15715_v50  ;;  %v15655_v59 = vld [vmem:[%s17146_s29 + $0xa50] sm:$0xff]  ;;  %v15687_v50 = vld [vmem:[%s17146_s29 + $0xc00] sm:$0xff] }
 0x6e2   : > { %15928 = vmatpush.xpose.msk.msrb.mxu0 %vm794_vm0, %v15666_v51  ;;  %15962 = vmatpush.xpose.msk.msrb.mxu2 %vm794_vm0, %v15698_v21  ;;  %v15703_v51 = vld [vmem:[%s17146_s29 + $0xcc0] sm:$0xff] }
 0x6e3   : > { %15945 = vmatpush.xpose.msk.msrb.mxu1 %vm794_vm0, %v15682_v61  ;;  %15979 = vmatpush.xpose.msk.msrb.mxu3 %vm794_vm0, %v15714_v23  ;;  %v16007_v61 = vld [vmem:[%s17146_s29 + $0xe1] sm:$0xff]  ;;  %v16039_v23 = vld [vmem:[%s17146_s29 + $0x291] sm:$0xff] }
 0x6e4   : > { %v16023_v21 = vld [vmem:[%s17146_s29 + $0x1a1] sm:$0xff] }
 0x6e6   : > { %15929 = vmatpush.xpose.msk.msrb.mxu0 %vm794_vm0, %v15665_v39  ;;  %15963 = vmatpush.xpose.msk.msrb.mxu2 %vm794_vm0, %v15697_v14  ;;  %v16055_v39 = vld [vmem:[%s17146_s29 + $0x351] sm:$0xff]  ;;  %v16022_v14 = vld [vmem:[%s17146_s29 + $0x199] sm:$0xff] }
 0x6e7   : > { %15946 = vmatpush.xpose.msk.msrb.mxu1 %vm794_vm0, %v15681_v13  ;;  %15980 = vmatpush.xpose.msk.msrb.mxu3 %vm794_vm0, %v15713_v18  ;;  %v16006_v13 = vld [vmem:[%s17146_s29 + $0xd9] sm:$0xff]  ;;  %v21265_v18 = vpop.f32.mrf.mxu2 }
 0x6ea   : > { %15930 = vmatpush.xpose.msk.msrb.mxu0 %vm794_vm0, %v15664_v29  ;;  %15964 = vmatpush.xpose.msk.msrb.mxu2 %vm794_vm0, %v15696_v4  ;;  %v21267_v29 = vpop.f32.mrf.mxu3  ;;  %v16054_v4 = vld [vmem:[%s17146_s29 + $0x349] sm:$0xff] }
 0x6eb   : > { %15947 = vmatpush.xpose.msk.msrb.mxu1 %vm794_vm0, %v15680_v32  ;;  %15981 = vmatpush.xpose.msk.msrb.mxu3 %vm794_vm0, %v15712_v37  ;;  %v16038_v32 = vld [vmem:[%s17146_s29 + $0x289] sm:$0xff] }
 0x6ec   : > { %v16005_v37 = vld [vmem:[%s17146_s29 + $0xc9] sm:$0xff] }
 0x6ee   : > { %15931 = vmatpush.xpose.msk.msrb.mxu0 %vm794_vm0, %v15663_v63  ;;  %15965 = vmatpush.xpose.msk.msrb.mxu2 %vm794_vm0, %v15695_v7  ;;  %v16021_v63 = vld [vmem:[%s17146_s29 + $0x189] sm:$0xff]  ;;  %v16053_v7 = vld [vmem:[%s17146_s29 + $0x339] sm:$0xff] }
 0x6ef   : > { %15948 = vmatpush.xpose.msk.msrb.mxu1 %vm794_vm0, %v15679_v30  ;;  %15982 = vmatpush.xpose.msk.msrb.mxu3 %vm794_vm0, %v15711_v57  ;;  %v16037_v30 = vld [vmem:[%s17146_s29 + $0x279] sm:$0xff]  ;;  %v16020_v57 = vld [vmem:[%s17146_s29 + $0x181] sm:$0xff] }
 0x6f2   : > { %15932 = vmatpush.xpose.msk.msrb.mxu0 %vm794_vm0, %v15662_v44  ;;  %15966 = vmatpush.xpose.msk.msrb.mxu2 %vm794_vm0, %v15694_v20  ;;  %v16036_v20 = vld [vmem:[%s17146_s29 + $0x271] sm:$0xff] }
 0x6f3   : > { %15949 = vmatpush.xpose.msk.msrb.mxu1 %vm794_vm0, %v15678_v15  ;;  %15983 = vmatpush.xpose.msk.msrb.mxu3 %vm794_vm0, %v15710_v56  ;;  %v16052_v56 = vld [vmem:[%s17146_s29 + $0x331] sm:$0xff] }
 0x6f6   : > { %15933 = vmatpush.xpose.msk.msrb.mxu0 %vm794_vm0, %v15661_v6  ;;  %15967 = vmatpush.xpose.msk.msrb.mxu2 %vm794_vm0, %v15693_v28  ;;  %v16003_v28 = vld [vmem:[%s17146_s29 + $0xb1] sm:$0xff] }
 0x6f7   : > { %15950 = vmatpush.xpose.msk.msrb.mxu1 %vm794_vm0, %v15677_v45  ;;  %15984 = vmatpush.xpose.msk.msrb.mxu3 %vm794_vm0, %v15709_v27  ;;  %v16019_v27 = vld [vmem:[%s17146_s29 + $0x171] sm:$0xff] }
 0x6fa   : > { %15934 = vmatpush.xpose.msk.msrb.mxu0 %vm794_vm0, %v15660_v46  ;;  %15968 = vmatpush.xpose.msk.msrb.mxu2 %vm794_vm0, %v15692_v53  ;;  %v16035_v46 = vld [vmem:[%s17146_s29 + $0x261] sm:$0xff]  ;;  %v16034_v53 = vld [vmem:[%s17146_s29 + $0x259] sm:$0xff] }
 0x6fb   : > { %15951 = vmatpush.xpose.msk.msrb.mxu1 %vm794_vm0, %v15676_v49  ;;  %15985 = vmatpush.xpose.msk.msrb.mxu3 %vm794_vm0, %v15708_v54  ;;  %v16018_v49 = vld [vmem:[%s17146_s29 + $0x169] sm:$0xff]  ;;  %v16050_v54 = vld [vmem:[%s17146_s29 + $0x319] sm:$0xff] }
 0x6fe   : > { %15935 = vmatpush.xpose.msk.msrb.mxu0 %vm794_vm0, %v15659_v58  ;;  %15969 = vmatpush.xpose.msk.msrb.mxu2 %vm794_vm0, %v15691_v42  ;;  %v16001_v58 = vld [vmem:[%s17146_s29 + $0x99] sm:$0xff]  ;;  %v16033_v42 = vld [vmem:[%s17146_s29 + $0x249] sm:$0xff] }
 0x6ff   : > { %15952 = vmatpush.xpose.msk.msrb.mxu1 %vm794_vm0, %v15675_v10  ;;  %15986 = vmatpush.xpose.msk.msrb.mxu3 %vm794_vm0, %v15707_v12  ;;  %v16017_v10 = vld [vmem:[%s17146_s29 + $0x159] sm:$0xff]  ;;  %v16049_v12 = vld [vmem:[%s17146_s29 + $0x309] sm:$0xff] }
 0x702   : > { %15936 = vmatpush.xpose.msk.msrb.mxu0 %vm794_vm0, %v15658_v47  ;;  %15970 = vmatpush.xpose.msk.msrb.mxu2 %vm794_vm0, %v15690_v34  ;;  %v16000_v47 = vld [vmem:[%s17146_s29 + $0x91] sm:$0xff]  ;;  %v16032_v34 = vld [vmem:[%s17146_s29 + $0x241] sm:$0xff] }
 0x703   : > { %15953 = vmatpush.xpose.msk.msrb.mxu1 %vm794_vm0, %v15674_v48  ;;  %15987 = vmatpush.xpose.msk.msrb.mxu3 %vm794_vm0, %v15706_v36  ;;  %v16016_v48 = vld [vmem:[%s17146_s29 + $0x151] sm:$0xff]  ;;  %v16048_v36 = vld [vmem:[%s17146_s29 + $0x301] sm:$0xff] }
 0x706   : > { %15937 = vmatpush.xpose.msk.msrb.mxu0 %vm794_vm0, %v15657_v9  ;;  %15971 = vmatpush.xpose.msk.msrb.mxu2 %vm794_vm0, %v15689_v5  ;;  %v15999_v9 = vld [vmem:[%s17146_s29 + $0x81] sm:$0xff]  ;;  %v16031_v5 = vld [vmem:[%s17146_s29 + $0x231] sm:$0xff] }
 0x707   : > { %15954 = vmatpush.xpose.msk.msrb.mxu1 %vm794_vm0, %v15673_v2  ;;  %15988 = vmatpush.xpose.msk.msrb.mxu3 %vm794_vm0, %v15705_v25  ;;  %v16015_v2 = vld [vmem:[%s17146_s29 + $0x141] sm:$0xff]  ;;  %v16047_v25 = vld [vmem:[%s17146_s29 + $0x2f1] sm:$0xff] }
 0x70a   : > { %15938 = vmatpush.xpose.msk.msrb.mxu0 %vm794_vm0, %v15656_v26  ;;  %15972 = vmatpush.xpose.msk.msrb.mxu2 %vm794_vm0, %v15688_v22  ;;  %v15998_v26 = vld [vmem:[%s17146_s29 + $0x79] sm:$0xff]  ;;  %v16030_v22 = vld [vmem:[%s17146_s29 + $0x229] sm:$0xff] }
 0x70b   : > { %15955 = vmatpush.xpose.msk.msrb.mxu1 %vm794_vm0, %v15672_v19  ;;  %15989 = vmatpush.xpose.msk.msrb.mxu3 %vm794_vm0, %v15704_v33  ;;  %v16014_v19 = vld [vmem:[%s17146_s29 + $0x139] sm:$0xff]  ;;  %v16046_v33 = vld [vmem:[%s17146_s29 + $0x2e9] sm:$0xff] }
 0x70e   : > { %15939 = vmatpush.xpose.msk.msrb.mxu0 %vm794_vm0, %v15655_v59  ;;  %15973 = vmatpush.xpose.msk.msrb.mxu2 %vm794_vm0, %v15687_v50  ;;  %v15997_v59 = vld [vmem:[%s17146_s29 + $0x69] sm:$0xff]  ;;  %v16029_v50 = vld [vmem:[%s17146_s29 + $0x219] sm:$0xff] }
 0x70f   : > { %15956 = vmatpush.xpose.msk.msrb.mxu1 %vm794_vm0, %v15671_v60  ;;  %15990 = vmatpush.xpose.msk.msrb.mxu3 %vm794_vm0, %v15703_v51  ;;  %v16013_v60 = vld [vmem:[%s17146_s29 + $0x129] sm:$0xff]  ;;  %v16045_v51 = vld [vmem:[%s17146_s29 + $0x2d9] sm:$0xff] }
 0x711   : > { %15940 = vmatmul.msk.f32.vlgmr.msrb.gmra.mxu0 %vm794_vm0, %v20799_v8  ;;  %15974 = vmatmul.msk.f32.vlgmr.msrb.gmra.mxu2 %vm794_vm0, %v20799_v8 }
 0x712   : > { %16249 = vmatpush.xpose.msk.msra.mxu0 %vm794_vm0, %v16007_v61  ;;  %16283 = vmatpush.xpose.msk.msra.mxu2 %vm794_vm0, %v16039_v23  ;;  %v15996_v61 = vld [vmem:[%s17146_s29 + $0x61] sm:$0xff]  ;;  %v16028_v23 = vld [vmem:[%s17146_s29 + $0x211] sm:$0xff] }
 0x713   : > { %16266 = vmatpush.xpose.msk.msra.mxu1 %vm794_vm0, %v16023_v21  ;;  %16300 = vmatpush.xpose.msk.msra.mxu3 %vm794_vm0, %v16055_v39  ;;  %v16012_v21 = vld [vmem:[%s17146_s29 + $0x121] sm:$0xff]  ;;  %v16044_v39 = vld [vmem:[%s17146_s29 + $0x2d1] sm:$0xff] }
 0x714   : > { %15957 = vmatmul.msk.f32.vlgmr.msrb.gmra.mxu1 %vm794_vm0, %v20799_v8  ;;  %15991 = vmatmul.msk.f32.vlgmr.msrb.gmra.mxu3 %vm794_vm0, %v20799_v8  ;;  %v16004_v8 = vld [vmem:[%s17146_s29 + $0xc1] sm:$0xff]  ;;  %v9605_v44 = vpop.f32.mrf.mxu2 }
 0x715   : > { %v21296_v6 = vadd.f32 %v9605_v44, %v20682_v41  ;;  %v16051_v41 = vld [vmem:[%s17146_s29 + $0x321] sm:$0xff]  ;;  %v15993_v44 = vld [vmem:[%s17146_s29 + $0x39] sm:$0xff] }
 0x716   : > { %16250 = vmatpush.xpose.msk.msra.mxu0 %vm794_vm0, %v16006_v13  ;;  %16284 = vmatpush.xpose.msk.msra.mxu2 %vm794_vm0, %v16038_v32  ;;  %v15995_v13 = vld [vmem:[%s17146_s29 + $0x51] sm:$0xff]  ;;  %v16027_v32 = vld [vmem:[%s17146_s29 + $0x201] sm:$0xff] }
 0x717   : > { %16267 = vmatpush.xpose.msk.msra.mxu1 %vm794_vm0, %v16022_v14  ;;  %16301 = vmatpush.xpose.msk.msra.mxu3 %vm794_vm0, %v16054_v4  ;;  %v9625_v15 = vpop.f32.mrf.mxu3  ;;  %v16011_v14 = vld [vmem:[%s17146_s29 + $0x111] sm:$0xff]  ;;  %v16043_v4 = vld [vmem:[%s17146_s29 + $0x2c1] sm:$0xff] }
 0x718   : > { %v21299_v45 = vadd.f32 %v9625_v15, %v20684_v11  ;;  %v16002_v11 = vld [vmem:[%s17146_s29 + $0xa9] sm:$0xff]  ;;  %v16009_v15 = vld [vmem:[%s17146_s29 + $0xf9] sm:$0xff] }
 0x71a   : > { %16251 = vmatpush.xpose.msk.msra.mxu0 %vm794_vm0, %v16005_v37  ;;  %16285 = vmatpush.xpose.msk.msra.mxu2 %vm794_vm0, %v16037_v30  ;;  %v21375_v37 = vpop.f32.mrf.mxu0  ;;  %v15994_v30 = vld [vmem:[%s17146_s29 + $0x49] sm:$0xff] }
 0x71b   : > { %16268 = vmatpush.xpose.msk.msra.mxu1 %vm794_vm0, %v16021_v63  ;;  %16302 = vmatpush.xpose.msk.msra.mxu3 %vm794_vm0, %v16053_v7  ;;  %v21377_v63 = vpop.f32.mrf.mxu1  ;;  %v16010_v7 = vld [vmem:[%s17146_s29 + $0x109] sm:$0xff] }
 0x71e   : > { %16252 = vmatpush.xpose.msk.msra.mxu0 %vm794_vm0, %v16004_v8  ;;  %16286 = vmatpush.xpose.msk.msra.mxu2 %vm794_vm0, %v16036_v20  ;;  %v16026_v8 = vld [vmem:[%s17146_s29 + $0x1f9] sm:$0xff]  ;;  %v16025_v20 = vld [vmem:[%s17146_s29 + $0x1e9] sm:$0xff] }
 0x71f   : > { %16269 = vmatpush.xpose.msk.msra.mxu1 %vm794_vm0, %v16020_v57  ;;  %16303 = vmatpush.xpose.msk.msra.mxu3 %vm794_vm0, %v16052_v56  ;;  %v16042_v57 = vld [vmem:[%s17146_s29 + $0x2b9] sm:$0xff]  ;;  %v16041_v56 = vld [vmem:[%s17146_s29 + $0x2a9] sm:$0xff] }
 0x722   : > { %16253 = vmatpush.xpose.msk.msra.mxu0 %vm794_vm0, %v16003_v28  ;;  %16287 = vmatpush.xpose.msk.msra.mxu2 %vm794_vm0, %v16035_v46  ;;  %v21395_v28 = vpop.f32.mrf.mxu0  ;;  %v15992_v46 = vld [vmem:[%s17146_s29 + $0x31] sm:$0xff] }
 0x723   : > { %16270 = vmatpush.xpose.msk.msra.mxu1 %vm794_vm0, %v16019_v27  ;;  %16304 = vmatpush.xpose.msk.msra.mxu3 %vm794_vm0, %v16051_v41  ;;  %v21397_v27 = vpop.f32.mrf.mxu1  ;;  %v16008_v41 = vld [vmem:[%s17146_s29 + $0xf1] sm:$0xff] }
 0x726   : > { %16254 = vmatpush.xpose.msk.msra.mxu0 %vm794_vm0, %v16002_v11  ;;  %16288 = vmatpush.xpose.msk.msra.mxu2 %vm794_vm0, %v16034_v53  ;;  %v16024_v11 = vld [vmem:[%s17146_s29 + $0x1e1] sm:$0xff] }
 0x727   : > { %16271 = vmatpush.xpose.msk.msra.mxu1 %vm794_vm0, %v16018_v49  ;;  %16305 = vmatpush.xpose.msk.msra.mxu3 %vm794_vm0, %v16050_v54  ;;  %v16040_v49 = vld [vmem:[%s17146_s29 + $0x2a1] sm:$0xff] }
 0x728   : > { %v16071_v53 = vld [vmem:[%s17146_s29 + $0x441] sm:$0xff] }
 0x729   : > { %v16087_v54 = vld [vmem:[%s17146_s29 + $0x501] sm:$0xff] }
 0x72a   : > { %16255 = vmatpush.xpose.msk.msra.mxu0 %vm794_vm0, %v16001_v58  ;;  %16289 = vmatpush.xpose.msk.msra.mxu2 %vm794_vm0, %v16033_v42  ;;  %v16103_v58 = vld [vmem:[%s17146_s29 + $0x5f1] sm:$0xff] }
 0x72b   : > { %16272 = vmatpush.xpose.msk.msra.mxu1 %vm794_vm0, %v16017_v10  ;;  %16306 = vmatpush.xpose.msk.msra.mxu3 %vm794_vm0, %v16049_v12  ;;  %v16119_v10 = vld [vmem:[%s17146_s29 + $0x6b1] sm:$0xff]  ;;  %v16070_v12 = vld [vmem:[%s17146_s29 + $0x439] sm:$0xff] }
 0x72c   : > { %v21416_v42 = vld [vmem:[%s22602_s1 + $0x38] sm:$0xff] }
 0x72e   : > { %16256 = vmatpush.xpose.msk.msra.mxu0 %vm794_vm0, %v16000_v47  ;;  %16290 = vmatpush.xpose.msk.msra.mxu2 %vm794_vm0, %v16032_v34  ;;  %v16086_v47 = vld [vmem:[%s17146_s29 + $0x4f9] sm:$0xff]  ;;  %v16118_v34 = vld [vmem:[%s17146_s29 + $0x6a9] sm:$0xff] }
 0x72f   : > { %16273 = vmatpush.xpose.msk.msra.mxu1 %vm794_vm0, %v16016_v48  ;;  %16307 = vmatpush.xpose.msk.msra.mxu3 %vm794_vm0, %v16048_v36  ;;  %v16102_v48 = vld [vmem:[%s17146_s29 + $0x5e9] sm:$0xff] }
 0x732   : > { %16257 = vmatpush.xpose.msk.msra.mxu0 %vm794_vm0, %v15999_v9  ;;  %16291 = vmatpush.xpose.msk.msra.mxu2 %vm794_vm0, %v16031_v5 }
 0x733   : > { %16274 = vmatpush.xpose.msk.msra.mxu1 %vm794_vm0, %v16015_v2  ;;  %16308 = vmatpush.xpose.msk.msra.mxu3 %vm794_vm0, %v16047_v25  ;;  %v16069_v25 = vld [vmem:[%s17146_s29 + $0x429] sm:$0xff] }
 0x736   : > { %16258 = vmatpush.xpose.msk.msra.mxu0 %vm794_vm0, %v15998_v26  ;;  %16292 = vmatpush.xpose.msk.msra.mxu2 %vm794_vm0, %v16030_v22  ;;  %v16085_v26 = vld [vmem:[%s17146_s29 + $0x4e9] sm:$0xff]  ;;  %v16117_v22 = vld [vmem:[%s17146_s29 + $0x699] sm:$0xff] }
 0x737   : > { %16275 = vmatpush.xpose.msk.msra.mxu1 %vm794_vm0, %v16014_v19  ;;  %16309 = vmatpush.xpose.msk.msra.mxu3 %vm794_vm0, %v16046_v33  ;;  %v16101_v19 = vld [vmem:[%s17146_s29 + $0x5d9] sm:$0xff] }
 0x73a   : > { %16259 = vmatpush.xpose.msk.msra.mxu0 %vm794_vm0, %v15997_v59  ;;  %16293 = vmatpush.xpose.msk.msra.mxu2 %vm794_vm0, %v16029_v50  ;;  %v16116_v50 = vld [vmem:[%s17146_s29 + $0x691] sm:$0xff] }
 0x73b   : > { %16276 = vmatpush.xpose.msk.msra.mxu1 %vm794_vm0, %v16013_v60  ;;  %16310 = vmatpush.xpose.msk.msra.mxu3 %vm794_vm0, %v16045_v51  ;;  %v16100_v60 = vld [vmem:[%s17146_s29 + $0x5d1] sm:$0xff] }
 0x73e   : > { %16260 = vmatpush.xpose.msk.msra.mxu0 %vm794_vm0, %v15996_v61  ;;  %16294 = vmatpush.xpose.msk.msra.mxu2 %vm794_vm0, %v16028_v23  ;;  %v16083_v23 = vld [vmem:[%s17146_s29 + $0x4d1] sm:$0xff] }
 0x73f   : > { %16277 = vmatpush.xpose.msk.msra.mxu1 %vm794_vm0, %v16012_v21  ;;  %16311 = vmatpush.xpose.msk.msra.mxu3 %vm794_vm0, %v16044_v39  ;;  %v16067_v21 = vld [vmem:[%s17146_s29 + $0x411] sm:$0xff]  ;;  %v16099_v39 = vld [vmem:[%s17146_s29 + $0x5c1] sm:$0xff] }
 0x742   : > { %16261 = vmatpush.xpose.msk.msra.mxu0 %vm794_vm0, %v15995_v13  ;;  %16295 = vmatpush.xpose.msk.msra.mxu2 %vm794_vm0, %v16027_v32  ;;  %v16082_v13 = vld [vmem:[%s17146_s29 + $0x4c9] sm:$0xff]  ;;  %v16114_v32 = vld [vmem:[%s17146_s29 + $0x679] sm:$0xff] }
 0x743   : > { %16278 = vmatpush.xpose.msk.msra.mxu1 %vm794_vm0, %v16011_v14  ;;  %16312 = vmatpush.xpose.msk.msra.mxu3 %vm794_vm0, %v16043_v4  ;;  %v16098_v14 = vld [vmem:[%s17146_s29 + $0x5b9] sm:$0xff] }
 0x744   : > { %v16065_v4 = vld [vmem:[%s17146_s29 + $0x3f9] sm:$0xff] }
 0x746   : > { %16262 = vmatpush.xpose.msk.msra.mxu0 %vm794_vm0, %v15994_v30  ;;  %16296 = vmatpush.xpose.msk.msra.mxu2 %vm794_vm0, %v16026_v8  ;;  %v16081_v30 = vld [vmem:[%s17146_s29 + $0x4b9] sm:$0xff]  ;;  %v16113_v8 = vld [vmem:[%s17146_s29 + $0x669] sm:$0xff] }
 0x747   : > { %16279 = vmatpush.xpose.msk.msra.mxu1 %vm794_vm0, %v16010_v7  ;;  %16313 = vmatpush.xpose.msk.msra.mxu3 %vm794_vm0, %v16042_v57  ;;  %v16097_v7 = vld [vmem:[%s17146_s29 + $0x5a9] sm:$0xff]  ;;  %v16064_v57 = vld [vmem:[%s17146_s29 + $0x3f1] sm:$0xff] }
 0x74a   : > { %16263 = vmatpush.xpose.msk.msra.mxu0 %vm794_vm0, %v15993_v44  ;;  %16297 = vmatpush.xpose.msk.msra.mxu2 %vm794_vm0, %v16025_v20  ;;  %v16080_v44 = vld [vmem:[%s17146_s29 + $0x4b1] sm:$0xff]  ;;  %v16112_v20 = vld [vmem:[%s17146_s29 + $0x661] sm:$0xff] }
 0x74b   : > { %16280 = vmatpush.xpose.msk.msra.mxu1 %vm794_vm0, %v16009_v15  ;;  %16314 = vmatpush.xpose.msk.msra.mxu3 %vm794_vm0, %v16041_v56  ;;  %v16096_v15 = vld [vmem:[%s17146_s29 + $0x5a1] sm:$0xff] }
 0x74c   : > { %v16063_v56 = vld [vmem:[%s17146_s29 + $0x3e1] sm:$0xff] }
 0x74e   : > { %16264 = vmatpush.xpose.msk.msra.mxu0 %vm794_vm0, %v15992_v46  ;;  %16298 = vmatpush.xpose.msk.msra.mxu2 %vm794_vm0, %v16024_v11  ;;  %v9645_v36 = vpop.f32.mrf.mxu0  ;;  %v16079_v46 = vld [vmem:[%s17146_s29 + $0x4a1] sm:$0xff]  ;;  %v16111_v11 = vld [vmem:[%s17146_s29 + $0x651] sm:$0xff] }
 0x74f   : > { %16281 = vmatpush.xpose.msk.msra.mxu1 %vm794_vm0, %v16008_v41  ;;  %16315 = vmatpush.xpose.msk.msra.mxu3 %vm794_vm0, %v16040_v49  ;;  %v21437_v2 = vadd.f32 %v9645_v36, %v20827_v0  ;;  %v16068_v0 = vld [vmem:[%s17146_s29 + $0x421] sm:$0xff]  ;;  %v16095_v41 = vld [vmem:[%s17146_s29 + $0x591] sm:$0xff]  ;;  %v16062_v49 = vld [vmem:[%s17146_s29 + $0x3d9] sm:$0xff] }
 0x750   : > { %v16076_v36 = vld [vmem:[%s17146_s29 + $0x481] sm:$0xff] }
 0x751   : > { %16265 = vmatmul.msk.f32.vlgmr.msra.gmra.mxu0 %vm794_vm0, %v21416_v42  ;;  %16299 = vmatmul.msk.f32.vlgmr.msra.gmra.mxu2 %vm794_vm0, %v21416_v42  ;;  %v9665_v9 = vpop.f32.mrf.mxu1 }
 0x752   : > { %16317 = vmatpush.xpose.msk.msrb.mxu0 %vm794_vm0, %v16071_v53  ;;  %16351 = vmatpush.xpose.msk.msrb.mxu2 %vm794_vm0, %v16103_v58  ;;  %v21440_v5 = vadd.f32 %v9665_v9, %v20829_v17  ;;  %v16084_v17 = vld [vmem:[%s17146_s29 + $0x4e1] sm:$0xff]  ;;  %v16078_v53 = vld [vmem:[%s17146_s29 + $0x499] sm:$0xff]  ;;  %v16110_v58 = vld [vmem:[%s17146_s29 + $0x649] sm:$0xff] }
 0x753   : > { %16334 = vmatpush.xpose.msk.msrb.mxu1 %vm794_vm0, %v16087_v54  ;;  %16368 = vmatpush.xpose.msk.msrb.mxu3 %vm794_vm0, %v16119_v10  ;;  %v16094_v54 = vld [vmem:[%s17146_s29 + $0x589] sm:$0xff]  ;;  %v16092_v9 = vld [vmem:[%s17146_s29 + $0x571] sm:$0xff] }
 0x754   : > { %16282 = vmatmul.msk.f32.vlgmr.msra.gmra.mxu1 %vm794_vm0, %v21416_v42  ;;  %16316 = vmatmul.msk.f32.vlgmr.msra.gmra.mxu3 %vm794_vm0, %v21416_v42  ;;  %v9685_v33 = vpop.f32.mrf.mxu2  ;;  %v16061_v10 = vld [vmem:[%s17146_s29 + $0x3c9] sm:$0xff] }
 0x755   : > { %v21457_v51 = vadd.f32 %v9685_v33, %v20851_v43  ;;  %v16115_v43 = vld [vmem:[%s17146_s29 + $0x681] sm:$0xff]  ;;  %v16074_v33 = vld [vmem:[%s17146_s29 + $0x469] sm:$0xff] }
 0x756   : > { %16318 = vmatpush.xpose.msk.msrb.mxu0 %vm794_vm0, %v16070_v12  ;;  %16352 = vmatpush.xpose.msk.msrb.mxu2 %vm794_vm0, %v16102_v48  ;;  %v16077_v12 = vld [vmem:[%s17146_s29 + $0x489] sm:$0xff]  ;;  %v16109_v48 = vld [vmem:[%s17146_s29 + $0x639] sm:$0xff] }
 0x757   : > { %16335 = vmatpush.xpose.msk.msrb.mxu1 %vm794_vm0, %v16086_v47  ;;  %16369 = vmatpush.xpose.msk.msrb.mxu3 %vm794_vm0, %v16118_v34  ;;  %v9705_v59 = vpop.f32.mrf.mxu3  ;;  %v16093_v47 = vld [vmem:[%s17146_s29 + $0x579] sm:$0xff]  ;;  %v16060_v34 = vld [vmem:[%s17146_s29 + $0x3c1] sm:$0xff] }
 0x758   : > { %v21460_v61 = vadd.f32 %v9705_v59, %v20853_v31  ;;  %v16066_v31 = vld [vmem:[%s17146_s29 + $0x409] sm:$0xff]  ;;  %v16090_v59 = vld [vmem:[%s17146_s29 + $0x559] sm:$0xff] }
 0x75a   : > { %16319 = vmatpush.xpose.msk.msrb.mxu0 %vm794_vm0, %v16069_v25  ;;  %16353 = vmatpush.xpose.msk.msrb.mxu2 %vm794_vm0, %v16101_v19  ;;  %v16108_v25 = vld [vmem:[%s17146_s29 + $0x631] sm:$0xff] }
 0x75b   : > { %16336 = vmatpush.xpose.msk.msrb.mxu1 %vm794_vm0, %v16085_v26  ;;  %16370 = vmatpush.xpose.msk.msrb.mxu3 %vm794_vm0, %v16117_v22  ;;  %v16059_v26 = vld [vmem:[%s17146_s29 + $0x3b1] sm:$0xff]  ;;  %v16091_v22 = vld [vmem:[%s17146_s29 + $0x561] sm:$0xff] }
 0x75c   : > { %v16075_v19 = vld [vmem:[%s17146_s29 + $0x471] sm:$0xff] }
 0x75e   : > { %16320 = vmatpush.xpose.msk.msrb.mxu0 %vm794_vm0, %v16068_v0  ;;  %16354 = vmatpush.xpose.msk.msrb.mxu2 %vm794_vm0, %v16100_v60  ;;  %v16107_v0 = vld [vmem:[%s17146_s29 + $0x621] sm:$0xff]  ;;  %v16106_v60 = vld [vmem:[%s17146_s29 + $0x619] sm:$0xff] }
 0x75f   : > { %16337 = vmatpush.xpose.msk.msrb.mxu1 %vm794_vm0, %v16084_v17  ;;  %16371 = vmatpush.xpose.msk.msrb.mxu3 %vm794_vm0, %v16116_v50  ;;  %v16058_v17 = vld [vmem:[%s17146_s29 + $0x3a9] sm:$0xff]  ;;  %v16057_v50 = vld [vmem:[%s17146_s29 + $0x399] sm:$0xff] }
 0x762   : > { %16321 = vmatpush.xpose.msk.msrb.mxu0 %vm794_vm0, %v16067_v21  ;;  %16355 = vmatpush.xpose.msk.msrb.mxu2 %vm794_vm0, %v16099_v39  ;;  %v16073_v21 = vld [vmem:[%s17146_s29 + $0x459] sm:$0xff]  ;;  %v16105_v39 = vld [vmem:[%s17146_s29 + $0x609] sm:$0xff] }
 0x763   : > { %16338 = vmatpush.xpose.msk.msrb.mxu1 %vm794_vm0, %v16083_v23  ;;  %16372 = vmatpush.xpose.msk.msrb.mxu3 %vm794_vm0, %v16115_v43  ;;  %v16089_v23 = vld [vmem:[%s17146_s29 + $0x549] sm:$0xff]  ;;  %v16056_v43 = vld [vmem:[%s17146_s29 + $0x391] sm:$0xff] }
 0x766   : > { %16322 = vmatpush.xpose.msk.msrb.mxu0 %vm794_vm0, %v16066_v31  ;;  %16356 = vmatpush.xpose.msk.msrb.mxu2 %vm794_vm0, %v16098_v14  ;;  %v16072_v31 = vld [vmem:[%s17146_s29 + $0x451] sm:$0xff]  ;;  %v16104_v14 = vld [vmem:[%s17146_s29 + $0x601] sm:$0xff] }
 0x767   : > { %16339 = vmatpush.xpose.msk.msrb.mxu1 %vm794_vm0, %v16082_v13  ;;  %16373 = vmatpush.xpose.msk.msrb.mxu3 %vm794_vm0, %v16114_v32  ;;  %v16088_v13 = vld [vmem:[%s17146_s29 + $0x541] sm:$0xff] }
 0x768   : > { %v16135_v32 = vld [vmem:[%s17146_s29 + $0x7a1] sm:$0xff] }
 0x76a   : > { %16323 = vmatpush.xpose.msk.msrb.mxu0 %vm794_vm0, %v16065_v4  ;;  %16357 = vmatpush.xpose.msk.msrb.mxu2 %vm794_vm0, %v16097_v7  ;;  %v16151_v4 = vld [vmem:[%s17146_s29 + $0x861] sm:$0xff]  ;;  %v16183_v7 = vld [vmem:[%s17146_s29 + $0xa11] sm:$0xff] }
 0x76b   : > { %16340 = vmatpush.xpose.msk.msrb.mxu1 %vm794_vm0, %v16081_v30  ;;  %16374 = vmatpush.xpose.msk.msrb.mxu3 %vm794_vm0, %v16113_v8  ;;  %v16167_v30 = vld [vmem:[%s17146_s29 + $0x951] sm:$0xff]  ;;  %v16134_v8 = vld [vmem:[%s17146_s29 + $0x799] sm:$0xff] }
 0x76e   : > { %16324 = vmatpush.xpose.msk.msrb.mxu0 %vm794_vm0, %v16064_v57  ;;  %16358 = vmatpush.xpose.msk.msrb.mxu2 %vm794_vm0, %v16096_v15  ;;  %v16150_v57 = vld [vmem:[%s17146_s29 + $0x859] sm:$0xff]  ;;  %v16182_v15 = vld [vmem:[%s17146_s29 + $0xa09] sm:$0xff] }
 0x76f   : > { %16341 = vmatpush.xpose.msk.msrb.mxu1 %vm794_vm0, %v16080_v44  ;;  %16375 = vmatpush.xpose.msk.msrb.mxu3 %vm794_vm0, %v16112_v20  ;;  %v16166_v44 = vld [vmem:[%s17146_s29 + $0x949] sm:$0xff] }
 0x772   : > { %16325 = vmatpush.xpose.msk.msrb.mxu0 %vm794_vm0, %v16063_v56  ;;  %16359 = vmatpush.xpose.msk.msrb.mxu2 %vm794_vm0, %v16095_v41 }
 0x773   : > { %16342 = vmatpush.xpose.msk.msrb.mxu1 %vm794_vm0, %v16079_v46  ;;  %16376 = vmatpush.xpose.msk.msrb.mxu3 %vm794_vm0, %v16111_v11  ;;  %v16133_v11 = vld [vmem:[%s17146_s29 + $0x789] sm:$0xff] }
 0x776   : > { %16326 = vmatpush.xpose.msk.msrb.mxu0 %vm794_vm0, %v16062_v49  ;;  %16360 = vmatpush.xpose.msk.msrb.mxu2 %vm794_vm0, %v16094_v54  ;;  %v16149_v49 = vld [vmem:[%s17146_s29 + $0x849] sm:$0xff]  ;;  %v16181_v54 = vld [vmem:[%s17146_s29 + $0x9f9] sm:$0xff] }
 0x777   : > { %16343 = vmatpush.xpose.msk.msrb.mxu1 %vm794_vm0, %v16078_v53  ;;  %16377 = vmatpush.xpose.msk.msrb.mxu3 %vm794_vm0, %v16110_v58  ;;  %v16165_v53 = vld [vmem:[%s17146_s29 + $0x939] sm:$0xff] }
 0x77a   : > { %16327 = vmatpush.xpose.msk.msrb.mxu0 %vm794_vm0, %v16061_v10  ;;  %16361 = vmatpush.xpose.msk.msrb.mxu2 %vm794_vm0, %v16093_v47  ;;  %v16180_v47 = vld [vmem:[%s17146_s29 + $0x9f1] sm:$0xff] }
 0x77b   : > { %16344 = vmatpush.xpose.msk.msrb.mxu1 %vm794_vm0, %v16077_v12  ;;  %16378 = vmatpush.xpose.msk.msrb.mxu3 %vm794_vm0, %v16109_v48  ;;  %v16164_v12 = vld [vmem:[%s17146_s29 + $0x931] sm:$0xff] }
 0x77e   : > { %16328 = vmatpush.xpose.msk.msrb.mxu0 %vm794_vm0, %v16060_v34  ;;  %16362 = vmatpush.xpose.msk.msrb.mxu2 %vm794_vm0, %v16092_v9  ;;  %v16147_v9 = vld [vmem:[%s17146_s29 + $0x831] sm:$0xff] }
 0x77f   : > { %16345 = vmatpush.xpose.msk.msrb.mxu1 %vm794_vm0, %v16076_v36  ;;  %16379 = vmatpush.xpose.msk.msrb.mxu3 %vm794_vm0, %v16108_v25  ;;  %v16131_v36 = vld [vmem:[%s17146_s29 + $0x771] sm:$0xff]  ;;  %v16163_v25 = vld [vmem:[%s17146_s29 + $0x921] sm:$0xff] }
 0x782   : > { %16329 = vmatpush.xpose.msk.msrb.mxu0 %vm794_vm0, %v16059_v26  ;;  %16363 = vmatpush.xpose.msk.msrb.mxu2 %vm794_vm0, %v16091_v22  ;;  %v16146_v26 = vld [vmem:[%s17146_s29 + $0x829] sm:$0xff]  ;;  %v16178_v22 = vld [vmem:[%s17146_s29 + $0x9d9] sm:$0xff] }
 0x783   : > { %16346 = vmatpush.xpose.msk.msrb.mxu1 %vm794_vm0, %v16075_v19  ;;  %16380 = vmatpush.xpose.msk.msrb.mxu3 %vm794_vm0, %v16107_v0  ;;  %v16162_v19 = vld [vmem:[%s17146_s29 + $0x919] sm:$0xff] }
 0x784   : > { %v16129_v0 = vld [vmem:[%s17146_s29 + $0x759] sm:$0xff] }
 0x786   : > { %16330 = vmatpush.xpose.msk.msrb.mxu0 %vm794_vm0, %v16058_v17  ;;  %16364 = vmatpush.xpose.msk.msrb.mxu2 %vm794_vm0, %v16090_v59  ;;  %v16145_v17 = vld [vmem:[%s17146_s29 + $0x819] sm:$0xff]  ;;  %v16177_v59 = vld [vmem:[%s17146_s29 + $0x9c9] sm:$0xff] }
 0x787   : > { %16347 = vmatpush.xpose.msk.msrb.mxu1 %vm794_vm0, %v16074_v33  ;;  %16381 = vmatpush.xpose.msk.msrb.mxu3 %vm794_vm0, %v16106_v60  ;;  %v16161_v33 = vld [vmem:[%s17146_s29 + $0x909] sm:$0xff]  ;;  %v16128_v60 = vld [vmem:[%s17146_s29 + $0x751] sm:$0xff] }
 0x78a   : > { %16331 = vmatpush.xpose.msk.msrb.mxu0 %vm794_vm0, %v16057_v50  ;;  %16365 = vmatpush.xpose.msk.msrb.mxu2 %vm794_vm0, %v16089_v23  ;;  %v16144_v50 = vld [vmem:[%s17146_s29 + $0x811] sm:$0xff]  ;;  %v16176_v23 = vld [vmem:[%s17146_s29 + $0x9c1] sm:$0xff] }
 0x78b   : > { %16348 = vmatpush.xpose.msk.msrb.mxu1 %vm794_vm0, %v16073_v21  ;;  %16382 = vmatpush.xpose.msk.msrb.mxu3 %vm794_vm0, %v16105_v39  ;;  %v16160_v21 = vld [vmem:[%s17146_s29 + $0x901] sm:$0xff] }
 0x78c   : > { %v16127_v39 = vld [vmem:[%s17146_s29 + $0x741] sm:$0xff] }
 0x78e   : > { %16332 = vmatpush.xpose.msk.msrb.mxu0 %vm794_vm0, %v16056_v43  ;;  %16366 = vmatpush.xpose.msk.msrb.mxu2 %vm794_vm0, %v16088_v13  ;;  %v9725_v20 = vpop.f32.mrf.mxu0  ;;  %v16143_v43 = vld [vmem:[%s17146_s29 + $0x801] sm:$0xff]  ;;  %v16175_v13 = vld [vmem:[%s17146_s29 + $0x9b1] sm:$0xff] }
 0x78f   : > { %16349 = vmatpush.xpose.msk.msrb.mxu1 %vm794_vm0, %v16072_v31  ;;  %16383 = vmatpush.xpose.msk.msrb.mxu3 %vm794_vm0, %v16104_v14  ;;  %v21585_v46 = vadd.f32 %v9725_v20, %v20991_v52  ;;  %v16132_v52 = vld [vmem:[%s17146_s29 + $0x781] sm:$0xff]  ;;  %v16159_v31 = vld [vmem:[%s17146_s29 + $0x8f1] sm:$0xff]  ;;  %v16126_v14 = vld [vmem:[%s17146_s29 + $0x739] sm:$0xff] }
 0x790   : > { %v16140_v20 = vld [vmem:[%s17146_s29 + $0x7e1] sm:$0xff] }
 0x791   : > { %16333 = vmatmul.msk.f32.vlgmr.msrb.gmra.mxu0 %vm794_vm0, %v21416_v42  ;;  %16367 = vmatmul.msk.f32.vlgmr.msrb.gmra.mxu2 %vm794_vm0, %v21416_v42  ;;  %v9745_v56 = vpop.f32.mrf.mxu1 }
 0x792   : > { %16385 = vmatpush.xpose.msk.msra.mxu0 %vm794_vm0, %v16135_v32  ;;  %16419 = vmatpush.xpose.msk.msra.mxu2 %vm794_vm0, %v16167_v30  ;;  %v21588_v41 = vadd.f32 %v9745_v56, %v20993_v62  ;;  %v16148_v62 = vld [vmem:[%s17146_s29 + $0x841] sm:$0xff]  ;;  %v16142_v32 = vld [vmem:[%s17146_s29 + $0x7f9] sm:$0xff]  ;;  %v16174_v30 = vld [vmem:[%s17146_s29 + $0x9a9] sm:$0xff] }
 0x793   : > { %16402 = vmatpush.xpose.msk.msra.mxu1 %vm794_vm0, %v16151_v4  ;;  %16436 = vmatpush.xpose.msk.msra.mxu3 %vm794_vm0, %v16183_v7  ;;  %v16158_v4 = vld [vmem:[%s17146_s29 + $0x8e9] sm:$0xff]  ;;  %v16156_v56 = vld [vmem:[%s17146_s29 + $0x8d1] sm:$0xff] }
 0x794   : > { %16350 = vmatmul.msk.f32.vlgmr.msrb.gmra.mxu1 %vm794_vm0, %v21416_v42  ;;  %16384 = vmatmul.msk.f32.vlgmr.msrb.gmra.mxu3 %vm794_vm0, %v21416_v42  ;;  %v9765_v58 = vpop.f32.mrf.mxu2  ;;  %v16125_v7 = vld [vmem:[%s17146_s29 + $0x729] sm:$0xff] }
 0x795   : > { %v21605_v48 = vadd.f32 %v9765_v58, %v21015_v1  ;;  %v16179_v1 = vld [vmem:[%s17146_s29 + $0x9e1] sm:$0xff]  ;;  %v16138_v58 = vld [vmem:[%s17146_s29 + $0x7c9] sm:$0xff] }
 0x796   : > { %16386 = vmatpush.xpose.msk.msra.mxu0 %vm794_vm0, %v16134_v8  ;;  %16420 = vmatpush.xpose.msk.msra.mxu2 %vm794_vm0, %v16166_v44  ;;  %v16141_v8 = vld [vmem:[%s17146_s29 + $0x7e9] sm:$0xff]  ;;  %v16173_v44 = vld [vmem:[%s17146_s29 + $0x999] sm:$0xff] }
 0x797   : > { %16403 = vmatpush.xpose.msk.msra.mxu1 %vm794_vm0, %v16150_v57  ;;  %16437 = vmatpush.xpose.msk.msra.mxu3 %vm794_vm0, %v16182_v15  ;;  %v9785_v10 = vpop.f32.mrf.mxu3  ;;  %v16157_v57 = vld [vmem:[%s17146_s29 + $0x8d9] sm:$0xff]  ;;  %v16124_v15 = vld [vmem:[%s17146_s29 + $0x721] sm:$0xff] }
 0x798   : > { %v21608_v34 = vadd.f32 %v9785_v10, %v21017_v40  ;;  %v16130_v40 = vld [vmem:[%s17146_s29 + $0x769] sm:$0xff]  ;;  %v16154_v10 = vld [vmem:[%s17146_s29 + $0x8b9] sm:$0xff] }
 0x79a   : > { %16387 = vmatpush.xpose.msk.msra.mxu0 %vm794_vm0, %v16133_v11  ;;  %16421 = vmatpush.xpose.msk.msra.mxu2 %vm794_vm0, %v16165_v53  ;;  %v16172_v11 = vld [vmem:[%s17146_s29 + $0x991] sm:$0xff] }
 0x79b   : > { %16404 = vmatpush.xpose.msk.msra.mxu1 %vm794_vm0, %v16149_v49  ;;  %16438 = vmatpush.xpose.msk.msra.mxu3 %vm794_vm0, %v16181_v54  ;;  %v16123_v49 = vld [vmem:[%s17146_s29 + $0x711] sm:$0xff]  ;;  %v16155_v54 = vld [vmem:[%s17146_s29 + $0x8c1] sm:$0xff] }
 0x79c   : > { %v16139_v53 = vld [vmem:[%s17146_s29 + $0x7d1] sm:$0xff] }
 0x79e   : > { %16388 = vmatpush.xpose.msk.msra.mxu0 %vm794_vm0, %v16132_v52  ;;  %16422 = vmatpush.xpose.msk.msra.mxu2 %vm794_vm0, %v16164_v12  ;;  %v16171_v52 = vld [vmem:[%s17146_s29 + $0x981] sm:$0xff]  ;;  %v16170_v12 = vld [vmem:[%s17146_s29 + $0x979] sm:$0xff] }
 0x79f   : > { %16405 = vmatpush.xpose.msk.msra.mxu1 %vm794_vm0, %v16148_v62  ;;  %16439 = vmatpush.xpose.msk.msra.mxu3 %vm794_vm0, %v16180_v47  ;;  %v16122_v62 = vld [vmem:[%s17146_s29 + $0x709] sm:$0xff]  ;;  %v16121_v47 = vld [vmem:[%s17146_s29 + $0x6f9] sm:$0xff] }
 0x7a2   : > { %16389 = vmatpush.xpose.msk.msra.mxu0 %vm794_vm0, %v16131_v36  ;;  %16423 = vmatpush.xpose.msk.msra.mxu2 %vm794_vm0, %v16163_v25  ;;  %v16137_v36 = vld [vmem:[%s17146_s29 + $0x7b9] sm:$0xff]  ;;  %v16169_v25 = vld [vmem:[%s17146_s29 + $0x969] sm:$0xff] }
 0x7a3   : > { %16406 = vmatpush.xpose.msk.msra.mxu1 %vm794_vm0, %v16147_v9  ;;  %16440 = vmatpush.xpose.msk.msra.mxu3 %vm794_vm0, %v16179_v1  ;;  %v16153_v9 = vld [vmem:[%s17146_s29 + $0x8a9] sm:$0xff]  ;;  %v16120_v1 = vld [vmem:[%s17146_s29 + $0x6f1] sm:$0xff] }
 0x7a6   : > { %16390 = vmatpush.xpose.msk.msra.mxu0 %vm794_vm0, %v16130_v40  ;;  %16424 = vmatpush.xpose.msk.msra.mxu2 %vm794_vm0, %v16162_v19  ;;  %v16136_v40 = vld [vmem:[%s17146_s29 + $0x7b1] sm:$0xff]  ;;  %v16168_v19 = vld [vmem:[%s17146_s29 + $0x961] sm:$0xff] }
 0x7a7   : > { %16407 = vmatpush.xpose.msk.msra.mxu1 %vm794_vm0, %v16146_v26  ;;  %16441 = vmatpush.xpose.msk.msra.mxu3 %vm794_vm0, %v16178_v22  ;;  %v16152_v26 = vld [vmem:[%s17146_s29 + $0x8a1] sm:$0xff] }
 0x7a8   : > { %v16199_v22 = vld [vmem:[%s17146_s29 + $0xb01] sm:$0xff] }
 0x7aa   : > { %16391 = vmatpush.xpose.msk.msra.mxu0 %vm794_vm0, %v16129_v0  ;;  %16425 = vmatpush.xpose.msk.msra.mxu2 %vm794_vm0, %v16161_v33  ;;  %v16215_v0 = vld [vmem:[%s17146_s29 + $0xbc1] sm:$0xff]  ;;  %v16247_v33 = vld [vmem:[%s17146_s29 + $0xd71] sm:$0xff] }
 0x7ab   : > { %16408 = vmatpush.xpose.msk.msra.mxu1 %vm794_vm0, %v16145_v17  ;;  %16442 = vmatpush.xpose.msk.msra.mxu3 %vm794_vm0, %v16177_v59  ;;  %v16231_v17 = vld [vmem:[%s17146_s29 + $0xcb1] sm:$0xff]  ;;  %v16198_v59 = vld [vmem:[%s17146_s29 + $0xaf9] sm:$0xff] }
 0x7ae   : > { %16392 = vmatpush.xpose.msk.msra.mxu0 %vm794_vm0, %v16128_v60  ;;  %16426 = vmatpush.xpose.msk.msra.mxu2 %vm794_vm0, %v16160_v21  ;;  %v16214_v60 = vld [vmem:[%s17146_s29 + $0xbb9] sm:$0xff]  ;;  %v16246_v21 = vld [vmem:[%s17146_s29 + $0xd69] sm:$0xff] }
 0x7af   : > { %16409 = vmatpush.xpose.msk.msra.mxu1 %vm794_vm0, %v16144_v50  ;;  %16443 = vmatpush.xpose.msk.msra.mxu3 %vm794_vm0, %v16176_v23  ;;  %v16230_v50 = vld [vmem:[%s17146_s29 + $0xca9] sm:$0xff] }
 0x7b0   : > { %v16197_v23 = vld [vmem:[%s17146_s29 + $0xae9] sm:$0xff] }
 0x7b2   : > { %16393 = vmatpush.xpose.msk.msra.mxu0 %vm794_vm0, %v16127_v39  ;;  %16427 = vmatpush.xpose.msk.msra.mxu2 %vm794_vm0, %v16159_v31  ;;  %v16213_v39 = vld [vmem:[%s17146_s29 + $0xba9] sm:$0xff]  ;;  %v16245_v31 = vld [vmem:[%s17146_s29 + $0xd59] sm:$0xff] }
 0x7b3   : > { %16410 = vmatpush.xpose.msk.msra.mxu1 %vm794_vm0, %v16143_v43  ;;  %16444 = vmatpush.xpose.msk.msra.mxu3 %vm794_vm0, %v16175_v13  ;;  %v16229_v43 = vld [vmem:[%s17146_s29 + $0xc99] sm:$0xff]  ;;  %v16196_v13 = vld [vmem:[%s17146_s29 + $0xae1] sm:$0xff] }
 0x7b6   : > { %16394 = vmatpush.xpose.msk.msra.mxu0 %vm794_vm0, %v16126_v14  ;;  %16428 = vmatpush.xpose.msk.msra.mxu2 %vm794_vm0, %v16158_v4  ;;  %v16212_v14 = vld [vmem:[%s17146_s29 + $0xba1] sm:$0xff]  ;;  %v16244_v4 = vld [vmem:[%s17146_s29 + $0xd51] sm:$0xff] }
 0x7b7   : > { %16411 = vmatpush.xpose.msk.msra.mxu1 %vm794_vm0, %v16142_v32  ;;  %16445 = vmatpush.xpose.msk.msra.mxu3 %vm794_vm0, %v16174_v30  ;;  %v16228_v32 = vld [vmem:[%s17146_s29 + $0xc91] sm:$0xff] }
 0x7b8   : > { %v16195_v30 = vld [vmem:[%s17146_s29 + $0xad1] sm:$0xff] }
 0x7ba   : > { %16395 = vmatpush.xpose.msk.msra.mxu0 %vm794_vm0, %v16125_v7  ;;  %16429 = vmatpush.xpose.msk.msra.mxu2 %vm794_vm0, %v16157_v57  ;;  %v16211_v7 = vld [vmem:[%s17146_s29 + $0xb91] sm:$0xff]  ;;  %v16243_v57 = vld [vmem:[%s17146_s29 + $0xd41] sm:$0xff] }
 0x7bb   : > { %16412 = vmatpush.xpose.msk.msra.mxu1 %vm794_vm0, %v16141_v8  ;;  %16446 = vmatpush.xpose.msk.msra.mxu3 %vm794_vm0, %v16173_v44  ;;  %v16227_v8 = vld [vmem:[%s17146_s29 + $0xc81] sm:$0xff]  ;;  %v16194_v44 = vld [vmem:[%s17146_s29 + $0xac9] sm:$0xff] }
 0x7be   : > { %16396 = vmatpush.xpose.msk.msra.mxu0 %vm794_vm0, %v16124_v15  ;;  %16430 = vmatpush.xpose.msk.msra.mxu2 %vm794_vm0, %v16156_v56  ;;  %v16210_v15 = vld [vmem:[%s17146_s29 + $0xb89] sm:$0xff]  ;;  %v16242_v56 = vld [vmem:[%s17146_s29 + $0xd39] sm:$0xff] }
 0x7bf   : > { %16413 = vmatpush.xpose.msk.msra.mxu1 %vm794_vm0, %v16140_v20  ;;  %16447 = vmatpush.xpose.msk.msra.mxu3 %vm794_vm0, %v16172_v11  ;;  %v16226_v20 = vld [vmem:[%s17146_s29 + $0xc79] sm:$0xff] }
 0x7c0   : > { %v16193_v11 = vld [vmem:[%s17146_s29 + $0xab9] sm:$0xff] }
 0x7c2   : > { %16397 = vmatpush.xpose.msk.msra.mxu0 %vm794_vm0, %v16123_v49  ;;  %16431 = vmatpush.xpose.msk.msra.mxu2 %vm794_vm0, %v16155_v54  ;;  %v16209_v49 = vld [vmem:[%s17146_s29 + $0xb79] sm:$0xff]  ;;  %v16241_v54 = vld [vmem:[%s17146_s29 + $0xd29] sm:$0xff] }
 0x7c3   : > { %16414 = vmatpush.xpose.msk.msra.mxu1 %vm794_vm0, %v16139_v53  ;;  %16448 = vmatpush.xpose.msk.msra.mxu3 %vm794_vm0, %v16171_v52  ;;  %v16225_v53 = vld [vmem:[%s17146_s29 + $0xc69] sm:$0xff]  ;;  %v16192_v52 = vld [vmem:[%s17146_s29 + $0xab1] sm:$0xff] }
 0x7c6   : > { %16398 = vmatpush.xpose.msk.msra.mxu0 %vm794_vm0, %v16122_v62  ;;  %16432 = vmatpush.xpose.msk.msra.mxu2 %vm794_vm0, %v16154_v10  ;;  %v16208_v62 = vld [vmem:[%s17146_s29 + $0xb71] sm:$0xff]  ;;  %v16240_v10 = vld [vmem:[%s17146_s29 + $0xd21] sm:$0xff] }
 0x7c7   : > { %16415 = vmatpush.xpose.msk.msra.mxu1 %vm794_vm0, %v16138_v58  ;;  %16449 = vmatpush.xpose.msk.msra.mxu3 %vm794_vm0, %v16170_v12  ;;  %v16224_v58 = vld [vmem:[%s17146_s29 + $0xc61] sm:$0xff] }
 0x7c8   : > { %v16191_v12 = vld [vmem:[%s17146_s29 + $0xaa1] sm:$0xff] }
 0x7ca   : > { %16399 = vmatpush.xpose.msk.msra.mxu0 %vm794_vm0, %v16121_v47  ;;  %16433 = vmatpush.xpose.msk.msra.mxu2 %vm794_vm0, %v16153_v9  ;;  %v16207_v47 = vld [vmem:[%s17146_s29 + $0xb61] sm:$0xff]  ;;  %v16239_v9 = vld [vmem:[%s17146_s29 + $0xd11] sm:$0xff] }
 0x7cb   : > { %16416 = vmatpush.xpose.msk.msra.mxu1 %vm794_vm0, %v16137_v36  ;;  %16450 = vmatpush.xpose.msk.msra.mxu3 %vm794_vm0, %v16169_v25  ;;  %v16223_v36 = vld [vmem:[%s17146_s29 + $0xc51] sm:$0xff]  ;;  %v16190_v25 = vld [vmem:[%s17146_s29 + $0xa99] sm:$0xff] }
 0x7ce   : > { %16400 = vmatpush.xpose.msk.msra.mxu0 %vm794_vm0, %v16120_v1  ;;  %16434 = vmatpush.xpose.msk.msra.mxu2 %vm794_vm0, %v16152_v26  ;;  %v16206_v1 = vld [vmem:[%s17146_s29 + $0xb59] sm:$0xff]  ;;  %v16238_v26 = vld [vmem:[%s17146_s29 + $0xd09] sm:$0xff] }
 0x7cf   : > { %16417 = vmatpush.xpose.msk.msra.mxu1 %vm794_vm0, %v16136_v40  ;;  %16451 = vmatpush.xpose.msk.msra.mxu3 %vm794_vm0, %v16168_v19  ;;  %v16222_v40 = vld [vmem:[%s17146_s29 + $0xc49] sm:$0xff] }
 0x7d0   : > { %v16189_v19 = vld [vmem:[%s17146_s29 + $0xa89] sm:$0xff] }
 0x7d1   : > { %16401 = vmatmul.msk.f32.vlgmr.msra.gmra.mxu0 %vm794_vm0, %v21416_v42  ;;  %16435 = vmatmul.msk.f32.vlgmr.msra.gmra.mxu2 %vm794_vm0, %v21416_v42 }
 0x7d2   : > { %16453 = vmatpush.xpose.msk.msrb.mxu0 %vm794_vm0, %v16199_v22  ;;  %16487 = vmatpush.xpose.msk.msrb.mxu2 %vm794_vm0, %v16231_v17  ;;  %v16205_v22 = vld [vmem:[%s17146_s29 + $0xb49] sm:$0xff]  ;;  %v16237_v17 = vld [vmem:[%s17146_s29 + $0xcf9] sm:$0xff] }
 0x7d3   : > { %16470 = vmatpush.xpose.msk.msrb.mxu1 %vm794_vm0, %v16215_v0  ;;  %16504 = vmatpush.xpose.msk.msrb.mxu3 %vm794_vm0, %v16247_v33  ;;  %v16221_v0 = vld [vmem:[%s17146_s29 + $0xc39] sm:$0xff]  ;;  %v16188_v33 = vld [vmem:[%s17146_s29 + $0xa81] sm:$0xff] }
 0x7d4   : > { %16418 = vmatmul.msk.f32.vlgmr.msra.gmra.mxu1 %vm794_vm0, %v21416_v42  ;;  %16452 = vmatmul.msk.f32.vlgmr.msra.gmra.mxu3 %vm794_vm0, %v21416_v42 }
 0x7d6   : > { %16454 = vmatpush.xpose.msk.msrb.mxu0 %vm794_vm0, %v16198_v59  ;;  %16488 = vmatpush.xpose.msk.msrb.mxu2 %vm794_vm0, %v16230_v50  ;;  %v16204_v59 = vld [vmem:[%s17146_s29 + $0xb41] sm:$0xff]  ;;  %v16236_v50 = vld [vmem:[%s17146_s29 + $0xcf1] sm:$0xff] }
 0x7d7   : > { %16471 = vmatpush.xpose.msk.msrb.mxu1 %vm794_vm0, %v16214_v60  ;;  %16505 = vmatpush.xpose.msk.msrb.mxu3 %vm794_vm0, %v16246_v21  ;;  %v16220_v60 = vld [vmem:[%s17146_s29 + $0xc31] sm:$0xff] }
 0x7d8   : > { %v16187_v21 = vld [vmem:[%s17146_s29 + $0xa71] sm:$0xff] }
 0x7da   : > { %16455 = vmatpush.xpose.msk.msrb.mxu0 %vm794_vm0, %v16197_v23  ;;  %16489 = vmatpush.xpose.msk.msrb.mxu2 %vm794_vm0, %v16229_v43  ;;  %v16203_v23 = vld [vmem:[%s17146_s29 + $0xb31] sm:$0xff]  ;;  %v16235_v43 = vld [vmem:[%s17146_s29 + $0xce1] sm:$0xff] }
 0x7db   : > { %16472 = vmatpush.xpose.msk.msrb.mxu1 %vm794_vm0, %v16213_v39  ;;  %16506 = vmatpush.xpose.msk.msrb.mxu3 %vm794_vm0, %v16245_v31  ;;  %v16219_v39 = vld [vmem:[%s17146_s29 + $0xc21] sm:$0xff]  ;;  %v16186_v31 = vld [vmem:[%s17146_s29 + $0xa69] sm:$0xff] }
 0x7de   : > { %16456 = vmatpush.xpose.msk.msrb.mxu0 %vm794_vm0, %v16196_v13  ;;  %16490 = vmatpush.xpose.msk.msrb.mxu2 %vm794_vm0, %v16228_v32  ;;  %v16202_v13 = vld [vmem:[%s17146_s29 + $0xb29] sm:$0xff]  ;;  %v16234_v32 = vld [vmem:[%s17146_s29 + $0xcd9] sm:$0xff] }
 0x7df   : > { %16473 = vmatpush.xpose.msk.msrb.mxu1 %vm794_vm0, %v16212_v14  ;;  %16507 = vmatpush.xpose.msk.msrb.mxu3 %vm794_vm0, %v16244_v4  ;;  %v16218_v14 = vld [vmem:[%s17146_s29 + $0xc19] sm:$0xff] }
 0x7e0   : > { %v16185_v4 = vld [vmem:[%s17146_s29 + $0xa59] sm:$0xff] }
 0x7e2   : > { %16457 = vmatpush.xpose.msk.msrb.mxu0 %vm794_vm0, %v16195_v30  ;;  %16491 = vmatpush.xpose.msk.msrb.mxu2 %vm794_vm0, %v16227_v8  ;;  %v16201_v30 = vld [vmem:[%s17146_s29 + $0xb19] sm:$0xff]  ;;  %v16233_v8 = vld [vmem:[%s17146_s29 + $0xcc9] sm:$0xff] }
 0x7e3   : > { %16474 = vmatpush.xpose.msk.msrb.mxu1 %vm794_vm0, %v16211_v7  ;;  %16508 = vmatpush.xpose.msk.msrb.mxu3 %vm794_vm0, %v16243_v57  ;;  %v16217_v7 = vld [vmem:[%s17146_s29 + $0xc09] sm:$0xff]  ;;  %v16184_v57 = vld [vmem:[%s17146_s29 + $0xa51] sm:$0xff] }
 0x7e6   : > { %16458 = vmatpush.xpose.msk.msrb.mxu0 %vm794_vm0, %v16194_v44  ;;  %16492 = vmatpush.xpose.msk.msrb.mxu2 %vm794_vm0, %v16226_v20  ;;  %v16200_v44 = vld [vmem:[%s17146_s29 + $0xb11] sm:$0xff]  ;;  %v16232_v20 = vld [vmem:[%s17146_s29 + $0xcc1] sm:$0xff] }
 0x7e7   : > { %16475 = vmatpush.xpose.msk.msrb.mxu1 %vm794_vm0, %v16210_v15  ;;  %16509 = vmatpush.xpose.msk.msrb.mxu3 %vm794_vm0, %v16242_v56  ;;  %v16216_v15 = vld [vmem:[%s17146_s29 + $0xc01] sm:$0xff] }
 0x7e8   : > { %v16536_v56 = vld [vmem:[%s17146_s29 + $0xe2] sm:$0xff] }
 0x7ea   : > { %16459 = vmatpush.xpose.msk.msrb.mxu0 %vm794_vm0, %v16193_v11  ;;  %16493 = vmatpush.xpose.msk.msrb.mxu2 %vm794_vm0, %v16225_v53  ;;  %v16552_v11 = vld [vmem:[%s17146_s29 + $0x1a2] sm:$0xff]  ;;  %v16584_v53 = vld [vmem:[%s17146_s29 + $0x352] sm:$0xff] }
 0x7eb   : > { %16476 = vmatpush.xpose.msk.msrb.mxu1 %vm794_vm0, %v16209_v49  ;;  %16510 = vmatpush.xpose.msk.msrb.mxu3 %vm794_vm0, %v16241_v54  ;;  %v16568_v49 = vld [vmem:[%s17146_s29 + $0x292] sm:$0xff]  ;;  %v16535_v54 = vld [vmem:[%s17146_s29 + $0xda] sm:$0xff] }
 0x7ee   : > { %16460 = vmatpush.xpose.msk.msrb.mxu0 %vm794_vm0, %v16192_v52  ;;  %16494 = vmatpush.xpose.msk.msrb.mxu2 %vm794_vm0, %v16224_v58  ;;  %v16551_v52 = vld [vmem:[%s17146_s29 + $0x19a] sm:$0xff]  ;;  %v16583_v58 = vld [vmem:[%s17146_s29 + $0x34a] sm:$0xff] }
 0x7ef   : > { %16477 = vmatpush.xpose.msk.msrb.mxu1 %vm794_vm0, %v16208_v62  ;;  %16511 = vmatpush.xpose.msk.msrb.mxu3 %vm794_vm0, %v16240_v10  ;;  %v16567_v62 = vld [vmem:[%s17146_s29 + $0x28a] sm:$0xff] }
 0x7f0   : > { %v16534_v10 = vld [vmem:[%s17146_s29 + $0xca] sm:$0xff] }
 0x7f2   : > { %16461 = vmatpush.xpose.msk.msrb.mxu0 %vm794_vm0, %v16191_v12  ;;  %16495 = vmatpush.xpose.msk.msrb.mxu2 %vm794_vm0, %v16223_v36  ;;  %v16550_v12 = vld [vmem:[%s17146_s29 + $0x18a] sm:$0xff]  ;;  %v16582_v36 = vld [vmem:[%s17146_s29 + $0x33a] sm:$0xff] }
 0x7f3   : > { %16478 = vmatpush.xpose.msk.msrb.mxu1 %vm794_vm0, %v16207_v47  ;;  %16512 = vmatpush.xpose.msk.msrb.mxu3 %vm794_vm0, %v16239_v9  ;;  %v16566_v47 = vld [vmem:[%s17146_s29 + $0x27a] sm:$0xff]  ;;  %v16549_v9 = vld [vmem:[%s17146_s29 + $0x182] sm:$0xff] }
 0x7f6   : > { %16462 = vmatpush.xpose.msk.msrb.mxu0 %vm794_vm0, %v16190_v25  ;;  %16496 = vmatpush.xpose.msk.msrb.mxu2 %vm794_vm0, %v16222_v40  ;;  %v16565_v25 = vld [vmem:[%s17146_s29 + $0x272] sm:$0xff] }
 0x7f7   : > { %16479 = vmatpush.xpose.msk.msrb.mxu1 %vm794_vm0, %v16206_v1  ;;  %16513 = vmatpush.xpose.msk.msrb.mxu3 %vm794_vm0, %v16238_v26  ;;  %v16581_v1 = vld [vmem:[%s17146_s29 + $0x332] sm:$0xff] }
 0x7f8   : > { %v16532_v40 = vld [vmem:[%s17146_s29 + $0xb2] sm:$0xff] }
 0x7f9   : > { %v16548_v26 = vld [vmem:[%s17146_s29 + $0x172] sm:$0xff] }
 0x7fa   : > { %16463 = vmatpush.xpose.msk.msrb.mxu0 %vm794_vm0, %v16189_v19  ;;  %16497 = vmatpush.xpose.msk.msrb.mxu2 %vm794_vm0, %v16221_v0  ;;  %v16564_v19 = vld [vmem:[%s17146_s29 + $0x262] sm:$0xff]  ;;  %v16531_v0 = vld [vmem:[%s17146_s29 + $0xaa] sm:$0xff] }
 0x7fb   : > { %16480 = vmatpush.xpose.msk.msrb.mxu1 %vm794_vm0, %v16205_v22  ;;  %16514 = vmatpush.xpose.msk.msrb.mxu3 %vm794_vm0, %v16237_v17  ;;  %v16580_v22 = vld [vmem:[%s17146_s29 + $0x322] sm:$0xff]  ;;  %v16547_v17 = vld [vmem:[%s17146_s29 + $0x16a] sm:$0xff] }
 0x7fe   : > { %16464 = vmatpush.xpose.msk.msrb.mxu0 %vm794_vm0, %v16188_v33  ;;  %16498 = vmatpush.xpose.msk.msrb.mxu2 %vm794_vm0, %v16220_v60  ;;  %v16563_v33 = vld [vmem:[%s17146_s29 + $0x25a] sm:$0xff] }
 0x7ff   : > { %16481 = vmatpush.xpose.msk.msrb.mxu1 %vm794_vm0, %v16204_v59  ;;  %16515 = vmatpush.xpose.msk.msrb.mxu3 %vm794_vm0, %v16236_v50  ;;  %v16579_v59 = vld [vmem:[%s17146_s29 + $0x31a] sm:$0xff] }
 0x800   : > { %v16530_v60 = vld [vmem:[%s17146_s29 + $0x9a] sm:$0xff] }
 0x801   : > { %v16546_v50 = vld [vmem:[%s17146_s29 + $0x15a] sm:$0xff] }
 0x802   : > { %16465 = vmatpush.xpose.msk.msrb.mxu0 %vm794_vm0, %v16187_v21  ;;  %16499 = vmatpush.xpose.msk.msrb.mxu2 %vm794_vm0, %v16219_v39  ;;  %v16562_v21 = vld [vmem:[%s17146_s29 + $0x24a] sm:$0xff]  ;;  %v16529_v39 = vld [vmem:[%s17146_s29 + $0x92] sm:$0xff] }
 0x803   : > { %16482 = vmatpush.xpose.msk.msrb.mxu1 %vm794_vm0, %v16203_v23  ;;  %16516 = vmatpush.xpose.msk.msrb.mxu3 %vm794_vm0, %v16235_v43  ;;  %v16578_v23 = vld [vmem:[%s17146_s29 + $0x30a] sm:$0xff]  ;;  %v16545_v43 = vld [vmem:[%s17146_s29 + $0x152] sm:$0xff] }
 0x806   : > { %16466 = vmatpush.xpose.msk.msrb.mxu0 %vm794_vm0, %v16186_v31  ;;  %16500 = vmatpush.xpose.msk.msrb.mxu2 %vm794_vm0, %v16218_v14  ;;  %v16561_v31 = vld [vmem:[%s17146_s29 + $0x242] sm:$0xff] }
 0x807   : > { %16483 = vmatpush.xpose.msk.msrb.mxu1 %vm794_vm0, %v16202_v13  ;;  %16517 = vmatpush.xpose.msk.msrb.mxu3 %vm794_vm0, %v16234_v32  ;;  %v16577_v13 = vld [vmem:[%s17146_s29 + $0x302] sm:$0xff] }
 0x808   : > { %v16528_v14 = vld [vmem:[%s17146_s29 + $0x82] sm:$0xff] }
 0x809   : > { %v16544_v32 = vld [vmem:[%s17146_s29 + $0x142] sm:$0xff] }
 0x80a   : > { %16467 = vmatpush.xpose.msk.msrb.mxu0 %vm794_vm0, %v16185_v4  ;;  %16501 = vmatpush.xpose.msk.msrb.mxu2 %vm794_vm0, %v16217_v7  ;;  %v16560_v4 = vld [vmem:[%s17146_s29 + $0x232] sm:$0xff]  ;;  %v16527_v7 = vld [vmem:[%s17146_s29 + $0x7a] sm:$0xff] }
 0x80b   : > { %16484 = vmatpush.xpose.msk.msrb.mxu1 %vm794_vm0, %v16201_v30  ;;  %16518 = vmatpush.xpose.msk.msrb.mxu3 %vm794_vm0, %v16233_v8  ;;  %v16576_v30 = vld [vmem:[%s17146_s29 + $0x2f2] sm:$0xff]  ;;  %v16543_v8 = vld [vmem:[%s17146_s29 + $0x13a] sm:$0xff] }
 0x80e   : > { %16468 = vmatpush.xpose.msk.msrb.mxu0 %vm794_vm0, %v16184_v57  ;;  %16502 = vmatpush.xpose.msk.msrb.mxu2 %vm794_vm0, %v16216_v15  ;;  %v16559_v57 = vld [vmem:[%s17146_s29 + $0x22a] sm:$0xff] }
 0x80f   : > { %16485 = vmatpush.xpose.msk.msrb.mxu1 %vm794_vm0, %v16200_v44  ;;  %16519 = vmatpush.xpose.msk.msrb.mxu3 %vm794_vm0, %v16232_v20  ;;  %v16575_v44 = vld [vmem:[%s17146_s29 + $0x2ea] sm:$0xff] }
 0x810   : > { %v16526_v15 = vld [vmem:[%s17146_s29 + $0x6a] sm:$0xff] }
 0x811   : > { %16469 = vmatmul.msk.f32.vlgmr.msrb.gmra.mxu0 %vm794_vm0, %v21416_v42  ;;  %16503 = vmatmul.msk.f32.vlgmr.msrb.gmra.mxu2 %vm794_vm0, %v21416_v42  ;;  %v16542_v20 = vld [vmem:[%s17146_s29 + $0x12a] sm:$0xff] }
 0x812   : > { %16778 = vmatpush.xpose.msk.msra.mxu0 %vm794_vm0, %v16536_v56  ;;  %16812 = vmatpush.xpose.msk.msra.mxu2 %vm794_vm0, %v16568_v49  ;;  %v16558_v56 = vld [vmem:[%s17146_s29 + $0x21a] sm:$0xff]  ;;  %v17090_v49 = vmov 0  }
 0x813   : > { %16795 = vmatpush.xpose.msk.msra.mxu1 %vm794_vm0, %v16552_v11  ;;  %16829 = vmatpush.xpose.msk.msra.mxu3 %vm794_vm0, %v16584_v53  ;;  %v16574_v11 = vld [vmem:[%s17146_s29 + $0x2da] sm:$0xff] }
 0x814   : > { %16486 = vmatmul.msk.f32.vlgmr.msrb.gmra.mxu1 %vm794_vm0, %v21416_v42  ;;  %16520 = vmatmul.msk.f32.vlgmr.msrb.gmra.mxu3 %vm794_vm0, %v21416_v42  ;;  %v16533_v42 = vld [vmem:[%s17146_s29 + $0xc2] sm:$0xff] }
 0x815   : > { %17080 = vset.pattern.permute.xlu0 %v17090_v49  ;;  %17081 = vset.pattern.permute.xlu1 %v17090_v49  ;;  %v12534_v53 = vld [vmem:[%s22603_s2] sm:$0xff] }
 0x816   : > { %16779 = vmatpush.xpose.msk.msra.mxu0 %vm794_vm0, %v16535_v54  ;;  %16813 = vmatpush.xpose.msk.msra.mxu2 %vm794_vm0, %v16567_v62  ;;  %v16525_v54 = vld [vmem:[%s17146_s29 + $0x62] sm:$0xff]  ;;  %v16557_v62 = vld [vmem:[%s17146_s29 + $0x212] sm:$0xff] }
 0x817   : > { %16796 = vmatpush.xpose.msk.msra.mxu1 %vm794_vm0, %v16551_v52  ;;  %16830 = vmatpush.xpose.msk.msra.mxu3 %vm794_vm0, %v16583_v58  ;;  %v16541_v52 = vld [vmem:[%s17146_s29 + $0x122] sm:$0xff]  ;;  %v16573_v58 = vld [vmem:[%s17146_s29 + $0x2d2] sm:$0xff] }
 0x818   : > { %12537 = vperm.xlu0 %17080, %v12534_v53  }
 0x81a   : > { %16780 = vmatpush.xpose.msk.msra.mxu0 %vm794_vm0, %v16534_v10  ;;  %16814 = vmatpush.xpose.msk.msra.mxu2 %vm794_vm0, %v16566_v47  ;;  %v16524_v10 = vld [vmem:[%s17146_s29 + $0x52] sm:$0xff]  ;;  %v16556_v47 = vld [vmem:[%s17146_s29 + $0x202] sm:$0xff] }
 0x81b   : > { %16797 = vmatpush.xpose.msk.msra.mxu1 %vm794_vm0, %v16550_v12  ;;  %16831 = vmatpush.xpose.msk.msra.mxu3 %vm794_vm0, %v16582_v36  ;;  %v16540_v12 = vld [vmem:[%s17146_s29 + $0x112] sm:$0xff]  ;;  %v16572_v36 = vld [vmem:[%s17146_s29 + $0x2c2] sm:$0xff] }
 0x81e   : > { %16781 = vmatpush.xpose.msk.msra.mxu0 %vm794_vm0, %v16533_v42  ;;  %16815 = vmatpush.xpose.msk.msra.mxu2 %vm794_vm0, %v16565_v25  ;;  %v12556_v42 = vld [vmem:[%s22604_s3] sm:$0xff]  ;;  %v21964_v25 = vpop.f32.mrf.mxu1 }
 0x81f   : > { %16798 = vmatpush.xpose.msk.msra.mxu1 %vm794_vm0, %v16549_v9  ;;  %16832 = vmatpush.xpose.msk.msra.mxu3 %vm794_vm0, %v16581_v1  ;;  %v21962_v9 = vpop.f32.mrf.mxu0  ;;  %v16523_v1 = vld [vmem:[%s17146_s29 + $0x4a] sm:$0xff] }
 0x820   : > { %12559 = vperm.xlu0 %17080, %v12556_v42  }
 0x822   : > { %16782 = vmatpush.xpose.msk.msra.mxu0 %vm794_vm0, %v16532_v40  ;;  %16816 = vmatpush.xpose.msk.msra.mxu2 %vm794_vm0, %v16564_v19  ;;  %v16539_v40 = vld [vmem:[%s17146_s29 + $0x10a] sm:$0xff]  ;;  %v16571_v19 = vld [vmem:[%s17146_s29 + $0x2ba] sm:$0xff] }
 0x823   : > { %16799 = vmatpush.xpose.msk.msra.mxu1 %vm794_vm0, %v16548_v26  ;;  %16833 = vmatpush.xpose.msk.msra.mxu3 %vm794_vm0, %v16580_v22  ;;  %v16555_v26 = vld [vmem:[%s17146_s29 + $0x1fa] sm:$0xff] }
 0x824   : > { %v16522_v22 = vld [vmem:[%s17146_s29 + $0x3a] sm:$0xff] }
 0x826   : > { %16783 = vmatpush.xpose.msk.msra.mxu0 %vm794_vm0, %v16531_v0  ;;  %16817 = vmatpush.xpose.msk.msra.mxu2 %vm794_vm0, %v16563_v33  ;;  %v16538_v0 = vld [vmem:[%s17146_s29 + $0xfa] sm:$0xff]  ;;  %v16570_v33 = vld [vmem:[%s17146_s29 + $0x2aa] sm:$0xff] }
 0x827   : > { %16800 = vmatpush.xpose.msk.msra.mxu1 %vm794_vm0, %v16547_v17  ;;  %16834 = vmatpush.xpose.msk.msra.mxu3 %vm794_vm0, %v16579_v59  ;;  %v16554_v17 = vld [vmem:[%s17146_s29 + $0x1ea] sm:$0xff]  ;;  %v21980_v59 = vpop.f32.mrf.mxu2 }
 0x82a   : > { %16784 = vmatpush.xpose.msk.msra.mxu0 %vm794_vm0, %v16530_v60  ;;  %16818 = vmatpush.xpose.msk.msra.mxu2 %vm794_vm0, %v16562_v21  ;;  %v21982_v60 = vpop.f32.mrf.mxu3  ;;  %v21988_v21 = vpop.f32.mrf.mxu1 }
 0x82b   : > { %16801 = vmatpush.xpose.msk.msra.mxu1 %vm794_vm0, %v16546_v50  ;;  %16835 = vmatpush.xpose.msk.msra.mxu3 %vm794_vm0, %v16578_v23  ;;  %v21986_v50 = vpop.f32.mrf.mxu0  ;;  %v16521_v23 = vld [vmem:[%s17146_s29 + $0x32] sm:$0xff] }
 0x82e   : > { %16785 = vmatpush.xpose.msk.msra.mxu0 %vm794_vm0, %v16529_v39  ;;  %16819 = vmatpush.xpose.msk.msra.mxu2 %vm794_vm0, %v16561_v31  ;;  %v16537_v39 = vld [vmem:[%s17146_s29 + $0xf2] sm:$0xff]  ;;  %v16569_v31 = vld [vmem:[%s17146_s29 + $0x2a2] sm:$0xff] }
 0x82f   : > { %16802 = vmatpush.xpose.msk.msra.mxu1 %vm794_vm0, %v16545_v43  ;;  %16836 = vmatpush.xpose.msk.msra.mxu3 %vm794_vm0, %v16577_v13  ;;  %v16553_v43 = vld [vmem:[%s17146_s29 + $0x1e2] sm:$0xff] }
 0x830   : > { %v16600_v13 = vld [vmem:[%s17146_s29 + $0x442] sm:$0xff] }
 0x832   : > { %16786 = vmatpush.xpose.msk.msra.mxu0 %vm794_vm0, %v16528_v14  ;;  %16820 = vmatpush.xpose.msk.msra.mxu2 %vm794_vm0, %v16560_v4  ;;  %v16616_v14 = vld [vmem:[%s17146_s29 + $0x502] sm:$0xff]  ;;  %v16648_v4 = vld [vmem:[%s17146_s29 + $0x6b2] sm:$0xff] }
 0x833   : > { %16803 = vmatpush.xpose.msk.msra.mxu1 %vm794_vm0, %v16544_v32  ;;  %16837 = vmatpush.xpose.msk.msra.mxu3 %vm794_vm0, %v16576_v30  ;;  %v16632_v32 = vld [vmem:[%s17146_s29 + $0x5f2] sm:$0xff]  ;;  %v22007_v30 = vld [vmem:[%s22602_s1 + $0x40] sm:$0xff] }
 0x836   : > { %16787 = vmatpush.xpose.msk.msra.mxu0 %vm794_vm0, %v16527_v7  ;;  %16821 = vmatpush.xpose.msk.msra.mxu2 %vm794_vm0, %v16559_v57  ;;  %v16599_v7 = vld [vmem:[%s17146_s29 + $0x43a] sm:$0xff]  ;;  %v22015_v57 = vpop.f32.mrf.mxu2 }
 0x837   : > { %16804 = vmatpush.xpose.msk.msra.mxu1 %vm794_vm0, %v16543_v8  ;;  %16838 = vmatpush.xpose.msk.msra.mxu3 %vm794_vm0, %v16575_v44  ;;  %v16615_v8 = vld [vmem:[%s17146_s29 + $0x4fa] sm:$0xff]  ;;  %v22017_v44 = vpop.f32.mrf.mxu3 }
 0x83a   : > { %16788 = vmatpush.xpose.msk.msra.mxu0 %vm794_vm0, %v16526_v15  ;;  %16822 = vmatpush.xpose.msk.msra.mxu2 %vm794_vm0, %v16558_v56  ;;  %v16631_v15 = vld [vmem:[%s17146_s29 + $0x5ea] sm:$0xff] }
 0x83b   : > { %16805 = vmatpush.xpose.msk.msra.mxu1 %vm794_vm0, %v16542_v20  ;;  %16839 = vmatpush.xpose.msk.msra.mxu3 %vm794_vm0, %v16574_v11  ;;  %v16647_v20 = vld [vmem:[%s17146_s29 + $0x6aa] sm:$0xff] }
 0x83e   : > { %16789 = vmatpush.xpose.msk.msra.mxu0 %vm794_vm0, %v16525_v54  ;;  %16823 = vmatpush.xpose.msk.msra.mxu2 %vm794_vm0, %v16557_v62  ;;  %v16598_v54 = vld [vmem:[%s17146_s29 + $0x42a] sm:$0xff]  ;;  %v16630_v62 = vld [vmem:[%s17146_s29 + $0x5da] sm:$0xff] }
 0x83f   : > { %16806 = vmatpush.xpose.msk.msra.mxu1 %vm794_vm0, %v16541_v52  ;;  %16840 = vmatpush.xpose.msk.msra.mxu3 %vm794_vm0, %v16573_v58  ;;  %v16614_v52 = vld [vmem:[%s17146_s29 + $0x4ea] sm:$0xff]  ;;  %v16646_v58 = vld [vmem:[%s17146_s29 + $0x69a] sm:$0xff] }
 0x842   : > { %16790 = vmatpush.xpose.msk.msra.mxu0 %vm794_vm0, %v16524_v10  ;;  %16824 = vmatpush.xpose.msk.msra.mxu2 %vm794_vm0, %v16556_v47  ;;  %v16629_v47 = vld [vmem:[%s17146_s29 + $0x5d2] sm:$0xff] }
 0x843   : > { %16807 = vmatpush.xpose.msk.msra.mxu1 %vm794_vm0, %v16540_v12  ;;  %16841 = vmatpush.xpose.msk.msra.mxu3 %vm794_vm0, %v16572_v36  ;;  %v16645_v36 = vld [vmem:[%s17146_s29 + $0x692] sm:$0xff] }
 0x846   : > { %16791 = vmatpush.xpose.msk.msra.mxu0 %vm794_vm0, %v16523_v1  ;;  %16825 = vmatpush.xpose.msk.msra.mxu2 %vm794_vm0, %v16555_v26  ;;  %v16612_v26 = vld [vmem:[%s17146_s29 + $0x4d2] sm:$0xff] }
 0x847   : > { %16808 = vmatpush.xpose.msk.msra.mxu1 %vm794_vm0, %v16539_v40  ;;  %16842 = vmatpush.xpose.msk.msra.mxu3 %vm794_vm0, %v16571_v19  ;;  %v16596_v40 = vld [vmem:[%s17146_s29 + $0x412] sm:$0xff]  ;;  %v16628_v19 = vld [vmem:[%s17146_s29 + $0x5c2] sm:$0xff] }
 0x84a   : > { %16792 = vmatpush.xpose.msk.msra.mxu0 %vm794_vm0, %v16522_v22  ;;  %16826 = vmatpush.xpose.msk.msra.mxu2 %vm794_vm0, %v16554_v17  ;;  %v16611_v22 = vld [vmem:[%s17146_s29 + $0x4ca] sm:$0xff]  ;;  %v16643_v17 = vld [vmem:[%s17146_s29 + $0x67a] sm:$0xff] }
 0x84b   : > { %16809 = vmatpush.xpose.msk.msra.mxu1 %vm794_vm0, %v16538_v0  ;;  %16843 = vmatpush.xpose.msk.msra.mxu3 %vm794_vm0, %v16570_v33  ;;  %v16627_v0 = vld [vmem:[%s17146_s29 + $0x5ba] sm:$0xff] }
 0x84c   : > { %v16594_v33 = vld [vmem:[%s17146_s29 + $0x3fa] sm:$0xff] }
 0x84e   : > { %16793 = vmatpush.xpose.msk.msra.mxu0 %vm794_vm0, %v16521_v23  ;;  %16827 = vmatpush.xpose.msk.msra.mxu2 %vm794_vm0, %v16553_v43  ;;  %v11010_v56 = vpop.f32.mrf.mxu0  ;;  %v16610_v23 = vld [vmem:[%s17146_s29 + $0x4ba] sm:$0xff]  ;;  %v16642_v43 = vld [vmem:[%s17146_s29 + $0x66a] sm:$0xff] }
 0x84f   : > { %16810 = vmatpush.xpose.msk.msra.mxu1 %vm794_vm0, %v16537_v39  ;;  %16844 = vmatpush.xpose.msk.msra.mxu3 %vm794_vm0, %v16569_v31  ;;  %v22032_v49 = vadd.f32 %v11010_v56, %v21437_v2  ;;  %v16597_v2 = vld [vmem:[%s17146_s29 + $0x422] sm:$0xff]  ;;  %v16626_v39 = vld [vmem:[%s17146_s29 + $0x5aa] sm:$0xff]  ;;  %v16593_v31 = vld [vmem:[%s17146_s29 + $0x3f2] sm:$0xff] }
 0x850   : > { %v16607_v56 = vld [vmem:[%s17146_s29 + $0x49a] sm:$0xff] }
 0x851   : > { %16794 = vmatmul.msk.f32.vlgmr.msra.gmra.mxu0 %vm794_vm0, %v22007_v30  ;;  %16828 = vmatmul.msk.f32.vlgmr.msra.gmra.mxu2 %vm794_vm0, %v22007_v30  ;;  %v11030_v11 = vpop.f32.mrf.mxu1 }
 0x852   : > { %16846 = vmatpush.xpose.msk.msrb.mxu0 %vm794_vm0, %v16600_v13  ;;  %16880 = vmatpush.xpose.msk.msrb.mxu2 %vm794_vm0, %v16632_v32  ;;  %v22035_v53 = vadd.f32 %v11030_v11, %v21440_v5  ;;  %v16613_v5 = vld [vmem:[%s17146_s29 + $0x4e2] sm:$0xff]  ;;  %v16609_v13 = vld [vmem:[%s17146_s29 + $0x4b2] sm:$0xff]  ;;  %v16623_v11 = vld [vmem:[%s17146_s29 + $0x58a] sm:$0xff] }
 0x853   : > { %16863 = vmatpush.xpose.msk.msrb.mxu1 %vm794_vm0, %v16616_v14  ;;  %16897 = vmatpush.xpose.msk.msrb.mxu3 %vm794_vm0, %v16648_v4  ;;  %v16625_v14 = vld [vmem:[%s17146_s29 + $0x5a2] sm:$0xff] }
 0x854   : > { %16811 = vmatmul.msk.f32.vlgmr.msra.gmra.mxu1 %vm794_vm0, %v22007_v30  ;;  %16845 = vmatmul.msk.f32.vlgmr.msra.gmra.mxu3 %vm794_vm0, %v22007_v30  ;;  %v11050_v10 = vpop.f32.mrf.mxu2  ;;  %v16641_v32 = vld [vmem:[%s17146_s29 + $0x662] sm:$0xff] }
 0x855   : > { %v22052_v42 = vadd.f32 %v11050_v10, %v21457_v51  ;;  %v16644_v51 = vld [vmem:[%s17146_s29 + $0x682] sm:$0xff] }
 0x856   : > { %16847 = vmatpush.xpose.msk.msrb.mxu0 %vm794_vm0, %v16599_v7  ;;  %16881 = vmatpush.xpose.msk.msrb.mxu2 %vm794_vm0, %v16631_v15  ;;  %v16592_v4 = vld [vmem:[%s17146_s29 + $0x3e2] sm:$0xff]  ;;  %v16640_v15 = vld [vmem:[%s17146_s29 + $0x652] sm:$0xff] }
 0x857   : > { %16864 = vmatpush.xpose.msk.msrb.mxu1 %vm794_vm0, %v16615_v8  ;;  %16898 = vmatpush.xpose.msk.msrb.mxu3 %vm794_vm0, %v16647_v20  ;;  %v11070_v12 = vpop.f32.mrf.mxu3  ;;  %v16608_v7 = vld [vmem:[%s17146_s29 + $0x4a2] sm:$0xff]  ;;  %v16624_v8 = vld [vmem:[%s17146_s29 + $0x592] sm:$0xff]  ;;  %v16591_v20 = vld [vmem:[%s17146_s29 + $0x3da] sm:$0xff] }
 0x858   : > { %v22055_v1 = vadd.f32 %v11070_v12, %v21460_v61  ;;  %v16595_v61 = vld [vmem:[%s17146_s29 + $0x40a] sm:$0xff]  ;;  %v16605_v10 = vld [vmem:[%s17146_s29 + $0x482] sm:$0xff]  ;;  %v16621_v12 = vld [vmem:[%s17146_s29 + $0x572] sm:$0xff] }
 0x85a   : > { %16848 = vmatpush.xpose.msk.msrb.mxu0 %vm794_vm0, %v16598_v54  ;;  %16882 = vmatpush.xpose.msk.msrb.mxu2 %vm794_vm0, %v16630_v62  ;;  %v16639_v54 = vld [vmem:[%s17146_s29 + $0x64a] sm:$0xff] }
 0x85b   : > { %16865 = vmatpush.xpose.msk.msrb.mxu1 %vm794_vm0, %v16614_v52  ;;  %16899 = vmatpush.xpose.msk.msrb.mxu3 %vm794_vm0, %v16646_v58  ;;  %v16590_v52 = vld [vmem:[%s17146_s29 + $0x3ca] sm:$0xff]  ;;  %v16622_v58 = vld [vmem:[%s17146_s29 + $0x57a] sm:$0xff] }
 0x85c   : > { %v16606_v62 = vld [vmem:[%s17146_s29 + $0x48a] sm:$0xff] }
 0x85e   : > { %16849 = vmatpush.xpose.msk.msrb.mxu0 %vm794_vm0, %v16597_v2  ;;  %16883 = vmatpush.xpose.msk.msrb.mxu2 %vm794_vm0, %v16629_v47  ;;  %v16638_v2 = vld [vmem:[%s17146_s29 + $0x63a] sm:$0xff]  ;;  %v16637_v47 = vld [vmem:[%s17146_s29 + $0x632] sm:$0xff] }
 0x85f   : > { %16866 = vmatpush.xpose.msk.msrb.mxu1 %vm794_vm0, %v16613_v5  ;;  %16900 = vmatpush.xpose.msk.msrb.mxu3 %vm794_vm0, %v16645_v36  ;;  %v16589_v5 = vld [vmem:[%s17146_s29 + $0x3c2] sm:$0xff]  ;;  %v16588_v36 = vld [vmem:[%s17146_s29 + $0x3b2] sm:$0xff] }
 0x862   : > { %16850 = vmatpush.xpose.msk.msrb.mxu0 %vm794_vm0, %v16596_v40  ;;  %16884 = vmatpush.xpose.msk.msrb.mxu2 %vm794_vm0, %v16628_v19  ;;  %v16604_v40 = vld [vmem:[%s17146_s29 + $0x472] sm:$0xff]  ;;  %v16636_v19 = vld [vmem:[%s17146_s29 + $0x622] sm:$0xff] }
 0x863   : > { %16867 = vmatpush.xpose.msk.msrb.mxu1 %vm794_vm0, %v16612_v26  ;;  %16901 = vmatpush.xpose.msk.msrb.mxu3 %vm794_vm0, %v16644_v51  ;;  %v16620_v26 = vld [vmem:[%s17146_s29 + $0x562] sm:$0xff]  ;;  %v16587_v51 = vld [vmem:[%s17146_s29 + $0x3aa] sm:$0xff] }
 0x866   : > { %16851 = vmatpush.xpose.msk.msrb.mxu0 %vm794_vm0, %v16595_v61  ;;  %16885 = vmatpush.xpose.msk.msrb.mxu2 %vm794_vm0, %v16627_v0  ;;  %v16603_v61 = vld [vmem:[%s17146_s29 + $0x46a] sm:$0xff]  ;;  %v16635_v0 = vld [vmem:[%s17146_s29 + $0x61a] sm:$0xff] }
 0x867   : > { %16868 = vmatpush.xpose.msk.msrb.mxu1 %vm794_vm0, %v16611_v22  ;;  %16902 = vmatpush.xpose.msk.msrb.mxu3 %vm794_vm0, %v16643_v17  ;;  %v16619_v22 = vld [vmem:[%s17146_s29 + $0x55a] sm:$0xff] }
 0x868   : > { %v16586_v17 = vld [vmem:[%s17146_s29 + $0x39a] sm:$0xff] }
 0x86a   : > { %16852 = vmatpush.xpose.msk.msrb.mxu0 %vm794_vm0, %v16594_v33  ;;  %16886 = vmatpush.xpose.msk.msrb.mxu2 %vm794_vm0, %v16626_v39  ;;  %v16602_v33 = vld [vmem:[%s17146_s29 + $0x45a] sm:$0xff]  ;;  %v16634_v39 = vld [vmem:[%s17146_s29 + $0x60a] sm:$0xff] }
 0x86b   : > { %16869 = vmatpush.xpose.msk.msrb.mxu1 %vm794_vm0, %v16610_v23  ;;  %16903 = vmatpush.xpose.msk.msrb.mxu3 %vm794_vm0, %v16642_v43  ;;  %v16618_v23 = vld [vmem:[%s17146_s29 + $0x54a] sm:$0xff]  ;;  %v16585_v43 = vld [vmem:[%s17146_s29 + $0x392] sm:$0xff] }
 0x86e   : > { %16853 = vmatpush.xpose.msk.msrb.mxu0 %vm794_vm0, %v16593_v31  ;;  %16887 = vmatpush.xpose.msk.msrb.mxu2 %vm794_vm0, %v16625_v14  ;;  %v16601_v31 = vld [vmem:[%s17146_s29 + $0x452] sm:$0xff]  ;;  %v16633_v14 = vld [vmem:[%s17146_s29 + $0x602] sm:$0xff] }
 0x86f   : > { %16870 = vmatpush.xpose.msk.msrb.mxu1 %vm794_vm0, %v16609_v13  ;;  %16904 = vmatpush.xpose.msk.msrb.mxu3 %vm794_vm0, %v16641_v32  ;;  %v16617_v13 = vld [vmem:[%s17146_s29 + $0x542] sm:$0xff] }
 0x870   : > { %v16664_v32 = vld [vmem:[%s17146_s29 + $0x7a2] sm:$0xff] }
 0x872   : > { %16854 = vmatpush.xpose.msk.msrb.mxu0 %vm794_vm0, %v16592_v4  ;;  %16888 = vmatpush.xpose.msk.msrb.mxu2 %vm794_vm0, %v16624_v8  ;;  %v16680_v4 = vld [vmem:[%s17146_s29 + $0x862] sm:$0xff]  ;;  %v16712_v8 = vld [vmem:[%s17146_s29 + $0xa12] sm:$0xff] }
 0x873   : > { %16871 = vmatpush.xpose.msk.msrb.mxu1 %vm794_vm0, %v16608_v7  ;;  %16905 = vmatpush.xpose.msk.msrb.mxu3 %vm794_vm0, %v16640_v15  ;;  %v16696_v7 = vld [vmem:[%s17146_s29 + $0x952] sm:$0xff]  ;;  %v16663_v15 = vld [vmem:[%s17146_s29 + $0x79a] sm:$0xff] }
 0x876   : > { %16855 = vmatpush.xpose.msk.msrb.mxu0 %vm794_vm0, %v16591_v20  ;;  %16889 = vmatpush.xpose.msk.msrb.mxu2 %vm794_vm0, %v16623_v11  ;;  %v16679_v20 = vld [vmem:[%s17146_s29 + $0x85a] sm:$0xff]  ;;  %v16711_v11 = vld [vmem:[%s17146_s29 + $0xa0a] sm:$0xff] }
 0x877   : > { %16872 = vmatpush.xpose.msk.msrb.mxu1 %vm794_vm0, %v16607_v56  ;;  %16906 = vmatpush.xpose.msk.msrb.mxu3 %vm794_vm0, %v16639_v54  ;;  %v16695_v56 = vld [vmem:[%s17146_s29 + $0x94a] sm:$0xff] }
 0x87a   : > { %16856 = vmatpush.xpose.msk.msrb.mxu0 %vm794_vm0, %v16590_v52  ;;  %16890 = vmatpush.xpose.msk.msrb.mxu2 %vm794_vm0, %v16622_v58 }
 0x87b   : > { %16873 = vmatpush.xpose.msk.msrb.mxu1 %vm794_vm0, %v16606_v62  ;;  %16907 = vmatpush.xpose.msk.msrb.mxu3 %vm794_vm0, %v16638_v2  ;;  %v16662_v2 = vld [vmem:[%s17146_s29 + $0x78a] sm:$0xff] }
 0x87e   : > { %16857 = vmatpush.xpose.msk.msrb.mxu0 %vm794_vm0, %v16589_v5  ;;  %16891 = vmatpush.xpose.msk.msrb.mxu2 %vm794_vm0, %v16621_v12  ;;  %v16678_v5 = vld [vmem:[%s17146_s29 + $0x84a] sm:$0xff]  ;;  %v16710_v12 = vld [vmem:[%s17146_s29 + $0x9fa] sm:$0xff] }
 0x87f   : > { %16874 = vmatpush.xpose.msk.msrb.mxu1 %vm794_vm0, %v16605_v10  ;;  %16908 = vmatpush.xpose.msk.msrb.mxu3 %vm794_vm0, %v16637_v47  ;;  %v16694_v10 = vld [vmem:[%s17146_s29 + $0x93a] sm:$0xff] }
 0x882   : > { %16858 = vmatpush.xpose.msk.msrb.mxu0 %vm794_vm0, %v16588_v36  ;;  %16892 = vmatpush.xpose.msk.msrb.mxu2 %vm794_vm0, %v16620_v26  ;;  %v16709_v26 = vld [vmem:[%s17146_s29 + $0x9f2] sm:$0xff] }
 0x883   : > { %16875 = vmatpush.xpose.msk.msrb.mxu1 %vm794_vm0, %v16604_v40  ;;  %16909 = vmatpush.xpose.msk.msrb.mxu3 %vm794_vm0, %v16636_v19  ;;  %v16693_v40 = vld [vmem:[%s17146_s29 + $0x932] sm:$0xff] }
 0x886   : > { %16859 = vmatpush.xpose.msk.msrb.mxu0 %vm794_vm0, %v16587_v51  ;;  %16893 = vmatpush.xpose.msk.msrb.mxu2 %vm794_vm0, %v16619_v22  ;;  %v16676_v22 = vld [vmem:[%s17146_s29 + $0x832] sm:$0xff] }
 0x887   : > { %16876 = vmatpush.xpose.msk.msrb.mxu1 %vm794_vm0, %v16603_v61  ;;  %16910 = vmatpush.xpose.msk.msrb.mxu3 %vm794_vm0, %v16635_v0  ;;  %v16660_v61 = vld [vmem:[%s17146_s29 + $0x772] sm:$0xff]  ;;  %v16692_v0 = vld [vmem:[%s17146_s29 + $0x922] sm:$0xff] }
 0x88a   : > { %16860 = vmatpush.xpose.msk.msrb.mxu0 %vm794_vm0, %v16586_v17  ;;  %16894 = vmatpush.xpose.msk.msrb.mxu2 %vm794_vm0, %v16618_v23  ;;  %v16675_v17 = vld [vmem:[%s17146_s29 + $0x82a] sm:$0xff]  ;;  %v16707_v23 = vld [vmem:[%s17146_s29 + $0x9da] sm:$0xff] }
 0x88b   : > { %16877 = vmatpush.xpose.msk.msrb.mxu1 %vm794_vm0, %v16602_v33  ;;  %16911 = vmatpush.xpose.msk.msrb.mxu3 %vm794_vm0, %v16634_v39  ;;  %v16691_v33 = vld [vmem:[%s17146_s29 + $0x91a] sm:$0xff] }
 0x88c   : > { %v16658_v39 = vld [vmem:[%s17146_s29 + $0x75a] sm:$0xff] }
 0x88e   : > { %16861 = vmatpush.xpose.msk.msrb.mxu0 %vm794_vm0, %v16585_v43  ;;  %16895 = vmatpush.xpose.msk.msrb.mxu2 %vm794_vm0, %v16617_v13  ;;  %v11090_v54 = vpop.f32.mrf.mxu0  ;;  %v16674_v43 = vld [vmem:[%s17146_s29 + $0x81a] sm:$0xff]  ;;  %v16706_v13 = vld [vmem:[%s17146_s29 + $0x9ca] sm:$0xff] }
 0x88f   : > { %16878 = vmatpush.xpose.msk.msrb.mxu1 %vm794_vm0, %v16601_v31  ;;  %16912 = vmatpush.xpose.msk.msrb.mxu3 %vm794_vm0, %v16633_v14  ;;  %v22180_v62 = vadd.f32 %v11090_v54, %v21585_v46  ;;  %v16661_v46 = vld [vmem:[%s17146_s29 + $0x782] sm:$0xff]  ;;  %v16690_v31 = vld [vmem:[%s17146_s29 + $0x90a] sm:$0xff]  ;;  %v16657_v14 = vld [vmem:[%s17146_s29 + $0x752] sm:$0xff] }
 0x890   : > { %v16671_v54 = vld [vmem:[%s17146_s29 + $0x7fa] sm:$0xff] }
 0x891   : > { %16862 = vmatmul.msk.f32.vlgmr.msrb.gmra.mxu0 %vm794_vm0, %v22007_v30  ;;  %16896 = vmatmul.msk.f32.vlgmr.msrb.gmra.mxu2 %vm794_vm0, %v22007_v30  ;;  %v11110_v52 = vpop.f32.mrf.mxu1 }
 0x892   : > { %16914 = vmatpush.xpose.msk.msra.mxu0 %vm794_vm0, %v16664_v32  ;;  %16948 = vmatpush.xpose.msk.msra.mxu2 %vm794_vm0, %v16696_v7  ;;  %v22183_v58 = vadd.f32 %v11110_v52, %v21588_v41  ;;  %v16677_v41 = vld [vmem:[%s17146_s29 + $0x842] sm:$0xff]  ;;  %v16673_v32 = vld [vmem:[%s17146_s29 + $0x812] sm:$0xff]  ;;  %v16687_v52 = vld [vmem:[%s17146_s29 + $0x8ea] sm:$0xff] }
 0x893   : > { %16931 = vmatpush.xpose.msk.msra.mxu1 %vm794_vm0, %v16680_v4  ;;  %16965 = vmatpush.xpose.msk.msra.mxu3 %vm794_vm0, %v16712_v8  ;;  %v16689_v4 = vld [vmem:[%s17146_s29 + $0x902] sm:$0xff] }
 0x894   : > { %16879 = vmatmul.msk.f32.vlgmr.msrb.gmra.mxu1 %vm794_vm0, %v22007_v30  ;;  %16913 = vmatmul.msk.f32.vlgmr.msrb.gmra.mxu3 %vm794_vm0, %v22007_v30  ;;  %v11130_v47 = vpop.f32.mrf.mxu2  ;;  %v16705_v7 = vld [vmem:[%s17146_s29 + $0x9c2] sm:$0xff] }
 0x895   : > { %v22200_v19 = vadd.f32 %v11130_v47, %v21605_v48  ;;  %v16708_v48 = vld [vmem:[%s17146_s29 + $0x9e2] sm:$0xff] }
 0x896   : > { %16915 = vmatpush.xpose.msk.msra.mxu0 %vm794_vm0, %v16663_v15  ;;  %16949 = vmatpush.xpose.msk.msra.mxu2 %vm794_vm0, %v16695_v56  ;;  %v16656_v8 = vld [vmem:[%s17146_s29 + $0x742] sm:$0xff]  ;;  %v16704_v56 = vld [vmem:[%s17146_s29 + $0x9b2] sm:$0xff] }
 0x897   : > { %16932 = vmatpush.xpose.msk.msra.mxu1 %vm794_vm0, %v16679_v20  ;;  %16966 = vmatpush.xpose.msk.msra.mxu3 %vm794_vm0, %v16711_v11  ;;  %v11150_v36 = vpop.f32.mrf.mxu3  ;;  %v16672_v15 = vld [vmem:[%s17146_s29 + $0x802] sm:$0xff]  ;;  %v16688_v20 = vld [vmem:[%s17146_s29 + $0x8f2] sm:$0xff]  ;;  %v16655_v11 = vld [vmem:[%s17146_s29 + $0x73a] sm:$0xff] }
 0x898   : > { %v22203_v51 = vadd.f32 %v11150_v36, %v21608_v34  ;;  %v16659_v34 = vld [vmem:[%s17146_s29 + $0x76a] sm:$0xff]  ;;  %v16669_v47 = vld [vmem:[%s17146_s29 + $0x7e2] sm:$0xff]  ;;  %v16685_v36 = vld [vmem:[%s17146_s29 + $0x8d2] sm:$0xff] }
 0x89a   : > { %16916 = vmatpush.xpose.msk.msra.mxu0 %vm794_vm0, %v16662_v2  ;;  %16950 = vmatpush.xpose.msk.msra.mxu2 %vm794_vm0, %v16694_v10  ;;  %v16703_v2 = vld [vmem:[%s17146_s29 + $0x9aa] sm:$0xff] }
 0x89b   : > { %16933 = vmatpush.xpose.msk.msra.mxu1 %vm794_vm0, %v16678_v5  ;;  %16967 = vmatpush.xpose.msk.msra.mxu3 %vm794_vm0, %v16710_v12  ;;  %v16654_v5 = vld [vmem:[%s17146_s29 + $0x72a] sm:$0xff]  ;;  %v16686_v12 = vld [vmem:[%s17146_s29 + $0x8da] sm:$0xff] }
 0x89c   : > { %v16670_v10 = vld [vmem:[%s17146_s29 + $0x7ea] sm:$0xff] }
 0x89e   : > { %16917 = vmatpush.xpose.msk.msra.mxu0 %vm794_vm0, %v16661_v46  ;;  %16951 = vmatpush.xpose.msk.msra.mxu2 %vm794_vm0, %v16693_v40  ;;  %v16702_v46 = vld [vmem:[%s17146_s29 + $0x99a] sm:$0xff]  ;;  %v16701_v40 = vld [vmem:[%s17146_s29 + $0x992] sm:$0xff] }
 0x89f   : > { %16934 = vmatpush.xpose.msk.msra.mxu1 %vm794_vm0, %v16677_v41  ;;  %16968 = vmatpush.xpose.msk.msra.mxu3 %vm794_vm0, %v16709_v26  ;;  %v16653_v41 = vld [vmem:[%s17146_s29 + $0x722] sm:$0xff]  ;;  %v16652_v26 = vld [vmem:[%s17146_s29 + $0x712] sm:$0xff] }
 0x8a2   : > { %16918 = vmatpush.xpose.msk.msra.mxu0 %vm794_vm0, %v16660_v61  ;;  %16952 = vmatpush.xpose.msk.msra.mxu2 %vm794_vm0, %v16692_v0  ;;  %v16668_v61 = vld [vmem:[%s17146_s29 + $0x7d2] sm:$0xff]  ;;  %v16700_v0 = vld [vmem:[%s17146_s29 + $0x982] sm:$0xff] }
 0x8a3   : > { %16935 = vmatpush.xpose.msk.msra.mxu1 %vm794_vm0, %v16676_v22  ;;  %16969 = vmatpush.xpose.msk.msra.mxu3 %vm794_vm0, %v16708_v48  ;;  %v16684_v22 = vld [vmem:[%s17146_s29 + $0x8c2] sm:$0xff]  ;;  %v16651_v48 = vld [vmem:[%s17146_s29 + $0x70a] sm:$0xff] }
 0x8a6   : > { %16919 = vmatpush.xpose.msk.msra.mxu0 %vm794_vm0, %v16659_v34  ;;  %16953 = vmatpush.xpose.msk.msra.mxu2 %vm794_vm0, %v16691_v33  ;;  %v16667_v34 = vld [vmem:[%s17146_s29 + $0x7ca] sm:$0xff]  ;;  %v16699_v33 = vld [vmem:[%s17146_s29 + $0x97a] sm:$0xff] }
 0x8a7   : > { %16936 = vmatpush.xpose.msk.msra.mxu1 %vm794_vm0, %v16675_v17  ;;  %16970 = vmatpush.xpose.msk.msra.mxu3 %vm794_vm0, %v16707_v23  ;;  %v16683_v17 = vld [vmem:[%s17146_s29 + $0x8ba] sm:$0xff] }
 0x8a8   : > { %v16650_v23 = vld [vmem:[%s17146_s29 + $0x6fa] sm:$0xff] }
 0x8aa   : > { %16920 = vmatpush.xpose.msk.msra.mxu0 %vm794_vm0, %v16658_v39  ;;  %16954 = vmatpush.xpose.msk.msra.mxu2 %vm794_vm0, %v16690_v31  ;;  %v16666_v39 = vld [vmem:[%s17146_s29 + $0x7ba] sm:$0xff]  ;;  %v16698_v31 = vld [vmem:[%s17146_s29 + $0x96a] sm:$0xff] }
 0x8ab   : > { %16937 = vmatpush.xpose.msk.msra.mxu1 %vm794_vm0, %v16674_v43  ;;  %16971 = vmatpush.xpose.msk.msra.mxu3 %vm794_vm0, %v16706_v13  ;;  %v16682_v43 = vld [vmem:[%s17146_s29 + $0x8aa] sm:$0xff]  ;;  %v16649_v13 = vld [vmem:[%s17146_s29 + $0x6f2] sm:$0xff] }
 0x8ae   : > { %16921 = vmatpush.xpose.msk.msra.mxu0 %vm794_vm0, %v16657_v14  ;;  %16955 = vmatpush.xpose.msk.msra.mxu2 %vm794_vm0, %v16689_v4  ;;  %v16665_v14 = vld [vmem:[%s17146_s29 + $0x7b2] sm:$0xff]  ;;  %v16697_v4 = vld [vmem:[%s17146_s29 + $0x962] sm:$0xff] }
 0x8af   : > { %16938 = vmatpush.xpose.msk.msra.mxu1 %vm794_vm0, %v16673_v32  ;;  %16972 = vmatpush.xpose.msk.msra.mxu3 %vm794_vm0, %v16705_v7  ;;  %v16681_v32 = vld [vmem:[%s17146_s29 + $0x8a2] sm:$0xff] }
 0x8b0   : > { %v16728_v7 = vld [vmem:[%s17146_s29 + $0xb02] sm:$0xff] }
 0x8b2   : > { %16922 = vmatpush.xpose.msk.msra.mxu0 %vm794_vm0, %v16656_v8  ;;  %16956 = vmatpush.xpose.msk.msra.mxu2 %vm794_vm0, %v16688_v20  ;;  %v16744_v8 = vld [vmem:[%s17146_s29 + $0xbc2] sm:$0xff]  ;;  %v16776_v20 = vld [vmem:[%s17146_s29 + $0xd72] sm:$0xff] }
 0x8b3   : > { %16939 = vmatpush.xpose.msk.msra.mxu1 %vm794_vm0, %v16672_v15  ;;  %16973 = vmatpush.xpose.msk.msra.mxu3 %vm794_vm0, %v16704_v56  ;;  %v16760_v15 = vld [vmem:[%s17146_s29 + $0xcb2] sm:$0xff]  ;;  %v16727_v56 = vld [vmem:[%s17146_s29 + $0xafa] sm:$0xff] }
 0x8b6   : > { %16923 = vmatpush.xpose.msk.msra.mxu0 %vm794_vm0, %v16655_v11  ;;  %16957 = vmatpush.xpose.msk.msra.mxu2 %vm794_vm0, %v16687_v52  ;;  %v16743_v11 = vld [vmem:[%s17146_s29 + $0xbba] sm:$0xff]  ;;  %v16775_v52 = vld [vmem:[%s17146_s29 + $0xd6a] sm:$0xff] }
 0x8b7   : > { %16940 = vmatpush.xpose.msk.msra.mxu1 %vm794_vm0, %v16671_v54  ;;  %16974 = vmatpush.xpose.msk.msra.mxu3 %vm794_vm0, %v16703_v2  ;;  %v16759_v54 = vld [vmem:[%s17146_s29 + $0xcaa] sm:$0xff] }
 0x8b8   : > { %v16726_v2 = vld [vmem:[%s17146_s29 + $0xaea] sm:$0xff] }
 0x8ba   : > { %16924 = vmatpush.xpose.msk.msra.mxu0 %vm794_vm0, %v16654_v5  ;;  %16958 = vmatpush.xpose.msk.msra.mxu2 %vm794_vm0, %v16686_v12  ;;  %v16742_v5 = vld [vmem:[%s17146_s29 + $0xbaa] sm:$0xff]  ;;  %v16774_v12 = vld [vmem:[%s17146_s29 + $0xd5a] sm:$0xff] }
 0x8bb   : > { %16941 = vmatpush.xpose.msk.msra.mxu1 %vm794_vm0, %v16670_v10  ;;  %16975 = vmatpush.xpose.msk.msra.mxu3 %vm794_vm0, %v16702_v46  ;;  %v16758_v10 = vld [vmem:[%s17146_s29 + $0xc9a] sm:$0xff]  ;;  %v16725_v46 = vld [vmem:[%s17146_s29 + $0xae2] sm:$0xff] }
 0x8be   : > { %16925 = vmatpush.xpose.msk.msra.mxu0 %vm794_vm0, %v16653_v41  ;;  %16959 = vmatpush.xpose.msk.msra.mxu2 %vm794_vm0, %v16685_v36  ;;  %v16741_v41 = vld [vmem:[%s17146_s29 + $0xba2] sm:$0xff]  ;;  %v16773_v36 = vld [vmem:[%s17146_s29 + $0xd52] sm:$0xff] }
 0x8bf   : > { %16942 = vmatpush.xpose.msk.msra.mxu1 %vm794_vm0, %v16669_v47  ;;  %16976 = vmatpush.xpose.msk.msra.mxu3 %vm794_vm0, %v16701_v40  ;;  %v16757_v47 = vld [vmem:[%s17146_s29 + $0xc92] sm:$0xff] }
 0x8c0   : > { %v16724_v40 = vld [vmem:[%s17146_s29 + $0xad2] sm:$0xff] }
 0x8c2   : > { %16926 = vmatpush.xpose.msk.msra.mxu0 %vm794_vm0, %v16652_v26  ;;  %16960 = vmatpush.xpose.msk.msra.mxu2 %vm794_vm0, %v16684_v22  ;;  %v16740_v26 = vld [vmem:[%s17146_s29 + $0xb92] sm:$0xff]  ;;  %v16772_v22 = vld [vmem:[%s17146_s29 + $0xd42] sm:$0xff] }
 0x8c3   : > { %16943 = vmatpush.xpose.msk.msra.mxu1 %vm794_vm0, %v16668_v61  ;;  %16977 = vmatpush.xpose.msk.msra.mxu3 %vm794_vm0, %v16700_v0  ;;  %v16756_v61 = vld [vmem:[%s17146_s29 + $0xc82] sm:$0xff]  ;;  %v16723_v0 = vld [vmem:[%s17146_s29 + $0xaca] sm:$0xff] }
 0x8c6   : > { %16927 = vmatpush.xpose.msk.msra.mxu0 %vm794_vm0, %v16651_v48  ;;  %16961 = vmatpush.xpose.msk.msra.mxu2 %vm794_vm0, %v16683_v17  ;;  %v16739_v48 = vld [vmem:[%s17146_s29 + $0xb8a] sm:$0xff]  ;;  %v16771_v17 = vld [vmem:[%s17146_s29 + $0xd3a] sm:$0xff] }
 0x8c7   : > { %16944 = vmatpush.xpose.msk.msra.mxu1 %vm794_vm0, %v16667_v34  ;;  %16978 = vmatpush.xpose.msk.msra.mxu3 %vm794_vm0, %v16699_v33  ;;  %v16755_v34 = vld [vmem:[%s17146_s29 + $0xc7a] sm:$0xff] }
 0x8c8   : > { %v16722_v33 = vld [vmem:[%s17146_s29 + $0xaba] sm:$0xff] }
 0x8ca   : > { %16928 = vmatpush.xpose.msk.msra.mxu0 %vm794_vm0, %v16650_v23  ;;  %16962 = vmatpush.xpose.msk.msra.mxu2 %vm794_vm0, %v16682_v43  ;;  %v16738_v23 = vld [vmem:[%s17146_s29 + $0xb7a] sm:$0xff]  ;;  %v16770_v43 = vld [vmem:[%s17146_s29 + $0xd2a] sm:$0xff] }
 0x8cb   : > { %16945 = vmatpush.xpose.msk.msra.mxu1 %vm794_vm0, %v16666_v39  ;;  %16979 = vmatpush.xpose.msk.msra.mxu3 %vm794_vm0, %v16698_v31  ;;  %v16754_v39 = vld [vmem:[%s17146_s29 + $0xc6a] sm:$0xff]  ;;  %v16721_v31 = vld [vmem:[%s17146_s29 + $0xab2] sm:$0xff] }
 0x8ce   : > { %16929 = vmatpush.xpose.msk.msra.mxu0 %vm794_vm0, %v16649_v13  ;;  %16963 = vmatpush.xpose.msk.msra.mxu2 %vm794_vm0, %v16681_v32  ;;  %v16737_v13 = vld [vmem:[%s17146_s29 + $0xb72] sm:$0xff]  ;;  %v16769_v32 = vld [vmem:[%s17146_s29 + $0xd22] sm:$0xff] }
 0x8cf   : > { %16946 = vmatpush.xpose.msk.msra.mxu1 %vm794_vm0, %v16665_v14  ;;  %16980 = vmatpush.xpose.msk.msra.mxu3 %vm794_vm0, %v16697_v4  ;;  %v16753_v14 = vld [vmem:[%s17146_s29 + $0xc62] sm:$0xff] }
 0x8d0   : > { %v16720_v4 = vld [vmem:[%s17146_s29 + $0xaa2] sm:$0xff] }
 0x8d1   : > { %16930 = vmatmul.msk.f32.vlgmr.msra.gmra.mxu0 %vm794_vm0, %v22007_v30  ;;  %16964 = vmatmul.msk.f32.vlgmr.msra.gmra.mxu2 %vm794_vm0, %v22007_v30 }
 0x8d2   : > { %16982 = vmatpush.xpose.msk.msrb.mxu0 %vm794_vm0, %v16728_v7  ;;  %17016 = vmatpush.xpose.msk.msrb.mxu2 %vm794_vm0, %v16760_v15  ;;  %v16736_v7 = vld [vmem:[%s17146_s29 + $0xb62] sm:$0xff]  ;;  %v16768_v15 = vld [vmem:[%s17146_s29 + $0xd12] sm:$0xff] }
 0x8d3   : > { %16999 = vmatpush.xpose.msk.msrb.mxu1 %vm794_vm0, %v16744_v8  ;;  %17033 = vmatpush.xpose.msk.msrb.mxu3 %vm794_vm0, %v16776_v20  ;;  %v16752_v8 = vld [vmem:[%s17146_s29 + $0xc52] sm:$0xff]  ;;  %v16719_v20 = vld [vmem:[%s17146_s29 + $0xa9a] sm:$0xff] }
 0x8d4   : > { %16947 = vmatmul.msk.f32.vlgmr.msra.gmra.mxu1 %vm794_vm0, %v22007_v30  ;;  %16981 = vmatmul.msk.f32.vlgmr.msra.gmra.mxu3 %vm794_vm0, %v22007_v30 }
 0x8d6   : > { %16983 = vmatpush.xpose.msk.msrb.mxu0 %vm794_vm0, %v16727_v56  ;;  %17017 = vmatpush.xpose.msk.msrb.mxu2 %vm794_vm0, %v16759_v54  ;;  %v16735_v56 = vld [vmem:[%s17146_s29 + $0xb5a] sm:$0xff]  ;;  %v16767_v54 = vld [vmem:[%s17146_s29 + $0xd0a] sm:$0xff] }
 0x8d7   : > { %17000 = vmatpush.xpose.msk.msrb.mxu1 %vm794_vm0, %v16743_v11  ;;  %17034 = vmatpush.xpose.msk.msrb.mxu3 %vm794_vm0, %v16775_v52  ;;  %v16751_v11 = vld [vmem:[%s17146_s29 + $0xc4a] sm:$0xff] }
 0x8d8   : > { %v16718_v52 = vld [vmem:[%s17146_s29 + $0xa8a] sm:$0xff] }
 0x8da   : > { %16984 = vmatpush.xpose.msk.msrb.mxu0 %vm794_vm0, %v16726_v2  ;;  %17018 = vmatpush.xpose.msk.msrb.mxu2 %vm794_vm0, %v16758_v10  ;;  %v16734_v2 = vld [vmem:[%s17146_s29 + $0xb4a] sm:$0xff]  ;;  %v16766_v10 = vld [vmem:[%s17146_s29 + $0xcfa] sm:$0xff] }
 0x8db   : > { %17001 = vmatpush.xpose.msk.msrb.mxu1 %vm794_vm0, %v16742_v5  ;;  %17035 = vmatpush.xpose.msk.msrb.mxu3 %vm794_vm0, %v16774_v12  ;;  %v16750_v5 = vld [vmem:[%s17146_s29 + $0xc3a] sm:$0xff]  ;;  %v16717_v12 = vld [vmem:[%s17146_s29 + $0xa82] sm:$0xff] }
 0x8de   : > { %16985 = vmatpush.xpose.msk.msrb.mxu0 %vm794_vm0, %v16725_v46  ;;  %17019 = vmatpush.xpose.msk.msrb.mxu2 %vm794_vm0, %v16757_v47  ;;  %v16733_v46 = vld [vmem:[%s17146_s29 + $0xb42] sm:$0xff]  ;;  %v16765_v47 = vld [vmem:[%s17146_s29 + $0xcf2] sm:$0xff] }
 0x8df   : > { %17002 = vmatpush.xpose.msk.msrb.mxu1 %vm794_vm0, %v16741_v41  ;;  %17036 = vmatpush.xpose.msk.msrb.mxu3 %vm794_vm0, %v16773_v36  ;;  %v16749_v41 = vld [vmem:[%s17146_s29 + $0xc32] sm:$0xff]  ;;  %v9790_v36 = vadd.f32 %v21265_v18, %v20518_v35  ;;  %v16764_v18 = vld [vmem:[%s17146_s29 + $0xce2] sm:$0xff] }
 0x8e2   : > { %16986 = vmatpush.xpose.msk.msrb.mxu0 %vm794_vm0, %v16724_v40  ;;  %17020 = vmatpush.xpose.msk.msrb.mxu2 %vm794_vm0, %v16756_v61  ;;  %v9791_v40 = vadd.f32 %v21267_v29, %v20520_v24  ;;  %v12255_v61 = vpop.f32.mrf.mxu2  ;;  %v16748_v24 = vld [vmem:[%s17146_s29 + $0xc22] sm:$0xff]  ;;  %v9788_v29 = vadd.f32 %v21375_v37, %v20494_v38  ;;  %v16715_v38 = vld [vmem:[%s17146_s29 + $0xa6a] sm:$0xff]  ;;  %v16747_v37 = vld [vmem:[%s17146_s29 + $0xc1a] sm:$0xff] }
 0x8e3   : > { %17003 = vmatpush.xpose.msk.msrb.mxu1 %vm794_vm0, %v16740_v26  ;;  %17037 = vmatpush.xpose.msk.msrb.mxu3 %vm794_vm0, %v16772_v22  ;;  %v22409_v26 = vpop.permute.xlu0 %12537  ;;  %v12275_v22 = vpop.f32.mrf.mxu3 }
 0x8e4   : > { %v11156_v35 = vadd.f32 %v21982_v60, %v9791_v40 }
 0x8e6   : > { %16987 = vmatpush.xpose.msk.msrb.mxu0 %vm794_vm0, %v16723_v0  ;;  %17021 = vmatpush.xpose.msk.msrb.mxu2 %vm794_vm0, %v16755_v34  ;;  %v16716_v0 = vld [vmem:[%s17146_s29 + $0xa72] sm:$0xff]  ;;  %v11155_v34 = vadd.f32 %v21980_v59, %v9790_v36  ;;  %v11153_v59 = vadd.f32 %v21962_v9, %v9788_v29  ;;  %v9793_v36 = vadd.f32 %v21397_v27, %v20660_v3 }
 0x8e7   : > { %17004 = vmatpush.xpose.msk.msrb.mxu1 %vm794_vm0, %v16739_v48  ;;  %17038 = vmatpush.xpose.msk.msrb.mxu3 %vm794_vm0, %v16771_v17  ;;  %v16732_v48 = vld [vmem:[%s17146_s29 + $0xb32] sm:$0xff]  ;;  %v9789_v17 = vadd.f32 %v21377_v63, %v20496_v55  ;;  %v16731_v55 = vld [vmem:[%s17146_s29 + $0xb2a] sm:$0xff]  ;;  %v16763_v63 = vld [vmem:[%s17146_s29 + $0xcda] sm:$0xff] }
 0x8e9   : > { %v11154_v60 = vadd.f32 %v21964_v25, %v9789_v17  ;;  %v16714_v25 = vld [vmem:[%s17146_s29 + $0xa5a] sm:$0xff] }
 0x8ea   : > { %16988 = vmatpush.xpose.msk.msrb.mxu0 %vm794_vm0, %v16722_v33  ;;  %17022 = vmatpush.xpose.msk.msrb.mxu2 %vm794_vm0, %v16754_v39  ;;  %v12215_v33 = vpop.f32.mrf.mxu0  ;;  %v12520_v39 = vadd.f32 %v12255_v61, %v11155_v34 }
 0x8eb   : > { %17005 = vmatpush.xpose.msk.msrb.mxu1 %vm794_vm0, %v16738_v23  ;;  %17039 = vmatpush.xpose.msk.msrb.mxu3 %vm794_vm0, %v16770_v43  ;;  %v12235_v23 = vpop.f32.mrf.mxu1  ;;  %v12521_v43 = vadd.f32 %v12275_v22, %v11156_v35 }
 0x8ed   : > { %v12543_v9 = vmul.f32 %v22409_v26, %v12521_v43 }
 0x8ee   : > { %16989 = vmatpush.xpose.msk.msrb.mxu0 %vm794_vm0, %v16721_v31  ;;  %17023 = vmatpush.xpose.msk.msrb.mxu2 %vm794_vm0, %v16753_v14  ;;  %v12518_v31 = vadd.f32 %v12215_v33, %v11153_v59  ;;  %v12542_v14 = vmul.f32 %v22409_v26, %v12520_v39 }
 0x8ef   : > { %17006 = vmatpush.xpose.msk.msrb.mxu1 %vm794_vm0, %v16737_v13  ;;  %17040 = vmatpush.xpose.msk.msrb.mxu3 %vm794_vm0, %v16769_v32  ;;  %v12519_v13 = vadd.f32 %v12235_v23, %v11154_v60  ;;  %v16730_v32 = vld [vmem:[%s17146_s29 + $0xb1a] sm:$0xff] }
 0x8f2   : > { %16990 = vmatpush.xpose.msk.msrb.mxu0 %vm794_vm0, %v16720_v4  ;;  %17024 = vmatpush.xpose.msk.msrb.mxu2 %vm794_vm0, %v16752_v8  ;;  %v16746_v4 = vld [vmem:[%s17146_s29 + $0xc0a] sm:$0xff]  ;;  %v12540_v8 = vmul.f32 %v22409_v26, %v12518_v31 }
 0x8f3   : > { %17007 = vmatpush.xpose.msk.msrb.mxu1 %vm794_vm0, %v16736_v7  ;;  %17041 = vmatpush.xpose.msk.msrb.mxu3 %vm794_vm0, %v16768_v15  ;;  %v16762_v7 = vld [vmem:[%s17146_s29 + $0xcca] sm:$0xff]  ;;  %v12541_v15 = vmul.f32 %v22409_v26, %v12519_v13 }
 0x8f6   : > { %16991 = vmatpush.xpose.msk.msrb.mxu0 %vm794_vm0, %v16719_v20  ;;  %17025 = vmatpush.xpose.msk.msrb.mxu2 %vm794_vm0, %v16751_v11  ;;  %v22447_v20 = vpop.permute.xlu0 %12559 }
 0x8f7   : > { %17008 = vmatpush.xpose.msk.msrb.mxu1 %vm794_vm0, %v16735_v56  ;;  %17042 = vmatpush.xpose.msk.msrb.mxu3 %vm794_vm0, %v16767_v54  ;;  %v12564_v56 = vadd.f32 %v22447_v20, %v12542_v14  ;;  %v12565_v11 = vadd.f32 %v22447_v20, %v12543_v9  ;;  %v16713_v54 = vld [vmem:[%s17146_s29 + $0xa52] sm:$0xff] }
 0x8fa   : > { %16992 = vmatpush.xpose.msk.msrb.mxu0 %vm794_vm0, %v16718_v52  ;;  %17026 = vmatpush.xpose.msk.msrb.mxu2 %vm794_vm0, %v16750_v5  ;;  %v16729_v52 = vld [vmem:[%s17146_s29 + $0xb12] sm:$0xff]  ;;  %v16761_v5 = vld [vmem:[%s17146_s29 + $0xcc2] sm:$0xff] }
 0x8fb   : > { %17009 = vmatpush.xpose.msk.msrb.mxu1 %vm794_vm0, %v16734_v2  ;;  %17043 = vmatpush.xpose.msk.msrb.mxu3 %vm794_vm0, %v16766_v10  ;;  %v16745_v2 = vld [vmem:[%s17146_s29 + $0xc02] sm:$0xff]  ;;  %v12562_v10 = vadd.f32 %v22447_v20, %v12540_v8 }
 0x8fd   : > { %v12578_v40 = vmax.f32 %v12562_v10, 0.0 }
 0x8fe   : > { %16993 = vmatpush.xpose.msk.msrb.mxu0 %vm794_vm0, %v16717_v12  ;;  %17027 = vmatpush.xpose.msk.msrb.mxu2 %vm794_vm0, %v16749_v41  ;;  %v12563_v12 = vadd.f32 %v22447_v20, %v12541_v15  ;;  %v12581_v41 = vmax.f32 %v12565_v11, 0.0 }
 0x8ff   : > { %17010 = vmatpush.xpose.msk.msrb.mxu1 %vm794_vm0, %v16733_v46  ;;  %17044 = vmatpush.xpose.msk.msrb.mxu3 %vm794_vm0, %v16765_v47  ;;  %v12580_v46 = vmax.f32 %v12564_v56, 0.0  ;;  %v9792_v47 = vadd.f32 %v21395_v28, %v20658_v16 }
 0x900   : > { %v12579_v61 = vmax.f32 %v12563_v12, 0.0 }
 0x901   : > { %v11157_v22 = vadd.f32 %v21986_v50, %v9792_v47 }
 0x902   : > { %16994 = vmatpush.xpose.msk.msrb.mxu0 %vm794_vm0, %v16716_v0  ;;  %17028 = vmatpush.xpose.msk.msrb.mxu2 %vm794_vm0, %v16748_v24  ;;  %v11158_v0 = vadd.f32 %v21988_v21, %v9793_v36  ;;  %v11160_v24 = vadd.f32 %v22017_v44, %v21299_v45  ;;  %v22494_v44 = vld [vmem:[%s22605_s4] sm:$0xff] }
 0x903   : > { %17011 = vmatpush.xpose.msk.msrb.mxu1 %vm794_vm0, %v16732_v48  ;;  %17045 = vmatpush.xpose.msk.msrb.mxu3 %vm794_vm0, %v16764_v18  ;;  %v17091_v48 = vmov 0.0  }
 0x906   : > { %16995 = vmatpush.xpose.msk.msrb.mxu0 %vm794_vm0, %v16715_v38  ;;  %17029 = vmatpush.xpose.msk.msrb.mxu2 %vm794_vm0, %v16747_v37 }
 0x907   : > { %17012 = vmatpush.xpose.msk.msrb.mxu1 %vm794_vm0, %v16731_v55  ;;  %17046 = vmatpush.xpose.msk.msrb.mxu3 %vm794_vm0, %v16763_v63 }
 0x90a   : > { %16996 = vmatpush.xpose.msk.msrb.mxu0 %vm794_vm0, %v16714_v25  ;;  %17030 = vmatpush.xpose.msk.msrb.mxu2 %vm794_vm0, %v16746_v4 }
 0x90b   : > { %17013 = vmatpush.xpose.msk.msrb.mxu1 %vm794_vm0, %v16730_v32  ;;  %17047 = vmatpush.xpose.msk.msrb.mxu3 %vm794_vm0, %v16762_v7 }
 0x90e   : > { %16997 = vmatpush.xpose.msk.msrb.mxu0 %vm794_vm0, %v16713_v54  ;;  %17031 = vmatpush.xpose.msk.msrb.mxu2 %vm794_vm0, %v16745_v2  ;;  %v12295_v16 = vpop.f32.mrf.mxu0 }
 0x90f   : > { %17014 = vmatpush.xpose.msk.msrb.mxu1 %vm794_vm0, %v16729_v52  ;;  %17048 = vmatpush.xpose.msk.msrb.mxu3 %vm794_vm0, %v16761_v5  ;;  %v12522_v28 = vadd.f32 %v12295_v16, %v11157_v22 }
 0x911   : > { %16998 = vmatmul.msk.f32.vlgmr.msrb.gmra.mxu0 %vm794_vm0, %v22007_v30  ;;  %17032 = vmatmul.msk.f32.vlgmr.msrb.gmra.mxu2 %vm794_vm0, %v22007_v30  ;;  %v12315_v3 = vpop.f32.mrf.mxu1  ;;  %v12544_v34 = vmul.f32 %v22409_v26, %v12522_v28 }
 0x912   : > { %12612 = vmatpush.msra.mxu0 %v12580_v46  ;;  %17015 = vmatmul.msk.f32.vlgmr.msrb.gmra.mxu1 %vm794_vm0, %v22007_v30  ;;  %v12523_v27 = vadd.f32 %v12315_v3, %v11158_v0 }
 0x913   : > { %12632 = vmatpush.msra.mxu1 %v12581_v41  ;;  %17049 = vmatmul.msk.f32.vlgmr.msrb.gmra.mxu3 %vm794_vm0, %v22007_v30  ;;  %v12566_v21 = vadd.f32 %v22447_v20, %v12544_v34  ;;  %v11159_v30 = vadd.f32 %v22015_v57, %v21296_v6 }
 0x914   : > { %12613 = vmatpush.msra.mxu0 %v12578_v40  ;;  %v12545_v50 = vmul.f32 %v22409_v26, %v12523_v27  ;;  %v12335_v17 = vpop.f32.mrf.mxu2 }
 0x915   : > { %12633 = vmatpush.msra.mxu1 %v12579_v61  ;;  %v12582_v18 = vmax.f32 %v12566_v21, 0.0  ;;  %v12524_v23 = vadd.f32 %v12335_v17, %v11159_v30 }
 0x916   : > { %12614 = vmatpush.msra.mxu0 %v17091_v48  ;;  %v12567_v35 = vadd.f32 %v22447_v20, %v12545_v50 }
 0x917   : > { %12634 = vmatpush.msra.mxu1 %v17091_v48  ;;  %v12355_v33 = vpop.f32.mrf.mxu3  ;;  %12652 = vmatpush.msra.mxu2 %v12582_v18  ;;  %v12546_v43 = vmul.f32 %v22409_v26, %v12524_v23 }
 0x918   : > { %v12583_v29 = vmax.f32 %v12567_v35, 0.0  ;;  %v12525_v39 = vadd.f32 %v12355_v33, %v11160_v24 }
 0x919   : > { %12653 = vmatpush.msra.mxu2 %v12580_v46  ;;  %v12568_v60 = vadd.f32 %v22447_v20, %v12546_v43  ;;  %17050 = vmatmul.msk.f32.vlgmr.msra.gmra.mxu0 %vm12595_vm1, %v22494_v44 }
 0x91a   : > { %12672 = vmatpush.msra.mxu3 %v12583_v29  ;;  %v12547_v59 = vmul.f32 %v22409_v26, %v12525_v39  ;;  %17051 = vmatmul.msk.f32.vlgmr.msra.gmra.mxu1 %vm12595_vm1, %v22494_v44 }
 0x91b   : > { %12654 = vmatpush.msra.mxu2 %v12578_v40  ;;  %v12584_v45 = vmax.f32 %v12568_v60, 0.0 }
 0x91c   : > { %12673 = vmatpush.msra.mxu3 %v12581_v41  ;;  %v12569_v6 = vadd.f32 %v22447_v20, %v12547_v59  ;;  %17052 = vmatmul.msk.f32.vlgmr.msra.gmra.mxu2 %vm12595_vm1, %v22494_v44 }
 0x91d   : > { %12692 = vmatpush.msrb.mxu0 %v12584_v45 }
 0x91e   : > { %12674 = vmatpush.msra.mxu3 %v12579_v61  ;;  %v12585_v57 = vmax.f32 %v12569_v6, 0.0 }
 0x91f   : > { %12693 = vmatpush.msrb.mxu0 %v12582_v18  ;;  %17053 = vmatmul.msk.f32.vlgmr.msra.gmra.mxu3 %vm12595_vm1, %v22494_v44 }
 0x920   : > { %12712 = vmatpush.msrb.mxu1 %v12585_v57 }
 0x921   : > { %12694 = vmatpush.msrb.mxu0 %v12580_v46 }
 0x922   : > { %12713 = vmatpush.msrb.mxu1 %v12583_v29  ;;  %17054 = vmatmul.msk.f32.vlgmr.msrb.gmra.mxu0 %vm12595_vm1, %v22494_v44 }
 0x924   : > { %12714 = vmatpush.msrb.mxu1 %v12581_v41 }
 0x925   : > { %17055 = vmatmul.msk.f32.vlgmr.msrb.gmra.mxu1 %vm12595_vm1, %v22494_v44 }
 0x94e   : > { %v12375_v38 = vpop.f32.mrf.mxu0 }
 0x94f   : > { %v12526_v37 = vadd.f32 %v12375_v38, %v22032_v49 }
 0x951   : > { %v12395_v55 = vpop.f32.mrf.mxu1  ;;  %v12548_v31 = vmul.f32 %v22409_v26, %v12526_v37 }
 0x952   : > { %v12527_v63 = vadd.f32 %v12395_v55, %v22035_v53 }
 0x953   : > { %v12570_v14 = vadd.f32 %v22447_v20, %v12548_v31 }
 0x954   : > { %v12549_v13 = vmul.f32 %v22409_v26, %v12527_v63  ;;  %v12415_v4 = vpop.f32.mrf.mxu2 }
 0x955   : > { %v12586_v25 = vmax.f32 %v12570_v14, 0.0  ;;  %v12528_v8 = vadd.f32 %v12415_v4, %v22052_v42  ;;  %v12919_v42 = vld [vmem:[%s22606_s5] sm:$0xff] }
 0x956   : > { %v12571_v9 = vadd.f32 %v22447_v20, %v12549_v13  ;;  %12922 = vperm.xlu1 %17081, %v12919_v42  }
 0x957   : > { %v12435_v7 = vpop.f32.mrf.mxu3  ;;  %12732 = vmatpush.msrb.mxu2 %v12586_v25  ;;  %v12550_v49 = vmul.f32 %v22409_v26, %v12528_v8 }
 0x958   : > { %v12587_v32 = vmax.f32 %v12571_v9, 0.0  ;;  %v12529_v15 = vadd.f32 %v12435_v7, %v22055_v1  ;;  %v12941_v1 = vld [vmem:[%s22607_s6] sm:$0xff] }
 0x959   : > { %12733 = vmatpush.msrb.mxu2 %v12584_v45  ;;  %v12572_v56 = vadd.f32 %v22447_v20, %v12550_v49 }
 0x95a   : > { %12752 = vmatpush.msrb.mxu3 %v12587_v32  ;;  %v12551_v53 = vmul.f32 %v22409_v26, %v12529_v15 }
 0x95b   : > { %12734 = vmatpush.msrb.mxu2 %v12582_v18  ;;  %v12588_v54 = vmax.f32 %v12572_v56, 0.0 }
 0x95c   : > { %12753 = vmatpush.msrb.mxu3 %v12585_v57  ;;  %v12573_v11 = vadd.f32 %v22447_v20, %v12551_v53  ;;  %17056 = vmatmul.msk.f32.vlgmr.msrb.gmra.mxu2 %vm12595_vm1, %v22494_v44 }
 0x95d   : > { %12772 = vmatpush.msra.mxu0 %v12588_v54 }
 0x95e   : > { %12754 = vmatpush.msrb.mxu3 %v12583_v29  ;;  %v12589_v52 = vmax.f32 %v12573_v11, 0.0  ;;  %12944 = vperm.xlu1 %17081, %v12941_v1  }
 0x95f   : > { %17057 = vmatmul.msk.f32.vlgmr.msrb.gmra.mxu3 %vm12595_vm1, %v22494_v44  ;;  %12773 = vmatpush.msra.mxu0 %v12586_v25 }
 0x960   : > { %12792 = vmatpush.msra.mxu1 %v12589_v52 }
 0x961   : > { %12774 = vmatpush.msra.mxu0 %v12584_v45 }
 0x962   : > { %12793 = vmatpush.msra.mxu1 %v12587_v32  ;;  %17058 = vmatmul.msk.f32.vlgmr.msra.gmra.mxu0 %vm12595_vm1, %v22494_v44 }
 0x964   : > { %12794 = vmatpush.msra.mxu1 %v12585_v57 }
 0x965   : > { %17059 = vmatmul.msk.f32.vlgmr.msra.gmra.mxu1 %vm12595_vm1, %v22494_v44 }
 0x98e   : > { %v12455_v2 = vpop.f32.mrf.mxu0 }
 0x98f   : > { %v12475_v5 = vpop.f32.mrf.mxu1  ;;  %v12530_v10 = vadd.f32 %v12455_v2, %v22180_v62 }
 0x990   : > { %v12531_v12 = vadd.f32 %v12475_v5, %v22183_v58 }
 0x991   : > { %v12552_v46 = vmul.f32 %v22409_v26, %v12530_v10 }
 0x992   : > { %v12553_v41 = vmul.f32 %v22409_v26, %v12531_v12 }
 0x993   : > { %v12574_v47 = vadd.f32 %v22447_v20, %v12552_v46 }
 0x994   : > { %v12575_v36 = vadd.f32 %v22447_v20, %v12553_v41  ;;  %v12495_v22 = vpop.f32.mrf.mxu2 }
 0x995   : > { %v12590_v40 = vmax.f32 %v12574_v47, 0.0  ;;  %v12532_v16 = vadd.f32 %v12495_v22, %v22200_v19 }
 0x996   : > { %v12591_v61 = vmax.f32 %v12575_v36, 0.0  ;;  %v12515_v0 = vpop.f32.mrf.mxu3  ;;  %v12616_v19 = vpop.f32.mrf.mxu0 }
 0x997   : > { %v12533_v3 = vadd.f32 %v12515_v0, %v22203_v51  ;;  %12812 = vmatpush.msra.mxu2 %v12590_v40  ;;  %v12554_v62 = vmul.f32 %v22409_v26, %v12532_v16  ;;  %v12636_v51 = vpop.f32.mrf.mxu1 }
 0x998   : > { %12832 = vmatpush.msra.mxu3 %v12591_v61 }
 0x999   : > { %v12555_v58 = vmul.f32 %v22409_v26, %v12533_v3  ;;  %12813 = vmatpush.msra.mxu2 %v12588_v54  ;;  %v12576_v28 = vadd.f32 %v22447_v20, %v12554_v62 }
 0x99a   : > { %12833 = vmatpush.msra.mxu3 %v12589_v52 }
 0x99b   : > { %v12577_v27 = vadd.f32 %v22447_v20, %v12555_v58  ;;  %12814 = vmatpush.msra.mxu2 %v12586_v25  ;;  %v12592_v48 = vmax.f32 %v12576_v28, 0.0 }
 0x99c   : > { %12834 = vmatpush.msra.mxu3 %v12587_v32  ;;  %17060 = vmatmul.msk.f32.vlgmr.msra.gmra.mxu2 %vm12595_vm1, %v22494_v44 }
 0x99d   : > { %v12593_v34 = vmax.f32 %v12577_v27, 0.0  ;;  %17061 = vmatmul.msk.f32.vlgmr.msra.gmra.mxu3 %vm12595_vm1, %v22494_v44  ;;  %12852 = vmatpush.msrb.mxu0 %v12592_v48 }
 0x99e   : > { %12893 = vmatpush.msrb.mxu2 %v12592_v48 }
 0x99f   : > { %12872 = vmatpush.msrb.mxu1 %v12593_v34  ;;  %12913 = vmatpush.msrb.mxu3 %v12593_v34  ;;  %v12656_v26 = vpop.f32.mrf.mxu2  ;;  %v12696_v50 = vpop.f32.mrf.mxu0 }
 0x9a0   : > { %12853 = vmatpush.msrb.mxu0 %v12590_v40  ;;  %12894 = vmatpush.msrb.mxu2 %v12590_v40 }
 0x9a1   : > { %12873 = vmatpush.msrb.mxu1 %v12591_v61  ;;  %12914 = vmatpush.msrb.mxu3 %v12591_v61 }
 0x9a2   : > { %12854 = vmatpush.msrb.mxu0 %v12588_v54  ;;  %v12676_v20 = vpop.f32.mrf.mxu3  ;;  %v12716_v21 = vpop.f32.mrf.mxu1 }
 0x9a3   : > { %12874 = vmatpush.msrb.mxu1 %v12589_v52  ;;  %17062 = vmatmul.msk.f32.vlgmr.msrb.gmra.mxu0 %vm12595_vm1, %v22494_v44 }
 0x9a4   : > { %17063 = vmatmul.msk.f32.vlgmr.msrb.gmra.mxu1 %vm12595_vm1, %v22494_v44  ;;  %17064 = vmatmul.msk.f32.vlgmr.msrb.gmra.mxu2 %vm12595_vm1, %v22494_v44 }
 0x9a5   : > { %17065 = vmatmul.msk.f32.vlgmr.msrb.gmra.mxu3 %vm12595_vm1, %v22494_v44 }
 0x9c8   : > { %v22558_v35 = vpop.permute.xlu1 %12922 }
 0x9c9   : > { %v12927_v24 = vmul.f32 %v22558_v35, %v12656_v26  ;;  %v12928_v18 = vmul.f32 %v22558_v35, %v12676_v20  ;;  %v12925_v29 = vmul.f32 %v22558_v35, %v12616_v19  ;;  %v12926_v17 = vmul.f32 %v22558_v35, %v12636_v51 }
 0x9ca   : > { %v12929_v23 = vmul.f32 %v22558_v35, %v12696_v50  ;;  %v12930_v39 = vmul.f32 %v22558_v35, %v12716_v21 }
 0x9d0   : > { %v12945_v60 = vpop.permute.xlu1 %12944 }
 0x9d1   : > { %v12947_v57 = vadd.f32 %v12945_v60, %v12925_v29  ;;  %v12948_v44 = vadd.f32 %v12945_v60, %v12926_v17  ;;  %v12949_v38 = vadd.f32 %v12945_v60, %v12927_v24  ;;  %v12950_v55 = vadd.f32 %v12945_v60, %v12928_v18 }
 0x9d2   : > { %v12951_v63 = vadd.f32 %v12945_v60, %v12929_v23  ;;  %v12952_v31 = vadd.f32 %v12945_v60, %v12930_v39 }
 0x9d3   : > { %v12963_v14 = vmax.f32 %v12947_v57, 0.0  ;;  %v12964_v9 = vmax.f32 %v12948_v44, 0.0  ;;  %v12965_v25 = vmax.f32 %v12949_v38, 0.0  ;;  %v12966_v4 = vmax.f32 %v12950_v55, 0.0 }
 0x9d4   : > { %v12967_v8 = vmax.f32 %v12951_v63, 0.0  ;;  %v12968_v49 = vmax.f32 %v12952_v31, 0.0 }
 0x9d5   : > { %12979 = vst [vmem:[%s22573_s17] sm:$0xff] %v12963_v14 }
 0x9d6   : > { %12980 = vst [vmem:[%s22573_s17 + $0x8] sm:$0xff] %v12964_v9 }
 0x9d7   : > { %12981 = vst [vmem:[%s22573_s17 + $0x10] sm:$0xff] %v12965_v25 }
 0x9d8   : > { %12982 = vst [vmem:[%s22573_s17 + $0x18] sm:$0xff] %v12966_v4 }
 0x9d9   : > { %12983 = vst [vmem:[%s22573_s17 + $0x20] sm:$0xff] %v12967_v8 }
 0x9da   : > { %12984 = vst [vmem:[%s22573_s17 + $0x28] sm:$0xff] %v12968_v49 }
 0x9df   : > { %v12736_v30 = vpop.f32.mrf.mxu2  ;;  %v12776_v59 = vpop.f32.mrf.mxu0 }
 0x9e0   : > { %v12931_v43 = vmul.f32 %v22558_v35, %v12736_v30  ;;  %v12933_v45 = vmul.f32 %v22558_v35, %v12776_v59 }
 0x9e2   : > { %v12756_v33 = vpop.f32.mrf.mxu3  ;;  %v12796_v37 = vpop.f32.mrf.mxu1  ;;  %v12953_v32 = vadd.f32 %v12945_v60, %v12931_v43  ;;  %v12955_v15 = vadd.f32 %v12945_v60, %v12933_v45 }
 0x9e3   : > { %v12932_v6 = vmul.f32 %v22558_v35, %v12756_v33  ;;  %v12934_v13 = vmul.f32 %v22558_v35, %v12796_v37 }
 0x9e4   : > { %v12969_v56 = vmax.f32 %v12953_v32, 0.0  ;;  %v12971_v54 = vmax.f32 %v12955_v15, 0.0 }
 0x9e5   : > { %v12954_v7 = vadd.f32 %v12945_v60, %v12932_v6  ;;  %v12956_v53 = vadd.f32 %v12945_v60, %v12934_v13 }
 0x9e6   : > { %12985 = vst [vmem:[%s22573_s17 + $0x30] sm:$0xff] %v12969_v56 }
 0x9e7   : > { %v12970_v11 = vmax.f32 %v12954_v7, 0.0  ;;  %v12972_v52 = vmax.f32 %v12956_v53, 0.0  ;;  %12987 = vst [vmem:[%s22573_s17 + $0x40] sm:$0xff] %v12971_v54 }
 0x9e9   : > { %12986 = vst [vmem:[%s22573_s17 + $0x38] sm:$0xff] %v12970_v11 }
 0x9ea   : > { %12988 = vst [vmem:[%s22573_s17 + $0x48] sm:$0xff] %v12972_v52 }
 0xa1f   : > { %v12816_v42 = vpop.f32.mrf.mxu2 }
 0xa20   : > { %v12836_v1 = vpop.f32.mrf.mxu3  ;;  %v12935_v2 = vmul.f32 %v22558_v35, %v12816_v42  ;;  %v12856_v10 = vpop.f32.mrf.mxu0 }
 0xa21   : > { %v12936_v5 = vmul.f32 %v22558_v35, %v12836_v1  ;;  %v12876_v12 = vpop.f32.mrf.mxu1  ;;  %v12937_v46 = vmul.f32 %v22558_v35, %v12856_v10 }
 0xa22   : > { %v12938_v41 = vmul.f32 %v22558_v35, %v12876_v12  ;;  %v12957_v47 = vadd.f32 %v12945_v60, %v12935_v2 }
 0xa23   : > { %v12958_v36 = vadd.f32 %v12945_v60, %v12936_v5  ;;  %v12959_v40 = vadd.f32 %v12945_v60, %v12937_v46 }
 0xa24   : > { %v12960_v61 = vadd.f32 %v12945_v60, %v12938_v41  ;;  %v12973_v22 = vmax.f32 %v12957_v47, 0.0 }
 0xa25   : > { %v12974_v0 = vmax.f32 %v12958_v36, 0.0  ;;  %v12975_v16 = vmax.f32 %v12959_v40, 0.0 }
 0xa26   : > { %v12976_v3 = vmax.f32 %v12960_v61, 0.0  ;;  %12989 = vst [vmem:[%s22573_s17 + $0x50] sm:$0xff] %v12973_v22 }
 0xa27   : > { %12990 = vst [vmem:[%s22573_s17 + $0x58] sm:$0xff] %v12974_v0  ;;  %v12896_v62 = vpop.f32.mrf.mxu2 }
 0xa28   : > { %v12916_v58 = vpop.f32.mrf.mxu3  ;;  %12991 = vst [vmem:[%s22573_s17 + $0x60] sm:$0xff] %v12975_v16  ;;  %v12939_v28 = vmul.f32 %v22558_v35, %v12896_v62 }
 0xa29   : > { %v12940_v27 = vmul.f32 %v22558_v35, %v12916_v58  ;;  %12992 = vst [vmem:[%s22573_s17 + $0x68] sm:$0xff] %v12976_v3 }
 0xa2a   : > { %v12961_v48 = vadd.f32 %v12945_v60, %v12939_v28 }
 0xa2b   : > { %v12962_v34 = vadd.f32 %v12945_v60, %v12940_v27 }
 0xa2c   : > { %v12977_v19 = vmax.f32 %v12961_v48, 0.0 }
 0xa2d   : > { %v12978_v51 = vmax.f32 %v12962_v34, 0.0 }
 0xa2e   : > { %12993 = vst [vmem:[%s22573_s17 + $0x70] sm:$0xff] %v12977_v19 }
 0xa2f   : > { %12994 = vst [vmem:[%s22573_s17 + $0x78] sm:$0xff] %v12978_v51 }
 0xa30 PF: > { %s17_s24 = sadd.s32 1, %s17088_s24  }
 0xa31   : > { %p14_p4 = scmp.ge.s32.totalorder %s17_s24, 4  }
 0xa33   :  { %16 = sbr.rel (!%p14_p4) target bundleno = 1 (0x1), region = 88 }

</bundles_post_ra>
